<compile_context>
chip_gen: v7x
topology: tpu7x:2x2x1
jax: 0.10.0
libtpu: 0.0.40
codegen_flags: <defaults>
</compile_context>

<pallas_src>
import functools

import jax
import jax.numpy as jnp
from jax import lax
from jax.experimental import pallas as pl
from jax.experimental.pallas import tpu as pltpu


def _compiler_params(dims, vmem_limit_bytes=None):
    kw = dict(dimension_semantics=dims)
    if vmem_limit_bytes is not None:
        kw["vmem_limit_bytes"] = int(vmem_limit_bytes)
    return pltpu.CompilerParams(**kw)


def _nbytes(*arrs):
    return int(sum(int(a.size) * a.dtype.itemsize for a in arrs))


def _pick_tile(total, want):
    """Largest tile <= want that divides `total` and is sublane friendly."""
    want = max(1, min(want, total))
    for t in range(want, 0, -1):
        if total % t == 0 and (t % 8 == 0 or t == total):
            return t
    return total


# ----------------------------------------------------------------------------
# Kernel A: fused knn — negative pairwise squared distances (pure VPU) +
# packed-key top-k (one XLU max-reduce per neighbor) + neighbor-1 coordinates.
# ----------------------------------------------------------------------------
def _knn_kernel(xr_ref, xc_ref, idx_ref, nbr1_ref, *, k, n):
    xr = xr_ref[0]                                    # (tq, 3) f32 query rows
    xc = xc_ref[0]                                    # (3, N)  f32 all points (lanes=N)

    inner = (xr[:, 0:1] * xc[0:1, :]
             + xr[:, 1:2] * xc[1:2, :]
             + xr[:, 2:3] * xc[2:3, :])               # (tq, N)
    sq_r = xr[:, 0:1] ** 2 + xr[:, 1:2] ** 2 + xr[:, 2:3] ** 2
    sq_c = xc[0:1, :] ** 2 + xc[1:2, :] ** 2 + xc[2:3, :] ** 2
    d = 2.0 * inner - sq_r - sq_c                     # == -||xi - xj||^2

    # Pack (monotone distance key, complemented lane index) into one sortable
    # int32 so every top-k step needs a single lane reduction (review item).
    ib = max(int(n - 1).bit_length(), 1)              # index bits (low bits)
    mask = (1 << ib) - 1
    bits = pltpu.bitcast(d, jnp.int32)
    key = jnp.where(bits >= 0, bits, bits ^ jnp.int32(0x7FFFFFFF))  # monotone in d
    lane = lax.broadcasted_iota(jnp.int32, d.shape, 1)
    packed = (key & jnp.int32(~mask)) | (jnp.int32(mask) - lane)

    removed = jnp.int32(-(2 ** 31))
    idx_cols = []
    for kk in range(k):
        sel = jnp.max(packed, axis=-1, keepdims=True)                # (tq, 1)
        idx_cols.append(jnp.int32(mask) - (sel & jnp.int32(mask)))   # lane index
        is_sel = packed == sel                                       # one hit / row
        if kk == 1:
            # Fused neighbor-1 coordinate extraction (3 masked reductions).
            nbr1_ref[0] = jnp.concatenate(
                [jnp.sum(jnp.where(is_sel, xc[c:c + 1, :], 0.0),
                         axis=-1, keepdims=True) for c in range(3)],
                axis=-1)
        packed = jnp.where(is_sel, removed, packed)
    idx_ref[0] = jnp.concatenate(idx_cols, axis=-1)                  # (tq, k)


def knn_with_nbr1(coords, k, tq=128, vmem_limit_bytes=None):
    B, N, _ = coords.shape
    assert 2 <= k <= N
    tq = _pick_tile(N, tq)
    coords_t = jnp.transpose(coords, (0, 2, 1))       # (B, 3, N): lane axis = N
    flops = int(B * N * N * (10 + 3 * k))
    bytes_accessed = int(B * N * (3 * 4 * 2 + k * 4 + 3 * 4))
    return pl.pallas_call(
        functools.partial(_knn_kernel, k=k, n=N),
        out_shape=(jax.ShapeDtypeStruct((B, N, k), jnp.int32),
                   jax.ShapeDtypeStruct((B, N, 3), jnp.float32)),
        grid=(B, N // tq),
        in_specs=[pl.BlockSpec((1, tq, 3), lambda b, i: (b, i, 0)),
                  pl.BlockSpec((1, 3, N), lambda b, i: (b, 0, 0))],
        out_specs=(pl.BlockSpec((1, tq, k), lambda b, i: (b, i, 0)),
                   pl.BlockSpec((1, tq, 3), lambda b, i: (b, i, 0))),
        compiler_params=_compiler_params(("parallel", "parallel"),
                                         vmem_limit_bytes),
        cost_estimate=pl.CostEstimate(flops=flops, transcendentals=0,
                                      bytes_accessed=bytes_accessed),
    )(coords, coords_t)


# ----------------------------------------------------------------------------
# Kernel B: fused local_cov + mlp1:
#   [coords | coords ⊗ nbr1] -> Linear(12,128)+ReLU -> ResLinear(128)+ReLU
#   -> ResLinear(128)+ReLU.  The 12-channel Linear runs on the MXU via a
#   repacked (3,512) weight (review item); only 3 rank-1 terms stay on the VPU.
# ----------------------------------------------------------------------------
def _mlp1_kernel(c_ref, n1_ref, wp_ref, b0_ref, w1_ref, b1_ref,
                 w2_ref, b2_ref, o_ref):
    c = c_ref[...]                      # (tm, 3) f32 coords (== neighbor 0)
    n1 = n1_ref[...]                    # (tm, 3) f32 neighbor-1 coords

    # wp = [w0[0:3] | V0 | V1 | V2] with Vj[i,:] = w0[3+3i+j,:]; row 3+3i+j of
    # w0 weights the local_cov term c_i*n1_j (torch outer-product row-major).
    p = jnp.dot(c, wp_ref[...], preferred_element_type=jnp.float32)  # (tm, 512)
    h = b0_ref[...] + p[:, 0:128]
    h = h + n1[:, 0:1] * p[:, 128:256]
    h = h + n1[:, 1:2] * p[:, 256:384]
    h = h + n1[:, 2:3] * p[:, 384:512]
    h = jnp.maximum(h, 0.0)                                           # (tm, 128) f32

    r = jnp.dot(h.astype(jnp.bfloat16), w1_ref[...],
                preferred_element_type=jnp.float32) + b1_ref[...] + h
    h = jnp.maximum(r, 0.0)
    r = jnp.dot(h.astype(jnp.bfloat16), w2_ref[...],
                preferred_element_type=jnp.float32) + b2_ref[...] + h
    o_ref[...] = jnp.maximum(r, 0.0).astype(o_ref.dtype)


def point_mlp(coords_flat, nbr1_flat, p, tm=1024, vmem_limit_bytes=None):
    M = coords_flat.shape[0]
    tm = _pick_tile(M, tm)
    w0 = p["w0"]                                      # (12, 128) reference layout
    wp = jnp.concatenate([w0[0:3], w0[3::3], w0[4::3], w0[5::3]], axis=1)  # (3,512)
    flops = int(2 * M * (3 * 512 + 128 * 128 + 128 * 128))
    bytes_accessed = int(M * (2 * 3 * 4 + 128 * 2)) + _nbytes(*p.values())
    full = lambda a: pl.BlockSpec(a.shape, lambda i: (0,) * a.ndim)
    return pl.pallas_call(
        _mlp1_kernel,
        out_shape=jax.ShapeDtypeStruct((M, 128), jnp.bfloat16),
        grid=(M // tm,),
        in_specs=[pl.BlockSpec((tm, 3), lambda i: (i, 0)),
                  pl.BlockSpec((tm, 3), lambda i: (i, 0)),
                  pl.BlockSpec((3, 512), lambda i: (0, 0)), full(p["b0"]),
                  full(p["w1"]), full(p["b1"]), full(p["w2"]), full(p["b2"])],
        out_specs=pl.BlockSpec((tm, 128), lambda i: (i, 0)),
        compiler_params=_compiler_params(("parallel",), vmem_limit_bytes),
        cost_estimate=pl.CostEstimate(flops=flops, transcendentals=0,
                                      bytes_accessed=bytes_accessed),
    )(coords_flat, nbr1_flat, wp, p["b0"], p["w1"], p["b1"], p["w2"], p["b2"])


# ----------------------------------------------------------------------------
# local_maxpool: gather + max over K neighbors, left to XLA (gather fuses into
# the reduction, so only (B,N,C) is materialized — no 16x (B,N,K,C) tensor).
# ----------------------------------------------------------------------------
def local_maxpool(feat, idx):
    gathered = jax.vmap(lambda fb, ib: fb[ib])(feat, idx)   # (B, N, K, C)
    return jnp.max(gathered, axis=2)                        # (B, N, C)


# ----------------------------------------------------------------------------
# Kernel C: graph_layer1 on pooled features: ResLinear(128)+ReLU
#           -> Linear(128,256)+ReLU  (bf16 in/out).
# ----------------------------------------------------------------------------
def _graph1_kernel(x_ref, wr_ref, br_ref, wl_ref, bl_ref, o_ref):
    x = x_ref[0]                                      # (tm, 128) bf16 (pooled)
    xf = x.astype(jnp.float32)
    r = (jnp.dot(x, wr_ref[...], preferred_element_type=jnp.float32)
         + br_ref[...] + xf)
    h = jnp.maximum(r, 0.0)
    out = jnp.dot(h.astype(jnp.bfloat16), wl_ref[...],
                  preferred_element_type=jnp.float32) + bl_ref[...]
    o_ref[0] = jnp.maximum(out, 0.0).astype(o_ref.dtype)


def graph1(pooled, p, tm=512, vmem_limit_bytes=None):
    B, N, C = pooled.shape                            # C = 128
    tm = _pick_tile(N, tm)
    flops = int(2 * B * N * (C * C + C * 256))
    bytes_accessed = int(B * N * (C * 2 + 256 * 2)) + _nbytes(*p.values())
    full = lambda a: pl.BlockSpec(a.shape, lambda b, i: (0,) * a.ndim)
    return pl.pallas_call(
        _graph1_kernel,
        out_shape=jax.ShapeDtypeStruct((B, N, 256), jnp.bfloat16),
        grid=(B, N // tm),
        in_specs=[pl.BlockSpec((1, tm, C), lambda b, i: (b, i, 0)),
                  full(p["wr"]), full(p["br"]), full(p["wl"]), full(p["bl"])],
        out_specs=pl.BlockSpec((1, tm, 256), lambda b, i: (b, i, 0)),
        compiler_params=_compiler_params(("parallel", "parallel"),
                                         vmem_limit_bytes),
        cost_estimate=pl.CostEstimate(flops=flops, transcendentals=0,
                                      bytes_accessed=bytes_accessed),
    )(pooled, p["wr"], p["br"], p["wl"], p["bl"])


# ----------------------------------------------------------------------------
# Kernel D: graph_layer2 + global max fused on pooled features:
#   ResLinear(256)+ReLU -> Linear(256,512) -> running max over N, accumulated
#   in an f32 VMEM scratch, written once on the last step.  N is split two
#   ways ("parallel") so both v7x TensorCores get work even when B is 1/odd.
# ----------------------------------------------------------------------------
def _graph2_kernel(x_ref, wr_ref, br_ref, wl_ref, bl_ref, o_ref, acc_ref):
    t = pl.program_id(2)
    x = x_ref[0]                                      # (tm, 256) bf16 (pooled)
    xf = x.astype(jnp.float32)
    r = (jnp.dot(x, wr_ref[...], preferred_element_type=jnp.float32)
         + br_ref[...] + xf)
    h = jnp.maximum(r, 0.0)
    out = jnp.dot(h.astype(jnp.bfloat16), wl_ref[...],
                  preferred_element_type=jnp.float32) + bl_ref[...]  # (tm, 512)
    tile_max = jnp.max(out, axis=0, keepdims=True)                   # (1, 512)

    @pl.when(t == 0)
    def _():
        acc_ref[...] = tile_max

    @pl.when(t > 0)
    def _():
        acc_ref[...] = jnp.maximum(acc_ref[...], tile_max)

    @pl.when(t == pl.num_programs(2) - 1)
    def _():
        o_ref[0] = acc_ref[...]


def graph2_global_max(pooled, p, tm=512, vmem_limit_bytes=None):
    B, N, C = pooled.shape                            # C = 256
    n_splits = 2 if (N % 2 == 0 and N >= 16) else 1
    chunk = N // n_splits
    tm = _pick_tile(chunk, tm)
    n_tiles = chunk // tm
    flops = int(2 * B * N * (C * C + C * 512))
    bytes_accessed = (int(B * N * C * 2 + B * n_splits * 512 * 4)
                      + _nbytes(*p.values()))
    full = lambda a: pl.BlockSpec(a.shape, lambda b, s, t: (0,) * a.ndim)
    partial = pl.pallas_call(
        _graph2_kernel,
        out_shape=jax.ShapeDtypeStruct((B * n_splits, 1, 512), jnp.float32),
        grid=(B, n_splits, n_tiles),
        in_specs=[pl.BlockSpec((1, tm, C),
                               lambda b, s, t: (b, s * n_tiles + t, 0)),
                  full(p["wr"]), full(p["br"]), full(p["wl"]), full(p["bl"])],
        out_specs=pl.BlockSpec((1, 1, 512),
                               lambda b, s, t: (b * n_splits + s, 0, 0)),
        scratch_shapes=[pltpu.VMEM((1, 512), jnp.float32)],
        compiler_params=_compiler_params(("parallel", "parallel", "arbitrary"),
                                         vmem_limit_bytes),
        cost_estimate=pl.CostEstimate(flops=flops, transcendentals=0,
                                      bytes_accessed=bytes_accessed),
    )(pooled, p["wr"], p["br"], p["wl"], p["bl"])
    # Combine the per-split partial maxima (tiny) in XLA.
    return jnp.max(partial.reshape(B, n_splits, 512), axis=1, keepdims=True)


# ----------------------------------------------------------------------------
# Top-level forward (jitted so the XLA glue — gather+max, global MLP — fuses).
# ----------------------------------------------------------------------------
@functools.partial(jax.jit,
                   static_argnames=("k", "tm", "tm_mlp", "tq",
                                    "vmem_limit_bytes"))
def foldnet_encoder_linear(pts, params, k=16, tm=512, tm_mlp=1024, tq=128,
                           vmem_limit_bytes=None):
    B, N, _ = pts.shape
    coords = pts[:, :, :3].astype(jnp.float32)

    # knn: distances + top-k + neighbor-1 coords fused in one Pallas kernel.
    idx, nbr1 = knn_with_nbr1(coords, k, tq=tq,
                              vmem_limit_bytes=vmem_limit_bytes)

    M = B * N
    local_feat = point_mlp(coords.reshape(M, 3), nbr1.reshape(M, 3),
                           params["mlp1"], tm=tm_mlp,
                           vmem_limit_bytes=vmem_limit_bytes)
    local_feat = local_feat.reshape(B, N, 128)                 # bf16

    pooled1 = local_maxpool(local_feat, idx)                   # (B, N, 128) bf16
    inter = graph1(pooled1, params["graph1"], tm=tm,
                   vmem_limit_bytes=vmem_limit_bytes)          # (B, N, 256) bf16

    pooled2 = local_maxpool(inter, idx)                        # (B, N, 256) bf16
    gmax = graph2_global_max(pooled2, params["graph2"], tm=tm,
                             vmem_limit_bytes=vmem_limit_bytes)  # (B, 1, 512)

    # global_mlp: two tiny (1-row, <=64-lane) matmuls — left to XLA.
    gp = params["global"]
    h = jnp.maximum(jnp.einsum("bif,fo->bio", gmax, gp["w1"]) + gp["b1"], 0.0)
    global_feat = jnp.einsum("bif,fo->bio", h, gp["w2"]) + gp["b2"]
    # The reference's second torch.max over dim=1 acts on a size-1 axis -> id.
    # local_feat is returned in bf16 (review item); cast downstream if needed.
    return global_feat, local_feat


# ----------------------------------------------------------------------------
# Deterministic parameter init (mimics nn.Linear default U(-1/sqrt(in), +)).
# Weights stored transposed (in, out); MXU-facing weights stored bf16.
# ----------------------------------------------------------------------------
def _linear_init(key, fan_in, fan_out, w_dtype=jnp.float32):
    kw, kb = jax.random.split(key)
    bound = 1.0 / (fan_in ** 0.5)
    w = jax.random.uniform(kw, (fan_in, fan_out), jnp.float32, -bound, bound)
    b = jax.random.uniform(kb, (1, fan_out), jnp.float32, -bound, bound)
    return w.astype(w_dtype), b


def init_params(key, in_channels=12, feat_dims=32):
    assert in_channels == 12, "point_normals=True path not wired in this script"
    ks = jax.random.split(key, 9)
    bf16 = jnp.bfloat16
    w0, b0 = _linear_init(ks[0], in_channels, 128, jnp.float32)
    w1, b1 = _linear_init(ks[1], 128, 128, bf16)
    w2, b2 = _linear_init(ks[2], 128, 128, bf16)
    mlp1 = dict(w0=w0, b0=b0, w1=w1, b1=b1, w2=w2, b2=b2)

    wr, br = _linear_init(ks[3], 128, 128, bf16)
    wl, bl = _linear_init(ks[4], 128, 256, bf16)
    graph1_p = dict(wr=wr, br=br, wl=wl, bl=bl)

    wr2, br2 = _linear_init(ks[5], 256, 256, bf16)
    wl2, bl2 = _linear_init(ks[6], 256, 512, bf16)
    graph2_p = dict(wr=wr2, br=br2, wl=wl2, bl=bl2)

    wg1, bg1 = _linear_init(ks[7], 512, 2 * feat_dims, jnp.float32)
    wg2, bg2 = _linear_init(ks[8], 2 * feat_dims, 2 * feat_dims, jnp.float32)
    glob = dict(w1=wg1, b1=bg1, w2=wg2, b2=bg2)

    return {"mlp1": mlp1, "graph1": graph1_p, "graph2": graph2_p,
            "global": glob}


if __name__ == "__main__":
    B, N, K, FEAT_DIMS = 2, 128, 16, 32   # point_normals=False -> in_channels=12
    key = jax.random.PRNGKey(0)
    k_pts, k_par = jax.random.split(key)

    pts = jax.random.normal(k_pts, (B, N, 3), dtype=jnp.float32)
    params = init_params(k_par, in_channels=12, feat_dims=FEAT_DIMS)

    # Sanity-check the fused knn kernel: neighbor 0 must be the point itself
    # and the in-kernel nbr1 extraction must match an XLA gather of idx[:,:,1].
    idx, nbr1 = knn_with_nbr1(pts, K)
    jax.block_until_ready((idx, nbr1))
    assert idx.shape == (B, N, K) and nbr1.shape == (B, N, 3)
    assert bool(jnp.all(idx[:, :, 0] == jnp.arange(N)[None, :])), "knn self idx"
    nbr1_ref = jax.vmap(lambda cb, ib: cb[ib])(pts, idx[:, :, 1])
    assert bool(jnp.allclose(nbr1, nbr1_ref)), "knn nbr1 mismatch"

    global_feat, local_feat = foldnet_encoder_linear(pts, params, k=K)
    jax.block_until_ready((global_feat, local_feat))

    assert global_feat.shape == (B, 1, 2 * FEAT_DIMS), global_feat.shape
    assert local_feat.shape == (B, N, 128), local_feat.shape
    assert local_feat.dtype == jnp.bfloat16
    assert bool(jnp.all(jnp.isfinite(global_feat.astype(jnp.float32))))
    assert bool(jnp.all(jnp.isfinite(local_feat.astype(jnp.float32))))
    print("KERNEL_OK")
</pallas_src>

<mosaic_0001>
module attributes {stable_mosaic.version = 11 : i64} {
  func.func @_knn_kernel(%arg0: i32, %arg1: i32, %arg2: memref<1x128x3xf32, #tpu.memory_space<vmem>>, %arg3: memref<1x3x128xf32, #tpu.memory_space<vmem>>, %arg4: memref<1x128x16xi32, #tpu.memory_space<vmem>>, %arg5: memref<1x128x3xf32, #tpu.memory_space<vmem>>) attributes {dimension_semantics = [#tpu.dimension_semantics<parallel>, #tpu.dimension_semantics<parallel>], iteration_bounds = array<i64: 2, 1>, scalar_prefetch = 0 : i64, scratch_operands = 0 : i64, tpu.core_type = #tpu.core_type<tc>, window_params = [{transform_indices = @transform_0, window_bounds = array<i64: 1, 128, 3>}, {transform_indices = @transform_1, window_bounds = array<i64: 1, 3, 128>}, {transform_indices = @transform_2, window_bounds = array<i64: 1, 128, 16>}, {transform_indices = @transform_3, window_bounds = array<i64: 1, 128, 3>}]} {
    %c0 = arith.constant 0 : index
    %c0_0 = arith.constant 0 : index
    %c0_1 = arith.constant 0 : index
    %0 = vector.load %arg2[%c0, %c0_0, %c0_1] : memref<1x128x3xf32, #tpu.memory_space<vmem>>, vector<1x128x3xf32>
    %1 = vector.shape_cast %0 : vector<1x128x3xf32> to vector<128x3xf32>
    %c0_2 = arith.constant 0 : index
    %c0_3 = arith.constant 0 : index
    %c0_4 = arith.constant 0 : index
    %2 = vector.load %arg3[%c0_2, %c0_3, %c0_4] : memref<1x3x128xf32, #tpu.memory_space<vmem>>, vector<1x3x128xf32>
    %3 = vector.shape_cast %2 : vector<1x3x128xf32> to vector<3x128xf32>
    %4 = vector.extract_strided_slice %1 {offsets = [0, 0], sizes = [128, 1], strides = [1, 1]} : vector<128x3xf32> to vector<128x1xf32>
    %5 = vector.extract_strided_slice %3 {offsets = [0, 0], sizes = [1, 128], strides = [1, 1]} : vector<3x128xf32> to vector<1x128xf32>
    %6 = vector.broadcast %4 : vector<128x1xf32> to vector<128x128xf32>
    %7 = vector.broadcast %5 : vector<1x128xf32> to vector<128x128xf32>
    %8 = arith.mulf %6, %7 : vector<128x128xf32>
    %9 = vector.extract_strided_slice %1 {offsets = [0, 1], sizes = [128, 1], strides = [1, 1]} : vector<128x3xf32> to vector<128x1xf32>
    %10 = vector.extract_strided_slice %3 {offsets = [1, 0], sizes = [1, 128], strides = [1, 1]} : vector<3x128xf32> to vector<1x128xf32>
    %11 = vector.broadcast %9 : vector<128x1xf32> to vector<128x128xf32>
    %12 = vector.broadcast %10 : vector<1x128xf32> to vector<128x128xf32>
    %13 = arith.mulf %11, %12 : vector<128x128xf32>
    %14 = arith.addf %8, %13 : vector<128x128xf32>
    %15 = vector.extract_strided_slice %1 {offsets = [0, 2], sizes = [128, 1], strides = [1, 1]} : vector<128x3xf32> to vector<128x1xf32>
    %16 = vector.extract_strided_slice %3 {offsets = [2, 0], sizes = [1, 128], strides = [1, 1]} : vector<3x128xf32> to vector<1x128xf32>
    %17 = vector.broadcast %15 : vector<128x1xf32> to vector<128x128xf32>
    %18 = vector.broadcast %16 : vector<1x128xf32> to vector<128x128xf32>
    %19 = arith.mulf %17, %18 : vector<128x128xf32>
    %20 = arith.addf %14, %19 : vector<128x128xf32>
    %21 = vector.extract_strided_slice %1 {offsets = [0, 0], sizes = [128, 1], strides = [1, 1]} : vector<128x3xf32> to vector<128x1xf32>
    %22 = arith.mulf %21, %21 : vector<128x1xf32>
    %23 = vector.extract_strided_slice %1 {offsets = [0, 1], sizes = [128, 1], strides = [1, 1]} : vector<128x3xf32> to vector<128x1xf32>
    %24 = arith.mulf %23, %23 : vector<128x1xf32>
    %25 = arith.addf %22, %24 : vector<128x1xf32>
    %26 = vector.extract_strided_slice %1 {offsets = [0, 2], sizes = [128, 1], strides = [1, 1]} : vector<128x3xf32> to vector<128x1xf32>
    %27 = arith.mulf %26, %26 : vector<128x1xf32>
    %28 = arith.addf %25, %27 : vector<128x1xf32>
    %29 = vector.extract_strided_slice %3 {offsets = [0, 0], sizes = [1, 128], strides = [1, 1]} : vector<3x128xf32> to vector<1x128xf32>
    %30 = arith.mulf %29, %29 : vector<1x128xf32>
    %31 = vector.extract_strided_slice %3 {offsets = [1, 0], sizes = [1, 128], strides = [1, 1]} : vector<3x128xf32> to vector<1x128xf32>
    %32 = arith.mulf %31, %31 : vector<1x128xf32>
    %33 = arith.addf %30, %32 : vector<1x128xf32>
    %34 = vector.extract_strided_slice %3 {offsets = [2, 0], sizes = [1, 128], strides = [1, 1]} : vector<3x128xf32> to vector<1x128xf32>
    %35 = arith.mulf %34, %34 : vector<1x128xf32>
    %36 = arith.addf %33, %35 : vector<1x128xf32>
    %cst = arith.constant 2.000000e+00 : f32
    %37 = vector.broadcast %cst : f32 to vector<128x128xf32>
    %38 = arith.mulf %37, %20 : vector<128x128xf32>
    %39 = vector.broadcast %28 : vector<128x1xf32> to vector<128x128xf32>
    %40 = arith.subf %38, %39 : vector<128x128xf32>
    %41 = vector.broadcast %36 : vector<1x128xf32> to vector<128x128xf32>
    %42 = arith.subf %40, %41 : vector<128x128xf32>
    %43 = tpu.bitcast %42 : vector<128x128xf32> -> vector<128x128xi32>
    %c0_i32 = arith.constant 0 : i32
    %44 = vector.broadcast %c0_i32 : i32 to vector<128x128xi32>
    %45 = arith.cmpi sge, %43, %44 : vector<128x128xi32>
    %c2147483647_i32 = arith.constant 2147483647 : i32
    %46 = vector.broadcast %c2147483647_i32 : i32 to vector<128x128xi32>
    %47 = arith.xori %43, %46 : vector<128x128xi32>
    %48 = arith.select %45, %43, %47 : vector<128x128xi1>, vector<128x128xi32>
    %49 = tpu.iota {dimensions = array<i32: 1>} : vector<128x128xi32>
    %c-128_i32 = arith.constant -128 : i32
    %50 = vector.broadcast %c-128_i32 : i32 to vector<128x128xi32>
    %51 = arith.andi %48, %50 : vector<128x128xi32>
    %c127_i32 = arith.constant 127 : i32
    %52 = vector.broadcast %c127_i32 : i32 to vector<128x128xi32>
    %53 = arith.subi %52, %49 : vector<128x128xi32>
    %54 = arith.ori %51, %53 : vector<128x128xi32>
    %cst_5 = arith.constant dense<-2147483648> : vector<128xi32>
    %55 = vector.multi_reduction <maxsi>, %54, %cst_5 [1] : vector<128x128xi32> to vector<128xi32>
    %56 = vector.shape_cast %55 : vector<128xi32> to vector<128x1xi32>
    %c127_i32_6 = arith.constant 127 : i32
    %57 = vector.broadcast %c127_i32_6 : i32 to vector<128x1xi32>
    %58 = arith.andi %56, %57 : vector<128x1xi32>
    %c127_i32_7 = arith.constant 127 : i32
    %59 = vector.broadcast %c127_i32_7 : i32 to vector<128x1xi32>
    %60 = arith.subi %59, %58 : vector<128x1xi32>
    %61 = vector.broadcast %56 : vector<128x1xi32> to vector<128x128xi32>
    %62 = arith.cmpi eq, %54, %61 : vector<128x128xi32>
    %c-2147483648_i32 = arith.constant -2147483648 : i32
    %63 = vector.broadcast %c-2147483648_i32 : i32 to vector<128x128xi32>
    %64 = arith.select %62, %63, %54 : vector<128x128xi1>, vector<128x128xi32>
    %cst_8 = arith.constant dense<-2147483648> : vector<128xi32>
    %65 = vector.multi_reduction <maxsi>, %64, %cst_8 [1] : vector<128x128xi32> to vector<128xi32>
    %66 = vector.shape_cast %65 : vector<128xi32> to vector<128x1xi32>
    %c127_i32_9 = arith.constant 127 : i32
    %67 = vector.broadcast %c127_i32_9 : i32 to vector<128x1xi32>
    %68 = arith.andi %66, %67 : vector<128x1xi32>
    %c127_i32_10 = arith.constant 127 : i32
    %69 = vector.broadcast %c127_i32_10 : i32 to vector<128x1xi32>
    %70 = arith.subi %69, %68 : vector<128x1xi32>
    %71 = vector.broadcast %66 : vector<128x1xi32> to vector<128x128xi32>
    %72 = arith.cmpi eq, %64, %71 : vector<128x128xi32>
    %73 = vector.extract_strided_slice %3 {offsets = [0, 0], sizes = [1, 128], strides = [1, 1]} : vector<3x128xf32> to vector<1x128xf32>
    %cst_11 = arith.constant 0.000000e+00 : f32
    %74 = vector.shape_cast %73 : vector<1x128xf32> to vector<1x128xf32>
    %75 = vector.broadcast %74 : vector<1x128xf32> to vector<128x128xf32>
    %76 = vector.broadcast %cst_11 : f32 to vector<128x128xf32>
    %77 = arith.select %72, %75, %76 : vector<128x128xi1>, vector<128x128xf32>
    %cst_12 = arith.constant dense<0.000000e+00> : vector<128xf32>
    %78 = vector.multi_reduction <add>, %77, %cst_12 [1] : vector<128x128xf32> to vector<128xf32>
    %79 = vector.shape_cast %78 : vector<128xf32> to vector<128x1xf32>
    %80 = vector.extract_strided_slice %3 {offsets = [1, 0], sizes = [1, 128], strides = [1, 1]} : vector<3x128xf32> to vector<1x128xf32>
    %cst_13 = arith.constant 0.000000e+00 : f32
    %81 = vector.shape_cast %80 : vector<1x128xf32> to vector<1x128xf32>
    %82 = vector.broadcast %81 : vector<1x128xf32> to vector<128x128xf32>
    %83 = vector.broadcast %cst_13 : f32 to vector<128x128xf32>
    %84 = arith.select %72, %82, %83 : vector<128x128xi1>, vector<128x128xf32>
    %cst_14 = arith.constant dense<0.000000e+00> : vector<128xf32>
    %85 = vector.multi_reduction <add>, %84, %cst_14 [1] : vector<128x128xf32> to vector<128xf32>
    %86 = vector.shape_cast %85 : vector<128xf32> to vector<128x1xf32>
    %87 = vector.extract_strided_slice %3 {offsets = [2, 0], sizes = [1, 128], strides = [1, 1]} : vector<3x128xf32> to vector<1x128xf32>
    %cst_15 = arith.constant 0.000000e+00 : f32
    %88 = vector.shape_cast %87 : vector<1x128xf32> to vector<1x128xf32>
    %89 = vector.broadcast %88 : vector<1x128xf32> to vector<128x128xf32>
    %90 = vector.broadcast %cst_15 : f32 to vector<128x128xf32>
    %91 = arith.select %72, %89, %90 : vector<128x128xi1>, vector<128x128xf32>
    %cst_16 = arith.constant dense<0.000000e+00> : vector<128xf32>
    %92 = vector.multi_reduction <add>, %91, %cst_16 [1] : vector<128x128xf32> to vector<128xf32>
    %93 = vector.shape_cast %92 : vector<128xf32> to vector<128x1xf32>
    %94 = tpu.concatenate %79, %86, %93 in 1 : vector<128x1xf32>, vector<128x1xf32>, vector<128x1xf32> -> vector<128x3xf32>
    %c0_17 = arith.constant 0 : index
    %c0_18 = arith.constant 0 : index
    %c0_19 = arith.constant 0 : index
    %95 = vector.load %arg5[%c0_17, %c0_18, %c0_19] : memref<1x128x3xf32, #tpu.memory_space<vmem>>, vector<1x128x3xf32>
    %96 = vector.shape_cast %95 : vector<1x128x3xf32> to vector<128x3xf32>
    %97 = vector.shape_cast %94 : vector<128x3xf32> to vector<1x128x3xf32>
    tpu.vector_store %arg5[%c0_17, %c0_18, %c0_19], %97 {strides = array<i32>} : memref<1x128x3xf32, #tpu.memory_space<vmem>>, vector<1x128x3xf32>,
    %c-2147483648_i32_20 = arith.constant -2147483648 : i32
    %98 = vector.broadcast %c-2147483648_i32_20 : i32 to vector<128x128xi32>
    %99 = arith.select %72, %98, %64 : vector<128x128xi1>, vector<128x128xi32>
    %cst_21 = arith.constant dense<-2147483648> : vector<128xi32>
    %100 = vector.multi_reduction <maxsi>, %99, %cst_21 [1] : vector<128x128xi32> to vector<128xi32>
    %101 = vector.shape_cast %100 : vector<128xi32> to vector<128x1xi32>
    %c127_i32_22 = arith.constant 127 : i32
    %102 = vector.broadcast %c127_i32_22 : i32 to vector<128x1xi32>
    %103 = arith.andi %101, %102 : vector<128x1xi32>
    %c127_i32_23 = arith.constant 127 : i32
    %104 = vector.broadcast %c127_i32_23 : i32 to vector<128x1xi32>
    %105 = arith.subi %104, %103 : vector<128x1xi32>
    %106 = vector.broadcast %101 : vector<128x1xi32> to vector<128x128xi32>
    %107 = arith.cmpi eq, %99, %106 : vector<128x128xi32>
    %c-2147483648_i32_24 = arith.constant -2147483648 : i32
    %108 = vector.broadcast %c-2147483648_i32_24 : i32 to vector<128x128xi32>
    %109 = arith.select %107, %108, %99 : vector<128x128xi1>, vector<128x128xi32>
    %cst_25 = arith.constant dense<-2147483648> : vector<128xi32>
    %110 = vector.multi_reduction <maxsi>, %109, %cst_25 [1] : vector<128x128xi32> to vector<128xi32>
    %111 = vector.shape_cast %110 : vector<128xi32> to vector<128x1xi32>
    %c127_i32_26 = arith.constant 127 : i32
    %112 = vector.broadcast %c127_i32_26 : i32 to vector<128x1xi32>
    %113 = arith.andi %111, %112 : vector<128x1xi32>
    %c127_i32_27 = arith.constant 127 : i32
    %114 = vector.broadcast %c127_i32_27 : i32 to vector<128x1xi32>
    %115 = arith.subi %114, %113 : vector<128x1xi32>
    %116 = vector.broadcast %111 : vector<128x1xi32> to vector<128x128xi32>
    %117 = arith.cmpi eq, %109, %116 : vector<128x128xi32>
    %c-2147483648_i32_28 = arith.constant -2147483648 : i32
    %118 = vector.broadcast %c-2147483648_i32_28 : i32 to vector<128x128xi32>
    %119 = arith.select %117, %118, %109 : vector<128x128xi1>, vector<128x128xi32>
    %cst_29 = arith.constant dense<-2147483648> : vector<128xi32>
    %120 = vector.multi_reduction <maxsi>, %119, %cst_29 [1] : vector<128x128xi32> to vector<128xi32>
    %121 = vector.shape_cast %120 : vector<128xi32> to vector<128x1xi32>
    %c127_i32_30 = arith.constant 127 : i32
    %122 = vector.broadcast %c127_i32_30 : i32 to vector<128x1xi32>
    %123 = arith.andi %121, %122 : vector<128x1xi32>
    %c127_i32_31 = arith.constant 127 : i32
    %124 = vector.broadcast %c127_i32_31 : i32 to vector<128x1xi32>
    %125 = arith.subi %124, %123 : vector<128x1xi32>
    %126 = vector.broadcast %121 : vector<128x1xi32> to vector<128x128xi32>
    %127 = arith.cmpi eq, %119, %126 : vector<128x128xi32>
    %c-2147483648_i32_32 = arith.constant -2147483648 : i32
    %128 = vector.broadcast %c-2147483648_i32_32 : i32 to vector<128x128xi32>
    %129 = arith.select %127, %128, %119 : vector<128x128xi1>, vector<128x128xi32>
    %cst_33 = arith.constant dense<-2147483648> : vector<128xi32>
    %130 = vector.multi_reduction <maxsi>, %129, %cst_33 [1] : vector<128x128xi32> to vector<128xi32>
    %131 = vector.shape_cast %130 : vector<128xi32> to vector<128x1xi32>
    %c127_i32_34 = arith.constant 127 : i32
    %132 = vector.broadcast %c127_i32_34 : i32 to vector<128x1xi32>
    %133 = arith.andi %131, %132 : vector<128x1xi32>
    %c127_i32_35 = arith.constant 127 : i32
    %134 = vector.broadcast %c127_i32_35 : i32 to vector<128x1xi32>
    %135 = arith.subi %134, %133 : vector<128x1xi32>
    %136 = vector.broadcast %131 : vector<128x1xi32> to vector<128x128xi32>
    %137 = arith.cmpi eq, %129, %136 : vector<128x128xi32>
    %c-2147483648_i32_36 = arith.constant -2147483648 : i32
    %138 = vector.broadcast %c-2147483648_i32_36 : i32 to vector<128x128xi32>
    %139 = arith.select %137, %138, %129 : vector<128x128xi1>, vector<128x128xi32>
    %cst_37 = arith.constant dense<-2147483648> : vector<128xi32>
    %140 = vector.multi_reduction <maxsi>, %139, %cst_37 [1] : vector<128x128xi32> to vector<128xi32>
    %141 = vector.shape_cast %140 : vector<128xi32> to vector<128x1xi32>
    %c127_i32_38 = arith.constant 127 : i32
    %142 = vector.broadcast %c127_i32_38 : i32 to vector<128x1xi32>
    %143 = arith.andi %141, %142 : vector<128x1xi32>
    %c127_i32_39 = arith.constant 127 : i32
    %144 = vector.broadcast %c127_i32_39 : i32 to vector<128x1xi32>
    %145 = arith.subi %144, %143 : vector<128x1xi32>
    %146 = vector.broadcast %141 : vector<128x1xi32> to vector<128x128xi32>
    %147 = arith.cmpi eq, %139, %146 : vector<128x128xi32>
    %c-2147483648_i32_40 = arith.constant -2147483648 : i32
    %148 = vector.broadcast %c-2147483648_i32_40 : i32 to vector<128x128xi32>
    %149 = arith.select %147, %148, %139 : vector<128x128xi1>, vector<128x128xi32>
    %cst_41 = arith.constant dense<-2147483648> : vector<128xi32>
    %150 = vector.multi_reduction <maxsi>, %149, %cst_41 [1] : vector<128x128xi32> to vector<128xi32>
    %151 = vector.shape_cast %150 : vector<128xi32> to vector<128x1xi32>
    %c127_i32_42 = arith.constant 127 : i32
    %152 = vector.broadcast %c127_i32_42 : i32 to vector<128x1xi32>
    %153 = arith.andi %151, %152 : vector<128x1xi32>
    %c127_i32_43 = arith.constant 127 : i32
    %154 = vector.broadcast %c127_i32_43 : i32 to vector<128x1xi32>
    %155 = arith.subi %154, %153 : vector<128x1xi32>
    %156 = vector.broadcast %151 : vector<128x1xi32> to vector<128x128xi32>
    %157 = arith.cmpi eq, %149, %156 : vector<128x128xi32>
    %c-2147483648_i32_44 = arith.constant -2147483648 : i32
    %158 = vector.broadcast %c-2147483648_i32_44 : i32 to vector<128x128xi32>
    %159 = arith.select %157, %158, %149 : vector<128x128xi1>, vector<128x128xi32>
    %cst_45 = arith.constant dense<-2147483648> : vector<128xi32>
    %160 = vector.multi_reduction <maxsi>, %159, %cst_45 [1] : vector<128x128xi32> to vector<128xi32>
    %161 = vector.shape_cast %160 : vector<128xi32> to vector<128x1xi32>
    %c127_i32_46 = arith.constant 127 : i32
    %162 = vector.broadcast %c127_i32_46 : i32 to vector<128x1xi32>
    %163 = arith.andi %161, %162 : vector<128x1xi32>
    %c127_i32_47 = arith.constant 127 : i32
    %164 = vector.broadcast %c127_i32_47 : i32 to vector<128x1xi32>
    %165 = arith.subi %164, %163 : vector<128x1xi32>
    %166 = vector.broadcast %161 : vector<128x1xi32> to vector<128x128xi32>
    %167 = arith.cmpi eq, %159, %166 : vector<128x128xi32>
    %c-2147483648_i32_48 = arith.constant -2147483648 : i32
    %168 = vector.broadcast %c-2147483648_i32_48 : i32 to vector<128x128xi32>
    %169 = arith.select %167, %168, %159 : vector<128x128xi1>, vector<128x128xi32>
    %cst_49 = arith.constant dense<-2147483648> : vector<128xi32>
    %170 = vector.multi_reduction <maxsi>, %169, %cst_49 [1] : vector<128x128xi32> to vector<128xi32>
    %171 = vector.shape_cast %170 : vector<128xi32> to vector<128x1xi32>
    %c127_i32_50 = arith.constant 127 : i32
    %172 = vector.broadcast %c127_i32_50 : i32 to vector<128x1xi32>
    %173 = arith.andi %171, %172 : vector<128x1xi32>
    %c127_i32_51 = arith.constant 127 : i32
    %174 = vector.broadcast %c127_i32_51 : i32 to vector<128x1xi32>
    %175 = arith.subi %174, %173 : vector<128x1xi32>
    %176 = vector.broadcast %171 : vector<128x1xi32> to vector<128x128xi32>
    %177 = arith.cmpi eq, %169, %176 : vector<128x128xi32>
    %c-2147483648_i32_52 = arith.constant -2147483648 : i32
    %178 = vector.broadcast %c-2147483648_i32_52 : i32 to vector<128x128xi32>
    %179 = arith.select %177, %178, %169 : vector<128x128xi1>, vector<128x128xi32>
    %cst_53 = arith.constant dense<-2147483648> : vector<128xi32>
    %180 = vector.multi_reduction <maxsi>, %179, %cst_53 [1] : vector<128x128xi32> to vector<128xi32>
    %181 = vector.shape_cast %180 : vector<128xi32> to vector<128x1xi32>
    %c127_i32_54 = arith.constant 127 : i32
    %182 = vector.broadcast %c127_i32_54 : i32 to vector<128x1xi32>
    %183 = arith.andi %181, %182 : vector<128x1xi32>
    %c127_i32_55 = arith.constant 127 : i32
    %184 = vector.broadcast %c127_i32_55 : i32 to vector<128x1xi32>
    %185 = arith.subi %184, %183 : vector<128x1xi32>
    %186 = vector.broadcast %181 : vector<128x1xi32> to vector<128x128xi32>
    %187 = arith.cmpi eq, %179, %186 : vector<128x128xi32>
    %c-2147483648_i32_56 = arith.constant -2147483648 : i32
    %188 = vector.broadcast %c-2147483648_i32_56 : i32 to vector<128x128xi32>
    %189 = arith.select %187, %188, %179 : vector<128x128xi1>, vector<128x128xi32>
    %cst_57 = arith.constant dense<-2147483648> : vector<128xi32>
    %190 = vector.multi_reduction <maxsi>, %189, %cst_57 [1] : vector<128x128xi32> to vector<128xi32>
    %191 = vector.shape_cast %190 : vector<128xi32> to vector<128x1xi32>
    %c127_i32_58 = arith.constant 127 : i32
    %192 = vector.broadcast %c127_i32_58 : i32 to vector<128x1xi32>
    %193 = arith.andi %191, %192 : vector<128x1xi32>
    %c127_i32_59 = arith.constant 127 : i32
    %194 = vector.broadcast %c127_i32_59 : i32 to vector<128x1xi32>
    %195 = arith.subi %194, %193 : vector<128x1xi32>
    %196 = vector.broadcast %191 : vector<128x1xi32> to vector<128x128xi32>
    %197 = arith.cmpi eq, %189, %196 : vector<128x128xi32>
    %c-2147483648_i32_60 = arith.constant -2147483648 : i32
    %198 = vector.broadcast %c-2147483648_i32_60 : i32 to vector<128x128xi32>
    %199 = arith.select %197, %198, %189 : vector<128x128xi1>, vector<128x128xi32>
    %cst_61 = arith.constant dense<-2147483648> : vector<128xi32>
    %200 = vector.multi_reduction <maxsi>, %199, %cst_61 [1] : vector<128x128xi32> to vector<128xi32>
    %201 = vector.shape_cast %200 : vector<128xi32> to vector<128x1xi32>
    %c127_i32_62 = arith.constant 127 : i32
    %202 = vector.broadcast %c127_i32_62 : i32 to vector<128x1xi32>
    %203 = arith.andi %201, %202 : vector<128x1xi32>
    %c127_i32_63 = arith.constant 127 : i32
    %204 = vector.broadcast %c127_i32_63 : i32 to vector<128x1xi32>
    %205 = arith.subi %204, %203 : vector<128x1xi32>
    %206 = vector.broadcast %201 : vector<128x1xi32> to vector<128x128xi32>
    %207 = arith.cmpi eq, %199, %206 : vector<128x128xi32>
    %c-2147483648_i32_64 = arith.constant -2147483648 : i32
    %208 = vector.broadcast %c-2147483648_i32_64 : i32 to vector<128x128xi32>
    %209 = arith.select %207, %208, %199 : vector<128x128xi1>, vector<128x128xi32>
    %cst_65 = arith.constant dense<-2147483648> : vector<128xi32>
    %210 = vector.multi_reduction <maxsi>, %209, %cst_65 [1] : vector<128x128xi32> to vector<128xi32>
    %211 = vector.shape_cast %210 : vector<128xi32> to vector<128x1xi32>
    %c127_i32_66 = arith.constant 127 : i32
    %212 = vector.broadcast %c127_i32_66 : i32 to vector<128x1xi32>
    %213 = arith.andi %211, %212 : vector<128x1xi32>
    %c127_i32_67 = arith.constant 127 : i32
    %214 = vector.broadcast %c127_i32_67 : i32 to vector<128x1xi32>
    %215 = arith.subi %214, %213 : vector<128x1xi32>
    %216 = vector.broadcast %211 : vector<128x1xi32> to vector<128x128xi32>
    %217 = arith.cmpi eq, %209, %216 : vector<128x128xi32>
    %c-2147483648_i32_68 = arith.constant -2147483648 : i32
    %218 = vector.broadcast %c-2147483648_i32_68 : i32 to vector<128x128xi32>
    %219 = arith.select %217, %218, %209 : vector<128x128xi1>, vector<128x128xi32>
    %cst_69 = arith.constant dense<-2147483648> : vector<128xi32>
    %220 = vector.multi_reduction <maxsi>, %219, %cst_69 [1] : vector<128x128xi32> to vector<128xi32>
    %221 = vector.shape_cast %220 : vector<128xi32> to vector<128x1xi32>
    %c127_i32_70 = arith.constant 127 : i32
    %222 = vector.broadcast %c127_i32_70 : i32 to vector<128x1xi32>
    %223 = arith.andi %221, %222 : vector<128x1xi32>
    %c127_i32_71 = arith.constant 127 : i32
    %224 = vector.broadcast %c127_i32_71 : i32 to vector<128x1xi32>
    %225 = arith.subi %224, %223 : vector<128x1xi32>
    %226 = vector.broadcast %221 : vector<128x1xi32> to vector<128x128xi32>
    %227 = arith.cmpi eq, %219, %226 : vector<128x128xi32>
    %c-2147483648_i32_72 = arith.constant -2147483648 : i32
    %228 = vector.broadcast %c-2147483648_i32_72 : i32 to vector<128x128xi32>
    %229 = arith.select %227, %228, %219 : vector<128x128xi1>, vector<128x128xi32>
    %cst_73 = arith.constant dense<-2147483648> : vector<128xi32>
    %230 = vector.multi_reduction <maxsi>, %229, %cst_73 [1] : vector<128x128xi32> to vector<128xi32>
    %231 = vector.shape_cast %230 : vector<128xi32> to vector<128x1xi32>
    %c127_i32_74 = arith.constant 127 : i32
    %232 = vector.broadcast %c127_i32_74 : i32 to vector<128x1xi32>
    %233 = arith.andi %231, %232 : vector<128x1xi32>
    %c127_i32_75 = arith.constant 127 : i32
    %234 = vector.broadcast %c127_i32_75 : i32 to vector<128x1xi32>
    %235 = arith.subi %234, %233 : vector<128x1xi32>
    %236 = tpu.concatenate %60, %70, %105, %115, %125, %135, %145, %155, %165, %175, %185, %195, %205, %215, %225, %235 in 1 : vector<128x1xi32>, vector<128x1xi32>, vector<128x1xi32>, vector<128x1xi32>, vector<128x1xi32>, vector<128x1xi32>, vector<128x1xi32>, vector<128x1xi32>, vector<128x1xi32>, vector<128x1xi32>, vector<128x1xi32>, vector<128x1xi32>, vector<128x1xi32>, vector<128x1xi32>, vector<128x1xi32>, vector<128x1xi32> -> vector<128x16xi32>
    %c0_76 = arith.constant 0 : index
    %c0_77 = arith.constant 0 : index
    %c0_78 = arith.constant 0 : index
    %237 = vector.load %arg4[%c0_76, %c0_77, %c0_78] : memref<1x128x16xi32, #tpu.memory_space<vmem>>, vector<1x128x16xi32>
    %238 = vector.shape_cast %237 : vector<1x128x16xi32> to vector<128x16xi32>
    %239 = vector.shape_cast %236 : vector<128x16xi32> to vector<1x128x16xi32>
    tpu.vector_store %arg4[%c0_76, %c0_77, %c0_78], %239 {strides = array<i32>} : memref<1x128x16xi32, #tpu.memory_space<vmem>>, vector<1x128x16xi32>,
    return
  }
  func.func @transform_0(%arg0: i32, %arg1: i32) -> (i32, i32, i32) {
    %c0_i32 = arith.constant 0 : i32
    %c0_i32_0 = arith.constant 0 : i32
    return %arg0, %arg1, %c0_i32 : i32, i32, i32
  }
  func.func @transform_1(%arg0: i32, %arg1: i32) -> (i32, i32, i32) {
    %c0_i32 = arith.constant 0 : i32
    %c0_i32_0 = arith.constant 0 : i32
    %c0_i32_1 = arith.constant 0 : i32
    return %arg0, %c0_i32, %c0_i32_0 : i32, i32, i32
  }
  func.func @transform_2(%arg0: i32, %arg1: i32) -> (i32, i32, i32) {
    %c0_i32 = arith.constant 0 : i32
    %c0_i32_0 = arith.constant 0 : i32
    return %arg0, %arg1, %c0_i32 : i32, i32, i32
  }
  func.func @transform_3(%arg0: i32, %arg1: i32) -> (i32, i32, i32) {
    %c0_i32 = arith.constant 0 : i32
    %c0_i32_0 = arith.constant 0 : i32
    return %arg0, %arg1, %c0_i32 : i32, i32, i32
  }
}

</mosaic_0001>

<bundles_post_ra>
// kernel: tpu_custom_call.1
= control target key start
LH: loop header
LB: loop body
LE: loop exit
PB: predicated region body
PF: predicated region fallthrough
CT: control target
= control target key end

     0   :  { %s6258_s12 = smov 0   ;;  %s6260_s13 = smov 0   ;;  %s11813_s0 = inlined_call_operand.vmem [shape: f32[2,128,3], index: 0, kind: input, shape index: {}]   ;;  %s11814_s1 = inlined_call_operand.vmem [shape: f32[2,3,128], index: 1, kind: input, shape index: {}]   ;;  %s11815_s2 = inlined_call_operand.vmem [shape: s32[2,128,16], index: 2, kind: output, shape index: {0}]   ;;  %s11816_s3 = inlined_call_operand.vmem [shape: f32[2,128,3], index: 3, kind: output, shape index: {1}]  }
   0x1   :  { %s6262_s14 = smov 0  }
   0x2 LB: > { %s26_s15 = sadd.s32 1, %s6227_s13  ;;  %p6160_p0 = scmp.ge.s32.totalorder %s6231_s14, 1  ;;  %s6231_s14 = sphi %s6262_s14, %s14_s14   ;;  %s6227_s13 = sphi %s6260_s13, %s12154_s13   ;;  %s6223_s12 = sphi %s6258_s12, %s12153_s12  }
   0x3   : > { %p28_p1 = scmp.ge.s32.totalorder %s26_s15, 2  ;;  %p172_p2 = scmp.lt.s32.totalorder %s6231_s14, 3 }
   0x5   : > { %s12156_s15 = smov (%p28_p1, %s26_s15), 0  ;;  %p173_p3 = pnand %p6160_p0, %p172_p2 }
   0x7   : > { %176 = sbr.rel (%p173_p3) target bundleno = 5137 (0x1411), region = 28 }
   0xe   : > { %p218_p4 = scmp.lt.s32.totalorder %s6223_s12, 1  ;;  %v6233_v0 = vmov 1   ;;  %v6234_v1 = vmov 0   ;;  %s6235_s20 = smov 127   ;;  %v6237_v34 = vmov 2  }
   0xf   : > { %6204 = vset.pattern.permute.xlu0 %v6233_v0  ;;  %6202 = vset.pattern.permute.xlu1 %v6234_v1  ;;  %s6236_s21 = smov 126  }
  0x10   : > { %s12158_s12 = smov (!%p218_p4, %s6223_s12), 1 }
  0x11   : > { %s6281_s16 = sshll.u32 %s12158_s12, 7  ;;  %s6163_s22 = sshll.u32 %s12158_s12, 2 }
  0x12   : > { %s6287_s19 = scalar_lea.vmem %s11813_s0, %s6281_s16  ;;  %s230_s25 = scalar_lea.vmem %s11814_s1, %s6163_s22 }
  0x13   : > { %v6290_v2 = vld [vmem:[%s6287_s19 + $0x10] sm:$0xff]  ;;  %v6293_v3 = vld [vmem:[%s6287_s19] sm:$0xff]  ;;  %v6300_v5 = vld [vmem:[%s6287_s19 + $0x18] sm:$0xff]  ;;  %s11636_s28 = scalar_lea.vmem %s11816_s3, %s6281_s16  ;;  %s11699_s4 = scalar_lea.vmem %s11815_s2, %s6281_s16 }
  0x14   : > { %v6297_v4 = vmul.f32 %v6290_v2, %v6290_v2  ;;  %v6303_v6 = vld [vmem:[%s6287_s19 + $0x8] sm:$0xff]  ;;  %v6307_v7 = vmul.f32 %v6293_v3, %v6293_v3  ;;  %v6313_v8 = vmul.f32 %v6300_v5, %v6300_v5  ;;  %v6325_v11 = vld [vmem:[%s6287_s19 + $0x20] sm:$0xff]  ;;  %v6340_v14 = vld [vmem:[%s6287_s19 + $0x38] sm:$0xff] }
  0x15   : > { %v6319_v9 = vmul.f32 %v6303_v6, %v6303_v6  ;;  %v6322_v10 = vld [vmem:[%s6287_s19 + $0x28] sm:$0xff]  ;;  %v6337_v13 = vmul.f32 %v6325_v11, %v6325_v11  ;;  %v6343_v15 = vld [vmem:[%s6287_s19 + $0x30] sm:$0xff]  ;;  %v6349_v16 = vmul.f32 %v6340_v14, %v6340_v14  ;;  %v6361_v19 = vld [vmem:[%s6287_s19 + $0x40] sm:$0xff] }
  0x16   : > { %604 = vrot.lane.b32.xlu1 %v6297_v4, %s6235_s20  ;;  %600 = vrot.lane.b32.xlu0 %v6307_v7, %s6235_s20  ;;  %v6331_v12 = vmul.f32 %v6322_v10, %v6322_v10  ;;  %v6355_v17 = vmul.f32 %v6343_v15, %v6343_v15  ;;  %v6358_v18 = vld [vmem:[%s6287_s19 + $0x48] sm:$0xff]  ;;  %v6373_v21 = vmul.f32 %v6361_v19, %v6361_v19  ;;  %v6376_v22 = vld [vmem:[%s6287_s19 + $0x58] sm:$0xff] }
  0x17   : > { %v6367_v20 = vmul.f32 %v6358_v18, %v6358_v18  ;;  %v6379_v23 = vld [vmem:[%s6287_s19 + $0x50] sm:$0xff]  ;;  %v6385_v24 = vmul.f32 %v6376_v22, %v6376_v22  ;;  %v6394_v26 = vld [vmem:[%s6287_s19 + $0x68] sm:$0xff]  ;;  %v6397_v27 = vld [vmem:[%s6287_s19 + $0x60] sm:$0xff] }
  0x18   : > { %v6391_v25 = vmul.f32 %v6379_v23, %v6379_v23  ;;  %v6403_v28 = vmul.f32 %v6394_v26, %v6394_v26  ;;  %v6409_v29 = vmul.f32 %v6397_v27, %v6397_v27  ;;  %v6412_v30 = vld [vmem:[%s6287_s19 + $0x78] sm:$0xff]  ;;  %v6415_v31 = vld [vmem:[%s6287_s19 + $0x70] sm:$0xff] }
  0x19   : > { %v6421_v32 = vmul.f32 %v6412_v30, %v6412_v30  ;;  %v6427_v33 = vmul.f32 %v6415_v31, %v6415_v31 }
  0x1a   : > { %606 = vrot.lane.b32.xlu1 %v6313_v8, %s6235_s20  ;;  %602 = vrot.lane.b32.xlu0 %v6319_v9, %s6235_s20 }
  0x1e   : > { %610 = vrot.lane.b32.xlu1 %v6331_v12, %s6235_s20  ;;  %608 = vrot.lane.b32.xlu0 %v6337_v13, %s6235_s20 }
  0x22   : > { %614 = vrot.lane.b32.xlu1 %v6349_v16, %s6235_s20  ;;  %612 = vrot.lane.b32.xlu0 %v6355_v17, %s6235_s20 }
  0x26   : > { %618 = vrot.lane.b32.xlu1 %v6367_v20, %s6235_s20  ;;  %616 = vrot.lane.b32.xlu0 %v6373_v21, %s6235_s20 }
  0x2a   : > { %622 = vrot.lane.b32.xlu1 %v6385_v24, %s6235_s20  ;;  %620 = vrot.lane.b32.xlu0 %v6391_v25, %s6235_s20 }
  0x2e   : > { %626 = vrot.lane.b32.xlu1 %v6403_v28, %s6235_s20  ;;  %624 = vrot.lane.b32.xlu0 %v6409_v29, %s6235_s20 }
  0x32   : > { %630 = vrot.lane.b32.xlu1 %v6421_v32, %s6235_s20  ;;  %628 = vrot.lane.b32.xlu0 %v6427_v33, %s6235_s20 }
  0x36   : > { %666 = vrot.lane.b32.xlu1 %v6319_v9, %s6236_s21  ;;  %664 = vrot.lane.b32.xlu0 %v6307_v7, %s6236_s21 }
  0x3a   : > { %670 = vrot.lane.b32.xlu1 %v6313_v8, %s6236_s21  ;;  %668 = vrot.lane.b32.xlu0 %v6297_v4, %s6236_s21 }
  0x3e   : > { %674 = vrot.lane.b32.xlu1 %v6331_v12, %s6236_s21  ;;  %672 = vrot.lane.b32.xlu0 %v6337_v13, %s6236_s21 }
  0x42   : > { %678 = vrot.lane.b32.xlu1 %v6349_v16, %s6236_s21  ;;  %676 = vrot.lane.b32.xlu0 %v6355_v17, %s6236_s21 }
  0x46   : > { %682 = vrot.lane.b32.xlu1 %v6367_v20, %s6236_s21  ;;  %680 = vrot.lane.b32.xlu0 %v6373_v21, %s6236_s21 }
  0x4a   : > { %686 = vrot.lane.b32.xlu1 %v6385_v24, %s6236_s21  ;;  %684 = vrot.lane.b32.xlu0 %v6391_v25, %s6236_s21 }
  0x4e   : > { %690 = vrot.lane.b32.xlu1 %v6403_v28, %s6236_s21  ;;  %688 = vrot.lane.b32.xlu0 %v6409_v29, %s6236_s21 }
  0x52   : > { %694 = vrot.lane.b32.xlu1 %v6421_v32, %s6236_s21  ;;  %692 = vrot.lane.b32.xlu0 %v6427_v33, %s6236_s21 }
  0x56   : > { %275 = vperm.xlu1 %6202, %v6303_v6   ;;  %373 = vperm.xlu0 %6204, %v6303_v6  }
  0x5a   : > { %280 = vperm.xlu1 %6202, %v6290_v2   ;;  %385 = vperm.xlu0 %6204, %v6325_v11  }
  0x5e   : > { %290 = vperm.xlu1 %6202, %v6325_v11   ;;  %393 = vperm.xlu0 %6204, %v6343_v15  }
  0x62   : > { %300 = vperm.xlu1 %6202, %v6343_v15   ;;  %401 = vperm.xlu0 %6204, %v6361_v19  }
  0x66   : > { %310 = vperm.xlu1 %6202, %v6361_v19   ;;  %409 = vperm.xlu0 %6204, %v6379_v23  }
  0x6a   : > { %320 = vperm.xlu1 %6202, %v6379_v23   ;;  %417 = vperm.xlu0 %6204, %v6397_v27  }
  0x6e   : > { %330 = vperm.xlu1 %6202, %v6397_v27   ;;  %425 = vperm.xlu0 %6204, %v6415_v31  }
  0x72   : > { %340 = vperm.xlu1 %6202, %v6415_v31   ;;  %6205 = vset.pattern.permute.xlu0 %v6237_v34 }
  0x73   : > { %469 = vperm.xlu0 %6205, %v6293_v3  }
  0x76   : > { %6203 = vset.pattern.permute.xlu1 %v6233_v0 }
  0x77   : > { %369 = vperm.xlu1 %6203, %v6293_v3   ;;  %481 = vperm.xlu0 %6205, %v6300_v5  }
  0x7b   : > { %377 = vperm.xlu1 %6203, %v6290_v2   ;;  %489 = vperm.xlu0 %6205, %v6322_v10  }
  0x7f   : > { %381 = vperm.xlu1 %6203, %v6300_v5   ;;  %497 = vperm.xlu0 %6205, %v6340_v14  }
  0x83   : > { %389 = vperm.xlu1 %6203, %v6322_v10   ;;  %505 = vperm.xlu0 %6205, %v6358_v18  }
  0x87   : > { %397 = vperm.xlu1 %6203, %v6340_v14   ;;  %513 = vperm.xlu0 %6205, %v6376_v22  }
  0x88   : > { %v605_v35 = vpop.permute.xlu1 %604  ;;  %v601_v36 = vpop.permute.xlu0 %600 }
  0x89   : > { %v648_v62 = vadd.f32 %v601_v36, %v6307_v7 }
  0x8b   : > { %405 = vperm.xlu1 %6203, %v6358_v18   ;;  %521 = vperm.xlu0 %6205, %v6394_v26  }
  0x8c   : > { %v6478_v37 = vpop.permute.xlu1 %606  ;;  %v603_v38 = vpop.permute.xlu0 %602 }
  0x8d   : > { %v649_v55 = vadd.f32 %v603_v38, %v6319_v9  ;;  %v651_v7 = vadd.f32 %v6478_v37, %v6313_v8 }
  0x8f   : > { %413 = vperm.xlu1 %6203, %v6376_v22   ;;  %529 = vperm.xlu0 %6205, %v6412_v30  }
  0x90   : > { %v6482_v39 = vpop.permute.xlu1 %610  ;;  %v609_v40 = vpop.permute.xlu0 %608 }
  0x91   : > { %v652_v59 = vadd.f32 %v609_v40, %v6337_v13 }
  0x93   : > { %421 = vperm.xlu1 %6203, %v6394_v26   ;;  %6207 = vset.pattern.permute.xlu0 %v6234_v1 }
  0x94   : > { %v6486_v41 = vpop.permute.xlu1 %614  ;;  %270 = vperm.xlu0 %6207, %v6293_v3   ;;  %v613_v42 = vpop.permute.xlu0 %612 }
  0x95   : > { %v654_v63 = vadd.f32 %v613_v42, %v6355_v17  ;;  %v655_v8 = vadd.f32 %v6486_v41, %v6349_v16 }
  0x97   : > { %429 = vperm.xlu1 %6203, %v6412_v30  }
  0x98   : > { %v6490_v43 = vpop.permute.xlu1 %618  ;;  %285 = vperm.xlu0 %6207, %v6300_v5   ;;  %v617_v44 = vpop.permute.xlu0 %616 }
  0x99   : > { %v656_v9 = vadd.f32 %v617_v44, %v6373_v21 }
  0x9b   : > { %6206 = vset.pattern.permute.xlu1 %v6237_v34 }
  0x9c   : > { %v6493_v45 = vpop.permute.xlu1 %622  ;;  %473 = vperm.xlu1 %6206, %v6303_v6   ;;  %295 = vperm.xlu0 %6207, %v6322_v10   ;;  %v621_v46 = vpop.permute.xlu0 %620  ;;  %v650_v6 = vadd.f32 %v605_v35, %v6297_v4  ;;  %v653_v4 = vadd.f32 %v6482_v39, %v6331_v12  ;;  %v657_v12 = vadd.f32 %v6490_v43, %v6367_v20 }
  0x9d   : > { %v659_v34 = vadd.f32 %v6493_v45, %v6385_v24 }
  0xa0   : > { %v6497_v47 = vpop.permute.xlu1 %626  ;;  %477 = vperm.xlu1 %6206, %v6290_v2   ;;  %305 = vperm.xlu0 %6207, %v6340_v14   ;;  %v625_v48 = vpop.permute.xlu0 %624 }
  0xa1   : > { %v661_v16 = vadd.f32 %v6497_v47, %v6403_v28 }
  0xa4   : > { %v6501_v49 = vpop.permute.xlu1 %630  ;;  %485 = vperm.xlu1 %6206, %v6325_v11   ;;  %315 = vperm.xlu0 %6207, %v6358_v18   ;;  %v629_v50 = vpop.permute.xlu0 %628 }
  0xa5   : > { %v663_v39 = vadd.f32 %v6501_v49, %v6421_v32 }
  0xa8   : > { %v667_v51 = vpop.permute.xlu1 %666  ;;  %493 = vperm.xlu1 %6206, %v6343_v15   ;;  %325 = vperm.xlu0 %6207, %v6376_v22   ;;  %v665_v52 = vpop.permute.xlu0 %664  ;;  %v658_v15 = vadd.f32 %v621_v46, %v6391_v25  ;;  %v662_v25 = vadd.f32 %v629_v50, %v6427_v33 }
  0xa9   : > { %v713_v57 = vadd.f32 %v667_v51, %v649_v55  ;;  %v712_v3 = vadd.f32 %v665_v52, %v648_v62 }
  0xac   : > { %501 = vperm.xlu1 %6206, %v6361_v19   ;;  %v671_v53 = vpop.permute.xlu1 %670  ;;  %335 = vperm.xlu0 %6207, %v6394_v26   ;;  %v669_v54 = vpop.permute.xlu0 %668  ;;  %v660_v19 = vadd.f32 %v625_v48, %v6409_v29 }
  0xad   : > { %v714_v11 = vadd.f32 %v669_v54, %v650_v6  ;;  %v715_v18 = vadd.f32 %v671_v53, %v651_v7  ;;  %v267_v6 = vld [vmem:[%s230_s25] sm:$0x7] }
  0xb0   : > { %509 = vperm.xlu1 %6206, %v6379_v23   ;;  %345 = vperm.xlu0 %6207, %v6412_v30   ;;  %v673_v56 = vpop.permute.xlu0 %672  ;;  %v675_v58 = vpop.permute.xlu1 %674 }
  0xb1   : > { %v716_v61 = vadd.f32 %v673_v56, %v652_v59  ;;  %v717_v22 = vadd.f32 %v675_v58, %v653_v4 }
  0xb4   : > { %517 = vperm.xlu1 %6206, %v6397_v27   ;;  %759 = vperm.xlu0 %6207, %v713_v57   ;;  %v677_v60 = vpop.permute.xlu0 %676  ;;  %v679_v0 = vpop.permute.xlu1 %678 }
  0xb5   : > { %v718_v5 = vadd.f32 %v677_v60, %v654_v63  ;;  %v719_v27 = vadd.f32 %v679_v0, %v655_v8 }
  0xb8   : > { %525 = vperm.xlu1 %6206, %v6415_v31   ;;  %774 = vperm.xlu0 %6207, %v716_v61   ;;  %v681_v2 = vpop.permute.xlu0 %680  ;;  %v683_v13 = vpop.permute.xlu1 %682 }
  0xb9   : > { %v720_v14 = vadd.f32 %v681_v2, %v656_v9  ;;  %v721_v29 = vadd.f32 %v683_v13, %v657_v12 }
  0xbc   : > { %6208 = vset.pattern.permute.xlu1 %v6234_v1  ;;  %784 = vperm.xlu0 %6207, %v718_v5   ;;  %v685_v10 = vpop.permute.xlu0 %684  ;;  %v687_v21 = vpop.permute.xlu1 %686 }
  0xbd   : > { %754 = vperm.xlu1 %6208, %v712_v3   ;;  %v722_v1 = vadd.f32 %v685_v10, %v658_v15  ;;  %v723_v36 = vadd.f32 %v687_v21, %v659_v34  ;;  %v348_v3 = vlaneseq  ;;  %v728_v10 = vmul.f32 %v267_v6, %v267_v6 }
  0xbf   : > { %v733_v4 = vrot.slane %v728_v10, 2  ;;  %v933_v12 = vand.u32 127, %v348_v3 }
  0xc0   : > { %794 = vperm.xlu0 %6207, %v720_v14   ;;  %v689_v17 = vpop.permute.xlu0 %688  ;;  %v691_v30 = vpop.permute.xlu1 %690  ;;  %v730_v14 = vrot.slane %v728_v10, 1 }
  0xc1   : > { %764 = vperm.xlu1 %6208, %v714_v11   ;;  %v724_v23 = vadd.f32 %v689_v17, %v660_v19  ;;  %v725_v38 = vadd.f32 %v691_v30, %v661_v16  ;;  %v349_v11 = vshrl.u32 %v348_v3, 7 }
  0xc3   : > { %v350_v15 = vsub.s32 0, %v349_v11  ;;  %v434_v17 = vsub.s32 1, %v349_v11 }
  0xc4   : > { %804 = vperm.xlu0 %6207, %v722_v1   ;;  %v693_v26 = vpop.permute.xlu0 %692  ;;  %v695_v35 = vpop.permute.xlu1 %694  ;;  %v732_v1 = vadd.f32 %v730_v14, %v728_v10  ;;  %v6605_v10 = vsub.s32 127, %v933_v12 }
  0xc5   : > { %769 = vperm.xlu1 %6208, %v715_v18   ;;  %v726_v31 = vadd.f32 %v693_v26, %v662_v25  ;;  %v727_v41 = vadd.f32 %v695_v35, %v663_v39  ;;  %v6585_v21 = vrot.slane %v267_v6, %v350_v15  ;;  %v534_v26 = vsub.s32 2, %v349_v11 }
  0xc6   : > { %v735_v8 = vadd.f32 %v733_v4, %v732_v1 }
  0xc7   : > { %11915 = vst [vmem:[#allocation2_spill] sm:$0xff] %v6585_v21 }
  0xc8   : > { %814 = vperm.xlu0 %6207, %v724_v23  }
  0xc9   : > { %779 = vperm.xlu1 %6208, %v717_v22   ;;  %v6587_v22 = vrot.slane %v267_v6, %v434_v17 }
  0xcb   : > { %11916 = vst [vmem:[#allocation3_spill] sm:$0xff] %v6587_v22 }
  0xcc   : > { %824 = vperm.xlu0 %6207, %v726_v31  }
  0xcd   : > { %789 = vperm.xlu1 %6208, %v719_v27  }
  0xd1   : > { %799 = vperm.xlu1 %6208, %v721_v29   ;;  %v6591_v29 = vrot.slane %v267_v6, %v534_v26 }
  0xd3   : > { %11917 = vst [vmem:[#allocation4_spill] sm:$0xff] %v6591_v29 }
  0xd5   : > { %v276_v33 = vpop.permute.xlu1 %275  ;;  %809 = vperm.xlu1 %6208, %v723_v36   ;;  %v374_v37 = vpop.permute.xlu0 %373 }
  0xd6   : > { %v353_v27 = vmul.f32 %v6585_v21, %v276_v33  ;;  %v437_v30 = vmul.f32 %v6587_v22, %v374_v37 }
  0xd8   : > { %v453_v3 = vadd.f32 %v437_v30, %v353_v27 }
  0xd9   : > { %v6537_v20 = vpop.permute.xlu1 %280  ;;  %819 = vperm.xlu1 %6208, %v725_v38   ;;  %v386_v40 = vpop.permute.xlu0 %385  ;;  %v6597_v38 = vrot.slane %v735_v8, %v350_v15 }
  0xda   : > { %v440_v34 = vmul.f32 %v6587_v22, %v386_v40  ;;  %v354_v6 = vmul.f32 %v6585_v21, %v6537_v20 }
  0xdd   : > { %v291_v42 = vpop.permute.xlu1 %290  ;;  %829 = vperm.xlu1 %6208, %v727_v41   ;;  %v394_v24 = vpop.permute.xlu0 %393 }
  0xde   : > { %v356_v35 = vmul.f32 %v6585_v21, %v291_v42  ;;  %v442_v36 = vmul.f32 %v6587_v22, %v394_v24 }
  0xe1   : > { %v301_v43 = vpop.permute.xlu1 %300  ;;  %v6539_v44 = vpop.permute.xlu0 %401 }
  0xe2   : > { %v358_v16 = vmul.f32 %v6585_v21, %v301_v43  ;;  %v444_v24 = vmul.f32 %v6587_v22, %v6539_v44 }
  0xe4   : > { %v458_v11 = vadd.f32 %v442_v36, %v358_v16 }
  0xe5   : > { %v311_v45 = vpop.permute.xlu1 %310  ;;  %v6541_v28 = vpop.permute.xlu0 %409 }
  0xe6   : > { %v360_v39 = vmul.f32 %v6585_v21, %v311_v45  ;;  %v446_v43 = vmul.f32 %v6587_v22, %v6541_v28 }
  0xe8   : > { %v6617_v14 = vadd.f32 %v444_v24, %v360_v39 }
  0xe9   : > { %v321_v46 = vpop.permute.xlu1 %320  ;;  %v6543_v47 = vpop.permute.xlu0 %417 }
  0xea   : > { %v362_v33 = vmul.f32 %v6585_v21, %v321_v46  ;;  %v448_v45 = vmul.f32 %v6587_v22, %v6543_v47 }
  0xec   : > { %v6619_v15 = vadd.f32 %v446_v43, %v362_v33 }
  0xed   : > { %v331_v48 = vpop.permute.xlu1 %330  ;;  %v6545_v50 = vpop.permute.xlu0 %425 }
  0xee   : > { %v364_v37 = vmul.f32 %v6585_v21, %v331_v48  ;;  %v456_v48 = vadd.f32 %v440_v34, %v356_v35  ;;  %v450_v20 = vmul.f32 %v6587_v22, %v6545_v50 }
  0xf0   : > { %v6621_v44 = vadd.f32 %v448_v45, %v364_v37 }
  0xf1   : > { %v341_v32 = vpop.permute.xlu1 %340 }
  0xf2   : > { %v6547_v49 = vpop.permute.xlu0 %469  ;;  %v366_v40 = vmul.f32 %v6585_v21, %v341_v32 }
  0xf4   : > { %v6624_v1 = vadd.f32 %v450_v20, %v366_v40 }
  0xf6   : > { %v6549_v51 = vpop.permute.xlu1 %369  ;;  %v6551_v52 = vpop.permute.xlu0 %481 }
  0xf7   : > { %v436_v47 = vmul.f32 %v6587_v22, %v6549_v51  ;;  %v539_v26 = vmul.f32 %v6591_v29, %v6551_v52 }
  0xfa   : > { %v378_v53 = vpop.permute.xlu1 %377  ;;  %v6553_v54 = vpop.permute.xlu0 %489 }
  0xfb   : > { %v438_v46 = vmul.f32 %v6587_v22, %v378_v53 }
  0xfd   : > { %v454_v8 = vadd.f32 %v438_v46, %v354_v6 }
  0xfe   : > { %v6555_v55 = vpop.permute.xlu1 %381  ;;  %v6557_v56 = vpop.permute.xlu0 %497 }
  0xff   : > { %v439_v27 = vmul.f32 %v6587_v22, %v6555_v55  ;;  %v543_v30 = vmul.f32 %v6591_v29, %v6557_v56 }
 0x102   : > { %v6559_v57 = vpop.permute.xlu1 %389  ;;  %v6561_v58 = vpop.permute.xlu0 %505 }
 0x103   : > { %v441_v51 = vmul.f32 %v6587_v22, %v6559_v57 }
 0x106   : > { %v6563_v59 = vpop.permute.xlu1 %397  ;;  %v6565_v60 = vpop.permute.xlu0 %513 }
 0x107   : > { %v547_v56 = vmul.f32 %v6591_v29, %v6565_v60 }
 0x10a   : > { %v6567_v61 = vpop.permute.xlu1 %405  ;;  %v6569_v62 = vpop.permute.xlu0 %521 }
 0x10e   : > { %v6571_v63 = vpop.permute.xlu1 %413  ;;  %v6573_v0 = vpop.permute.xlu0 %529 }
 0x10f   : > { %v447_v16 = vmul.f32 %v6587_v22, %v6571_v63 }
 0x112   : > { %v6576_v2 = vpop.permute.xlu1 %421 }
 0x113   : > { %v271_v5 = vpop.permute.xlu0 %270  ;;  %v449_v63 = vmul.f32 %v6587_v22, %v6576_v2 }
 0x114   : > { %v352_v32 = vmul.f32 %v6585_v21, %v271_v5  ;;  %v536_v5 = vmul.f32 %v6591_v29, %v6547_v49 }
 0x116   : > { %v6581_v9 = vpop.permute.xlu1 %429 }
 0x117   : > { %v286_v13 = vpop.permute.xlu0 %285 }
 0x118   : > { %v355_v53 = vmul.f32 %v6585_v21, %v286_v13  ;;  %v452_v13 = vadd.f32 %v436_v47, %v352_v32 }
 0x11a   : > { %v455_v35 = vadd.f32 %v439_v27, %v355_v53  ;;  %v552_v33 = vadd.f32 %v536_v5, %v452_v13 }
 0x11b   : > { %v474_v7 = vpop.permute.xlu1 %473  ;;  %v296_v18 = vpop.permute.xlu0 %295 }
 0x11c   : > { %v537_v28 = vmul.f32 %v6591_v29, %v474_v7  ;;  %v357_v50 = vmul.f32 %v6585_v21, %v296_v18  ;;  %v541_v7 = vmul.f32 %v6591_v29, %v6553_v54  ;;  %v443_v54 = vmul.f32 %v6587_v22, %v6563_v59 }
 0x11d   : > { %v549_v59 = vmul.f32 %v6591_v29, %v6569_v62  ;;  %v555_v24 = vadd.f32 %v539_v26, %v455_v35  ;;  %v6664_v62 = vmul.f32 %v6591_v29, %v6573_v0 }
 0x11e   : > { %v553_v49 = vadd.f32 %v537_v28, %v453_v3  ;;  %v457_v55 = vadd.f32 %v441_v51, %v357_v50 }
 0x11f   : > { %v6583_v19 = vpop.permute.xlu1 %477  ;;  %v306_v23 = vpop.permute.xlu0 %305  ;;  %v6672_v5 = vmul.f32 2.0, %v555_v24 }
 0x120   : > { %v359_v18 = vmul.f32 %v6585_v21, %v306_v23  ;;  %v545_v23 = vmul.f32 %v6591_v29, %v6561_v58  ;;  %v737_v60 = vmul.f32 2.0, %v553_v49 }
 0x122   : > { %v459_v39 = vadd.f32 %v443_v54, %v359_v18 }
 0x123   : > { %v486_v25 = vpop.permute.xlu1 %485  ;;  %v316_v31 = vpop.permute.xlu0 %315 }
 0x124   : > { %v540_v12 = vmul.f32 %v6591_v29, %v486_v25  ;;  %v361_v52 = vmul.f32 %v6585_v21, %v316_v31  ;;  %v445_v25 = vmul.f32 %v6587_v22, %v6567_v61  ;;  %v538_v31 = vmul.f32 %v6591_v29, %v6583_v19 }
 0x125   : > { %v557_v19 = vadd.f32 %v541_v7, %v457_v55  ;;  %v559_v20 = vadd.f32 %v543_v30, %v459_v39 }
 0x126   : > { %v556_v37 = vadd.f32 %v540_v12, %v456_v48  ;;  %v461_v3 = vadd.f32 %v445_v25, %v361_v52  ;;  %v554_v43 = vadd.f32 %v538_v31, %v454_v8  ;;  %v736_v48 = vmul.f32 2.0, %v552_v33 }
 0x127   : > { %v494_v41 = vpop.permute.xlu1 %493  ;;  %v326_v42 = vpop.permute.xlu0 %325  ;;  %v6674_v2 = vmul.f32 2.0, %v557_v19  ;;  %v6679_v51 = vmul.f32 2.0, %v559_v20 }
 0x128   : > { %v363_v36 = vmul.f32 %v6585_v21, %v326_v42  ;;  %v542_v58 = vmul.f32 %v6591_v29, %v494_v41  ;;  %v451_v41 = vmul.f32 %v6587_v22, %v6581_v9  ;;  %v740_v53 = vmul.f32 2.0, %v556_v37 }
 0x129   : > { %v561_v50 = vadd.f32 %v545_v23, %v461_v3  ;;  %v738_v7 = vmul.f32 2.0, %v554_v43 }
 0x12a   : > { %v463_v40 = vadd.f32 %v447_v16, %v363_v36  ;;  %v558_v32 = vadd.f32 %v542_v58, %v458_v11 }
 0x12b   : > { %v502_v17 = vpop.permute.xlu1 %501  ;;  %v336_v4 = vpop.permute.xlu0 %335  ;;  %v6682_v49 = vmul.f32 2.0, %v561_v50 }
 0x12c   : > { %v365_v61 = vmul.f32 %v6585_v21, %v336_v4  ;;  %v544_v46 = vmul.f32 %v6591_v29, %v502_v17  ;;  %v563_v26 = vadd.f32 %v547_v56, %v463_v40  ;;  %v742_v30 = vmul.f32 2.0, %v558_v32 }
 0x12e   : > { %v465_v0 = vadd.f32 %v449_v63, %v365_v61  ;;  %v560_v17 = vadd.f32 %v544_v46, %v6617_v14  ;;  %v6685_v55 = vmul.f32 2.0, %v563_v26 }
 0x12f   : > { %v510_v34 = vpop.permute.xlu1 %509  ;;  %v346_v57 = vpop.permute.xlu0 %345 }
 0x130   : > { %v546_v11 = vmul.f32 %v6591_v29, %v510_v34  ;;  %v367_v27 = vmul.f32 %v6585_v21, %v346_v57  ;;  %v565_v14 = vadd.f32 %v549_v59, %v465_v0  ;;  %v744_v31 = vmul.f32 2.0, %v560_v17 }
 0x132   : > { %v562_v23 = vadd.f32 %v546_v11, %v6619_v15  ;;  %v6688_v56 = vadd.f32 %v451_v41, %v367_v27 }
 0x133   : > { %v518_v6 = vpop.permute.xlu1 %517  ;;  %v760_v42 = vpop.permute.xlu0 %759 }
 0x134   : > { %v833_v45 = vsub.f32 %v737_v60, %v760_v42  ;;  %v548_v12 = vmul.f32 %v6591_v29, %v518_v6  ;;  %v6698_v60 = vmul.f32 2.0, %v565_v14  ;;  %v746_v41 = vmul.f32 2.0, %v562_v23 }
 0x136   : > { %v853_v28 = vsub.f32 %v833_v45, %v6597_v38  ;;  %v564_v59 = vadd.f32 %v548_v12, %v6621_v44 }
 0x137   : > { %v526_v47 = vpop.permute.xlu1 %525  ;;  %v775_v4 = vpop.permute.xlu0 %774 }
 0x138   : > { %vm885_vm0 = vcmp.ge.s32.totalorder %v853_v28, 0  ;;  %v901_v8 = vxor.u32 2147483647, %v853_v28  ;;  %v836_v9 = vsub.f32 %v740_v53, %v775_v4  ;;  %v550_v16 = vmul.f32 %v6591_v29, %v526_v47 }
 0x139   : > { %v748_v4 = vmul.f32 2.0, %v564_v59 }
 0x13a   : > { %v917_v13 = vsel %vm885_vm0, %v853_v28, %v901_v8  ;;  %v856_v18 = vsub.f32 %v836_v9, %v6597_v38  ;;  %v566_v44 = vadd.f32 %v550_v16, %v6624_v1 }
 0x13b   : > { %v935_v52 = vand.u32 4294967168, %v917_v13  ;;  %v785_v54 = vpop.permute.xlu0 %784 }
 0x13c   : > { %v755_v35 = vpop.permute.xlu1 %754  ;;  %vm888_vm1 = vcmp.ge.s32.totalorder %v856_v18, 0  ;;  %v904_v34 = vxor.u32 2147483647, %v856_v18  ;;  %v838_v36 = vsub.f32 %v742_v30, %v785_v54 }
 0x13d   : > { %v832_v57 = vsub.f32 %v736_v48, %v755_v35  ;;  %v6691_v25 = vor.u32 %v6605_v10, %v935_v52 }
 0x13e   : > { %v920_v39 = vsel %vm888_vm1, %v856_v18, %v904_v34  ;;  %v858_v33 = vsub.f32 %v838_v36, %v6597_v38  ;;  %v750_v18 = vmul.f32 2.0, %v566_v44 }
 0x13f   : > { %v852_v37 = vsub.f32 %v832_v57, %v6597_v38  ;;  %v938_v3 = vand.u32 4294967168, %v920_v39  ;;  %v795_v58 = vpop.permute.xlu0 %794  ;;  %v982_v15 = vshra.s32 %v6691_v25, 16 }
 0x140   : > { %v765_v6 = vpop.permute.xlu1 %764  ;;  %vm890_vm2 = vcmp.ge.s32.totalorder %v858_v33, 0  ;;  %v906_v40 = vxor.u32 2147483647, %v858_v33  ;;  %v840_v24 = vsub.f32 %v744_v31, %v795_v58 }
 0x141   : > { %vm884_vm3 = vcmp.ge.s32.totalorder %v852_v37, 0  ;;  %v900_v61 = vxor.u32 2147483647, %v852_v37  ;;  %v6701_v42 = vor.u32 %v6605_v10, %v938_v3  ;;  %v834_v19 = vsub.f32 %v738_v7, %v765_v6 }
 0x142   : > { %v6703_v63 = vcvt.s32.f32 %v982_v15  ;;  %v922_v43 = vsel %vm890_vm2, %v858_v33, %v906_v40  ;;  %v860_v20 = vsub.f32 %v840_v24, %v6597_v38 }
 0x143   : > { %v916_v45 = vsel %vm884_vm3, %v852_v37, %v900_v61  ;;  %v940_v46 = vand.u32 4294967168, %v922_v43  ;;  %v854_v32 = vsub.f32 %v834_v19, %v6597_v38  ;;  %v805_v28 = vpop.permute.xlu0 %804  ;;  %v1024_v0 = vshra.s32 %v6701_v42, 16 }
 0x144   : > { %v934_v48 = vand.u32 4294967168, %v916_v45  ;;  %985 = vmax.xlane.f32.xlu1 %v6703_v63  ;;  %v770_v47 = vpop.permute.xlu1 %769  ;;  %v842_v53 = vsub.f32 %v746_v41, %v805_v28  ;;  %vm892_vm4 = vcmp.ge.s32.totalorder %v860_v20, 0  ;;  %v908_v26 = vxor.u32 2147483647, %v860_v20 }
 0x145   : > { %v835_v50 = vsub.f32 %v6672_v5, %v770_v47  ;;  %v6712_v1 = vor.u32 %v6605_v10, %v940_v46  ;;  %vm886_vm5 = vcmp.ge.s32.totalorder %v854_v32, 0  ;;  %v902_v8 = vxor.u32 2147483647, %v854_v32 }
 0x146   : > { %v862_v9 = vsub.f32 %v842_v53, %v6597_v38  ;;  %v6716_v17 = vcvt.s32.f32 %v1024_v0  ;;  %v924_v11 = vsel %vm892_vm4, %v860_v20, %v908_v26  ;;  %v6720_v30 = vor.u32 %v6605_v10, %v934_v48 }
 0x147   : > { %v855_v7 = vsub.f32 %v835_v50, %v6597_v38  ;;  %v815_v27 = vpop.permute.xlu0 %814  ;;  %v1052_v5 = vshra.s32 %v6712_v1, 16  ;;  %v942_v12 = vand.u32 4294967168, %v924_v11  ;;  %v918_v52 = vsel %vm886_vm5, %v854_v32, %v902_v8 }
 0x148   : > { %v780_v13 = vpop.permute.xlu1 %779  ;;  %vm894_vm6 = vcmp.ge.s32.totalorder %v862_v9, 0  ;;  %v910_v54 = vxor.u32 2147483647, %v862_v9  ;;  %1027 = vmax.xlane.f32.xlu1 %v6716_v17  ;;  %v936_v35 = vand.u32 4294967168, %v918_v52  ;;  %v844_v34 = vsub.f32 %v748_v4, %v815_v27 }
 0x149   : > { %vm887_vm7 = vcmp.ge.s32.totalorder %v855_v7, 0  ;;  %v903_v14 = vxor.u32 2147483647, %v855_v7  ;;  %v6724_v36 = vor.u32 %v6605_v10, %v942_v12  ;;  %v837_v23 = vsub.f32 %v6674_v2, %v780_v13 }
 0x14a   : > { %v926_v57 = vsel %vm894_vm6, %v862_v9, %v910_v54  ;;  %v6727_v31 = vcvt.s32.f32 %v1052_v5  ;;  %v864_v33 = vsub.f32 %v844_v34, %v6597_v38  ;;  %v968_v3 = vshra.s32 %v6720_v30, 16 }
 0x14b   : > { %v944_v16 = vand.u32 4294967168, %v926_v57  ;;  %v919_v39 = vsel %vm887_vm7, %v855_v7, %v903_v14  ;;  %v825_v37 = vpop.permute.xlu0 %824  ;;  %v857_v6 = vsub.f32 %v837_v23, %v6597_v38  ;;  %v1080_v41 = vshra.s32 %v6724_v36, 16 }
 0x14c   : > { %v790_v59 = vpop.permute.xlu1 %789  ;;  %v937_v58 = vand.u32 4294967168, %v919_v39  ;;  %1055 = vmax.xlane.f32.xlu1 %v6727_v31  ;;  %v846_v15 = vsub.f32 %v750_v18, %v825_v37  ;;  %vm896_vm8 = vcmp.ge.s32.totalorder %v864_v33, 0  ;;  %v912_v61 = vxor.u32 2147483647, %v864_v33 }
 0x14d   : > { %v839_v40 = vsub.f32 %v6679_v51, %v790_v59  ;;  %v6735_v2 = vor.u32 %v6605_v10, %v944_v16  ;;  %v6737_v24 = vcvt.s32.f32 %v968_v3  ;;  %vm889_vm9 = vcmp.ge.s32.totalorder %v857_v6, 0 }
 0x14e   : > { %v905_v19 = vxor.u32 2147483647, %v857_v6  ;;  %v866_v44 = vsub.f32 %v846_v15, %v6597_v38  ;;  %v928_v45 = vsel %vm896_vm8, %v864_v33, %v912_v61  ;;  %v6744_v51 = vor.u32 %v6605_v10, %v936_v35 }
 0x14f   : > { %v859_v43 = vsub.f32 %v839_v40, %v6597_v38  ;;  %971 = vmax.xlane.f32.xlu0 %v6737_v24  ;;  %v1108_v48 = vshra.s32 %v6735_v2, 16  ;;  %v946_v20 = vand.u32 4294967168, %v928_v45  ;;  %v6747_v50 = vcvt.s32.f32 %v1080_v41 }
 0x150   : > { %v800_v46 = vpop.permute.xlu1 %799  ;;  %v921_v32 = vsel %vm889_vm9, %v857_v6, %v905_v19  ;;  %vm898_vm10 = vcmp.ge.s32.totalorder %v866_v44, 0  ;;  %v914_v28 = vxor.u32 2147483647, %v866_v44  ;;  %v996_v8 = vshra.s32 %v6744_v51, 16 }
 0x151   : > { %v939_v47 = vand.u32 4294967168, %v921_v32  ;;  %vm891_vm11 = vcmp.ge.s32.totalorder %v859_v43, 0  ;;  %v907_v53 = vxor.u32 2147483647, %v859_v43  ;;  %v6750_v0 = vor.u32 %v6605_v10, %v946_v20  ;;  %1083 = vmax.xlane.f32.xlu1 %v6747_v50 }
 0x152   : > { %v930_v4 = vsel %vm898_vm10, %v866_v44, %v914_v28  ;;  %v841_v26 = vsub.f32 %v6682_v49, %v800_v46  ;;  %v6758_v27 = vcvt.s32.f32 %v1108_v48  ;;  %v6761_v12 = vcvt.s32.f32 %v996_v8 }
 0x153   : > { %v6755_v9 = vor.u32 %v6605_v10, %v939_v47  ;;  %v948_v7 = vand.u32 4294967168, %v930_v4  ;;  %v923_v11 = vsel %vm891_vm11, %v859_v43, %v907_v53  ;;  %v6768_v54 = vor.u32 %v6605_v10, %v937_v58 }
 0x154   : > { %v810_v13 = vpop.permute.xlu1 %809  ;;  %v941_v5 = vand.u32 4294967168, %v923_v11  ;;  %v861_v18 = vsub.f32 %v841_v26, %v6597_v38  ;;  %v1136_v35 = vshra.s32 %v6750_v0, 16  ;;  %v567_v14 = vadd.f32 %v6664_v62, %v6688_v56  ;;  %999 = vmax.xlane.f32.xlu0 %v6761_v12 }
 0x155   : > { %v843_v52 = vsub.f32 %v6685_v55, %v810_v13  ;;  %v6765_v49 = vor.u32 %v6605_v10, %v948_v7  ;;  %v1038_v23 = vshra.s32 %v6755_v9, 16  ;;  %1111 = vmax.xlane.f32.xlu1 %v6758_v27  ;;  %v1010_v16 = vshra.s32 %v6768_v54, 16 }
 0x156   : > { %vm893_vm12 = vcmp.ge.s32.totalorder %v861_v18, 0  ;;  %v909_v34 = vxor.u32 2147483647, %v861_v18  ;;  %v6777_v55 = vor.u32 %v6605_v10, %v941_v5  ;;  %v6781_v39 = vcvt.s32.f32 %v1136_v35 }
 0x157   : > { %v863_v57 = vsub.f32 %v843_v52, %v6597_v38  ;;  %v1164_v62 = vshra.s32 %v6765_v49, 16  ;;  %v6785_v58 = vcvt.s32.f32 %v1010_v16  ;;  %v6788_v40 = vcvt.s32.f32 %v1038_v23 }
 0x158   : > { %v820_v33 = vpop.permute.xlu1 %819  ;;  %v925_v56 = vsel %vm893_vm12, %v861_v18, %v909_v34  ;;  %v751_v61 = vmul.f32 2.0, %v567_v14  ;;  %v1066_v45 = vshra.s32 %v6777_v55, 16  ;;  %v967_v16 = vand.u32 65535, %v6720_v30 }
 0x159   : > { %vm895_vm13 = vcmp.ge.s32.totalorder %v863_v57, 0  ;;  %v911_v37 = vxor.u32 2147483647, %v863_v57  ;;  %v845_v59 = vsub.f32 %v6698_v60, %v820_v33  ;;  %v943_v3 = vand.u32 4294967168, %v925_v56  ;;  %1013 = vmax.xlane.f32.xlu0 %v6785_v58  ;;  %1139 = vmax.xlane.f32.xlu1 %v6781_v39 }
 0x15a   : > { %v6795_v43 = vcvt.s32.f32 %v1164_v62  ;;  %v6804_v47 = vcvt.s32.f32 %v1066_v45  ;;  %v969_v56 = vcvt.s32.f32 %v967_v16  ;;  %v1051_v45 = vand.u32 65535, %v6712_v1 }
 0x15b   : > { %v927_v6 = vsel %vm895_vm13, %v863_v57, %v911_v37  ;;  %v865_v15 = vsub.f32 %v845_v59, %v6597_v38  ;;  %v6791_v19 = vor.u32 %v6605_v10, %v943_v3  ;;  %v995_v3 = vand.u32 65535, %v6744_v51 }
 0x15c   : > { %v945_v44 = vand.u32 4294967168, %v927_v6  ;;  %v830_v60 = vpop.permute.xlu1 %829 }
 0x15d   : > { %vm897_vm14 = vcmp.ge.s32.totalorder %v865_v15, 0  ;;  %v913_v41 = vxor.u32 2147483647, %v865_v15  ;;  %v847_v46 = vsub.f32 %v751_v61, %v830_v60  ;;  %1041 = vmax.xlane.f32.xlu0 %v6788_v40  ;;  %1167 = vmax.xlane.f32.xlu1 %v6795_v43  ;;  %v1094_v53 = vshra.s32 %v6791_v19, 16 }
 0x15e   : > { %v6800_v32 = vor.u32 %v6605_v10, %v945_v44  ;;  %v1009_v61 = vand.u32 65535, %v6768_v54 }
 0x15f   : > { %v929_v48 = vsel %vm897_vm14, %v865_v15, %v913_v41  ;;  %v867_v20 = vsub.f32 %v847_v46, %v6597_v38  ;;  %v6811_v38 = vcvt.s32.f32 %v1094_v53  ;;  %v1023_v15 = vand.u32 65535, %v6701_v42 }
 0x160   : > { %v947_v28 = vand.u32 4294967168, %v929_v48  ;;  %v1122_v11 = vshra.s32 %v6800_v32, 16  ;;  %v1011_v46 = vcvt.s32.f32 %v1009_v61  ;;  %v1037_v48 = vand.u32 65535, %v6755_v9 }
 0x161   : > { %vm899_vm15 = vcmp.ge.s32.totalorder %v867_v20, 0  ;;  %v915_v4 = vxor.u32 2147483647, %v867_v20  ;;  %1069 = vmax.xlane.f32.xlu0 %v6804_v47  ;;  %v1079_v53 = vand.u32 65535, %v6724_v36 }
 0x162   : > { %v6808_v8 = vor.u32 %v6605_v10, %v947_v28  ;;  %v6818_v5 = vcvt.s32.f32 %v1122_v11 }
 0x163   : > { %v931_v26 = vsel %vm899_vm15, %v867_v20, %v915_v4 }
 0x164   : > { %v949_v7 = vand.u32 4294967168, %v931_v26  ;;  %v1150_v18 = vshra.s32 %v6808_v8, 16  ;;  %v1039_v26 = vcvt.s32.f32 %v1037_v48 }
 0x165   : > { %1097 = vmax.xlane.f32.xlu0 %v6811_v38 }
 0x166   : > { %v6815_v13 = vor.u32 %v6605_v10, %v949_v7  ;;  %v6822_v52 = vcvt.s32.f32 %v1150_v18  ;;  %v981_v10 = vand.u32 65535, %v6691_v25  ;;  %v1065_v7 = vand.u32 65535, %v6777_v55 }
 0x167   : > { %v1107_v18 = vand.u32 65535, %v6735_v2 }
 0x168   : > { %v1178_v35 = vshra.s32 %v6815_v13, 16  ;;  %v983_v57 = vcvt.s32.f32 %v981_v10  ;;  %v1067_v10 = vcvt.s32.f32 %v1065_v7 }
 0x169   : > { %1125 = vmax.xlane.f32.xlu0 %v6818_v5 }
 0x16a   : > { %v6826_v14 = vcvt.s32.f32 %v1178_v35 }
 0x16d   : > { %1153 = vmax.xlane.f32.xlu0 %v6822_v52 }
 0x171   : > { %1181 = vmax.xlane.f32.xlu0 %v6826_v14 }
 0x1d1   : > { %v6830_v34 = vpop.xlane.xlu1 %985 }
 0x1d2   : > { %vm987_vm0 = vcmp.eq.f32.partialorder %v6703_v63, %v6830_v34  ;;  %v997_v63 = vcvt.s32.f32 %v995_v3 }
 0x1d3   : > { %v988_v23 = vsel %vm987_vm0, %v983_v57, -inf  ;;  %v1093_v57 = vand.u32 65535, %v6791_v19 }
 0x1d4   : > { %989 = vmax.xlane.f32.xlu0 %v988_v23 }
 0x1d5   : > { %v6835_v33 = vpop.xlane.xlu1 %1027  ;;  %v1095_v3 = vcvt.s32.f32 %v1093_v57 }
 0x1d6   : > { %vm1029_vm3 = vcmp.eq.f32.partialorder %v6716_v17, %v6835_v33  ;;  %v1053_v17 = vcvt.s32.f32 %v1051_v45 }
 0x1d9   : > { %v6841_v59 = vpop.xlane.xlu1 %1055 }
 0x1da   : > { %vm1057_vm5 = vcmp.eq.f32.partialorder %v6727_v31, %v6841_v59  ;;  %v1081_v31 = vcvt.s32.f32 %v1079_v53 }
 0x1db   : > { %v1058_v11 = vsel %vm1057_vm5, %v1053_v17, -inf  ;;  %v1177_v17 = vand.u32 65535, %v6815_v13 }
 0x1dc   : > { %v6837_v62 = vpop.xlane.xlu0 %971 }
 0x1dd   : > { %vm973_vm1 = vcmp.eq.f32.partialorder %v6737_v24, %v6837_v62  ;;  %v1025_v24 = vcvt.s32.f32 %v1023_v15  ;;  %v1179_v7 = vcvt.s32.f32 %v1177_v17 }
 0x1de   : > { %v974_v37 = vsel %vm973_vm1, %v969_v56, -inf  ;;  %v6850_v44 = vpop.xlane.xlu1 %1083  ;;  %v1135_v56 = vand.u32 65535, %v6750_v0 }
 0x1df   : > { %975 = vmax.xlane.f32.xlu1 %v974_v37  ;;  %v1030_v20 = vsel %vm1029_vm3, %v1025_v24, -inf  ;;  %vm1085_vm7 = vcmp.eq.f32.partialorder %v6747_v50, %v6850_v44  ;;  %v1109_v50 = vcvt.s32.f32 %v1107_v18 }
 0x1e0   : > { %v1086_v16 = vsel %vm1085_vm7, %v1081_v31, -inf }
 0x1e1   : > { %v6844_v6 = vpop.xlane.xlu0 %999 }
 0x1e2   : > { %vm1001_vm2 = vcmp.eq.f32.partialorder %v6761_v12, %v6844_v6  ;;  %v6862_v28 = vpop.xlane.xlu1 %1111 }
 0x1e3   : > { %v1002_v60 = vsel %vm1001_vm2, %v997_v63, -inf  ;;  %vm1113_vm9 = vcmp.eq.f32.partialorder %v6758_v27, %v6862_v28  ;;  %v1121_v63 = vand.u32 65535, %v6800_v32  ;;  %v1137_v27 = vcvt.s32.f32 %v1135_v56 }
 0x1e4   : > { %1003 = vmax.xlane.f32.xlu1 %v1002_v60  ;;  %v1114_v15 = vsel %vm1113_vm9, %v1109_v50, -inf  ;;  %v1163_v60 = vand.u32 65535, %v6765_v49 }
 0x1e5   : > { %v1123_v45 = vcvt.s32.f32 %v1121_v63 }
 0x1e6   : > { %v6855_v41 = vpop.xlane.xlu0 %1013  ;;  %v6876_v23 = vpop.xlane.xlu1 %1139 }
 0x1e7   : > { %vm1015_vm4 = vcmp.eq.f32.partialorder %v6785_v58, %v6855_v41  ;;  %vm1141_vm11 = vcmp.eq.f32.partialorder %v6781_v39, %v6876_v23  ;;  %v1165_v39 = vcvt.s32.f32 %v1163_v60  ;;  %v1020_v60 = vcvt.f32.s32 %v6855_v41 }
 0x1e8   : > { %1031 = vmax.xlane.f32.xlu1 %v1030_v20  ;;  %v1016_v12 = vsel %vm1015_vm4, %v1011_v46, -inf  ;;  %v1149_v46 = vand.u32 65535, %v6808_v8  ;;  %v1142_v48 = vsel %vm1141_vm11, %v1137_v27, -inf }
 0x1e9   : > { %1017 = vmax.xlane.f32.xlu0 %v1016_v12 }
 0x1ea   : > { %v6865_v4 = vpop.xlane.xlu0 %1041  ;;  %v6890_v61 = vpop.xlane.xlu1 %1167  ;;  %v1151_v12 = vcvt.s32.f32 %v1149_v46 }
 0x1eb   : > { %vm1043_vm6 = vcmp.eq.f32.partialorder %v6788_v40, %v6865_v4  ;;  %vm1169_vm13 = vcmp.eq.f32.partialorder %v6795_v43, %v6890_v61 }
 0x1ec   : > { %1059 = vmax.xlane.f32.xlu1 %v1058_v11  ;;  %v1044_v58 = vsel %vm1043_vm6, %v1039_v26, -inf  ;;  %v1170_v53 = vsel %vm1169_vm13, %v1165_v39, -inf  ;;  %v992_v11 = vcvt.f32.s32 %v6830_v34 }
 0x1ed   : > { %1045 = vmax.xlane.f32.xlu0 %v1044_v58 }
 0x1ee   : > { %v6873_v35 = vpop.xlane.xlu0 %1069  ;;  %v993_v31 = vshll.u32 %v992_v11, 16 }
 0x1ef   : > { %vm1071_vm8 = vcmp.eq.f32.partialorder %v6804_v47, %v6873_v35 }
 0x1f0   : > { %1087 = vmax.xlane.f32.xlu1 %v1086_v16  ;;  %v1072_v40 = vsel %vm1071_vm8, %v1067_v10, -inf  ;;  %v978_v16 = vcvt.f32.s32 %v6837_v62 }
 0x1f1   : > { %1073 = vmax.xlane.f32.xlu0 %v1072_v40 }
 0x1f2   : > { %v6883_v37 = vpop.xlane.xlu0 %1097  ;;  %v979_v40 = vshll.u32 %v978_v16, 16 }
 0x1f3   : > { %vm1099_vm10 = vcmp.eq.f32.partialorder %v6811_v38, %v6883_v37 }
 0x1f4   : > { %1115 = vmax.xlane.f32.xlu1 %v1114_v15  ;;  %v1100_v47 = vsel %vm1099_vm10, %v1095_v3, -inf  ;;  %v1006_v3 = vcvt.f32.s32 %v6844_v6  ;;  %v1034_v15 = vcvt.f32.s32 %v6835_v33  ;;  %v1062_v6 = vcvt.f32.s32 %v6841_v59 }
 0x1f5   : > { %1101 = vmax.xlane.f32.xlu0 %v1100_v47 }
 0x1f6   : > { %v6893_v24 = vpop.xlane.xlu0 %1125  ;;  %v1007_v47 = vshll.u32 %v1006_v3, 16  ;;  %v1118_v3 = vcvt.f32.s32 %v6862_v28 }
 0x1f7   : > { %vm1127_vm12 = vcmp.eq.f32.partialorder %v6818_v5, %v6893_v24 }
 0x1f8   : > { %1143 = vmax.xlane.f32.xlu1 %v1142_v48  ;;  %v1128_v38 = vsel %vm1127_vm12, %v1123_v45, -inf }
 0x1f9   : > { %1129 = vmax.xlane.f32.xlu0 %v1128_v38  ;;  %v1048_v38 = vcvt.f32.s32 %v6865_v4 }
 0x1fa   : > { %v6900_v20 = vpop.xlane.xlu0 %1153 }
 0x1fb   : > { %vm1155_vm14 = vcmp.eq.f32.partialorder %v6822_v52, %v6900_v20  ;;  %v1049_v11 = vshll.u32 %v1048_v38, 16 }
 0x1fc   : > { %1171 = vmax.xlane.f32.xlu1 %v1170_v53  ;;  %v1156_v26 = vsel %vm1155_vm14, %v1151_v12, -inf  ;;  %v1021_v12 = vshll.u32 %v1020_v60, 16 }
 0x1fd   : > { %1157 = vmax.xlane.f32.xlu0 %v1156_v26  ;;  %v1063_v26 = vshll.u32 %v1062_v6, 16  ;;  %v1146_v6 = vcvt.f32.s32 %v6876_v23 }
 0x1fe   : > { %v6905_v5 = vpop.xlane.xlu0 %1181 }
 0x1ff   : > { %vm1183_vm15 = vcmp.eq.f32.partialorder %v6826_v14, %v6905_v5 }
 0x200   : > { %v1184_v43 = vsel %vm1183_vm15, %v1179_v7, -inf  ;;  %v1090_v7 = vcvt.f32.s32 %v6850_v44 }
 0x201   : > { %1185 = vmax.xlane.f32.xlu0 %v1184_v43 }
 0x261   : > { %v990_v58 = vpop.xlane.xlu0 %989 }
 0x262   : > { %v991_v18 = vcvt.f32.s32 %v990_v58 }
 0x264   : > { %v6910_v10 = vadd.s32 %v993_v31, %v991_v18 }
 0x266   : > { %vm1224_vm0 = vcmp.eq.s32.totalorder %v6691_v25, %v6910_v10 }
 0x267   : > { %v6915_v52 = vsel %vm1224_vm0, 2147483648, %v6691_v25 }
 0x268   : > { %11918 = vst [vmem:[#allocation5_spill] sm:$0xff] %v6915_v52  ;;  %v1270_v57 = vshra.s32 %v6915_v52, 16 }
 0x26a   : > { %v6919_v14 = vcvt.s32.f32 %v1270_v57 }
 0x26c   : > { %1273 = vmax.xlane.f32.xlu0 %v6919_v14  ;;  %v976_v34 = vpop.xlane.xlu1 %975 }
 0x26d   : > { %v977_v50 = vcvt.f32.s32 %v976_v34 }
 0x26f   : > { %v6922_v56 = vadd.s32 %v979_v40, %v977_v50  ;;  %v1091_v50 = vshll.u32 %v1090_v7, 16 }
 0x271   : > { %vm1223_vm1 = vcmp.eq.s32.totalorder %v6720_v30, %v6922_v56  ;;  %v1004_v63 = vpop.xlane.xlu1 %1003 }
 0x272   : > { %v6928_v25 = vsel %vm1223_vm1, 2147483648, %v6720_v30  ;;  %v1005_v27 = vcvt.f32.s32 %v1004_v63  ;;  %v1035_v30 = vshll.u32 %v1034_v15, 16 }
 0x273   : > { %11919 = vst [vmem:[#allocation6_spill] sm:$0xff] %v6928_v25  ;;  %v1256_v62 = vshra.s32 %v6928_v25, 16 }
 0x274   : > { %v6935_v46 = vadd.s32 %v1007_v47, %v1005_v27 }
 0x275   : > { %v6933_v45 = vcvt.s32.f32 %v1256_v62  ;;  %v1032_v48 = vpop.xlane.xlu1 %1031  ;;  %v1104_v62 = vcvt.f32.s32 %v6883_v37 }
 0x276   : > { %vm1225_vm2 = vcmp.eq.s32.totalorder %v6744_v51, %v6935_v46  ;;  %v1033_v33 = vcvt.f32.s32 %v1032_v48  ;;  %v1018_v39 = vpop.xlane.xlu0 %1017 }
 0x277   : > { %1259 = vmax.xlane.f32.xlu1 %v6933_v45  ;;  %v6943_v41 = vsel %vm1225_vm2, 2147483648, %v6744_v51  ;;  %v1019_v17 = vcvt.f32.s32 %v1018_v39  ;;  %v1076_v51 = vcvt.f32.s32 %v6873_v35 }
 0x278   : > { %11920 = vst [vmem:[#allocation7_spill] sm:$0xff] %v6943_v41  ;;  %v6945_v53 = vadd.s32 %v1035_v30, %v1033_v33  ;;  %v1284_v59 = vshra.s32 %v6943_v41, 16 }
 0x279   : > { %v6949_v43 = vadd.s32 %v1021_v12, %v1019_v17  ;;  %v1060_v4 = vpop.xlane.xlu1 %1059  ;;  %v1077_v27 = vshll.u32 %v1076_v51, 16  ;;  %v1119_v12 = vshll.u32 %v1118_v3, 16  ;;  %v1105_v17 = vshll.u32 %v1104_v62, 16 }
 0x27a   : > { %vm1227_vm3 = vcmp.eq.s32.totalorder %v6701_v42, %v6945_v53  ;;  %v1061_v58 = vcvt.f32.s32 %v1060_v4  ;;  %v1046_v31 = vpop.xlane.xlu0 %1045  ;;  %v6953_v18 = vcvt.s32.f32 %v1284_v59  ;;  %v1132_v59 = vcvt.f32.s32 %v6893_v24 }
 0x27b   : > { %v6957_v57 = vsel %vm1227_vm3, 2147483648, %v6701_v42  ;;  %vm1226_vm4 = vcmp.eq.s32.totalorder %v6768_v54, %v6949_v43  ;;  %v1047_v44 = vcvt.f32.s32 %v1046_v31  ;;  %v1147_v4 = vshll.u32 %v1146_v6, 16 }
 0x27c   : > { %11921 = vst [vmem:[#allocation8_spill] sm:$0xff] %v6957_v57  ;;  %v6962_v16 = vsel %vm1226_vm4, 2147483648, %v6768_v54  ;;  %v6964_v34 = vadd.s32 %v1063_v26, %v1061_v58  ;;  %1287 = vmax.xlane.f32.xlu1 %v6953_v18  ;;  %v1312_v40 = vshra.s32 %v6957_v57, 16  ;;  %v1174_v51 = vcvt.f32.s32 %v6890_v61 }
 0x27d   : > { %11922 = vst [vmem:[#allocation9_spill] sm:$0xff] %v6962_v16  ;;  %v6969_v35 = vadd.s32 %v1049_v11, %v1047_v44  ;;  %v1088_v42 = vpop.xlane.xlu1 %1087  ;;  %v1298_v63 = vshra.s32 %v6962_v16, 16 }
 0x27e   : > { %vm1229_vm5 = vcmp.eq.s32.totalorder %v6712_v1, %v6964_v34  ;;  %v1089_v54 = vcvt.f32.s32 %v1088_v42  ;;  %v1074_v15 = vpop.xlane.xlu0 %1073  ;;  %v6975_v47 = vcvt.s32.f32 %v1312_v40 }
 0x27f   : > { %v6978_v60 = vsel %vm1229_vm5, 2147483648, %v6712_v1  ;;  %vm1228_vm6 = vcmp.eq.s32.totalorder %v6755_v9, %v6969_v35  ;;  %v1075_v28 = vcvt.f32.s32 %v1074_v15  ;;  %v6989_v30 = vcvt.s32.f32 %v1298_v63 }
 0x280   : > { %11923 = vst [vmem:[#allocation10_spill] sm:$0xff] %v6978_v60  ;;  %v6984_v48 = vsel %vm1228_vm6, 2147483648, %v6755_v9  ;;  %v6986_v37 = vadd.s32 %v1091_v50, %v1089_v54  ;;  %1315 = vmax.xlane.f32.xlu1 %v6975_v47  ;;  %v1340_v1 = vshra.s32 %v6978_v60, 16  ;;  %v1160_v50 = vcvt.f32.s32 %v6900_v20 }
 0x281   : > { %11924 = vst [vmem:[#allocation11_spill] sm:$0xff] %v6984_v48  ;;  %v6991_v38 = vadd.s32 %v1077_v27, %v1075_v28  ;;  %v1116_v33 = vpop.xlane.xlu1 %1115  ;;  %v1326_v39 = vshra.s32 %v6984_v48, 16  ;;  %1301 = vmax.xlane.f32.xlu0 %v6989_v30  ;;  %v1133_v63 = vshll.u32 %v1132_v59, 16  ;;  %v1175_v27 = vshll.u32 %v1174_v51, 16 }
 0x282   : > { %vm1231_vm7 = vcmp.eq.s32.totalorder %v6724_v36, %v6986_v37  ;;  %v1117_v9 = vcvt.f32.s32 %v1116_v33  ;;  %v1102_v23 = vpop.xlane.xlu0 %1101  ;;  %v7009_v31 = vcvt.s32.f32 %v1340_v1  ;;  %v1161_v1 = vshll.u32 %v1160_v50, 16 }
 0x283   : > { %v7000_v26 = vsel %vm1231_vm7, 2147483648, %v6724_v36  ;;  %vm1230_vm8 = vcmp.eq.s32.totalorder %v6777_v55, %v6991_v38  ;;  %v1103_v7 = vcvt.f32.s32 %v1102_v23  ;;  %v7014_v24 = vcvt.s32.f32 %v1326_v39 }
 0x284   : > { %11925 = vst [vmem:[#allocation12_spill] sm:$0xff] %v7000_v26  ;;  %v7005_v11 = vsel %vm1230_vm8, 2147483648, %v6777_v55  ;;  %v7007_v58 = vadd.s32 %v1119_v12, %v1117_v9  ;;  %v1368_v40 = vshra.s32 %v7000_v26, 16  ;;  %1343 = vmax.xlane.f32.xlu1 %v7009_v31 }
 0x285   : > { %11926 = vst [vmem:[#allocation13_spill] sm:$0xff] %v7005_v11  ;;  %v7012_v44 = vadd.s32 %v1105_v17, %v1103_v7  ;;  %v1144_v36 = vpop.xlane.xlu1 %1143  ;;  %v1354_v42 = vshra.s32 %v7005_v11, 16  ;;  %1329 = vmax.xlane.f32.xlu0 %v7014_v24  ;;  %v1188_v17 = vcvt.f32.s32 %v6905_v5 }
 0x286   : > { %vm1233_vm9 = vcmp.eq.s32.totalorder %v6735_v2, %v7007_v58  ;;  %v1145_v55 = vcvt.f32.s32 %v1144_v36  ;;  %v1130_v3 = vpop.xlane.xlu0 %1129  ;;  %v7033_v15 = vcvt.s32.f32 %v1368_v40 }
 0x287   : > { %v7023_v61 = vsel %vm1233_vm9, 2147483648, %v6735_v2  ;;  %vm1232_vm10 = vcmp.eq.s32.totalorder %v6791_v19, %v7012_v44  ;;  %v1131_v62 = vcvt.f32.s32 %v1130_v3  ;;  %v7037_v6 = vcvt.s32.f32 %v1354_v42 }
 0x288   : > { %11927 = vst [vmem:[#allocation14_spill] sm:$0xff] %v7023_v61  ;;  %v7029_v20 = vsel %vm1232_vm10, 2147483648, %v6791_v19  ;;  %v7031_v54 = vadd.s32 %v1147_v4, %v1145_v55  ;;  %v1396_v33 = vshra.s32 %v7023_v61, 16  ;;  %1371 = vmax.xlane.f32.xlu1 %v7033_v15 }
 0x289   : > { %11928 = vst [vmem:[#allocation15_spill] sm:$0xff] %v7029_v20  ;;  %v7035_v28 = vadd.s32 %v1133_v63, %v1131_v62  ;;  %v1172_v2 = vpop.xlane.xlu1 %1171  ;;  %v1382_v12 = vshra.s32 %v7029_v20, 16  ;;  %1357 = vmax.xlane.f32.xlu0 %v7037_v6 }
 0x28a   : > { %vm1235_vm11 = vcmp.eq.s32.totalorder %v6750_v0, %v7031_v54  ;;  %v1173_v19 = vcvt.f32.s32 %v1172_v2  ;;  %v1158_v39 = vpop.xlane.xlu0 %1157  ;;  %v7056_v4 = vcvt.s32.f32 %v1396_v33 }
 0x28b   : > { %v7046_v9 = vsel %vm1235_vm11, 2147483648, %v6750_v0  ;;  %vm1234_vm12 = vcmp.eq.s32.totalorder %v6800_v32, %v7035_v28  ;;  %v1159_v23 = vcvt.f32.s32 %v1158_v39  ;;  %v7060_v36 = vcvt.s32.f32 %v1382_v12 }
 0x28c   : > { %11929 = vst [vmem:[#allocation16_spill] sm:$0xff] %v7046_v9  ;;  %v7052_v59 = vsel %vm1234_vm12, 2147483648, %v6800_v32  ;;  %v7054_v7 = vadd.s32 %v1175_v27, %v1173_v19  ;;  %v1424_v0 = vshra.s32 %v7046_v9, 16  ;;  %1399 = vmax.xlane.f32.xlu1 %v7056_v4  ;;  %v1189_v32 = vshll.u32 %v1188_v17, 16 }
 0x28d   : > { %11930 = vst [vmem:[#allocation17_spill] sm:$0xff] %v7052_v59  ;;  %v7058_v51 = vadd.s32 %v1161_v1, %v1159_v23  ;;  %v1410_v40 = vshra.s32 %v7052_v59, 16  ;;  %1385 = vmax.xlane.f32.xlu0 %v7060_v36  ;;  %v1269_v39 = vand.u32 65535, %v6915_v52  ;;  %v1255_v23 = vand.u32 65535, %v6928_v25 }
 0x28e   : > { %vm1237_vm13 = vcmp.eq.s32.totalorder %v6765_v49, %v7054_v7  ;;  %v1186_v5 = vpop.xlane.xlu0 %1185  ;;  %v7076_v42 = vcvt.s32.f32 %v1424_v0 }
 0x28f   : > { %v7068_v50 = vsel %vm1237_vm13, 2147483648, %v6765_v49  ;;  %vm1236_vm14 = vcmp.eq.s32.totalorder %v6808_v8, %v7058_v51  ;;  %v1187_v55 = vcvt.f32.s32 %v1186_v5  ;;  %v7078_v63 = vcvt.s32.f32 %v1410_v40 }
 0x290   : > { %11931 = vst [vmem:[#allocation18_spill] sm:$0xff] %v7068_v50  ;;  %v7074_v3 = vsel %vm1236_vm14, 2147483648, %v6808_v8  ;;  %v1452_v27 = vshra.s32 %v7068_v50, 16  ;;  %1427 = vmax.xlane.f32.xlu1 %v7076_v42  ;;  %v1271_v17 = vcvt.s32.f32 %v1269_v39  ;;  %v1257_v5 = vcvt.s32.f32 %v1255_v23 }
 0x291   : > { %11932 = vst [vmem:[#allocation19_spill] sm:$0xff] %v7074_v3  ;;  %v7080_v62 = vadd.s32 %v1189_v32, %v1187_v55  ;;  %v1438_v49 = vshra.s32 %v7074_v3, 16  ;;  %1413 = vmax.xlane.f32.xlu0 %v7078_v63  ;;  %v1283_v32 = vand.u32 65535, %v6943_v41 }
 0x292   : > { %v7088_v2 = vcvt.s32.f32 %v1452_v27 }
 0x293   : > { %vm1238_vm15 = vcmp.eq.s32.totalorder %v6815_v13, %v7080_v62  ;;  %v7090_v8 = vcvt.s32.f32 %v1438_v49  ;;  %v1285_v27 = vcvt.s32.f32 %v1283_v32  ;;  %v1311_v49 = vand.u32 65535, %v6957_v57 }
 0x294   : > { %v7093_v33 = vsel %vm1238_vm15, 2147483648, %v6815_v13  ;;  %1455 = vmax.xlane.f32.xlu1 %v7088_v2 }
 0x295   : > { %11933 = vst [vmem:[#allocation20_spill] sm:$0xff] %v7093_v33  ;;  %v1466_v1 = vshra.s32 %v7093_v33, 16  ;;  %1441 = vmax.xlane.f32.xlu0 %v7090_v8 }
 0x297   : > { %v7098_v19 = vcvt.s32.f32 %v1466_v1  ;;  %v1297_v1 = vand.u32 65535, %v6962_v16 }
 0x299   : > { %1469 = vmax.xlane.f32.xlu0 %v7098_v19  ;;  %v1299_v23 = vcvt.s32.f32 %v1297_v1  ;;  %v1353_v1 = vand.u32 65535, %v7005_v11 }
 0x2f9   : > { %v7102_v12 = vpop.xlane.xlu0 %1273 }
 0x2fa   : > { %vm1275_vm0 = vcmp.eq.f32.partialorder %v6919_v14, %v7102_v12 }
 0x2fb   : > { %v1276_v13 = vsel %vm1275_vm0, %v1271_v17, -inf  ;;  %v1313_v17 = vcvt.s32.f32 %v1311_v49  ;;  %v1367_v49 = vand.u32 65535, %v7000_v26 }
 0x2fc   : > { %1277 = vmax.xlane.f32.xlu0 %v1276_v13 }
 0x304   : > { %v7107_v0 = vpop.xlane.xlu1 %1259 }
 0x305   : > { %vm1261_vm1 = vcmp.eq.f32.partialorder %v6933_v45, %v7107_v0 }
 0x306   : > { %v1262_v40 = vsel %vm1261_vm1, %v1257_v5, -inf  ;;  %v1339_v5 = vand.u32 65535, %v6978_v60  ;;  %vm11873_vm1 = vcmask 7168  }
 0x307   : > { %1263 = vmax.xlane.f32.xlu1 %v1262_v40 }
 0x309   : > { %v7112_v55 = vpop.xlane.xlu1 %1287 }
 0x30a   : > { %vm1289_vm2 = vcmp.eq.f32.partialorder %v6953_v18, %v7112_v55  ;;  %v1325_v18 = vand.u32 65535, %v6984_v48 }
 0x30b   : > { %v1290_v14 = vsel %vm1289_vm2, %v1285_v27, -inf  ;;  %v1341_v27 = vcvt.s32.f32 %v1339_v5  ;;  %v1395_v5 = vand.u32 65535, %v7023_v61 }
 0x30c   : > { %1291 = vmax.xlane.f32.xlu1 %v1290_v14  ;;  %v1327_v14 = vcvt.s32.f32 %v1325_v18  ;;  %v1381_v18 = vand.u32 65535, %v7029_v20 }
 0x30d   : > { %v7118_v39 = vpop.xlane.xlu1 %1315 }
 0x30e   : > { %vm1317_vm3 = vcmp.eq.f32.partialorder %v6975_v47, %v7118_v39  ;;  %v7122_v45 = vpop.xlane.xlu0 %1301 }
 0x30f   : > { %v1318_v13 = vsel %vm1317_vm3, %v1313_v17, -inf  ;;  %vm1303_vm4 = vcmp.eq.f32.partialorder %v6989_v30, %v7122_v45 }
 0x310   : > { %1319 = vmax.xlane.f32.xlu1 %v1318_v13  ;;  %v1304_v40 = vsel %vm1303_vm4, %v1299_v23, -inf  ;;  %v1369_v23 = vcvt.s32.f32 %v1367_v49  ;;  %v1397_v49 = vcvt.s32.f32 %v1395_v5 }
 0x311   : > { %1305 = vmax.xlane.f32.xlu0 %v1304_v40  ;;  %v7128_v32 = vpop.xlane.xlu1 %1343 }
 0x312   : > { %v7131_v47 = vpop.xlane.xlu0 %1329  ;;  %vm1345_vm5 = vcmp.eq.f32.partialorder %v7009_v31, %v7128_v32  ;;  %v1355_v31 = vcvt.s32.f32 %v1353_v1  ;;  %v1409_v1 = vand.u32 65535, %v7052_v59 }
 0x313   : > { %v1346_v17 = vsel %vm1345_vm5, %v1341_v27, -inf  ;;  %vm1331_vm6 = vcmp.eq.f32.partialorder %v7014_v24, %v7131_v47 }
 0x314   : > { %1347 = vmax.xlane.f32.xlu1 %v1346_v17  ;;  %v1332_v30 = vsel %vm1331_vm6, %v1327_v14, -inf  ;;  %v1423_v17 = vand.u32 65535, %v7046_v9 }
 0x315   : > { %1333 = vmax.xlane.f32.xlu0 %v1332_v30  ;;  %v7138_v13 = vpop.xlane.xlu1 %1371 }
 0x316   : > { %v7141_v40 = vpop.xlane.xlu0 %1357  ;;  %vm1373_vm7 = vcmp.eq.f32.partialorder %v7033_v15, %v7138_v13  ;;  %v1383_v15 = vcvt.s32.f32 %v1381_v18  ;;  %v1425_v5 = vcvt.s32.f32 %v1423_v17  ;;  %v1437_v18 = vand.u32 65535, %v7074_v3 }
 0x317   : > { %v1374_v27 = vsel %vm1373_vm7, %v1369_v23, -inf  ;;  %vm1359_vm8 = vcmp.eq.f32.partialorder %v7037_v6, %v7141_v40 }
 0x318   : > { %1375 = vmax.xlane.f32.xlu1 %v1374_v27  ;;  %v1360_v24 = vsel %vm1359_vm8, %v1355_v31, -inf  ;;  %v1451_v27 = vand.u32 65535, %v7068_v50 }
 0x319   : > { %1361 = vmax.xlane.f32.xlu0 %v1360_v24  ;;  %v7148_v14 = vpop.xlane.xlu1 %1399 }
 0x31a   : > { %v7151_v30 = vpop.xlane.xlu0 %1385  ;;  %vm1401_vm9 = vcmp.eq.f32.partialorder %v7056_v4, %v7148_v14  ;;  %v1411_v4 = vcvt.s32.f32 %v1409_v1  ;;  %v1453_v17 = vcvt.s32.f32 %v1451_v27 }
 0x31b   : > { %v1402_v23 = vsel %vm1401_vm9, %v1397_v49, -inf  ;;  %vm1387_vm10 = vcmp.eq.f32.partialorder %v7060_v36, %v7151_v30 }
 0x31c   : > { %1403 = vmax.xlane.f32.xlu1 %v1402_v23  ;;  %v1388_v6 = vsel %vm1387_vm10, %v1383_v15, -inf }
 0x31d   : > { %1389 = vmax.xlane.f32.xlu0 %v1388_v6  ;;  %v7158_v31 = vpop.xlane.xlu1 %1427  ;;  %v1439_v6 = vcvt.s32.f32 %v1437_v18 }
 0x31e   : > { %v7161_v24 = vpop.xlane.xlu0 %1413  ;;  %vm1429_vm11 = vcmp.eq.f32.partialorder %v7076_v42, %v7158_v31  ;;  %v1465_v42 = vand.u32 65535, %v7093_v33 }
 0x31f   : > { %v1430_v49 = vsel %vm1429_vm11, %v1425_v5, -inf  ;;  %vm1415_vm12 = vcmp.eq.f32.partialorder %v7078_v63, %v7161_v24 }
 0x320   : > { %1431 = vmax.xlane.f32.xlu1 %v1430_v49  ;;  %v1416_v36 = vsel %vm1415_vm12, %v1411_v4, -inf  ;;  %v1467_v4 = vcvt.s32.f32 %v1465_v42 }
 0x321   : > { %1417 = vmax.xlane.f32.xlu0 %v1416_v36  ;;  %v7168_v15 = vpop.xlane.xlu1 %1455 }
 0x322   : > { %v7170_v23 = vpop.xlane.xlu0 %1441  ;;  %vm1457_vm13 = vcmp.eq.f32.partialorder %v7088_v2, %v7168_v15  ;;  %v1280_v2 = vcvt.f32.s32 %v7102_v12 }
 0x323   : > { %v1458_v1 = vsel %vm1457_vm13, %v1453_v17, -inf  ;;  %vm1443_vm14 = vcmp.eq.f32.partialorder %v7090_v8, %v7170_v23  ;;  %v1192_v17 = vand.u32 127, %v6910_v10 }
 0x324   : > { %1459 = vmax.xlane.f32.xlu1 %v1458_v1  ;;  %v1444_v63 = vsel %vm1443_vm14, %v1439_v6, -inf  ;;  %v1281_v49 = vshll.u32 %v1280_v2, 16  ;;  %v1191_v6 = vand.u32 127, %v6922_v56  ;;  %v1193_v1 = vand.u32 127, %v6935_v46 }
 0x325   : > { %1445 = vmax.xlane.f32.xlu0 %v1444_v63  ;;  %v1208_v12 = vsub.s32 127, %v1192_v17  ;;  %v1266_v63 = vcvt.f32.s32 %v7107_v0  ;;  %v1195_v2 = vand.u32 127, %v6945_v53  ;;  %v1196_v56 = vand.u32 127, %v6969_v35 }
 0x326   : > { %v7177_v5 = vpop.xlane.xlu0 %1469  ;;  %v1199_v17 = vand.u32 127, %v6986_v37  ;;  %v7209_v46 = vsub.s32 127, %v1193_v1  ;;  %v1198_v0 = vand.u32 127, %v6991_v38  ;;  %v1205_v1 = vand.u32 127, %v7054_v7 }
 0x327   : > { %vm1471_vm15 = vcmp.eq.f32.partialorder %v7098_v19, %v7177_v5  ;;  %v7216_v35 = vsub.s32 127, %v1195_v2  ;;  %v7223_v38 = vsub.s32 127, %v1196_v56  ;;  %v1294_v2 = vcvt.f32.s32 %v7112_v55 }
 0x328   : > { %v1472_v27 = vsel %vm1471_vm15, %v1467_v4, -inf  ;;  %v1322_v56 = vcvt.f32.s32 %v7118_v39  ;;  %v1378_v39 = vcvt.f32.s32 %v7138_v13  ;;  %v1434_v13 = vcvt.f32.s32 %v7158_v31 }
 0x329   : > { %1473 = vmax.xlane.f32.xlu0 %v1472_v27 }
 0x389   : > { %v1278_v18 = vpop.xlane.xlu0 %1277 }
 0x38a   : > { %v1279_v36 = vcvt.f32.s32 %v1278_v18  ;;  %v1194_v18 = vand.u32 127, %v6949_v43  ;;  %v1203_v43 = vand.u32 127, %v7031_v54  ;;  %v7230_v54 = vsub.s32 127, %v1198_v0 }
 0x38c   : > { %v7183_v29 = vadd.s32 %v1281_v49, %v1279_v36  ;;  %v1197_v49 = vand.u32 127, %v6964_v34  ;;  %v1207_v36 = vsub.s32 127, %v1191_v6  ;;  %v1202_v34 = vand.u32 127, %v7035_v28 }
 0x38d   : > { %v1267_v6 = vshll.u32 %v1266_v63, 16  ;;  %v7218_v37 = vsub.s32 127, %v1194_v18  ;;  %v7237_v18 = vsub.s32 127, %v1203_v43 }
 0x38e   : > { %11934 = vst [vmem:[#allocation21_spill] sm:$0xff] %v7183_v29  ;;  %v1480_v8 = vand.u32 127, %v7183_v29  ;;  %vm1512_vm0 = vcmp.eq.s32.totalorder %v6915_v52, %v7183_v29 }
 0x38f   : > { %v7192_v19 = vsel %vm1512_vm0, 2147483648, %v6915_v52 }
 0x390   : > { %v1496_v42 = vsub.s32 127, %v1480_v8  ;;  %v1753_v10 = vshra.s32 %v7192_v19, 16  ;;  %v1201_v8 = vand.u32 127, %v7007_v58  ;;  %v7225_v58 = vsub.s32 127, %v1199_v17 }
 0x391   : > { %v1308_v17 = vcvt.f32.s32 %v7122_v45 }
 0x392   : > { %v7199_v4 = vsel %vm11873_vm1, %v1208_v12, %v1496_v42  ;;  %v7201_v27 = vcvt.s32.f32 %v1753_v10  ;;  %v1200_v12 = vand.u32 127, %v7012_v44  ;;  %v7220_v10 = vsub.s32 127, %v1197_v49 }
 0x393   : > { %v1204_v44 = vand.u32 127, %v7058_v51  ;;  %v7232_v28 = vsub.s32 127, %v1201_v8  ;;  %v7239_v49 = vsub.s32 127, %v1202_v34  ;;  %v7244_v51 = vsub.s32 127, %v1205_v1 }
 0x394   : > { %1756 = vmax.xlane.f32.xlu0 %v7201_v27  ;;  %v1264_v53 = vpop.xlane.xlu1 %1263  ;;  %v7234_v63 = vsub.s32 127, %v1200_v12  ;;  %v1350_v8 = vcvt.f32.s32 %v7128_v32  ;;  %v1295_v34 = vshll.u32 %v1294_v2, 16  ;;  %v1406_v1 = vcvt.f32.s32 %v7148_v14 }
 0x395   : > { %v1265_v42 = vcvt.f32.s32 %v1264_v53  ;;  %v7254_v0 = vsub.s32 127, %v1204_v44  ;;  %v1309_v52 = vshll.u32 %v1308_v17, 16  ;;  %v1379_v17 = vshll.u32 %v1378_v39, 16 }
 0x396   : > { %v1351_v2 = vshll.u32 %v1350_v8, 16 }
 0x397   : > { %v7228_v22 = vadd.s32 %v1267_v6, %v1265_v42  ;;  %v1336_v6 = vcvt.f32.s32 %v7131_v47  ;;  %v1364_v42 = vcvt.f32.s32 %v7141_v40  ;;  %v1392_v47 = vcvt.f32.s32 %v7151_v30 }
 0x398   : > { %v1420_v40 = vcvt.f32.s32 %v7161_v24 }
 0x399   : > { %11935 = vst [vmem:[#allocation22_spill] sm:$0xff] %v7228_v22  ;;  %v1479_v7 = vand.u32 127, %v7228_v22  ;;  %vm1511_vm2 = vcmp.eq.s32.totalorder %v6928_v25, %v7228_v22  ;;  %v1292_v53 = vpop.xlane.xlu1 %1291  ;;  %v1337_v14 = vshll.u32 %v1336_v6, 16 }
 0x39a   : > { %v7252_v55 = vsel %vm1511_vm2, 2147483648, %v6928_v25  ;;  %v1293_v45 = vcvt.f32.s32 %v1292_v53  ;;  %v7292_v39 = vshll.u32 %v1420_v40, 16 }
 0x39b   : > { %v1495_v12 = vsub.s32 127, %v1479_v7  ;;  %v1739_v43 = vshra.s32 %v7252_v55, 16  ;;  %v1323_v7 = vshll.u32 %v1322_v56, 16 }
 0x39c   : > { %v7268_v22 = vadd.s32 %v1295_v34, %v1293_v45  ;;  %v7288_v45 = vshll.u32 %v1392_v47, 16  ;;  %v1448_v47 = vcvt.f32.s32 %v7170_v23 }
 0x39d   : > { %v7263_v29 = vsel %vm11873_vm1, %v1207_v36, %v1495_v12  ;;  %v7265_v44 = vcvt.s32.f32 %v1739_v43  ;;  %v1320_v53 = vpop.xlane.xlu1 %1319  ;;  %v1365_v12 = vshll.u32 %v1364_v42, 16  ;;  %v7277_v43 = vshll.u32 %v1406_v1, 16 }
 0x39e   : > { %11936 = vst [vmem:[#allocation23_spill] sm:$0xff] %v7268_v22  ;;  %v1481_v36 = vand.u32 127, %v7268_v22  ;;  %vm1513_vm3 = vcmp.eq.s32.totalorder %v6943_v41, %v7268_v22  ;;  %v1321_v56 = vcvt.f32.s32 %v1320_v53  ;;  %v1306_v8 = vpop.xlane.xlu0 %1305  ;;  %v7290_v53 = vshll.u32 %v1434_v13, 16 }
 0x39f   : > { %1742 = vmax.xlane.f32.xlu1 %v7265_v44  ;;  %v7283_v30 = vsel %vm1513_vm3, 2147483648, %v6943_v41  ;;  %v1307_v34 = vcvt.f32.s32 %v1306_v8  ;;  %v1462_v42 = vcvt.f32.s32 %v7168_v15  ;;  %v1476_v13 = vcvt.f32.s32 %v7177_v5 }
 0x3a0   : > { %v1497_v31 = vsub.s32 127, %v1481_v36  ;;  %v7285_v24 = vadd.s32 %v1323_v7, %v1321_v56  ;;  %v1767_v6 = vshra.s32 %v7283_v30, 16 }
 0x3a1   : > { %v7302_v7 = vadd.s32 %v1309_v52, %v1307_v34  ;;  %v1348_v36 = vpop.xlane.xlu1 %1347  ;;  %v7317_v23 = vshll.u32 %v1462_v42, 16 }
 0x3a2   : > { %11937 = vst [vmem:[#allocation24_spill] sm:$0xff] %v7285_v24  ;;  %v7297_v1 = vsel %vm11873_vm1, %v7209_v46, %v1497_v31  ;;  %v1483_v32 = vand.u32 127, %v7285_v24  ;;  %vm1515_vm4 = vcmp.eq.s32.totalorder %v6957_v57, %v7285_v24  ;;  %v7306_v40 = vcvt.s32.f32 %v1767_v6  ;;  %v1334_v8 = vpop.xlane.xlu0 %1333 }
 0x3a3   : > { %11938 = vst [vmem:[#allocation25_spill] sm:$0xff] %v7302_v7  ;;  %v7312_v15 = vsel %vm1515_vm4, 2147483648, %v6957_v57  ;;  %v1482_v56 = vand.u32 127, %v7302_v7  ;;  %vm1514_vm5 = vcmp.eq.s32.totalorder %v6962_v16, %v7302_v7  ;;  %v1349_v52 = vcvt.f32.s32 %v1348_v36 }
 0x3a4   : > { %v1499_v46 = vsub.s32 127, %v1483_v32  ;;  %v1335_v5 = vcvt.f32.s32 %v1334_v8  ;;  %1770 = vmax.xlane.f32.xlu1 %v7306_v40  ;;  %v1795_v31 = vshra.s32 %v7312_v15, 16  ;;  %v7325_v34 = vsel %vm1514_vm5, 2147483648, %v6962_v16 }
 0x3a5   : > { %v1498_v6 = vsub.s32 127, %v1482_v56  ;;  %v7331_v36 = vadd.s32 %v1351_v2, %v1349_v52  ;;  %v1781_v42 = vshra.s32 %v7325_v34, 16  ;;  %v7334_v8 = vshll.u32 %v1448_v47, 16  ;;  %v1376_v22 = vpop.xlane.xlu1 %1375 }
 0x3a6   : > { %v7329_v32 = vsel %vm11873_vm1, %v7216_v35, %v1499_v46  ;;  %v7336_v24 = vshll.u32 %v1476_v13, 16  ;;  %v7338_v57 = vadd.s32 %v1337_v14, %v1335_v5  ;;  %v7340_v41 = vcvt.s32.f32 %v1795_v31  ;;  %v1362_v46 = vpop.xlane.xlu0 %1361 }
 0x3a7   : > { %11939 = vst [vmem:[#allocation26_spill] sm:$0xff] %v7331_v36  ;;  %v7344_v7 = vsel %vm11873_vm1, %v7218_v37, %v1498_v6  ;;  %v1485_v35 = vand.u32 127, %v7331_v36  ;;  %vm1517_vm6 = vcmp.eq.s32.totalorder %v6978_v60, %v7331_v36  ;;  %v1377_v2 = vcvt.f32.s32 %v1376_v22 }
 0x3a8   : > { %11940 = vst [vmem:[#allocation27_spill] sm:$0xff] %v7338_v57  ;;  %v1484_v47 = vand.u32 127, %v7338_v57  ;;  %vm1516_vm7 = vcmp.eq.s32.totalorder %v6984_v48, %v7338_v57  ;;  %v1363_v14 = vcvt.f32.s32 %v1362_v46  ;;  %1798 = vmax.xlane.f32.xlu1 %v7340_v41  ;;  %v7353_v13 = vcvt.s32.f32 %v1781_v42 }
 0x3a9   : > { %v1501_v56 = vsub.s32 127, %v1485_v35  ;;  %v7355_v37 = vadd.s32 %v1379_v17, %v1377_v2  ;;  %v7361_v52 = vsel %vm1517_vm6, 2147483648, %v6978_v60  ;;  %v7367_v22 = vsel %vm1516_vm7, 2147483648, %v6984_v48  ;;  %v1404_v6 = vpop.xlane.xlu1 %1403 }
 0x3aa   : > { %v1500_v5 = vsub.s32 127, %v1484_v47  ;;  %v7369_v31 = vadd.s32 %v1365_v12, %v1363_v14  ;;  %1784 = vmax.xlane.f32.xlu0 %v7353_v13  ;;  %v1823_v17 = vshra.s32 %v7361_v52, 16  ;;  %v1809_v42 = vshra.s32 %v7367_v22, 16  ;;  %v1390_v47 = vpop.xlane.xlu0 %1389 }
 0x3ab   : > { %11941 = vst [vmem:[#allocation28_spill] sm:$0xff] %v7355_v37  ;;  %v7376_v35 = vsel %vm11873_vm1, %v7220_v10, %v1501_v56  ;;  %v1487_v2 = vand.u32 127, %v7355_v37  ;;  %vm1519_vm8 = vcmp.eq.s32.totalorder %v7000_v26, %v7355_v37  ;;  %v1405_v46 = vcvt.f32.s32 %v1404_v6 }
 0x3ac   : > { %11942 = vst [vmem:[#allocation29_spill] sm:$0xff] %v7369_v31  ;;  %v7383_v12 = vsel %vm11873_vm1, %v7223_v38, %v1500_v5  ;;  %v1486_v14 = vand.u32 127, %v7369_v31  ;;  %vm1518_vm9 = vcmp.eq.s32.totalorder %v7005_v11, %v7369_v31  ;;  %v1391_v57 = vcvt.f32.s32 %v1390_v47 }
 0x3ad   : > { %v1503_v48 = vsub.s32 127, %v1487_v2  ;;  %v7389_v10 = vadd.s32 %v7277_v43, %v1405_v46  ;;  %v7391_v56 = vcvt.s32.f32 %v1823_v17  ;;  %v7393_v36 = vcvt.s32.f32 %v1809_v42  ;;  %v1432_v38 = vpop.xlane.xlu1 %1431 }
 0x3ae   : > { %v1502_v6 = vsub.s32 127, %v1486_v14  ;;  %v7396_v60 = vadd.s32 %v7288_v45, %v1391_v57  ;;  %v7402_v5 = vsel %vm1519_vm8, 2147483648, %v7000_v26  ;;  %v7408_v43 = vsel %vm1518_vm9, 2147483648, %v7005_v11  ;;  %v1418_v42 = vpop.xlane.xlu0 %1417 }
 0x3af   : > { %11943 = vst [vmem:[#allocation30_spill] sm:$0xff] %v7389_v10  ;;  %v7412_v17 = vsel %vm11873_vm1, %v7225_v58, %v1503_v48  ;;  %v1489_v57 = vand.u32 127, %v7389_v10  ;;  %vm1521_vm10 = vcmp.eq.s32.totalorder %v7023_v61, %v7389_v10  ;;  %1826 = vmax.xlane.f32.xlu1 %v7391_v56  ;;  %1812 = vmax.xlane.f32.xlu0 %v7393_v36  ;;  %v1433_v45 = vcvt.f32.s32 %v1432_v38 }
 0x3b0   : > { %11944 = vst [vmem:[#allocation31_spill] sm:$0xff] %v7396_v60  ;;  %v7421_v2 = vsel %vm11873_vm1, %v7230_v54, %v1502_v6  ;;  %v1488_v46 = vand.u32 127, %v7396_v60  ;;  %vm1520_vm11 = vcmp.eq.s32.totalorder %v7029_v20, %v7396_v60  ;;  %v1419_v48 = vcvt.f32.s32 %v1418_v42 }
 0x3b1   : > { %v1505_v58 = vsub.s32 127, %v1489_v57  ;;  %v7427_v47 = vadd.s32 %v7290_v53, %v1433_v45  ;;  %v1851_v14 = vshra.s32 %v7402_v5, 16  ;;  %v1837_v31 = vshra.s32 %v7408_v43, 16  ;;  %v1460_v54 = vpop.xlane.xlu1 %1459 }
 0x3b2   : > { %v1504_v38 = vsub.s32 127, %v1488_v46  ;;  %v7432_v11 = vadd.s32 %v7292_v39, %v1419_v48  ;;  %v7438_v6 = vsel %vm1521_vm10, 2147483648, %v7023_v61  ;;  %v7444_v53 = vsel %vm1520_vm11, 2147483648, %v7029_v20  ;;  %v1446_v42 = vpop.xlane.xlu0 %1445 }
 0x3b3   : > { %11945 = vst [vmem:[#allocation32_spill] sm:$0xff] %v7427_v47  ;;  %v7448_v57 = vsel %vm11873_vm1, %v7232_v28, %v1505_v58  ;;  %v1491_v39 = vand.u32 127, %v7427_v47  ;;  %vm1523_vm12 = vcmp.eq.s32.totalorder %v7046_v9, %v7427_v47  ;;  %v7453_v45 = vcvt.s32.f32 %v1851_v14 }
 0x3b4   : > { %11946 = vst [vmem:[#allocation33_spill] sm:$0xff] %v7432_v11  ;;  %v7457_v46 = vsel %vm11873_vm1, %v7234_v63, %v1504_v38  ;;  %v1490_v48 = vand.u32 127, %v7432_v11  ;;  %vm11865_vm13 = vcmp.eq.s32.totalorder %v7052_v59, %v7432_v11  ;;  %v7462_v60 = vcvt.s32.f32 %v1837_v31 }
 0x3b5   : > { %v1507_v28 = vsub.s32 127, %v1491_v39  ;;  %1854 = vmax.xlane.f32.xlu1 %v7453_v45  ;;  %v1461_v58 = vcvt.f32.s32 %v1460_v54  ;;  %v1447_v20 = vcvt.f32.s32 %v1446_v42  ;;  %v1879_v14 = vshra.s32 %v7438_v6, 16 }
 0x3b6   : > { %v1506_v10 = vsub.s32 127, %v1490_v48  ;;  %1840 = vmax.xlane.f32.xlu0 %v7462_v60  ;;  %v1865_v63 = vshra.s32 %v7444_v53, 16  ;;  %v7472_v38 = vsel %vm1523_vm12, 2147483648, %v7046_v9  ;;  %v7478_v31 = vsel %vm11865_vm13, 2147483648, %v7052_v59  ;;  %v1474_v47 = vpop.xlane.xlu0 %1473 }
 0x3b7   : > { %v7482_v54 = vsel %vm11873_vm1, %v7237_v18, %v1507_v28  ;;  %v7485_v39 = vadd.s32 %v7317_v23, %v1461_v58  ;;  %v7488_v42 = vadd.s32 %v7334_v8, %v1447_v20  ;;  %v7490_v48 = vcvt.s32.f32 %v1879_v14 }
 0x3b8   : > { %v7494_v9 = vsel %vm11873_vm1, %v7239_v49, %v1506_v10  ;;  %v7496_v11 = vcvt.s32.f32 %v1865_v63  ;;  %v1475_v59 = vcvt.f32.s32 %v1474_v47  ;;  %v1907_v61 = vshra.s32 %v7472_v38, 16 }
 0x3b9   : > { %11947 = vst [vmem:[#allocation34_spill] sm:$0xff] %v7485_v39  ;;  %11948 = vst [vmem:[#allocation35_spill] sm:$0xff] %v7488_v42  ;;  %v1493_v18 = vand.u32 127, %v7485_v39  ;;  %vm11887_vm14 = vcmp.eq.s32.totalorder %v7068_v50, %v7485_v39  ;;  %v1492_v20 = vand.u32 127, %v7488_v42  ;;  %vm11880_vm15 = vcmp.eq.s32.totalorder %v7074_v3, %v7488_v42  ;;  %1882 = vmax.xlane.f32.xlu1 %v7490_v48 }
 0x3ba   : > { %1868 = vmax.xlane.f32.xlu0 %v7496_v11  ;;  %v7508_v49 = vadd.s32 %v7336_v24, %v1475_v59  ;;  %v7510_v23 = vcvt.s32.f32 %v1907_v61  ;;  %v1893_v8 = vshra.s32 %v7478_v31, 16  ;;  %v7517_v10 = vsel %vm11887_vm14, 2147483648, %v7068_v50 }
 0x3bb   : > { %v1509_v47 = vsub.s32 127, %v1493_v18  ;;  %v1508_v28 = vsub.s32 127, %v1492_v20  ;;  %v1935_v58 = vshra.s32 %v7517_v10, 16  ;;  %v7524_v59 = vsel %vm11880_vm15, 2147483648, %v7074_v3 }
 0x3bc   : > { %11949 = vst [vmem:[#allocation36_spill] sm:$0xff] %v7508_v49  ;;  %v1494_v61 = vand.u32 127, %v7508_v49  ;;  %vm11872_vm13 = vcmp.eq.s32.totalorder %v7093_v33, %v7508_v49  ;;  %v7529_v24 = vcvt.s32.f32 %v1893_v8  ;;  %v1921_v14 = vshra.s32 %v7524_v59, 16 }
 0x3bd   : > { %v7534_v63 = vsel %vm11873_vm1, %v7244_v51, %v1509_v47  ;;  %v7538_v18 = vsel %vm11873_vm1, %v7254_v0, %v1508_v28  ;;  %1910 = vmax.xlane.f32.xlu1 %v7510_v23  ;;  %v7541_v20 = vcvt.s32.f32 %v1935_v58  ;;  %v7547_v8 = vsel %vm11872_vm13, 2147483648, %v7093_v33 }
 0x3be   : > { %v11950_v42 = vand.u32 127, %v7080_v62  ;;  %v1510_v39 = vsub.s32 127, %v1494_v61  ;;  %1896 = vmax.xlane.f32.xlu0 %v7529_v24  ;;  %v7552_v51 = vcvt.s32.f32 %v1921_v14  ;;  %v1949_v0 = vshra.s32 %v7547_v8, 16 }
 0x3bf   : > { %v1752_v62 = vand.u32 65535, %v7192_v19  ;;  %v1766_v49 = vand.u32 65535, %v7283_v30  ;;  %v1794_v50 = vand.u32 65535, %v7312_v15  ;;  %vm11892_vm14 = vcmask 15360  }
 0x3c0   : > { %v1222_v3 = vsub.s32 127, %v11950_v42  ;;  %v7560_v28 = vcvt.s32.f32 %v1949_v0 }
 0x3c1   : > { %1938 = vmax.xlane.f32.xlu1 %v7541_v20  ;;  %v1754_v58 = vcvt.s32.f32 %v1752_v62  ;;  %v1768_v62 = vcvt.s32.f32 %v1766_v49  ;;  %v1808_v49 = vand.u32 65535, %v7367_v22 }
 0x3c2   : > { %v7556_v47 = vsel %vm11873_vm1, %v1222_v3, %v1510_v39  ;;  %1924 = vmax.xlane.f32.xlu0 %v7552_v51  ;;  %v1738_v3 = vand.u32 65535, %v7252_v55 }
 0x3c4   : > { %v1740_v14 = vcvt.s32.f32 %v1738_v3  ;;  %v1796_v3 = vcvt.s32.f32 %v1794_v50 }
 0x3c6   : > { %1952 = vmax.xlane.f32.xlu0 %v7560_v28 }
 0x421   : > { %v7564_v42 = vpop.xlane.xlu0 %1756 }
 0x422   : > { %vm1758_vm13 = vcmp.eq.f32.partialorder %v7201_v27, %v7564_v42 }
 0x423   : > { %v1759_v61 = vsel %vm1758_vm13, %v1754_v58, -inf  ;;  %v1780_v58 = vand.u32 65535, %v7325_v34 }
 0x424   : > { %1760 = vmax.xlane.f32.xlu0 %v1759_v61 }
 0x42c   : > { %v7569_v39 = vpop.xlane.xlu1 %1742 }
 0x42d   : > { %vm1744_vm1 = vcmp.eq.f32.partialorder %v7265_v44, %v7569_v39 }
 0x42e   : > { %v1745_v0 = vsel %vm1744_vm1, %v1740_v14, -inf }
 0x42f   : > { %1746 = vmax.xlane.f32.xlu1 %v1745_v0  ;;  %v1782_v0 = vcvt.s32.f32 %v1780_v58 }
 0x431   : > { %v7574_v33 = vpop.xlane.xlu1 %1770 }
 0x432   : > { %vm1772_vm13 = vcmp.eq.f32.partialorder %v7306_v40, %v7574_v33  ;;  %v1822_v40 = vand.u32 65535, %v7361_v52 }
 0x433   : > { %v1773_v27 = vsel %vm1772_vm13, %v1768_v62, -inf }
 0x434   : > { %1774 = vmax.xlane.f32.xlu1 %v1773_v27  ;;  %v1824_v37 = vcvt.s32.f32 %v1822_v40  ;;  %v1878_v40 = vand.u32 65535, %v7438_v6 }
 0x435   : > { %v7580_v61 = vpop.xlane.xlu1 %1798 }
 0x436   : > { %vm1800_vm1 = vcmp.eq.f32.partialorder %v7340_v41, %v7580_v61  ;;  %v1810_v41 = vcvt.s32.f32 %v1808_v49 }
 0x437   : > { %v7584_v44 = vpop.xlane.xlu0 %1784  ;;  %v1801_v14 = vsel %vm1800_vm1, %v1796_v3, -inf  ;;  %v1850_v3 = vand.u32 65535, %v7402_v5 }
 0x438   : > { %1802 = vmax.xlane.f32.xlu1 %v1801_v14  ;;  %vm1786_vm15 = vcmp.eq.f32.partialorder %v7353_v13, %v7584_v44  ;;  %v1836_v14 = vand.u32 65535, %v7408_v43 }
 0x439   : > { %v1787_v62 = vsel %vm1786_vm15, %v1782_v0, -inf }
 0x43a   : > { %1788 = vmax.xlane.f32.xlu0 %v1787_v62  ;;  %v1852_v62 = vcvt.s32.f32 %v1850_v3  ;;  %v1906_v3 = vand.u32 65535, %v7472_v38 }
 0x43c   : > { %v7590_v27 = vpop.xlane.xlu1 %1826  ;;  %v7592_v50 = vpop.xlane.xlu0 %1812 }
 0x43d   : > { %vm1828_vm13 = vcmp.eq.f32.partialorder %v7391_v56, %v7590_v27  ;;  %vm1814_vm1 = vcmp.eq.f32.partialorder %v7393_v36, %v7592_v50  ;;  %v1838_v56 = vcvt.s32.f32 %v1836_v14  ;;  %v1864_v36 = vand.u32 65535, %v7444_v53 }
 0x43e   : > { %v1829_v58 = vsel %vm1828_vm13, %v1824_v37, -inf  ;;  %v1815_v13 = vsel %vm1814_vm1, %v1810_v41, -inf  ;;  %v1892_v14 = vand.u32 65535, %v7478_v31 }
 0x43f   : > { %1830 = vmax.xlane.f32.xlu1 %v1829_v58  ;;  %1816 = vmax.xlane.f32.xlu0 %v1815_v13  ;;  %v1880_v13 = vcvt.s32.f32 %v1878_v40  ;;  %v1908_v40 = vcvt.s32.f32 %v1906_v3 }
 0x442   : > { %v7600_v0 = vpop.xlane.xlu1 %1854 }
 0x443   : > { %v7603_v49 = vpop.xlane.xlu0 %1840  ;;  %vm1856_vm15 = vcmp.eq.f32.partialorder %v7453_v45, %v7600_v0  ;;  %v1866_v45 = vcvt.s32.f32 %v1864_v36  ;;  %v1920_v36 = vand.u32 65535, %v7524_v59 }
 0x444   : > { %v1857_v37 = vsel %vm1856_vm15, %v1852_v62, -inf  ;;  %vm1842_vm13 = vcmp.eq.f32.partialorder %v7462_v60, %v7603_v49 }
 0x445   : > { %1858 = vmax.xlane.f32.xlu1 %v1857_v37  ;;  %v1843_v41 = vsel %vm1842_vm13, %v1838_v56, -inf  ;;  %v1934_v37 = vand.u32 65535, %v7517_v10 }
 0x446   : > { %1844 = vmax.xlane.f32.xlu0 %v1843_v41  ;;  %v7610_v58 = vpop.xlane.xlu1 %1882 }
 0x447   : > { %v7613_v26 = vpop.xlane.xlu0 %1868  ;;  %vm1884_vm1 = vcmp.eq.f32.partialorder %v7490_v48, %v7610_v58  ;;  %v1894_v48 = vcvt.s32.f32 %v1892_v14  ;;  %v1936_v3 = vcvt.s32.f32 %v1934_v37 }
 0x448   : > { %v1885_v62 = vsel %vm1884_vm1, %v1880_v13, -inf  ;;  %vm1870_vm15 = vcmp.eq.f32.partialorder %v7496_v11, %v7613_v26 }
 0x449   : > { %1886 = vmax.xlane.f32.xlu1 %v1885_v62  ;;  %v1871_v60 = vsel %vm1870_vm15, %v1866_v45, -inf }
 0x44a   : > { %1872 = vmax.xlane.f32.xlu0 %v1871_v60  ;;  %v7620_v56 = vpop.xlane.xlu1 %1910  ;;  %v1922_v60 = vcvt.s32.f32 %v1920_v36 }
 0x44b   : > { %v7623_v41 = vpop.xlane.xlu0 %1896  ;;  %vm1912_vm13 = vcmp.eq.f32.partialorder %v7510_v23, %v7620_v56  ;;  %v1948_v23 = vand.u32 65535, %v7547_v8 }
 0x44c   : > { %v1913_v13 = vsel %vm1912_vm13, %v1908_v40, -inf  ;;  %vm1898_vm1 = vcmp.eq.f32.partialorder %v7529_v24, %v7623_v41 }
 0x44d   : > { %1914 = vmax.xlane.f32.xlu1 %v1913_v13  ;;  %v1899_v11 = vsel %vm1898_vm1, %v1894_v48, -inf  ;;  %v1950_v48 = vcvt.s32.f32 %v1948_v23 }
 0x44e   : > { %1900 = vmax.xlane.f32.xlu0 %v1899_v11  ;;  %v7630_v45 = vpop.xlane.xlu1 %1938 }
 0x44f   : > { %v7632_v62 = vpop.xlane.xlu0 %1924  ;;  %vm1940_vm15 = vcmp.eq.f32.partialorder %v7541_v20, %v7630_v45  ;;  %v1763_v20 = vcvt.f32.s32 %v7564_v42 }
 0x450   : > { %v1941_v14 = vsel %vm1940_vm15, %v1936_v3, -inf  ;;  %vm1926_vm13 = vcmp.eq.f32.partialorder %v7552_v51, %v7632_v62 }
 0x451   : > { %1942 = vmax.xlane.f32.xlu1 %v1941_v14  ;;  %v1927_v24 = vsel %vm1926_vm13, %v1922_v60, -inf  ;;  %v1764_v13 = vshll.u32 %v1763_v20, 16 }
 0x452   : > { %1928 = vmax.xlane.f32.xlu0 %v1927_v24 }
 0x453   : > { %v7639_v40 = vpop.xlane.xlu0 %1952 }
 0x454   : > { %vm1954_vm1 = vcmp.eq.f32.partialorder %v7560_v28, %v7639_v40  ;;  %v1749_v28 = vcvt.f32.s32 %v7569_v39 }
 0x455   : > { %v1955_v37 = vsel %vm1954_vm1, %v1950_v48, -inf }
 0x456   : > { %1956 = vmax.xlane.f32.xlu0 %v1955_v37  ;;  %v1750_v48 = vshll.u32 %v1749_v28, 16 }
 0x4b1   : > { %v1761_v36 = vpop.xlane.xlu0 %1760 }
 0x4b2   : > { %v1762_v11 = vcvt.f32.s32 %v1761_v36 }
 0x4b4   : > { %v1765_v3 = vadd.s32 %v1764_v13, %v1762_v11 }
 0x4b6   : > { %v1963_v16 = vand.u32 127, %v1765_v3  ;;  %vm1995_vm15 = vcmp.eq.s32.totalorder %v7192_v19, %v1765_v3  ;;  %v1805_v3 = vcvt.f32.s32 %v7580_v61 }
 0x4b7   : > { %v7646_v51 = vsel %vm1995_vm15, 2147483648, %v7192_v19  ;;  %v1777_v19 = vcvt.f32.s32 %v7574_v33  ;;  %v1791_v33 = vcvt.f32.s32 %v7584_v44 }
 0x4b8   : > { %v1979_v60 = vsub.s32 127, %v1963_v16  ;;  %v2041_v23 = vshra.s32 %v7646_v51, 16  ;;  %v1806_v61 = vshll.u32 %v1805_v3, 16 }
 0x4b9   : > { %v1778_v13 = vshll.u32 %v1777_v19, 16 }
 0x4ba   : > { %v7652_v14 = vsel %vm11892_vm14, %v7199_v4, %v1979_v60  ;;  %v7654_v42 = vcvt.s32.f32 %v2041_v23 }
 0x4bc   : > { %2044 = vmax.xlane.f32.xlu0 %v7654_v42  ;;  %v1747_v24 = vpop.xlane.xlu1 %1746 }
 0x4bd   : > { %v1748_v37 = vcvt.f32.s32 %v1747_v24 }
 0x4bf   : > { %v1751_v20 = vadd.s32 %v1750_v48, %v1748_v37  ;;  %v1819_v48 = vcvt.f32.s32 %v7592_v50  ;;  %v1861_v37 = vcvt.f32.s32 %v7600_v0  ;;  %v1847_v0 = vcvt.f32.s32 %v7603_v49 }
 0x4c1   : > { %v1962_v36 = vand.u32 127, %v1751_v20  ;;  %vm1994_vm13 = vcmp.eq.s32.totalorder %v7252_v55, %v1751_v20  ;;  %v1775_v11 = vpop.xlane.xlu1 %1774  ;;  %v1820_v50 = vshll.u32 %v1819_v48, 16  ;;  %v1862_v25 = vshll.u32 %v1861_v37, 16 }
 0x4c2   : > { %v7660_v16 = vsel %vm1994_vm13, 2147483648, %v7252_v55  ;;  %v1776_v23 = vcvt.f32.s32 %v1775_v11  ;;  %v1833_v55 = vcvt.f32.s32 %v7590_v27 }
 0x4c3   : > { %v1978_v39 = vsub.s32 127, %v1962_v36  ;;  %v2027_v4 = vshra.s32 %v7660_v16, 16  ;;  %v1792_v36 = vshll.u32 %v1791_v33, 16  ;;  %v1889_v33 = vcvt.f32.s32 %v7610_v58 }
 0x4c4   : > { %v1779_v24 = vadd.s32 %v1778_v13, %v1776_v23  ;;  %v1834_v23 = vshll.u32 %v1833_v55, 16 }
 0x4c5   : > { %v7666_v60 = vsel %vm11892_vm14, %v7263_v29, %v1978_v39  ;;  %v7668_v28 = vcvt.s32.f32 %v2027_v4  ;;  %v1803_v20 = vpop.xlane.xlu1 %1802 }
 0x4c6   : > { %v1964_v19 = vand.u32 127, %v1779_v24  ;;  %vm1996_vm1 = vcmp.eq.s32.totalorder %v7283_v30, %v1779_v24  ;;  %v1804_v29 = vcvt.f32.s32 %v1803_v20  ;;  %v1875_v20 = vcvt.f32.s32 %v7613_v26 }
 0x4c7   : > { %2030 = vmax.xlane.f32.xlu1 %v7668_v28  ;;  %v7677_v39 = vsel %vm1996_vm1, 2147483648, %v7283_v30  ;;  %v1789_v44 = vpop.xlane.xlu0 %1788 }
 0x4c8   : > { %v1980_v4 = vsub.s32 127, %v1964_v19  ;;  %v1807_v13 = vadd.s32 %v1806_v61, %v1804_v29  ;;  %v1790_v11 = vcvt.f32.s32 %v1789_v44  ;;  %v2055_v27 = vshra.s32 %v7677_v39, 16 }
 0x4c9   : > { %v1848_v29 = vshll.u32 %v1847_v0, 16 }
 0x4ca   : > { %v7683_v3 = vsel %vm11892_vm14, %v7297_v1, %v1980_v4  ;;  %v1966_v24 = vand.u32 127, %v1807_v13  ;;  %vm1998_vm15 = vcmp.eq.s32.totalorder %v7312_v15, %v1807_v13  ;;  %v1793_v30 = vadd.s32 %v1792_v36, %v1790_v11 }
 0x4cb   : > { %v7689_v61 = vsel %vm1998_vm15, 2147483648, %v7312_v15  ;;  %v7691_v55 = vcvt.s32.f32 %v2055_v27  ;;  %v1890_v11 = vshll.u32 %v1889_v33, 16  ;;  %v1876_v27 = vshll.u32 %v1875_v20, 16 }
 0x4cc   : > { %v1982_v48 = vsub.s32 127, %v1966_v24  ;;  %v1965_v37 = vand.u32 127, %v1793_v30  ;;  %vm1997_vm13 = vcmp.eq.s32.totalorder %v7325_v34, %v1793_v30  ;;  %v1831_v49 = vpop.xlane.xlu1 %1830  ;;  %v1817_v1 = vpop.xlane.xlu0 %1816  ;;  %v2083_v19 = vshra.s32 %v7689_v61, 16 }
 0x4cd   : > { %v7696_v36 = vsel %vm1997_vm13, 2147483648, %v7325_v34  ;;  %v1832_v58 = vcvt.f32.s32 %v1831_v49  ;;  %v1818_v44 = vcvt.f32.s32 %v1817_v1  ;;  %2058 = vmax.xlane.f32.xlu1 %v7691_v55  ;;  %v1917_v34 = vcvt.f32.s32 %v7620_v56 }
 0x4ce   : > { %v7701_v26 = vsel %vm11892_vm14, %v7329_v32, %v1982_v48  ;;  %v1981_v15 = vsub.s32 127, %v1965_v37  ;;  %v7703_v4 = vcvt.s32.f32 %v2083_v19  ;;  %v2069_v13 = vshra.s32 %v7696_v36, 16 }
 0x4cf   : > { %v1835_v24 = vadd.s32 %v1834_v23, %v1832_v58  ;;  %v1821_v0 = vadd.s32 %v1820_v50, %v1818_v44  ;;  %v1903_v30 = vcvt.f32.s32 %v7623_v41  ;;  %v1945_v23 = vcvt.f32.s32 %v7630_v45 }
 0x4d0   : > { %v7710_v49 = vsel %vm11892_vm14, %v7344_v7, %v1981_v15  ;;  %v7712_v1 = vcvt.s32.f32 %v2069_v13  ;;  %v1931_v56 = vcvt.f32.s32 %v7632_v62  ;;  %v1918_v44 = vshll.u32 %v1917_v34, 16 }
 0x4d1   : > { %v1968_v32 = vand.u32 127, %v1835_v24  ;;  %vm2000_vm1 = vcmp.eq.s32.totalorder %v7361_v52, %v1835_v24  ;;  %v1967_v48 = vand.u32 127, %v1821_v0  ;;  %vm1999_vm15 = vcmp.eq.s32.totalorder %v7367_v22, %v1821_v0  ;;  %2086 = vmax.xlane.f32.xlu1 %v7703_v4 }
 0x4d2   : > { %v7720_v41 = vsel %vm2000_vm1, 2147483648, %v7361_v52  ;;  %v7723_v7 = vsel %vm1999_vm15, 2147483648, %v7367_v22  ;;  %v1859_v50 = vpop.xlane.xlu1 %1858  ;;  %2072 = vmax.xlane.f32.xlu0 %v7712_v1  ;;  %v1959_v45 = vcvt.f32.s32 %v7639_v40  ;;  %v1904_v0 = vshll.u32 %v1903_v30, 16 }
 0x4d3   : > { %v1984_v33 = vsub.s32 127, %v1968_v32  ;;  %v1983_v20 = vsub.s32 127, %v1967_v48  ;;  %v1860_v37 = vcvt.f32.s32 %v1859_v50  ;;  %v1845_v19 = vpop.xlane.xlu0 %1844  ;;  %v2111_v58 = vshra.s32 %v7720_v41, 16 }
 0x4d4   : > { %v1846_v15 = vcvt.f32.s32 %v1845_v19  ;;  %v2097_v62 = vshra.s32 %v7723_v7, 16  ;;  %v1946_v32 = vshll.u32 %v1945_v23, 16  ;;  %v1932_v40 = vshll.u32 %v1931_v56, 16 }
 0x4d5   : > { %v7731_v52 = vsel %vm11892_vm14, %v7376_v35, %v1984_v33  ;;  %v7735_v22 = vsel %vm11892_vm14, %v7383_v12, %v1983_v20  ;;  %v1863_v13 = vadd.s32 %v1862_v25, %v1860_v37  ;;  %v7737_v24 = vcvt.s32.f32 %v2111_v58 }
 0x4d6   : > { %v1849_v48 = vadd.s32 %v1848_v29, %v1846_v15  ;;  %v1887_v34 = vpop.xlane.xlu1 %1886  ;;  %v7739_v50 = vcvt.s32.f32 %v2097_v62  ;;  %v7748_v29 = vshll.u32 %v1959_v45, 16 }
 0x4d7   : > { %v1970_v19 = vand.u32 127, %v1863_v13  ;;  %vm2002_vm13 = vcmp.eq.s32.totalorder %v7402_v5, %v1863_v13  ;;  %v1888_v21 = vcvt.f32.s32 %v1887_v34  ;;  %v1873_v35 = vpop.xlane.xlu0 %1872  ;;  %2114 = vmax.xlane.f32.xlu1 %v7737_v24 }
 0x4d8   : > { %v7744_v12 = vsel %vm2002_vm13, 2147483648, %v7402_v5  ;;  %v1969_v25 = vand.u32 127, %v1849_v48  ;;  %vm2001_vm1 = vcmp.eq.s32.totalorder %v7408_v43, %v1849_v48  ;;  %v1874_v30 = vcvt.f32.s32 %v1873_v35  ;;  %2100 = vmax.xlane.f32.xlu0 %v7739_v50 }
 0x4d9   : > { %v1986_v23 = vsub.s32 127, %v1970_v19  ;;  %v7751_v56 = vsel %vm2001_vm1, 2147483648, %v7408_v43  ;;  %v1891_v33 = vadd.s32 %v1890_v11, %v1888_v21  ;;  %v2139_v15 = vshra.s32 %v7744_v12, 16 }
 0x4da   : > { %v1985_v20 = vsub.s32 127, %v1969_v25  ;;  %v1877_v37 = vadd.s32 %v1876_v27, %v1874_v30  ;;  %v1915_v58 = vpop.xlane.xlu1 %1914  ;;  %v2125_v5 = vshra.s32 %v7751_v56, 16 }
 0x4db   : > { %v7757_v62 = vsel %vm11892_vm14, %v7412_v17, %v1986_v23  ;;  %v1972_v13 = vand.u32 127, %v1891_v33  ;;  %vm2004_vm15 = vcmp.eq.s32.totalorder %v7438_v6, %v1891_v33  ;;  %v1916_v45 = vcvt.f32.s32 %v1915_v58  ;;  %v1901_v48 = vpop.xlane.xlu0 %1900 }
 0x4dc   : > { %v7762_v43 = vsel %vm11892_vm14, %v7421_v2, %v1985_v20  ;;  %v7765_v21 = vsel %vm2004_vm15, 2147483648, %v7438_v6  ;;  %v1971_v11 = vand.u32 127, %v1877_v37  ;;  %vm2003_vm13 = vcmp.eq.s32.totalorder %v7444_v53, %v1877_v37 }
 0x4dd   : > { %v1988_v27 = vsub.s32 127, %v1972_v13  ;;  %v7769_v34 = vsel %vm2003_vm13, 2147483648, %v7444_v53  ;;  %v1919_v17 = vadd.s32 %v1918_v44, %v1916_v45  ;;  %v1902_v19 = vcvt.f32.s32 %v1901_v48 }
 0x4de   : > { %v1987_v35 = vsub.s32 127, %v1971_v11  ;;  %v7771_v25 = vcvt.s32.f32 %v2139_v15  ;;  %v7773_v30 = vcvt.s32.f32 %v2125_v5  ;;  %v1943_v23 = vpop.xlane.xlu1 %1942  ;;  %v2167_v2 = vshra.s32 %v7765_v21, 16 }
 0x4df   : > { %v7778_v6 = vsel %vm11892_vm14, %v7448_v57, %v1988_v27  ;;  %v1974_v33 = vand.u32 127, %v1919_v17  ;;  %vm2006_vm1 = vcmp.eq.s32.totalorder %v7472_v38, %v1919_v17  ;;  %v1905_v20 = vadd.s32 %v1904_v0, %v1902_v19  ;;  %v1929_v53 = vpop.xlane.xlu0 %1928 }
 0x4e0   : > { %v7783_v44 = vsel %vm11892_vm14, %v7457_v46, %v1987_v35  ;;  %v7786_v37 = vsel %vm2006_vm1, 2147483648, %v7472_v38  ;;  %2142 = vmax.xlane.f32.xlu1 %v7771_v25  ;;  %2128 = vmax.xlane.f32.xlu0 %v7773_v30  ;;  %v1944_v58 = vcvt.f32.s32 %v1943_v23  ;;  %v1930_v15 = vcvt.f32.s32 %v1929_v53 }
 0x4e1   : > { %v1990_v57 = vsub.s32 127, %v1974_v33  ;;  %v1973_v5 = vand.u32 127, %v1905_v20  ;;  %vm2005_vm15 = vcmp.eq.s32.totalorder %v7478_v31, %v1905_v20  ;;  %v7791_v13 = vcvt.s32.f32 %v2167_v2 }
 0x4e2   : > { %v7794_v0 = vsel %vm2005_vm15, 2147483648, %v7478_v31  ;;  %v1947_v46 = vadd.s32 %v1946_v32, %v1944_v58  ;;  %v1933_v45 = vadd.s32 %v1932_v40, %v1930_v15  ;;  %v2153_v38 = vshra.s32 %v7769_v34, 16 }
 0x4e3   : > { %v7799_v48 = vsel %vm11892_vm14, %v7482_v54, %v1990_v57  ;;  %v1989_v11 = vsub.s32 127, %v1973_v5  ;;  %v1957_v27 = vpop.xlane.xlu0 %1956  ;;  %v2195_v17 = vshra.s32 %v7786_v37, 16  ;;  %v2181_v19 = vshra.s32 %v7794_v0, 16 }
 0x4e4   : > { %v1976_v35 = vand.u32 127, %v1947_v46  ;;  %vm2008_vm13 = vcmp.eq.s32.totalorder %v7517_v10, %v1947_v46  ;;  %v1975_v23 = vand.u32 127, %v1933_v45  ;;  %vm2007_vm1 = vcmp.eq.s32.totalorder %v7524_v59, %v1933_v45  ;;  %2170 = vmax.xlane.f32.xlu1 %v7791_v13 }
 0x4e5   : > { %v7808_v31 = vsel %vm11892_vm14, %v7494_v9, %v1989_v11  ;;  %v7811_v54 = vsel %vm2008_vm13, 2147483648, %v7517_v10  ;;  %v7814_v32 = vsel %vm2007_vm1, 2147483648, %v7524_v59  ;;  %v7816_v40 = vcvt.s32.f32 %v2153_v38 }
 0x4e6   : > { %v1992_v2 = vsub.s32 127, %v1976_v35  ;;  %v1991_v33 = vsub.s32 127, %v1975_v23  ;;  %v1958_v20 = vcvt.f32.s32 %v1957_v27  ;;  %v7818_v53 = vcvt.s32.f32 %v2195_v17 }
 0x4e7   : > { %2156 = vmax.xlane.f32.xlu0 %v7816_v40  ;;  %v7821_v58 = vcvt.s32.f32 %v2181_v19  ;;  %v2223_v9 = vshra.s32 %v7811_v54, 16  ;;  %v2209_v15 = vshra.s32 %v7814_v32, 16  ;;  %v2026_v35 = vand.u32 65535, %v7660_v16 }
 0x4e8   : > { %v7827_v10 = vsel %vm11892_vm14, %v7534_v63, %v1992_v2  ;;  %v7831_v59 = vsel %vm11892_vm14, %v7538_v18, %v1991_v33  ;;  %v1961_v57 = vadd.s32 %v7748_v29, %v1958_v20  ;;  %2198 = vmax.xlane.f32.xlu1 %v7818_v53  ;;  %v2054_v33 = vand.u32 65535, %v7677_v39 }
 0x4e9   : > { %v7835_v5 = vcvt.s32.f32 %v2223_v9  ;;  %v7842_v63 = vcvt.s32.f32 %v2209_v15  ;;  %v2028_v23 = vcvt.s32.f32 %v2026_v35  ;;  %v2082_v15 = vand.u32 65535, %v7689_v61 }
 0x4ea   : > { %v1977_v46 = vand.u32 127, %v1961_v57  ;;  %vm2009_vm15 = vcmp.eq.s32.totalorder %v7547_v8, %v1961_v57  ;;  %v2056_v9 = vcvt.s32.f32 %v2054_v33 }
 0x4eb   : > { %v7839_v45 = vsel %vm2009_vm15, 2147483648, %v7547_v8  ;;  %2184 = vmax.xlane.f32.xlu0 %v7821_v58  ;;  %v2040_v8 = vand.u32 65535, %v7646_v51 }
 0x4ec   : > { %v1993_v38 = vsub.s32 127, %v1977_v46  ;;  %2226 = vmax.xlane.f32.xlu1 %v7835_v5  ;;  %v2237_v18 = vshra.s32 %v7839_v45, 16 }
 0x4ed   : > { %v2042_v17 = vcvt.s32.f32 %v2040_v8 }
 0x4ee   : > { %v7848_v29 = vsel %vm11892_vm14, %v7556_v47, %v1993_v38  ;;  %v7851_v11 = vcvt.s32.f32 %v2237_v18  ;;  %v2084_v38 = vcvt.s32.f32 %v2082_v15  ;;  %v2124_v15 = vand.u32 65535, %v7751_v56 }
 0x4ef   : > { %2212 = vmax.xlane.f32.xlu0 %v7842_v63  ;;  %vm11893_vm14 = vcmask 23552  }
 0x4f3   : > { %2240 = vmax.xlane.f32.xlu0 %v7851_v11 }
 0x549   : > { %v7855_v27 = vpop.xlane.xlu0 %2044 }
 0x54a   : > { %vm2046_vm13 = vcmp.eq.f32.partialorder %v7654_v42, %v7855_v27  ;;  %v2068_v42 = vand.u32 65535, %v7696_v36 }
 0x54b   : > { %v2047_v19 = vsel %vm2046_vm13, %v2042_v17, -inf  ;;  %v2110_v17 = vand.u32 65535, %v7720_v41 }
 0x54c   : > { %2048 = vmax.xlane.f32.xlu0 %v2047_v19  ;;  %v2070_v18 = vcvt.s32.f32 %v2068_v42  ;;  %v2096_v19 = vand.u32 65535, %v7723_v7 }
 0x554   : > { %v7860_v47 = vpop.xlane.xlu1 %2030 }
 0x555   : > { %vm2032_vm1 = vcmp.eq.f32.partialorder %v7668_v28, %v7860_v47 }
 0x556   : > { %v2033_v2 = vsel %vm2032_vm1, %v2028_v23, -inf  ;;  %v2112_v23 = vcvt.s32.f32 %v2110_v17  ;;  %v2152_v17 = vand.u32 65535, %v7769_v34 }
 0x557   : > { %2034 = vmax.xlane.f32.xlu1 %v2033_v2 }
 0x55a   : > { %v7865_v20 = vpop.xlane.xlu1 %2058 }
 0x55b   : > { %vm2060_vm15 = vcmp.eq.f32.partialorder %v7691_v55, %v7865_v20 }
 0x55c   : > { %v2061_v57 = vsel %vm2060_vm15, %v2056_v9, -inf  ;;  %v2138_v9 = vand.u32 65535, %v7744_v12 }
 0x55d   : > { %2062 = vmax.xlane.f32.xlu1 %v2061_v57 }
 0x55e   : > { %v7871_v46 = vpop.xlane.xlu1 %2086 }
 0x55f   : > { %v7873_v28 = vpop.xlane.xlu0 %2072  ;;  %vm2088_vm13 = vcmp.eq.f32.partialorder %v7703_v4, %v7871_v46  ;;  %v2098_v4 = vcvt.s32.f32 %v2096_v19 }
 0x560   : > { %v2089_v8 = vsel %vm2088_vm13, %v2084_v38, -inf  ;;  %vm2074_vm1 = vcmp.eq.f32.partialorder %v7712_v1, %v7873_v28  ;;  %v2140_v38 = vcvt.s32.f32 %v2138_v9 }
 0x561   : > { %2090 = vmax.xlane.f32.xlu1 %v2089_v8  ;;  %v2075_v55 = vsel %vm2074_vm1, %v2070_v18, -inf  ;;  %v2126_v18 = vcvt.s32.f32 %v2124_v15  ;;  %v2222_v15 = vand.u32 65535, %v7811_v54 }
 0x562   : > { %2076 = vmax.xlane.f32.xlu0 %v2075_v55 }
 0x564   : > { %v7881_v35 = vpop.xlane.xlu1 %2114 }
 0x565   : > { %v7883_v2 = vpop.xlane.xlu0 %2100  ;;  %vm2116_vm15 = vcmp.eq.f32.partialorder %v7737_v24, %v7881_v35  ;;  %v2166_v24 = vand.u32 65535, %v7765_v21 }
 0x566   : > { %v2117_v33 = vsel %vm2116_vm15, %v2112_v23, -inf  ;;  %vm2102_vm13 = vcmp.eq.f32.partialorder %v7739_v50, %v7883_v2  ;;  %v2194_v23 = vand.u32 65535, %v7786_v37 }
 0x567   : > { %2118 = vmax.xlane.f32.xlu1 %v2117_v33  ;;  %v2103_v1 = vsel %vm2102_vm13, %v2098_v4, -inf  ;;  %v2168_v19 = vcvt.s32.f32 %v2166_v24 }
 0x568   : > { %2104 = vmax.xlane.f32.xlu0 %v2103_v1  ;;  %v2196_v9 = vcvt.s32.f32 %v2194_v23 }
 0x56d   : > { %v7891_v42 = vpop.xlane.xlu1 %2142  ;;  %v7893_v57 = vpop.xlane.xlu0 %2128 }
 0x56e   : > { %vm2144_vm1 = vcmp.eq.f32.partialorder %v7771_v25, %v7891_v42  ;;  %vm2130_vm15 = vcmp.eq.f32.partialorder %v7773_v30, %v7893_v57  ;;  %v2154_v25 = vcvt.s32.f32 %v2152_v17  ;;  %v2180_v30 = vand.u32 65535, %v7794_v0 }
 0x56f   : > { %v2145_v50 = vsel %vm2144_vm1, %v2140_v38, -inf  ;;  %v2131_v8 = vsel %vm2130_vm15, %v2126_v18, -inf }
 0x570   : > { %2146 = vmax.xlane.f32.xlu1 %v2145_v50  ;;  %2132 = vmax.xlane.f32.xlu0 %v2131_v8  ;;  %v2182_v24 = vcvt.s32.f32 %v2180_v30  ;;  %v2208_v50 = vand.u32 65535, %v7814_v32  ;;  %v2224_v8 = vcvt.s32.f32 %v2222_v15 }
 0x571   : > { %v7901_v55 = vpop.xlane.xlu1 %2170 }
 0x572   : > { %vm2172_vm13 = vcmp.eq.f32.partialorder %v7791_v13, %v7901_v55  ;;  %v2210_v23 = vcvt.s32.f32 %v2208_v50 }
 0x573   : > { %v2173_v4 = vsel %vm2172_vm13, %v2168_v19, -inf }
 0x574   : > { %v7906_v33 = vpop.xlane.xlu0 %2156  ;;  %2174 = vmax.xlane.f32.xlu1 %v2173_v4  ;;  %v2236_v4 = vand.u32 65535, %v7839_v45 }
 0x575   : > { %vm2158_vm1 = vcmp.eq.f32.partialorder %v7816_v40, %v7906_v33  ;;  %v7911_v1 = vpop.xlane.xlu1 %2198 }
 0x576   : > { %v2159_v38 = vsel %vm2158_vm1, %v2154_v25, -inf  ;;  %vm2200_vm15 = vcmp.eq.f32.partialorder %v7818_v53, %v7911_v1  ;;  %v2238_v30 = vcvt.s32.f32 %v2236_v4 }
 0x577   : > { %2160 = vmax.xlane.f32.xlu0 %v2159_v38  ;;  %v2201_v13 = vsel %vm2200_vm15, %v2196_v9, -inf  ;;  %v2051_v9 = vcvt.f32.s32 %v7855_v27 }
 0x578   : > { %v7916_v18 = vpop.xlane.xlu0 %2184  ;;  %2202 = vmax.xlane.f32.xlu1 %v2201_v13 }
 0x579   : > { %vm2186_vm13 = vcmp.eq.f32.partialorder %v7821_v58, %v7916_v18  ;;  %v7921_v40 = vpop.xlane.xlu1 %2226  ;;  %v2052_v38 = vshll.u32 %v2051_v9, 16 }
 0x57a   : > { %v2187_v17 = vsel %vm2186_vm13, %v2182_v24, -inf  ;;  %vm2228_vm1 = vcmp.eq.f32.partialorder %v7835_v5, %v7921_v40 }
 0x57b   : > { %2188 = vmax.xlane.f32.xlu0 %v2187_v17  ;;  %v2229_v53 = vsel %vm2228_vm1, %v2224_v8, -inf }
 0x57c   : > { %v7925_v19 = vpop.xlane.xlu0 %2212  ;;  %2230 = vmax.xlane.f32.xlu1 %v2229_v53 }
 0x57d   : > { %vm2214_vm15 = vcmp.eq.f32.partialorder %v7842_v63, %v7925_v19 }
 0x57e   : > { %v2215_v25 = vsel %vm2214_vm15, %v2210_v23, -inf }
 0x57f   : > { %2216 = vmax.xlane.f32.xlu0 %v2215_v25 }
 0x580   : > { %v7930_v58 = vpop.xlane.xlu0 %2240 }
 0x581   : > { %vm2242_vm13 = vcmp.eq.f32.partialorder %v7851_v11, %v7930_v58  ;;  %v2037_v11 = vcvt.f32.s32 %v7860_v47 }
 0x582   : > { %v2243_v5 = vsel %vm2242_vm13, %v2238_v30, -inf }
 0x583   : > { %2244 = vmax.xlane.f32.xlu0 %v2243_v5  ;;  %v2038_v4 = vshll.u32 %v2037_v11, 16 }
 0x5d9   : > { %v2049_v15 = vpop.xlane.xlu0 %2048 }
 0x5da   : > { %v2050_v13 = vcvt.f32.s32 %v2049_v15 }
 0x5dc   : > { %v2053_v24 = vadd.s32 %v2052_v38, %v2050_v13 }
 0x5de   : > { %v2251_v50 = vand.u32 127, %v2053_v24  ;;  %vm2283_vm1 = vcmp.eq.s32.totalorder %v7646_v51, %v2053_v24 }
 0x5df   : > { %v7937_v63 = vsel %vm2283_vm1, 2147483648, %v7646_v51  ;;  %v2065_v51 = vcvt.f32.s32 %v7865_v20 }
 0x5e0   : > { %v2267_v8 = vsub.s32 127, %v2251_v50  ;;  %v2329_v17 = vshra.s32 %v7937_v63, 16  ;;  %v2093_v50 = vcvt.f32.s32 %v7871_v46 }
 0x5e1   : > { %v2066_v24 = vshll.u32 %v2065_v51, 16 }
 0x5e2   : > { %v7943_v53 = vsel %vm11893_vm14, %v7652_v14, %v2267_v8  ;;  %v7945_v27 = vcvt.s32.f32 %v2329_v17  ;;  %v2079_v17 = vcvt.f32.s32 %v7873_v28  ;;  %v2094_v11 = vshll.u32 %v2093_v50, 16 }
 0x5e4   : > { %2332 = vmax.xlane.f32.xlu0 %v7945_v27  ;;  %v2035_v23 = vpop.xlane.xlu1 %2034 }
 0x5e5   : > { %v2036_v25 = vcvt.f32.s32 %v2035_v23 }
 0x5e7   : > { %v2039_v30 = vadd.s32 %v2038_v4, %v2036_v25  ;;  %v2080_v25 = vshll.u32 %v2079_v17, 16 }
 0x5e9   : > { %v2250_v5 = vand.u32 127, %v2039_v30  ;;  %vm2282_vm15 = vcmp.eq.s32.totalorder %v7660_v16, %v2039_v30  ;;  %v2121_v30 = vcvt.f32.s32 %v7881_v35 }
 0x5ea   : > { %v7951_v9 = vsel %vm2282_vm15, 2147483648, %v7660_v16  ;;  %v2063_v38 = vpop.xlane.xlu1 %2062 }
 0x5eb   : > { %v2266_v47 = vsub.s32 127, %v2250_v5  ;;  %v2315_v14 = vshra.s32 %v7951_v9, 16  ;;  %v2064_v8 = vcvt.f32.s32 %v2063_v38  ;;  %v2122_v35 = vshll.u32 %v2121_v30, 16 }
 0x5ec   : > { %v2149_v30 = vcvt.f32.s32 %v7891_v42 }
 0x5ed   : > { %v7956_v15 = vsel %vm11893_vm14, %v7666_v60, %v2266_v47  ;;  %v7958_v13 = vcvt.s32.f32 %v2315_v14  ;;  %v2067_v16 = vadd.s32 %v2066_v24, %v2064_v8  ;;  %v2107_v14 = vcvt.f32.s32 %v7883_v2 }
 0x5ee   : > { %v2091_v20 = vpop.xlane.xlu1 %2090 }
 0x5ef   : > { %2318 = vmax.xlane.f32.xlu1 %v7958_v13  ;;  %v2252_v23 = vand.u32 127, %v2067_v16  ;;  %vm2284_vm13 = vcmp.eq.s32.totalorder %v7677_v39, %v2067_v16  ;;  %v2092_v4 = vcvt.f32.s32 %v2091_v20  ;;  %v2077_v60 = vpop.xlane.xlu0 %2076 }
 0x5f0   : > { %v7966_v5 = vsel %vm2284_vm13, 2147483648, %v7677_v39  ;;  %v2078_v46 = vcvt.f32.s32 %v2077_v60 }
 0x5f1   : > { %v2268_v51 = vsub.s32 127, %v2252_v23  ;;  %v2095_v47 = vadd.s32 %v2094_v11, %v2092_v4  ;;  %v2343_v28 = vshra.s32 %v7966_v5, 16  ;;  %v2108_v4 = vshll.u32 %v2107_v14, 16 }
 0x5f2   : > { %v2081_v38 = vadd.s32 %v2080_v25, %v2078_v46  ;;  %v2135_v14 = vcvt.f32.s32 %v7893_v57 }
 0x5f3   : > { %v7972_v24 = vsel %vm11893_vm14, %v7683_v3, %v2268_v51  ;;  %v2254_v50 = vand.u32 127, %v2095_v47  ;;  %vm2286_vm1 = vcmp.eq.s32.totalorder %v7689_v61, %v2095_v47  ;;  %v7975_v8 = vcvt.s32.f32 %v2343_v28 }
 0x5f4   : > { %v7978_v39 = vsel %vm2286_vm1, 2147483648, %v7689_v61  ;;  %v2253_v17 = vand.u32 127, %v2081_v38  ;;  %vm2285_vm15 = vcmp.eq.s32.totalorder %v7696_v36, %v2081_v38  ;;  %v2119_v16 = vpop.xlane.xlu1 %2118 }
 0x5f5   : > { %v2270_v20 = vsub.s32 127, %v2254_v50  ;;  %v7982_v2 = vsel %vm2285_vm15, 2147483648, %v7696_v36  ;;  %v2120_v11 = vcvt.f32.s32 %v2119_v16  ;;  %v2105_v3 = vpop.xlane.xlu0 %2104  ;;  %2346 = vmax.xlane.f32.xlu1 %v7975_v8  ;;  %v2371_v23 = vshra.s32 %v7978_v39, 16 }
 0x5f6   : > { %v2269_v60 = vsub.s32 127, %v2253_v17  ;;  %v2106_v25 = vcvt.f32.s32 %v2105_v3  ;;  %v2357_v61 = vshra.s32 %v7982_v2, 16  ;;  %v2177_v16 = vcvt.f32.s32 %v7901_v55 }
 0x5f7   : > { %v7990_v46 = vsel %vm11893_vm14, %v7701_v26, %v2270_v20  ;;  %v2123_v51 = vadd.s32 %v2122_v35, %v2120_v11  ;;  %v7992_v36 = vcvt.s32.f32 %v2371_v23  ;;  %v2163_v20 = vcvt.f32.s32 %v7906_v33 }
 0x5f8   : > { %v7996_v47 = vsel %vm11893_vm14, %v7710_v49, %v2269_v60  ;;  %v2109_v28 = vadd.s32 %v2108_v4, %v2106_v25  ;;  %v7998_v38 = vcvt.s32.f32 %v2357_v61  ;;  %v2150_v49 = vshll.u32 %v2149_v30, 16 }
 0x5f9   : > { %v2256_v50 = vand.u32 127, %v2123_v51  ;;  %vm2288_vm13 = vcmp.eq.s32.totalorder %v7720_v41, %v2123_v51  ;;  %2374 = vmax.xlane.f32.xlu1 %v7992_v36  ;;  %v2136_v3 = vshll.u32 %v2135_v14, 16  ;;  %v2205_v23 = vcvt.f32.s32 %v7911_v1 }
 0x5fa   : > { %v8004_v26 = vsel %vm2288_vm13, 2147483648, %v7720_v41  ;;  %v2255_v42 = vand.u32 127, %v2109_v28  ;;  %vm2287_vm1 = vcmp.eq.s32.totalorder %v7723_v7, %v2109_v28  ;;  %2360 = vmax.xlane.f32.xlu0 %v7998_v38  ;;  %v2178_v51 = vshll.u32 %v2177_v16, 16 }
 0x5fb   : > { %v2272_v35 = vsub.s32 127, %v2256_v50  ;;  %v8009_v17 = vsel %vm2287_vm1, 2147483648, %v7723_v7  ;;  %v2399_v57 = vshra.s32 %v8004_v26, 16  ;;  %v2164_v1 = vshll.u32 %v2163_v20, 16 }
 0x5fc   : > { %v2271_v11 = vsub.s32 127, %v2255_v42  ;;  %v2385_v41 = vshra.s32 %v8009_v17, 16  ;;  %v2191_v50 = vcvt.f32.s32 %v7916_v18  ;;  %v2233_v42 = vcvt.f32.s32 %v7921_v40 }
 0x5fd   : > { %v8018_v4 = vsel %vm11893_vm14, %v7731_v52, %v2272_v35  ;;  %v2147_v60 = vpop.xlane.xlu1 %2146  ;;  %v2133_v25 = vpop.xlane.xlu0 %2132  ;;  %v8020_v7 = vcvt.s32.f32 %v2399_v57  ;;  %v2206_v52 = vshll.u32 %v2205_v23, 16  ;;  %v2247_v16 = vcvt.f32.s32 %v7930_v58 }
 0x5fe   : > { %v8024_v61 = vsel %vm11893_vm14, %v7735_v22, %v2271_v11  ;;  %v2148_v55 = vcvt.f32.s32 %v2147_v60  ;;  %v2134_v33 = vcvt.f32.s32 %v2133_v25  ;;  %v8026_v30 = vcvt.s32.f32 %v2385_v41 }
 0x5ff   : > { %2402 = vmax.xlane.f32.xlu1 %v8020_v7  ;;  %v2219_v22 = vcvt.f32.s32 %v7925_v19  ;;  %v2192_v60 = vshll.u32 %v2191_v50, 16  ;;  %v2234_v25 = vshll.u32 %v2233_v42, 16  ;;  %v2248_v42 = vshll.u32 %v2247_v16, 16 }
 0x600   : > { %v2151_v28 = vadd.s32 %v2150_v49, %v2148_v55  ;;  %v2137_v14 = vadd.s32 %v2136_v3, %v2134_v33  ;;  %2388 = vmax.xlane.f32.xlu0 %v8026_v30 }
 0x601   : > { %v2175_v35 = vpop.xlane.xlu1 %2174 }
 0x602   : > { %v2258_v57 = vand.u32 127, %v2151_v28  ;;  %vm2290_vm15 = vcmp.eq.s32.totalorder %v7744_v12, %v2151_v28  ;;  %v2257_v11 = vand.u32 127, %v2137_v14  ;;  %vm2289_vm13 = vcmp.eq.s32.totalorder %v7751_v56, %v2137_v14 }
 0x603   : > { %v8037_v49 = vsel %vm2290_vm15, 2147483648, %v7744_v12  ;;  %v8040_v20 = vsel %vm2289_vm13, 2147483648, %v7751_v56  ;;  %v2176_v18 = vcvt.f32.s32 %v2175_v35 }
 0x604   : > { %v2274_v41 = vsub.s32 127, %v2258_v57  ;;  %v2273_v40 = vsub.s32 127, %v2257_v11  ;;  %v2161_v3 = vpop.xlane.xlu0 %2160  ;;  %v2427_v19 = vshra.s32 %v8037_v49, 16  ;;  %v2413_v23 = vshra.s32 %v8040_v20, 16 }
 0x605   : > { %v2179_v55 = vadd.s32 %v2178_v51, %v2176_v18  ;;  %v2162_v33 = vcvt.f32.s32 %v2161_v3  ;;  %v2203_v28 = vpop.xlane.xlu1 %2202  ;;  %v2220_v51 = vshll.u32 %v2219_v22, 16 }
 0x606   : > { %v8046_v12 = vsel %vm11893_vm14, %v7757_v62, %v2274_v41  ;;  %v8050_v56 = vsel %vm11893_vm14, %v7762_v43, %v2273_v40  ;;  %v2204_v58 = vcvt.f32.s32 %v2203_v28  ;;  %v8052_v14 = vcvt.s32.f32 %v2427_v19 }
 0x607   : > { %v2260_v35 = vand.u32 127, %v2179_v55  ;;  %vm2292_vm1 = vcmp.eq.s32.totalorder %v7765_v21, %v2179_v55  ;;  %v2165_v57 = vadd.s32 %v2164_v1, %v2162_v33  ;;  %v8055_v50 = vcvt.s32.f32 %v2413_v23 }
 0x608   : > { %v8058_v11 = vsel %vm2292_vm1, 2147483648, %v7765_v21  ;;  %v2207_v62 = vadd.s32 %v2206_v52, %v2204_v58  ;;  %v2189_v18 = vpop.xlane.xlu0 %2188  ;;  %2430 = vmax.xlane.f32.xlu1 %v8052_v14 }
 0x609   : > { %v2276_v43 = vsub.s32 127, %v2260_v35  ;;  %v2259_v41 = vand.u32 127, %v2165_v57  ;;  %vm2291_vm15 = vcmp.eq.s32.totalorder %v7769_v34, %v2165_v57  ;;  %v2190_v40 = vcvt.f32.s32 %v2189_v18  ;;  %2416 = vmax.xlane.f32.xlu0 %v8055_v50  ;;  %v2231_v3 = vpop.xlane.xlu1 %2230 }
 0x60a   : > { %v8064_v1 = vsel %vm2291_vm15, 2147483648, %v7769_v34  ;;  %v2262_v22 = vand.u32 127, %v2207_v62  ;;  %vm2294_vm13 = vcmp.eq.s32.totalorder %v7786_v37, %v2207_v62  ;;  %v2232_v21 = vcvt.f32.s32 %v2231_v3 }
 0x60b   : > { %v8069_v52 = vsel %vm11893_vm14, %v7778_v6, %v2276_v43  ;;  %v2275_v16 = vsub.s32 127, %v2259_v41  ;;  %v8072_v19 = vsel %vm2294_vm13, 2147483648, %v7786_v37  ;;  %v2193_v23 = vadd.s32 %v2192_v60, %v2190_v40 }
 0x60c   : > { %v2278_v55 = vsub.s32 127, %v2262_v22  ;;  %v2235_v33 = vadd.s32 %v2234_v25, %v2232_v21  ;;  %v2217_v28 = vpop.xlane.xlu0 %2216  ;;  %v2455_v58 = vshra.s32 %v8058_v11, 16  ;;  %v2441_v34 = vshra.s32 %v8064_v1, 16 }
 0x60d   : > { %v8078_v35 = vsel %vm11893_vm14, %v7783_v44, %v2275_v16  ;;  %v2261_v57 = vand.u32 127, %v2193_v23  ;;  %vm2293_vm1 = vcmp.eq.s32.totalorder %v7794_v0, %v2193_v23  ;;  %v2218_v6 = vcvt.f32.s32 %v2217_v28 }
 0x60e   : > { %v8083_v37 = vsel %vm11893_vm14, %v7799_v48, %v2278_v55  ;;  %v8086_v60 = vsel %vm2293_vm1, 2147483648, %v7794_v0  ;;  %v2264_v25 = vand.u32 127, %v2235_v33  ;;  %vm2296_vm15 = vcmp.eq.s32.totalorder %v7811_v54, %v2235_v33 }
 0x60f   : > { %v2277_v62 = vsub.s32 127, %v2261_v57  ;;  %v8090_v18 = vsel %vm2296_vm15, 2147483648, %v7811_v54  ;;  %v2221_v44 = vadd.s32 %v2220_v51, %v2218_v6  ;;  %v8092_v43 = vcvt.s32.f32 %v2455_v58 }
 0x610   : > { %v2280_v41 = vsub.s32 127, %v2264_v25  ;;  %v8094_v40 = vcvt.s32.f32 %v2441_v34  ;;  %v2245_v3 = vpop.xlane.xlu0 %2244  ;;  %v2483_v48 = vshra.s32 %v8072_v19, 16  ;;  %v2469_v22 = vshra.s32 %v8086_v60, 16 }
 0x611   : > { %v8100_v0 = vsel %vm11893_vm14, %v7808_v31, %v2277_v62  ;;  %v2263_v21 = vand.u32 127, %v2221_v44  ;;  %vm2295_vm13 = vcmp.eq.s32.totalorder %v7814_v32, %v2221_v44  ;;  %2458 = vmax.xlane.f32.xlu1 %v8092_v43  ;;  %v2246_v54 = vcvt.f32.s32 %v2245_v3 }
 0x612   : > { %v8106_v51 = vsel %vm11893_vm14, %v7827_v10, %v2280_v41  ;;  %v8109_v16 = vsel %vm2295_vm13, 2147483648, %v7814_v32  ;;  %2444 = vmax.xlane.f32.xlu0 %v8094_v40  ;;  %v8112_v23 = vcvt.s32.f32 %v2483_v48  ;;  %v8114_v55 = vcvt.s32.f32 %v2469_v22 }
 0x613   : > { %v2279_v31 = vsub.s32 127, %v2263_v21  ;;  %v2249_v33 = vadd.s32 %v2248_v42, %v2246_v54  ;;  %v2511_v28 = vshra.s32 %v8090_v18, 16  ;;  %v2497_v58 = vshra.s32 %v8109_v16, 16 }
 0x614   : > { %v2342_v54 = vand.u32 65535, %v7966_v5 }
 0x615   : > { %v8120_v34 = vsel %vm11893_vm14, %v7831_v59, %v2279_v31  ;;  %v2265_v10 = vand.u32 127, %v2249_v33  ;;  %vm2297_vm1 = vcmp.eq.s32.totalorder %v7839_v45, %v2249_v33  ;;  %2486 = vmax.xlane.f32.xlu1 %v8112_v23  ;;  %v8124_v32 = vcvt.s32.f32 %v2511_v28 }
 0x616   : > { %v8127_v57 = vsel %vm2297_vm1, 2147483648, %v7839_v45  ;;  %2472 = vmax.xlane.f32.xlu0 %v8114_v55  ;;  %v8130_v42 = vcvt.s32.f32 %v2497_v58  ;;  %v2328_v45 = vand.u32 65535, %v7937_v63  ;;  %v2344_v33 = vcvt.s32.f32 %v2342_v54 }
 0x617   : > { %v2281_v6 = vsub.s32 127, %v2265_v10  ;;  %v2525_v25 = vshra.s32 %v8127_v57, 16  ;;  %v2370_v28 = vand.u32 65535, %v7978_v39 }
 0x618   : > { %v2330_v41 = vcvt.s32.f32 %v2328_v45 }
 0x619   : > { %v8135_v59 = vsel %vm11893_vm14, %v7848_v29, %v2281_v6  ;;  %2514 = vmax.xlane.f32.xlu1 %v8124_v32  ;;  %v8139_v62 = vcvt.s32.f32 %v2525_v25  ;;  %v2314_v29 = vand.u32 65535, %v7951_v9  ;;  %v2372_v6 = vcvt.s32.f32 %v2370_v28 }
 0x61a   : > { %2500 = vmax.xlane.f32.xlu0 %v8130_v42  ;;  %v2412_v28 = vand.u32 65535, %v8040_v20  ;;  %vm5786_vm14 = vcmask 31744  }
 0x61b   : > { %v2316_v22 = vcvt.s32.f32 %v2314_v29 }
 0x61e   : > { %2528 = vmax.xlane.f32.xlu0 %v8139_v62 }
 0x671   : > { %v8143_v44 = vpop.xlane.xlu0 %2332 }
 0x672   : > { %vm2334_vm15 = vcmp.eq.f32.partialorder %v7945_v27, %v8143_v44  ;;  %v2356_v27 = vand.u32 65535, %v7982_v2 }
 0x673   : > { %v2335_v3 = vsel %vm2334_vm15, %v2330_v41, -inf  ;;  %v2398_v41 = vand.u32 65535, %v8004_v26 }
 0x674   : > { %2336 = vmax.xlane.f32.xlu0 %v2335_v3  ;;  %v2358_v25 = vcvt.s32.f32 %v2356_v27  ;;  %v2384_v3 = vand.u32 65535, %v8009_v17 }
 0x67c   : > { %v8148_v48 = vpop.xlane.xlu1 %2318 }
 0x67d   : > { %vm2320_vm13 = vcmp.eq.f32.partialorder %v7958_v13, %v8148_v48 }
 0x67e   : > { %v2321_v21 = vsel %vm2320_vm13, %v2316_v22, -inf  ;;  %v2400_v22 = vcvt.s32.f32 %v2398_v41  ;;  %v2440_v41 = vand.u32 65535, %v8064_v1 }
 0x67f   : > { %2322 = vmax.xlane.f32.xlu1 %v2321_v21 }
 0x682   : > { %v8153_v31 = vpop.xlane.xlu1 %2346 }
 0x683   : > { %vm2348_vm1 = vcmp.eq.f32.partialorder %v7975_v8, %v8153_v31 }
 0x684   : > { %v2349_v58 = vsel %vm2348_vm1, %v2344_v33, -inf  ;;  %v2426_v33 = vand.u32 65535, %v8037_v49 }
 0x685   : > { %2350 = vmax.xlane.f32.xlu1 %v2349_v58 }
 0x686   : > { %v8159_v10 = vpop.xlane.xlu1 %2374  ;;  %v2428_v58 = vcvt.s32.f32 %v2426_v33 }
 0x687   : > { %v8161_v13 = vpop.xlane.xlu0 %2360  ;;  %vm2376_vm15 = vcmp.eq.f32.partialorder %v7992_v36, %v8159_v10  ;;  %v2386_v36 = vcvt.s32.f32 %v2384_v3 }
 0x688   : > { %v2377_v45 = vsel %vm2376_vm15, %v2372_v6, -inf  ;;  %vm2362_vm13 = vcmp.eq.f32.partialorder %v7998_v38, %v8161_v13 }
 0x689   : > { %2378 = vmax.xlane.f32.xlu1 %v2377_v45  ;;  %v2363_v8 = vsel %vm2362_vm13, %v2358_v25, -inf  ;;  %v2454_v45 = vand.u32 65535, %v8058_v11 }
 0x68a   : > { %2364 = vmax.xlane.f32.xlu0 %v2363_v8 }
 0x68b   : > { %v2456_v3 = vcvt.s32.f32 %v2454_v45 }
 0x68c   : > { %v8169_v29 = vpop.xlane.xlu1 %2402 }
 0x68d   : > { %v8171_v21 = vpop.xlane.xlu0 %2388  ;;  %vm2404_vm1 = vcmp.eq.f32.partialorder %v8020_v7, %v8169_v29  ;;  %v2414_v7 = vcvt.s32.f32 %v2412_v28 }
 0x68e   : > { %v2405_v54 = vsel %vm2404_vm1, %v2400_v22, -inf  ;;  %vm2390_vm15 = vcmp.eq.f32.partialorder %v8026_v30, %v8171_v21  ;;  %v2482_v22 = vand.u32 65535, %v8072_v19 }
 0x68f   : > { %2406 = vmax.xlane.f32.xlu1 %v2405_v54  ;;  %v2391_v38 = vsel %vm2390_vm15, %v2386_v36, -inf }
 0x690   : > { %2392 = vmax.xlane.f32.xlu0 %v2391_v38  ;;  %v2484_v28 = vcvt.s32.f32 %v2482_v22 }
 0x695   : > { %v8179_v27 = vpop.xlane.xlu1 %2430 }
 0x696   : > { %v8181_v6 = vpop.xlane.xlu0 %2416  ;;  %vm2432_vm13 = vcmp.eq.f32.partialorder %v8052_v14, %v8179_v27  ;;  %v2442_v14 = vcvt.s32.f32 %v2440_v41 }
 0x697   : > { %v2433_v25 = vsel %vm2432_vm13, %v2428_v58, -inf  ;;  %vm2418_vm1 = vcmp.eq.f32.partialorder %v8055_v50, %v8181_v6  ;;  %v2468_v50 = vand.u32 65535, %v8086_v60  ;;  %v2510_v58 = vand.u32 65535, %v8090_v18 }
 0x698   : > { %2434 = vmax.xlane.f32.xlu1 %v2433_v25  ;;  %v2419_v30 = vsel %vm2418_vm1, %v2414_v7, -inf  ;;  %v2496_v25 = vand.u32 65535, %v8109_v16 }
 0x699   : > { %2420 = vmax.xlane.f32.xlu0 %v2419_v30  ;;  %v2512_v41 = vcvt.s32.f32 %v2510_v58 }
 0x69a   : > { %v2498_v22 = vcvt.s32.f32 %v2496_v25 }
 0x69e   : > { %v8189_v8 = vpop.xlane.xlu1 %2458 }
 0x69f   : > { %v8192_v36 = vpop.xlane.xlu0 %2444  ;;  %vm2460_vm15 = vcmp.eq.f32.partialorder %v8092_v43, %v8189_v8  ;;  %v2470_v43 = vcvt.s32.f32 %v2468_v50 }
 0x6a0   : > { %v2461_v54 = vsel %vm2460_vm15, %v2456_v3, -inf  ;;  %vm2446_vm13 = vcmp.eq.f32.partialorder %v8094_v40, %v8192_v36 }
 0x6a1   : > { %2462 = vmax.xlane.f32.xlu1 %v2461_v54  ;;  %v2447_v38 = vsel %vm2446_vm13, %v2442_v14, -inf }
 0x6a2   : > { %2448 = vmax.xlane.f32.xlu0 %v2447_v38  ;;  %v8199_v33 = vpop.xlane.xlu1 %2486 }
 0x6a3   : > { %v8202_v7 = vpop.xlane.xlu0 %2472  ;;  %vm2488_vm1 = vcmp.eq.f32.partialorder %v8112_v23, %v8199_v33  ;;  %v2524_v23 = vand.u32 65535, %v8127_v57 }
 0x6a4   : > { %v2489_v30 = vsel %vm2488_vm1, %v2484_v28, -inf  ;;  %vm2474_vm15 = vcmp.eq.f32.partialorder %v8114_v55, %v8202_v7 }
 0x6a5   : > { %2490 = vmax.xlane.f32.xlu1 %v2489_v30  ;;  %v2475_v40 = vsel %vm2474_vm15, %v2470_v43, -inf  ;;  %v2526_v54 = vcvt.s32.f32 %v2524_v23 }
 0x6a6   : > { %2476 = vmax.xlane.f32.xlu0 %v2475_v40  ;;  %v8209_v45 = vpop.xlane.xlu1 %2514 }
 0x6a7   : > { %v8211_v3 = vpop.xlane.xlu0 %2500  ;;  %vm2516_vm13 = vcmp.eq.f32.partialorder %v8124_v32, %v8209_v45  ;;  %v2339_v32 = vcvt.f32.s32 %v8143_v44 }
 0x6a8   : > { %v2517_v14 = vsel %vm2516_vm13, %v2512_v41, -inf  ;;  %vm2502_vm1 = vcmp.eq.f32.partialorder %v8130_v42, %v8211_v3 }
 0x6a9   : > { %2518 = vmax.xlane.f32.xlu1 %v2517_v14  ;;  %v2503_v55 = vsel %vm2502_vm1, %v2498_v22, -inf  ;;  %v2340_v58 = vshll.u32 %v2339_v32, 16 }
 0x6aa   : > { %2504 = vmax.xlane.f32.xlu0 %v2503_v55 }
 0x6ab   : > { %v8218_v50 = vpop.xlane.xlu0 %2528 }
 0x6ac   : > { %vm2530_vm15 = vcmp.eq.f32.partialorder %v8139_v62, %v8218_v50  ;;  %v2325_v62 = vcvt.f32.s32 %v8148_v48 }
 0x6ad   : > { %v2531_v38 = vsel %vm2530_vm15, %v2526_v54, -inf }
 0x6ae   : > { %2532 = vmax.xlane.f32.xlu0 %v2531_v38  ;;  %v2326_v14 = vshll.u32 %v2325_v62, 16 }
 0x701   : > { %v2337_v28 = vpop.xlane.xlu0 %2336 }
 0x702   : > { %v2338_v43 = vcvt.f32.s32 %v2337_v28 }
 0x704   : > { %v2341_v25 = vadd.s32 %v2340_v58, %v2338_v43 }
 0x706   : > { %v2539_v30 = vand.u32 127, %v2341_v25  ;;  %vm2571_vm13 = vcmp.eq.s32.totalorder %v7937_v63, %v2341_v25 }
 0x707   : > { %v8225_v42 = vsel %vm2571_vm13, 2147483648, %v7937_v63  ;;  %v2353_v63 = vcvt.f32.s32 %v8153_v31 }
 0x708   : > { %v2555_v40 = vsub.s32 127, %v2539_v30  ;;  %v2617_v41 = vshra.s32 %v8225_v42, 16  ;;  %v2381_v30 = vcvt.f32.s32 %v8159_v10 }
 0x709   : > { %v2354_v25 = vshll.u32 %v2353_v63, 16 }
 0x70a   : > { %v8231_v22 = vsel %vm5786_vm14, %v7943_v53, %v2555_v40  ;;  %v8233_v44 = vcvt.s32.f32 %v2617_v41  ;;  %v2367_v41 = vcvt.f32.s32 %v8161_v13  ;;  %v2382_v62 = vshll.u32 %v2381_v30, 16 }
 0x70c   : > { %2620 = vmax.xlane.f32.xlu0 %v8233_v44  ;;  %v2323_v23 = vpop.xlane.xlu1 %2322 }
 0x70d   : > { %v2324_v55 = vcvt.f32.s32 %v2323_v23 }
 0x70f   : > { %v2327_v54 = vadd.s32 %v2326_v14, %v2324_v55  ;;  %v2368_v55 = vshll.u32 %v2367_v41, 16 }
 0x711   : > { %v2538_v38 = vand.u32 127, %v2327_v54  ;;  %vm2570_vm1 = vcmp.eq.s32.totalorder %v7951_v9, %v2327_v54  ;;  %v2409_v54 = vcvt.f32.s32 %v8169_v29 }
 0x712   : > { %v8239_v32 = vsel %vm2570_vm1, 2147483648, %v7951_v9  ;;  %v2351_v58 = vpop.xlane.xlu1 %2350 }
 0x713   : > { %v2554_v48 = vsub.s32 127, %v2538_v38  ;;  %v2603_v53 = vshra.s32 %v8239_v32, 16  ;;  %v2352_v40 = vcvt.f32.s32 %v2351_v58  ;;  %v2410_v29 = vshll.u32 %v2409_v54, 16 }
 0x715   : > { %v8244_v28 = vsel %vm5786_vm14, %v7956_v15, %v2554_v48  ;;  %v8246_v43 = vcvt.s32.f32 %v2603_v53  ;;  %v2355_v9 = vadd.s32 %v2354_v25, %v2352_v40  ;;  %v2395_v53 = vcvt.f32.s32 %v8171_v21 }
 0x716   : > { %v2379_v31 = vpop.xlane.xlu1 %2378 }
 0x717   : > { %2606 = vmax.xlane.f32.xlu1 %v8246_v43  ;;  %v2540_v23 = vand.u32 127, %v2355_v9  ;;  %vm2572_vm15 = vcmp.eq.s32.totalorder %v7966_v5, %v2355_v9  ;;  %v2380_v14 = vcvt.f32.s32 %v2379_v31  ;;  %v2365_v15 = vpop.xlane.xlu0 %2364 }
 0x718   : > { %v8254_v38 = vsel %vm2572_vm15, 2147483648, %v7966_v5  ;;  %v2366_v10 = vcvt.f32.s32 %v2365_v15 }
 0x719   : > { %v2556_v63 = vsub.s32 127, %v2540_v23  ;;  %v2383_v48 = vadd.s32 %v2382_v62, %v2380_v14  ;;  %v2631_v13 = vshra.s32 %v8254_v38, 16  ;;  %v2396_v14 = vshll.u32 %v2395_v53, 16 }
 0x71a   : > { %v2369_v58 = vadd.s32 %v2368_v55, %v2366_v10  ;;  %v2437_v53 = vcvt.f32.s32 %v8179_v27 }
 0x71b   : > { %v8260_v25 = vsel %vm5786_vm14, %v7972_v24, %v2556_v63  ;;  %v2542_v30 = vand.u32 127, %v2383_v48  ;;  %vm2574_vm13 = vcmp.eq.s32.totalorder %v7978_v39, %v2383_v48  ;;  %v8263_v40 = vcvt.s32.f32 %v2631_v13 }
 0x71c   : > { %v8266_v5 = vsel %vm2574_vm13, 2147483648, %v7978_v39  ;;  %v2541_v41 = vand.u32 127, %v2369_v58  ;;  %vm2573_vm1 = vcmp.eq.s32.totalorder %v7982_v2, %v2369_v58  ;;  %v2407_v9 = vpop.xlane.xlu1 %2406 }
 0x71d   : > { %v2558_v31 = vsub.s32 127, %v2542_v30  ;;  %v8270_v21 = vsel %vm2573_vm1, 2147483648, %v7982_v2  ;;  %v2408_v62 = vcvt.f32.s32 %v2407_v9  ;;  %v2393_v24 = vpop.xlane.xlu0 %2392  ;;  %2634 = vmax.xlane.f32.xlu1 %v8263_v40  ;;  %v2659_v23 = vshra.s32 %v8266_v5, 16 }
 0x71e   : > { %v2557_v15 = vsub.s32 127, %v2541_v41  ;;  %v2394_v55 = vcvt.f32.s32 %v2393_v24  ;;  %v2645_v39 = vshra.s32 %v8270_v21, 16 }
 0x71f   : > { %v8277_v54 = vsel %vm5786_vm14, %v7990_v46, %v2558_v31  ;;  %v2411_v10 = vadd.s32 %v2410_v29, %v2408_v62  ;;  %v8279_v63 = vcvt.s32.f32 %v2659_v23  ;;  %v2438_v23 = vshll.u32 %v2437_v53, 16 }
 0x720   : > { %v8283_v2 = vsel %vm5786_vm14, %v7996_v47, %v2557_v15  ;;  %v2397_v48 = vadd.s32 %v2396_v14, %v2394_v55  ;;  %v8285_v13 = vcvt.s32.f32 %v2645_v39  ;;  %v2423_v47 = vcvt.f32.s32 %v8181_v6 }
 0x721   : > { %v2544_v58 = vand.u32 127, %v2411_v10  ;;  %vm2576_vm15 = vcmp.eq.s32.totalorder %v8004_v26, %v2411_v10  ;;  %2662 = vmax.xlane.f32.xlu1 %v8279_v63 }
 0x722   : > { %v8291_v46 = vsel %vm2576_vm15, 2147483648, %v8004_v26  ;;  %v2543_v30 = vand.u32 127, %v2397_v48  ;;  %vm2575_vm13 = vcmp.eq.s32.totalorder %v8009_v17, %v2397_v48  ;;  %2648 = vmax.xlane.f32.xlu0 %v8285_v13  ;;  %v2424_v55 = vshll.u32 %v2423_v47, 16 }
 0x723   : > { %v2560_v29 = vsub.s32 127, %v2544_v58  ;;  %v8297_v41 = vsel %vm2575_vm13, 2147483648, %v8009_v17  ;;  %v2687_v9 = vshra.s32 %v8291_v46, 16 }
 0x724   : > { %v2559_v31 = vsub.s32 127, %v2543_v30  ;;  %v2673_v62 = vshra.s32 %v8297_v41, 16  ;;  %v2451_v30 = vcvt.f32.s32 %v8192_v36 }
 0x725   : > { %v8303_v26 = vsel %vm5786_vm14, %v8018_v4, %v2560_v29  ;;  %v2435_v27 = vpop.xlane.xlu1 %2434  ;;  %v8305_v24 = vcvt.s32.f32 %v2687_v9  ;;  %v2465_v4 = vcvt.f32.s32 %v8189_v8  ;;  %v2493_v8 = vcvt.f32.s32 %v8199_v33 }
 0x726   : > { %v8309_v6 = vsel %vm5786_vm14, %v8024_v61, %v2559_v31  ;;  %v2436_v14 = vcvt.f32.s32 %v2435_v27  ;;  %v2421_v17 = vpop.xlane.xlu0 %2420  ;;  %v8311_v15 = vcvt.s32.f32 %v2673_v62 }
 0x727   : > { %v2422_v39 = vcvt.f32.s32 %v2421_v17  ;;  %2690 = vmax.xlane.f32.xlu1 %v8305_v24  ;;  %v2466_v31 = vshll.u32 %v2465_v4, 16 }
 0x728   : > { %v2439_v10 = vadd.s32 %v2438_v23, %v2436_v14  ;;  %2676 = vmax.xlane.f32.xlu0 %v8311_v15  ;;  %v2521_v23 = vcvt.f32.s32 %v8209_v45 }
 0x729   : > { %v2425_v48 = vadd.s32 %v2424_v55, %v2422_v39 }
 0x72a   : > { %v2546_v58 = vand.u32 127, %v2439_v10  ;;  %vm2578_vm1 = vcmp.eq.s32.totalorder %v8037_v49, %v2439_v10 }
 0x72b   : > { %v8318_v61 = vsel %vm2578_vm1, 2147483648, %v8037_v49  ;;  %v2545_v53 = vand.u32 127, %v2425_v48  ;;  %vm2577_vm15 = vcmp.eq.s32.totalorder %v8040_v20, %v2425_v48  ;;  %v2479_v49 = vcvt.f32.s32 %v8202_v7 }
 0x72c   : > { %v2562_v47 = vsub.s32 127, %v2546_v58  ;;  %v8323_v29 = vsel %vm2577_vm15, 2147483648, %v8040_v20  ;;  %v2715_v9 = vshra.s32 %v8318_v61, 16  ;;  %v2507_v20 = vcvt.f32.s32 %v8211_v3 }
 0x72d   : > { %v2561_v62 = vsub.s32 127, %v2545_v53  ;;  %v2701_v27 = vshra.s32 %v8323_v29, 16  ;;  %v2452_v7 = vshll.u32 %v2451_v30, 16  ;;  %v2494_v48 = vshll.u32 %v2493_v8, 16 }
 0x72e   : > { %v8332_v14 = vsel %vm5786_vm14, %v8046_v12, %v2562_v47  ;;  %v2463_v36 = vpop.xlane.xlu1 %2462  ;;  %v8334_v17 = vcvt.s32.f32 %v2715_v9  ;;  %v2535_v12 = vcvt.f32.s32 %v8218_v50  ;;  %v2480_v58 = vshll.u32 %v2479_v49, 16 }
 0x72f   : > { %v8339_v55 = vsel %vm5786_vm14, %v8050_v56, %v2561_v62  ;;  %v2464_v33 = vcvt.f32.s32 %v2463_v36  ;;  %v2449_v39 = vpop.xlane.xlu0 %2448  ;;  %v8341_v10 = vcvt.s32.f32 %v2701_v27  ;;  %v2522_v3 = vshll.u32 %v2521_v23, 16 }
 0x730   : > { %v2450_v4 = vcvt.f32.s32 %v2449_v39  ;;  %2718 = vmax.xlane.f32.xlu1 %v8334_v17  ;;  %v2508_v56 = vshll.u32 %v2507_v20, 16 }
 0x731   : > { %v2467_v45 = vadd.s32 %v2466_v31, %v2464_v33  ;;  %2704 = vmax.xlane.f32.xlu0 %v8341_v10  ;;  %v2536_v31 = vshll.u32 %v2535_v12, 16 }
 0x732   : > { %v2453_v53 = vadd.s32 %v2452_v7, %v2450_v4  ;;  %v2491_v47 = vpop.xlane.xlu1 %2490 }
 0x733   : > { %v2548_v9 = vand.u32 127, %v2467_v45  ;;  %vm2580_vm13 = vcmp.eq.s32.totalorder %v8058_v11, %v2467_v45  ;;  %v2492_v62 = vcvt.f32.s32 %v2491_v47  ;;  %v2477_v27 = vpop.xlane.xlu0 %2476 }
 0x734   : > { %v8348_v30 = vsel %vm2580_vm13, 2147483648, %v8058_v11  ;;  %v2547_v36 = vand.u32 127, %v2453_v53  ;;  %vm2579_vm1 = vcmp.eq.s32.totalorder %v8064_v1, %v2453_v53  ;;  %v2478_v50 = vcvt.f32.s32 %v2477_v27 }
 0x735   : > { %v2564_v33 = vsub.s32 127, %v2548_v9  ;;  %v8352_v8 = vsel %vm2579_vm1, 2147483648, %v8064_v1  ;;  %v2495_v49 = vadd.s32 %v2494_v48, %v2492_v62  ;;  %v2743_v7 = vshra.s32 %v8348_v30, 16 }
 0x736   : > { %v2563_v23 = vsub.s32 127, %v2547_v36  ;;  %v2481_v20 = vadd.s32 %v2480_v58, %v2478_v50  ;;  %v2519_v39 = vpop.xlane.xlu1 %2518  ;;  %v2729_v4 = vshra.s32 %v8352_v8, 16 }
 0x737   : > { %v8358_v11 = vsel %vm5786_vm14, %v8069_v52, %v2564_v33  ;;  %v2550_v45 = vand.u32 127, %v2495_v49  ;;  %vm2582_vm15 = vcmp.eq.s32.totalorder %v8072_v19, %v2495_v49  ;;  %v2520_v12 = vcvt.f32.s32 %v2519_v39  ;;  %v2505_v53 = vpop.xlane.xlu0 %2504 }
 0x738   : > { %v8363_v1 = vsel %vm5786_vm14, %v8078_v35, %v2563_v23  ;;  %v8366_v48 = vsel %vm2582_vm15, 2147483648, %v8072_v19  ;;  %v2549_v58 = vand.u32 127, %v2481_v20  ;;  %vm2581_vm13 = vcmp.eq.s32.totalorder %v8086_v60, %v2481_v20 }
 0x739   : > { %v2566_v47 = vsub.s32 127, %v2550_v45  ;;  %v8370_v9 = vsel %vm2581_vm13, 2147483648, %v8086_v60  ;;  %v2523_v52 = vadd.s32 %v2522_v3, %v2520_v12  ;;  %v2506_v62 = vcvt.f32.s32 %v2505_v53 }
 0x73a   : > { %v2565_v27 = vsub.s32 127, %v2549_v58  ;;  %v8372_v36 = vcvt.s32.f32 %v2743_v7  ;;  %v8374_v50 = vcvt.s32.f32 %v2729_v4  ;;  %v2771_v35 = vshra.s32 %v8366_v48, 16 }
 0x73b   : > { %v8379_v19 = vsel %vm5786_vm14, %v8083_v37, %v2566_v47  ;;  %v2552_v33 = vand.u32 127, %v2523_v52  ;;  %vm2584_vm1 = vcmp.eq.s32.totalorder %v8090_v18, %v2523_v52  ;;  %v2509_v49 = vadd.s32 %v2508_v56, %v2506_v62  ;;  %v2533_v23 = vpop.xlane.xlu0 %2532 }
 0x73c   : > { %v8384_v60 = vsel %vm5786_vm14, %v8100_v0, %v2565_v27  ;;  %v8387_v3 = vsel %vm2584_vm1, 2147483648, %v8090_v18  ;;  %2746 = vmax.xlane.f32.xlu1 %v8372_v36  ;;  %2732 = vmax.xlane.f32.xlu0 %v8374_v50  ;;  %v2534_v20 = vcvt.f32.s32 %v2533_v23  ;;  %v8391_v39 = vcvt.s32.f32 %v2771_v35 }
 0x73d   : > { %v2568_v37 = vsub.s32 127, %v2552_v33  ;;  %v2551_v7 = vand.u32 127, %v2509_v49  ;;  %vm2583_vm15 = vcmp.eq.s32.totalorder %v8109_v16, %v2509_v49  ;;  %v2757_v56 = vshra.s32 %v8370_v9, 16 }
 0x73e   : > { %v8396_v4 = vsel %vm2583_vm15, 2147483648, %v8109_v16  ;;  %v2537_v0 = vadd.s32 %v2536_v31, %v2534_v20  ;;  %v2799_v18 = vshra.s32 %v8387_v3, 16 }
 0x73f   : > { %v8401_v45 = vsel %vm5786_vm14, %v8106_v51, %v2568_v37  ;;  %v2567_v12 = vsub.s32 127, %v2551_v7  ;;  %v8403_v53 = vcvt.s32.f32 %v2757_v56  ;;  %v2785_v58 = vshra.s32 %v8396_v4, 16 }
 0x740   : > { %v2553_v47 = vand.u32 127, %v2537_v0  ;;  %vm2585_vm13 = vcmp.eq.s32.totalorder %v8127_v57, %v2537_v0  ;;  %2774 = vmax.xlane.f32.xlu1 %v8391_v39  ;;  %v8408_v52 = vcvt.s32.f32 %v2799_v18  ;;  %v2630_v56 = vand.u32 65535, %v8254_v38 }
 0x741   : > { %v8412_v16 = vsel %vm5786_vm14, %v8120_v34, %v2567_v12  ;;  %v8415_v31 = vsel %vm2585_vm13, 2147483648, %v8127_v57  ;;  %2760 = vmax.xlane.f32.xlu0 %v8403_v53  ;;  %v8418_v51 = vcvt.s32.f32 %v2785_v58  ;;  %v2616_v57 = vand.u32 65535, %v8225_v42 }
 0x742   : > { %v2569_v62 = vsub.s32 127, %v2553_v47  ;;  %v2813_v27 = vshra.s32 %v8415_v31, 16  ;;  %v2632_v18 = vcvt.s32.f32 %v2630_v56  ;;  %v2658_v12 = vand.u32 65535, %v8266_v5 }
 0x743   : > { %v2618_v49 = vcvt.s32.f32 %v2616_v57 }
 0x744   : > { %v8423_v35 = vsel %vm5786_vm14, %v8135_v59, %v2569_v62  ;;  %2802 = vmax.xlane.f32.xlu1 %v8408_v52  ;;  %v8427_v34 = vcvt.s32.f32 %v2813_v27  ;;  %v2602_v59 = vand.u32 65535, %v8239_v32  ;;  %v2660_v62 = vcvt.s32.f32 %v2658_v12 }
 0x745   : > { %2788 = vmax.xlane.f32.xlu0 %v8418_v51  ;;  %v2700_v12 = vand.u32 65535, %v8323_v29 }
 0x746   : > { %v2604_v37 = vcvt.s32.f32 %v2602_v59 }
 0x749   : > { %2816 = vmax.xlane.f32.xlu0 %v8427_v34 }
 0x799   : > { %v8431_v33 = vpop.xlane.xlu0 %2620 }
 0x79a   : > { %vm2622_vm1 = vcmp.eq.f32.partialorder %v8233_v44, %v8431_v33  ;;  %v2644_v44 = vand.u32 65535, %v8270_v21 }
 0x79b   : > { %v2623_v23 = vsel %vm2622_vm1, %v2618_v49, -inf  ;;  %v2686_v49 = vand.u32 65535, %v8291_v46 }
 0x79c   : > { %2624 = vmax.xlane.f32.xlu0 %v2623_v23  ;;  %v2646_v27 = vcvt.s32.f32 %v2644_v44  ;;  %v2672_v23 = vand.u32 65535, %v8297_v41 }
 0x7a4   : > { %v8436_v20 = vpop.xlane.xlu1 %2606 }
 0x7a5   : > { %vm2608_vm14 = vcmp.eq.f32.partialorder %v8246_v43, %v8436_v20 }
 0x7a6   : > { %v2609_v7 = vsel %vm2608_vm14, %v2604_v37, -inf  ;;  %v2688_v37 = vcvt.s32.f32 %v2686_v49  ;;  %v2728_v49 = vand.u32 65535, %v8352_v8 }
 0x7a7   : > { %2610 = vmax.xlane.f32.xlu1 %v2609_v7 }
 0x7aa   : > { %v8441_v0 = vpop.xlane.xlu1 %2634 }
 0x7ab   : > { %vm2636_vm15 = vcmp.eq.f32.partialorder %v8263_v40, %v8441_v0 }
 0x7ac   : > { %v2637_v58 = vsel %vm2636_vm15, %v2632_v18, -inf  ;;  %v2714_v18 = vand.u32 65535, %v8318_v61 }
 0x7ad   : > { %2638 = vmax.xlane.f32.xlu1 %v2637_v58 }
 0x7ae   : > { %v8447_v47 = vpop.xlane.xlu1 %2662  ;;  %v2716_v58 = vcvt.s32.f32 %v2714_v18 }
 0x7af   : > { %v8449_v43 = vpop.xlane.xlu0 %2648  ;;  %vm2664_vm13 = vcmp.eq.f32.partialorder %v8279_v63, %v8447_v47  ;;  %v2674_v63 = vcvt.s32.f32 %v2672_v23 }
 0x7b0   : > { %v2665_v57 = vsel %vm2664_vm13, %v2660_v62, -inf  ;;  %vm2650_vm1 = vcmp.eq.f32.partialorder %v8285_v13, %v8449_v43 }
 0x7b1   : > { %2666 = vmax.xlane.f32.xlu1 %v2665_v57  ;;  %v2651_v40 = vsel %vm2650_vm1, %v2646_v27, -inf  ;;  %v2742_v57 = vand.u32 65535, %v8348_v30 }
 0x7b2   : > { %2652 = vmax.xlane.f32.xlu0 %v2651_v40 }
 0x7b4   : > { %v8457_v59 = vpop.xlane.xlu1 %2690 }
 0x7b5   : > { %v8459_v7 = vpop.xlane.xlu0 %2676  ;;  %vm2692_vm14 = vcmp.eq.f32.partialorder %v8305_v24, %v8457_v59  ;;  %v2702_v24 = vcvt.s32.f32 %v2700_v12 }
 0x7b6   : > { %v2693_v56 = vsel %vm2692_vm14, %v2688_v37, -inf  ;;  %vm2678_vm15 = vcmp.eq.f32.partialorder %v8311_v15, %v8459_v7  ;;  %v2744_v37 = vcvt.s32.f32 %v2742_v57 }
 0x7b7   : > { %2694 = vmax.xlane.f32.xlu1 %v2693_v56  ;;  %v2679_v13 = vsel %vm2678_vm15, %v2674_v63, -inf  ;;  %v2730_v63 = vcvt.s32.f32 %v2728_v49 }
 0x7b8   : > { %2680 = vmax.xlane.f32.xlu0 %v2679_v13 }
 0x7bd   : > { %v8467_v44 = vpop.xlane.xlu1 %2718 }
 0x7be   : > { %v8469_v62 = vpop.xlane.xlu0 %2704  ;;  %vm2720_vm13 = vcmp.eq.f32.partialorder %v8334_v17, %v8467_v44  ;;  %v2770_v17 = vand.u32 65535, %v8366_v48 }
 0x7bf   : > { %v2721_v27 = vsel %vm2720_vm13, %v2716_v58, -inf  ;;  %vm2706_vm1 = vcmp.eq.f32.partialorder %v8341_v10, %v8469_v62  ;;  %v2756_v10 = vand.u32 65535, %v8370_v9  ;;  %v2798_v58 = vand.u32 65535, %v8387_v3 }
 0x7c0   : > { %2722 = vmax.xlane.f32.xlu1 %v2721_v27  ;;  %v2707_v15 = vsel %vm2706_vm1, %v2702_v24, -inf  ;;  %v2772_v12 = vcvt.s32.f32 %v2770_v17  ;;  %v2784_v27 = vand.u32 65535, %v8396_v4 }
 0x7c1   : > { %2708 = vmax.xlane.f32.xlu0 %v2707_v15  ;;  %v2800_v49 = vcvt.s32.f32 %v2798_v58 }
 0x7c9   : > { %v8477_v40 = vpop.xlane.xlu1 %2746  ;;  %v8479_v23 = vpop.xlane.xlu0 %2732 }
 0x7ca   : > { %vm2748_vm14 = vcmp.eq.f32.partialorder %v8372_v36, %v8477_v40  ;;  %vm2734_vm15 = vcmp.eq.f32.partialorder %v8374_v50, %v8479_v23  ;;  %v2758_v36 = vcvt.s32.f32 %v2756_v10 }
 0x7cb   : > { %v2749_v56 = vsel %vm2748_vm14, %v2744_v37, -inf  ;;  %v2735_v13 = vsel %vm2734_vm15, %v2730_v63, -inf  ;;  %v2786_v63 = vcvt.s32.f32 %v2784_v27 }
 0x7cc   : > { %2750 = vmax.xlane.f32.xlu1 %v2749_v56  ;;  %2736 = vmax.xlane.f32.xlu0 %v2735_v13 }
 0x7cd   : > { %v8487_v18 = vpop.xlane.xlu1 %2774 }
 0x7ce   : > { %v8490_v24 = vpop.xlane.xlu0 %2760  ;;  %vm2776_vm13 = vcmp.eq.f32.partialorder %v8391_v39, %v8487_v18  ;;  %v2812_v39 = vand.u32 65535, %v8415_v31 }
 0x7cf   : > { %v2777_v50 = vsel %vm2776_vm13, %v2772_v12, -inf  ;;  %vm2762_vm1 = vcmp.eq.f32.partialorder %v8403_v53, %v8490_v24 }
 0x7d0   : > { %2778 = vmax.xlane.f32.xlu1 %v2777_v50  ;;  %v2763_v15 = vsel %vm2762_vm1, %v2758_v36, -inf  ;;  %v2814_v56 = vcvt.s32.f32 %v2812_v39 }
 0x7d1   : > { %2764 = vmax.xlane.f32.xlu0 %v2763_v15  ;;  %v8497_v57 = vpop.xlane.xlu1 %2802 }
 0x7d2   : > { %v8499_v37 = vpop.xlane.xlu0 %2788  ;;  %vm2804_vm14 = vcmp.eq.f32.partialorder %v8408_v52, %v8497_v57  ;;  %v2627_v52 = vcvt.f32.s32 %v8431_v33 }
 0x7d3   : > { %v2805_v17 = vsel %vm2804_vm14, %v2800_v49, -inf  ;;  %vm2790_vm15 = vcmp.eq.f32.partialorder %v8418_v51, %v8499_v37  ;;  %vm5803_vm14 = vcmask 39936  }
 0x7d4   : > { %2806 = vmax.xlane.f32.xlu1 %v2805_v17  ;;  %v2791_v53 = vsel %vm2790_vm15, %v2786_v63, -inf  ;;  %v2628_v58 = vshll.u32 %v2627_v52, 16 }
 0x7d5   : > { %2792 = vmax.xlane.f32.xlu0 %v2791_v53 }
 0x7d6   : > { %v8506_v10 = vpop.xlane.xlu0 %2816 }
 0x7d7   : > { %vm2818_vm13 = vcmp.eq.f32.partialorder %v8427_v34, %v8506_v10  ;;  %v2613_v34 = vcvt.f32.s32 %v8436_v20 }
 0x7d8   : > { %v2819_v13 = vsel %vm2818_vm13, %v2814_v56, -inf }
 0x7d9   : > { %2820 = vmax.xlane.f32.xlu0 %v2819_v13  ;;  %v2614_v17 = vshll.u32 %v2613_v34, 16 }
 0x829   : > { %v2625_v12 = vpop.xlane.xlu0 %2624 }
 0x82a   : > { %v2626_v36 = vcvt.f32.s32 %v2625_v12 }
 0x82c   : > { %v2629_v27 = vadd.s32 %v2628_v58, %v2626_v36 }
 0x82e   : > { %v2827_v50 = vand.u32 127, %v2629_v27  ;;  %vm2859_vm1 = vcmp.eq.s32.totalorder %v8225_v42, %v2629_v27 }
 0x82f   : > { %v8513_v51 = vsel %vm2859_vm1, 2147483648, %v8225_v42  ;;  %v2641_v42 = vcvt.f32.s32 %v8441_v0 }
 0x830   : > { %v2843_v15 = vsub.s32 127, %v2827_v50  ;;  %v2905_v49 = vshra.s32 %v8513_v51, 16  ;;  %v2669_v50 = vcvt.f32.s32 %v8447_v47 }
 0x831   : > { %v2642_v27 = vshll.u32 %v2641_v42, 16 }
 0x832   : > { %v8519_v63 = vsel %vm5803_vm14, %v8231_v22, %v2843_v15  ;;  %v8521_v33 = vcvt.s32.f32 %v2905_v49  ;;  %v2655_v49 = vcvt.f32.s32 %v8449_v43  ;;  %v2670_v34 = vshll.u32 %v2669_v50, 16 }
 0x834   : > { %2908 = vmax.xlane.f32.xlu0 %v8521_v33  ;;  %v2611_v39 = vpop.xlane.xlu1 %2610 }
 0x835   : > { %v2612_v53 = vcvt.f32.s32 %v2611_v39 }
 0x837   : > { %v2615_v56 = vadd.s32 %v2614_v17, %v2612_v53  ;;  %v2656_v53 = vshll.u32 %v2655_v49, 16 }
 0x839   : > { %v2826_v13 = vand.u32 127, %v2615_v56  ;;  %vm2858_vm15 = vcmp.eq.s32.totalorder %v8239_v32, %v2615_v56  ;;  %v2697_v56 = vcvt.f32.s32 %v8457_v59 }
 0x83a   : > { %v8527_v52 = vsel %vm2858_vm15, 2147483648, %v8239_v32  ;;  %v2639_v58 = vpop.xlane.xlu1 %2638 }
 0x83b   : > { %v2842_v20 = vsub.s32 127, %v2826_v13  ;;  %v2891_v22 = vshra.s32 %v8527_v52, 16  ;;  %v2640_v15 = vcvt.f32.s32 %v2639_v58  ;;  %v2698_v59 = vshll.u32 %v2697_v56, 16 }
 0x83d   : > { %v8532_v12 = vsel %vm5803_vm14, %v8244_v28, %v2842_v20  ;;  %v8534_v36 = vcvt.s32.f32 %v2891_v22  ;;  %v2643_v32 = vadd.s32 %v2642_v27, %v2640_v15  ;;  %v2683_v22 = vcvt.f32.s32 %v8459_v7 }
 0x83e   : > { %v2667_v0 = vpop.xlane.xlu1 %2666 }
 0x83f   : > { %2894 = vmax.xlane.f32.xlu1 %v8534_v36  ;;  %v2828_v39 = vand.u32 127, %v2643_v32  ;;  %vm2860_vm13 = vcmp.eq.s32.totalorder %v8254_v38, %v2643_v32  ;;  %v2668_v17 = vcvt.f32.s32 %v2667_v0  ;;  %v2653_v28 = vpop.xlane.xlu0 %2652 }
 0x840   : > { %v8542_v13 = vsel %vm2860_vm13, 2147483648, %v8254_v38  ;;  %v2654_v47 = vcvt.f32.s32 %v2653_v28 }
 0x841   : > { %v2844_v42 = vsub.s32 127, %v2828_v39  ;;  %v2671_v20 = vadd.s32 %v2670_v34, %v2668_v17  ;;  %v2919_v43 = vshra.s32 %v8542_v13, 16  ;;  %v2684_v17 = vshll.u32 %v2683_v22, 16 }
 0x842   : > { %v2657_v58 = vadd.s32 %v2656_v53, %v2654_v47  ;;  %v2725_v22 = vcvt.f32.s32 %v8467_v44 }
 0x843   : > { %v8548_v27 = vsel %vm5803_vm14, %v8260_v25, %v2844_v42  ;;  %v2830_v50 = vand.u32 127, %v2671_v20  ;;  %vm2862_vm1 = vcmp.eq.s32.totalorder %v8266_v5, %v2671_v20  ;;  %v8551_v15 = vcvt.s32.f32 %v2919_v43 }
 0x844   : > { %v8554_v38 = vsel %vm2862_vm1, 2147483648, %v8266_v5  ;;  %v2829_v49 = vand.u32 127, %v2657_v58  ;;  %vm2861_vm15 = vcmp.eq.s32.totalorder %v8270_v21, %v2657_v58  ;;  %v2695_v32 = vpop.xlane.xlu1 %2694 }
 0x845   : > { %v2846_v0 = vsub.s32 127, %v2830_v50  ;;  %v8558_v7 = vsel %vm2861_vm15, 2147483648, %v8270_v21  ;;  %v2696_v34 = vcvt.f32.s32 %v2695_v32  ;;  %v2681_v25 = vpop.xlane.xlu0 %2680  ;;  %2922 = vmax.xlane.f32.xlu1 %v8551_v15  ;;  %v2947_v39 = vshra.s32 %v8554_v38, 16 }
 0x846   : > { %v2845_v28 = vsub.s32 127, %v2829_v49  ;;  %v2682_v53 = vcvt.f32.s32 %v2681_v25  ;;  %v2933_v5 = vshra.s32 %v8558_v7, 16 }
 0x847   : > { %v8565_v56 = vsel %vm5803_vm14, %v8277_v54, %v2846_v0  ;;  %v2699_v47 = vadd.s32 %v2698_v59, %v2696_v34  ;;  %v8567_v42 = vcvt.s32.f32 %v2947_v39  ;;  %v2726_v39 = vshll.u32 %v2725_v22, 16 }
 0x848   : > { %v8571_v21 = vsel %vm5803_vm14, %v8283_v2, %v2845_v28  ;;  %v2685_v20 = vadd.s32 %v2684_v17, %v2682_v53  ;;  %v8573_v43 = vcvt.s32.f32 %v2933_v5  ;;  %v2711_v2 = vcvt.f32.s32 %v8469_v62 }
 0x849   : > { %v2832_v58 = vand.u32 127, %v2699_v47  ;;  %vm2864_vm13 = vcmp.eq.s32.totalorder %v8291_v46, %v2699_v47  ;;  %2950 = vmax.xlane.f32.xlu1 %v8567_v42 }
 0x84a   : > { %v8579_v54 = vsel %vm2864_vm13, 2147483648, %v8291_v46  ;;  %v2831_v50 = vand.u32 127, %v2685_v20  ;;  %vm2863_vm1 = vcmp.eq.s32.totalorder %v8297_v41, %v2685_v20  ;;  %2936 = vmax.xlane.f32.xlu0 %v8573_v43  ;;  %v2712_v53 = vshll.u32 %v2711_v2, 16 }
 0x84b   : > { %v2848_v59 = vsub.s32 127, %v2832_v58  ;;  %v8585_v49 = vsel %vm2863_vm1, 2147483648, %v8297_v41  ;;  %v2975_v32 = vshra.s32 %v8579_v54, 16 }
 0x84c   : > { %v2847_v0 = vsub.s32 127, %v2831_v50  ;;  %v2961_v34 = vshra.s32 %v8585_v49, 16 }
 0x84d   : > { %v8591_v46 = vsel %vm5803_vm14, %v8303_v26, %v2848_v59  ;;  %v2723_v44 = vpop.xlane.xlu1 %2722  ;;  %v8593_v25 = vcvt.s32.f32 %v2975_v32 }
 0x84e   : > { %v8597_v62 = vsel %vm5803_vm14, %v8309_v6, %v2847_v0  ;;  %v2724_v17 = vcvt.f32.s32 %v2723_v44  ;;  %v2709_v41 = vpop.xlane.xlu0 %2708  ;;  %v8599_v28 = vcvt.s32.f32 %v2961_v34  ;;  %v2753_v0 = vcvt.f32.s32 %v8477_v40 }
 0x84f   : > { %v2710_v5 = vcvt.f32.s32 %v2709_v41  ;;  %2978 = vmax.xlane.f32.xlu1 %v8593_v25  ;;  %v2739_v34 = vcvt.f32.s32 %v8479_v23  ;;  %v2767_v40 = vcvt.f32.s32 %v8490_v24  ;;  %v2809_v23 = vcvt.f32.s32 %v8497_v57 }
 0x850   : > { %v2727_v47 = vadd.s32 %v2726_v39, %v2724_v17  ;;  %2964 = vmax.xlane.f32.xlu0 %v8599_v28  ;;  %v2781_v17 = vcvt.f32.s32 %v8487_v18  ;;  %v2823_v18 = vcvt.f32.s32 %v8506_v10 }
 0x851   : > { %v2713_v26 = vadd.s32 %v2712_v53, %v2710_v5  ;;  %v2740_v5 = vshll.u32 %v2739_v34, 16 }
 0x852   : > { %v2834_v20 = vand.u32 127, %v2727_v47  ;;  %vm2866_vm15 = vcmp.eq.s32.totalorder %v8318_v61, %v2727_v47 }
 0x853   : > { %v8605_v58 = vsel %vm2866_vm15, 2147483648, %v8318_v61  ;;  %v2833_v6 = vand.u32 127, %v2713_v26  ;;  %vm2865_vm13 = vcmp.eq.s32.totalorder %v8323_v29, %v2713_v26 }
 0x854   : > { %v2850_v22 = vsub.s32 127, %v2834_v20  ;;  %v8609_v50 = vsel %vm2865_vm13, 2147483648, %v8323_v29  ;;  %v3003_v2 = vshra.s32 %v8605_v58, 16 }
 0x855   : > { %v2849_v59 = vsub.s32 127, %v2833_v6  ;;  %v2989_v32 = vshra.s32 %v8609_v50, 16 }
 0x856   : > { %v8617_v61 = vsel %vm5803_vm14, %v8332_v14, %v2850_v22  ;;  %v8619_v44 = vcvt.s32.f32 %v3003_v2  ;;  %v2754_v14 = vshll.u32 %v2753_v0, 16  ;;  %v2782_v22 = vshll.u32 %v2781_v17, 16 }
 0x857   : > { %v8623_v39 = vsel %vm5803_vm14, %v8339_v55, %v2849_v59  ;;  %v8625_v29 = vcvt.s32.f32 %v2989_v32  ;;  %v2795_v55 = vcvt.f32.s32 %v8499_v37  ;;  %v2768_v2 = vshll.u32 %v2767_v40, 16 }
 0x858   : > { %3006 = vmax.xlane.f32.xlu1 %v8619_v44  ;;  %v2810_v59 = vshll.u32 %v2809_v23, 16 }
 0x859   : > { %v2751_v41 = vpop.xlane.xlu1 %2750  ;;  %v2737_v53 = vpop.xlane.xlu0 %2736  ;;  %2992 = vmax.xlane.f32.xlu0 %v8625_v29  ;;  %v2796_v40 = vshll.u32 %v2795_v55, 16 }
 0x85a   : > { %v2752_v47 = vcvt.f32.s32 %v2751_v41  ;;  %v2738_v26 = vcvt.f32.s32 %v2737_v53 }
 0x85c   : > { %v2755_v20 = vadd.s32 %v2754_v14, %v2752_v47  ;;  %v2741_v6 = vadd.s32 %v2740_v5, %v2738_v26  ;;  %v2824_v14 = vshll.u32 %v2823_v18, 16 }
 0x85d   : > { %v2779_v24 = vpop.xlane.xlu1 %2778 }
 0x85e   : > { %v2836_v32 = vand.u32 127, %v2755_v20  ;;  %vm2868_vm1 = vcmp.eq.s32.totalorder %v8348_v30, %v2755_v20  ;;  %v2835_v57 = vand.u32 127, %v2741_v6  ;;  %vm2867_vm15 = vcmp.eq.s32.totalorder %v8352_v8, %v2741_v6  ;;  %v2765_v0 = vpop.xlane.xlu0 %2764 }
 0x85f   : > { %v8637_v34 = vsel %vm2868_vm1, 2147483648, %v8348_v30  ;;  %v8640_v37 = vsel %vm2867_vm15, 2147483648, %v8352_v8  ;;  %v2780_v41 = vcvt.f32.s32 %v2779_v24  ;;  %v2766_v17 = vcvt.f32.s32 %v2765_v0 }
 0x860   : > { %v2852_v23 = vsub.s32 127, %v2836_v32  ;;  %v2851_v53 = vsub.s32 127, %v2835_v57  ;;  %v3031_v10 = vshra.s32 %v8637_v34, 16  ;;  %v3017_v20 = vshra.s32 %v8640_v37, 16 }
 0x861   : > { %v2783_v5 = vadd.s32 %v2782_v22, %v2780_v41  ;;  %v2769_v47 = vadd.s32 %v2768_v2, %v2766_v17  ;;  %v2807_v26 = vpop.xlane.xlu1 %2806 }
 0x862   : > { %v8646_v30 = vsel %vm5803_vm14, %v8358_v11, %v2852_v23  ;;  %v8650_v8 = vsel %vm5803_vm14, %v8363_v1, %v2851_v53  ;;  %v2808_v6 = vcvt.f32.s32 %v2807_v26  ;;  %v2793_v55 = vpop.xlane.xlu0 %2792  ;;  %v8652_v24 = vcvt.s32.f32 %v3031_v10 }
 0x863   : > { %v2838_v32 = vand.u32 127, %v2783_v5  ;;  %vm2870_vm13 = vcmp.eq.s32.totalorder %v8366_v48, %v2783_v5  ;;  %v2837_v22 = vand.u32 127, %v2769_v47  ;;  %vm2869_vm1 = vcmp.eq.s32.totalorder %v8370_v9, %v2769_v47 }
 0x864   : > { %v8657_v2 = vsel %vm2870_vm13, 2147483648, %v8366_v48  ;;  %v8660_v11 = vsel %vm2869_vm1, 2147483648, %v8370_v9  ;;  %v2811_v18 = vadd.s32 %v2810_v59, %v2808_v6  ;;  %v2794_v57 = vcvt.f32.s32 %v2793_v55  ;;  %3034 = vmax.xlane.f32.xlu1 %v8652_v24 }
 0x865   : > { %v2854_v1 = vsub.s32 127, %v2838_v32  ;;  %v2853_v0 = vsub.s32 127, %v2837_v22  ;;  %v8663_v41 = vcvt.s32.f32 %v3017_v20  ;;  %v3059_v17 = vshra.s32 %v8657_v2, 16 }
 0x866   : > { %v2840_v23 = vand.u32 127, %v2811_v18  ;;  %vm2872_vm15 = vcmp.eq.s32.totalorder %v8387_v3, %v2811_v18  ;;  %v2797_v53 = vadd.s32 %v2796_v40, %v2794_v57  ;;  %v2821_v10 = vpop.xlane.xlu0 %2820  ;;  %v3045_v48 = vshra.s32 %v8660_v11, 16 }
 0x867   : > { %v8670_v9 = vsel %vm5803_vm14, %v8379_v19, %v2854_v1  ;;  %v8674_v59 = vsel %vm5803_vm14, %v8384_v60, %v2853_v0  ;;  %v8677_v5 = vsel %vm2872_vm15, 2147483648, %v8387_v3  ;;  %3020 = vmax.xlane.f32.xlu0 %v8663_v41  ;;  %v2822_v47 = vcvt.f32.s32 %v2821_v10 }
 0x868   : > { %v2856_v26 = vsub.s32 127, %v2840_v23  ;;  %v2839_v20 = vand.u32 127, %v2797_v53  ;;  %vm2871_vm13 = vcmp.eq.s32.totalorder %v8396_v4, %v2797_v53  ;;  %v8681_v40 = vcvt.s32.f32 %v3059_v17 }
 0x869   : > { %v8684_v6 = vsel %vm2871_vm13, 2147483648, %v8396_v4  ;;  %v2825_v19 = vadd.s32 %v2824_v14, %v2822_v47  ;;  %v8686_v55 = vcvt.s32.f32 %v3045_v48  ;;  %v3087_v60 = vshra.s32 %v8677_v5, 16 }
 0x86a   : > { %v8691_v3 = vsel %vm5803_vm14, %v8401_v45, %v2856_v26  ;;  %v2855_v32 = vsub.s32 127, %v2839_v20  ;;  %3062 = vmax.xlane.f32.xlu1 %v8681_v40  ;;  %v3073_v22 = vshra.s32 %v8684_v6, 16  ;;  %v2890_v48 = vand.u32 65535, %v8527_v52 }
 0x86b   : > { %v2841_v18 = vand.u32 127, %v2825_v19  ;;  %vm2873_vm1 = vcmp.eq.s32.totalorder %v8415_v31, %v2825_v19  ;;  %3048 = vmax.xlane.f32.xlu0 %v8686_v55  ;;  %v8697_v4 = vcvt.s32.f32 %v3087_v60  ;;  %v2918_v20 = vand.u32 65535, %v8542_v13 }
 0x86c   : > { %v8701_v14 = vsel %vm5803_vm14, %v8412_v16, %v2855_v32  ;;  %v8704_v57 = vsel %vm2873_vm1, 2147483648, %v8415_v31  ;;  %v8706_v45 = vcvt.s32.f32 %v3073_v22  ;;  %v2904_v16 = vand.u32 65535, %v8513_v51 }
 0x86d   : > { %v2857_v1 = vsub.s32 127, %v2841_v18  ;;  %v3101_v0 = vshra.s32 %v8704_v57, 16  ;;  %v2892_v47 = vcvt.s32.f32 %v2890_v48  ;;  %v2920_v60 = vcvt.s32.f32 %v2918_v20 }
 0x86e   : > { %3090 = vmax.xlane.f32.xlu1 %v8697_v4  ;;  %v2906_v53 = vcvt.s32.f32 %v2904_v16  ;;  %v2946_v32 = vand.u32 65535, %v8554_v38 }
 0x86f   : > { %v8712_v17 = vsel %vm5803_vm14, %v8423_v35, %v2857_v1  ;;  %3076 = vmax.xlane.f32.xlu0 %v8706_v45  ;;  %v8715_v23 = vcvt.s32.f32 %v3101_v0 }
 0x870   : > { %v2948_v1 = vcvt.s32.f32 %v2946_v32  ;;  %v2988_v32 = vand.u32 65535, %v8609_v50 }
 0x873   : > { %3104 = vmax.xlane.f32.xlu0 %v8715_v23 }
 0x8c1   : > { %v8719_v31 = vpop.xlane.xlu0 %2908 }
 0x8c2   : > { %vm2910_vm15 = vcmp.eq.f32.partialorder %v8521_v33, %v8719_v31  ;;  %v2932_v33 = vand.u32 65535, %v8558_v7 }
 0x8c3   : > { %v2911_v10 = vsel %vm2910_vm15, %v2906_v53, -inf  ;;  %v2974_v53 = vand.u32 65535, %v8579_v54 }
 0x8c4   : > { %2912 = vmax.xlane.f32.xlu0 %v2911_v10  ;;  %v2934_v0 = vcvt.s32.f32 %v2932_v33  ;;  %v2960_v10 = vand.u32 65535, %v8585_v49 }
 0x8cc   : > { %v8724_v35 = vpop.xlane.xlu1 %2894 }
 0x8cd   : > { %vm2896_vm14 = vcmp.eq.f32.partialorder %v8534_v36, %v8724_v35 }
 0x8ce   : > { %v2897_v26 = vsel %vm2896_vm14, %v2892_v47, -inf  ;;  %v2976_v47 = vcvt.s32.f32 %v2974_v53  ;;  %v3016_v53 = vand.u32 65535, %v8640_v37 }
 0x8cf   : > { %2898 = vmax.xlane.f32.xlu1 %v2897_v26 }
 0x8d2   : > { %v8729_v19 = vpop.xlane.xlu1 %2922 }
 0x8d3   : > { %vm2924_vm13 = vcmp.eq.f32.partialorder %v8551_v15, %v8729_v19 }
 0x8d4   : > { %v2925_v22 = vsel %vm2924_vm13, %v2920_v60, -inf  ;;  %v3002_v60 = vand.u32 65535, %v8605_v58 }
 0x8d5   : > { %2926 = vmax.xlane.f32.xlu1 %v2925_v22 }
 0x8d6   : > { %v8735_v18 = vpop.xlane.xlu1 %2950  ;;  %v3004_v22 = vcvt.s32.f32 %v3002_v60 }
 0x8d7   : > { %v8737_v36 = vpop.xlane.xlu0 %2936  ;;  %vm2952_vm1 = vcmp.eq.f32.partialorder %v8567_v42, %v8735_v18  ;;  %v2962_v42 = vcvt.s32.f32 %v2960_v10 }
 0x8d8   : > { %v2953_v16 = vsel %vm2952_vm1, %v2948_v1, -inf  ;;  %vm2938_vm15 = vcmp.eq.f32.partialorder %v8573_v43, %v8737_v36 }
 0x8d9   : > { %2954 = vmax.xlane.f32.xlu1 %v2953_v16  ;;  %v2939_v15 = vsel %vm2938_vm15, %v2934_v0, -inf  ;;  %v3030_v16 = vand.u32 65535, %v8637_v34 }
 0x8da   : > { %2940 = vmax.xlane.f32.xlu0 %v2939_v15 }
 0x8db   : > { %v3032_v10 = vcvt.s32.f32 %v3030_v16 }
 0x8dc   : > { %v8745_v48 = vpop.xlane.xlu1 %2978 }
 0x8dd   : > { %v8747_v26 = vpop.xlane.xlu0 %2964  ;;  %vm2980_vm14 = vcmp.eq.f32.partialorder %v8593_v25, %v8745_v48  ;;  %v2990_v25 = vcvt.s32.f32 %v2988_v32 }
 0x8de   : > { %v2981_v20 = vsel %vm2980_vm14, %v2976_v47, -inf  ;;  %vm2966_vm13 = vcmp.eq.f32.partialorder %v8599_v28, %v8747_v26 }
 0x8df   : > { %2982 = vmax.xlane.f32.xlu1 %v2981_v20  ;;  %v2967_v43 = vsel %vm2966_vm13, %v2962_v42, -inf  ;;  %v3044_v20 = vand.u32 65535, %v8660_v11 }
 0x8e0   : > { %2968 = vmax.xlane.f32.xlu0 %v2967_v43 }
 0x8e5   : > { %v8755_v33 = vpop.xlane.xlu1 %3006 }
 0x8e6   : > { %v8757_v1 = vpop.xlane.xlu0 %2992  ;;  %vm3008_vm1 = vcmp.eq.f32.partialorder %v8619_v44, %v8755_v33  ;;  %v3058_v44 = vand.u32 65535, %v8657_v2 }
 0x8e7   : > { %v3009_v0 = vsel %vm3008_vm1, %v3004_v22, -inf  ;;  %vm2994_vm15 = vcmp.eq.f32.partialorder %v8625_v29, %v8757_v1  ;;  %v3018_v29 = vcvt.s32.f32 %v3016_v53  ;;  %v3086_v22 = vand.u32 65535, %v8677_v5 }
 0x8e8   : > { %3010 = vmax.xlane.f32.xlu1 %v3009_v0  ;;  %v2995_v28 = vsel %vm2994_vm15, %v2990_v25, -inf  ;;  %v3060_v32 = vcvt.s32.f32 %v3058_v44  ;;  %v3046_v25 = vcvt.s32.f32 %v3044_v20  ;;  %v3072_v0 = vand.u32 65535, %v8684_v6 }
 0x8e9   : > { %2996 = vmax.xlane.f32.xlu0 %v2995_v28  ;;  %v3088_v53 = vcvt.s32.f32 %v3086_v22 }
 0x8f1   : > { %v8765_v15 = vpop.xlane.xlu1 %3034 }
 0x8f2   : > { %vm3036_vm14 = vcmp.eq.f32.partialorder %v8652_v24, %v8765_v15 }
 0x8f3   : > { %v3037_v47 = vsel %vm3036_vm14, %v3032_v10, -inf }
 0x8f4   : > { %v8770_v42 = vpop.xlane.xlu0 %3020  ;;  %3038 = vmax.xlane.f32.xlu1 %v3037_v47  ;;  %v3074_v47 = vcvt.s32.f32 %v3072_v0 }
 0x8f5   : > { %vm3022_vm13 = vcmp.eq.f32.partialorder %v8663_v41, %v8770_v42 }
 0x8f6   : > { %v3023_v43 = vsel %vm3022_vm13, %v3018_v29, -inf }
 0x8f7   : > { %3024 = vmax.xlane.f32.xlu0 %v3023_v43  ;;  %v8775_v60 = vpop.xlane.xlu1 %3062 }
 0x8f8   : > { %v8778_v24 = vpop.xlane.xlu0 %3048  ;;  %vm3064_vm1 = vcmp.eq.f32.partialorder %v8681_v40, %v8775_v60  ;;  %v3100_v40 = vand.u32 65535, %v8704_v57 }
 0x8f9   : > { %v3065_v28 = vsel %vm3064_vm1, %v3060_v32, -inf  ;;  %vm3050_vm15 = vcmp.eq.f32.partialorder %v8686_v55, %v8778_v24 }
 0x8fa   : > { %3066 = vmax.xlane.f32.xlu1 %v3065_v28  ;;  %v3051_v41 = vsel %vm3050_vm15, %v3046_v25, -inf  ;;  %v3102_v20 = vcvt.s32.f32 %v3100_v40 }
 0x8fb   : > { %3052 = vmax.xlane.f32.xlu0 %v3051_v41  ;;  %v8785_v16 = vpop.xlane.xlu1 %3090 }
 0x8fc   : > { %v8787_v10 = vpop.xlane.xlu0 %3076  ;;  %vm3092_vm14 = vcmp.eq.f32.partialorder %v8697_v4, %v8785_v16  ;;  %v2915_v4 = vcvt.f32.s32 %v8719_v31 }
 0x8fd   : > { %v3093_v44 = vsel %vm3092_vm14, %v3088_v53, -inf  ;;  %vm3078_vm13 = vcmp.eq.f32.partialorder %v8706_v45, %v8787_v10  ;;  %vm5820_vm14 = vcmask 48128  }
 0x8fe   : > { %3094 = vmax.xlane.f32.xlu1 %v3093_v44  ;;  %v3079_v55 = vsel %vm3078_vm13, %v3074_v47, -inf  ;;  %v2916_v22 = vshll.u32 %v2915_v4, 16 }
 0x8ff   : > { %3080 = vmax.xlane.f32.xlu0 %v3079_v55 }
 0x900   : > { %v8794_v29 = vpop.xlane.xlu0 %3104 }
 0x901   : > { %vm3106_vm1 = vcmp.eq.f32.partialorder %v8715_v23, %v8794_v29  ;;  %v2901_v23 = vcvt.f32.s32 %v8724_v35 }
 0x902   : > { %v3107_v43 = vsel %vm3106_vm1, %v3102_v20, -inf }
 0x903   : > { %3108 = vmax.xlane.f32.xlu0 %v3107_v43  ;;  %v2902_v44 = vshll.u32 %v2901_v23, 16 }
 0x951   : > { %v2913_v32 = vpop.xlane.xlu0 %2912 }
 0x952   : > { %v2914_v25 = vcvt.f32.s32 %v2913_v32 }
 0x954   : > { %v2917_v0 = vadd.s32 %v2916_v22, %v2914_v25 }
 0x956   : > { %v3115_v28 = vand.u32 127, %v2917_v0  ;;  %vm3147_vm15 = vcmp.eq.s32.totalorder %v8513_v51, %v2917_v0 }
 0x957   : > { %v8801_v45 = vsel %vm3147_vm15, 2147483648, %v8513_v51  ;;  %v2929_v51 = vcvt.f32.s32 %v8729_v19 }
 0x958   : > { %v3131_v41 = vsub.s32 127, %v3115_v28  ;;  %v3193_v53 = vshra.s32 %v8801_v45, 16  ;;  %v2957_v28 = vcvt.f32.s32 %v8735_v18 }
 0x959   : > { %v2930_v0 = vshll.u32 %v2929_v51, 16 }
 0x95a   : > { %v8807_v47 = vsel %vm5820_vm14, %v8519_v63, %v3131_v41  ;;  %v8809_v31 = vcvt.s32.f32 %v3193_v53  ;;  %v2943_v53 = vcvt.f32.s32 %v8737_v36  ;;  %v2958_v23 = vshll.u32 %v2957_v28, 16 }
 0x95c   : > { %3196 = vmax.xlane.f32.xlu0 %v8809_v31  ;;  %v2899_v40 = vpop.xlane.xlu1 %2898 }
 0x95d   : > { %v2900_v55 = vcvt.f32.s32 %v2899_v40 }
 0x95f   : > { %v2903_v20 = vadd.s32 %v2902_v44, %v2900_v55  ;;  %v2944_v55 = vshll.u32 %v2943_v53, 16 }
 0x961   : > { %v3114_v43 = vand.u32 127, %v2903_v20  ;;  %vm3146_vm13 = vcmp.eq.s32.totalorder %v8527_v52, %v2903_v20  ;;  %v2985_v20 = vcvt.f32.s32 %v8745_v48 }
 0x962   : > { %v8815_v4 = vsel %vm3146_vm13, 2147483648, %v8527_v52  ;;  %v2927_v22 = vpop.xlane.xlu1 %2926 }
 0x963   : > { %v3130_v35 = vsub.s32 127, %v3114_v43  ;;  %v3179_v63 = vshra.s32 %v8815_v4, 16  ;;  %v2928_v41 = vcvt.f32.s32 %v2927_v22  ;;  %v2986_v48 = vshll.u32 %v2985_v20, 16 }
 0x965   : > { %v8820_v32 = vsel %vm5820_vm14, %v8532_v12, %v3130_v35  ;;  %v8822_v25 = vcvt.s32.f32 %v3179_v63  ;;  %v2931_v52 = vadd.s32 %v2930_v0, %v2928_v41  ;;  %v2971_v63 = vcvt.f32.s32 %v8747_v26 }
 0x966   : > { %v2955_v19 = vpop.xlane.xlu1 %2954 }
 0x967   : > { %3182 = vmax.xlane.f32.xlu1 %v8822_v25  ;;  %v3116_v40 = vand.u32 127, %v2931_v52  ;;  %vm3148_vm1 = vcmp.eq.s32.totalorder %v8542_v13, %v2931_v52  ;;  %v2956_v44 = vcvt.f32.s32 %v2955_v19  ;;  %v2941_v12 = vpop.xlane.xlu0 %2940 }
 0x968   : > { %v8830_v43 = vsel %vm3148_vm1, 2147483648, %v8542_v13  ;;  %v2942_v18 = vcvt.f32.s32 %v2941_v12 }
 0x969   : > { %v3132_v51 = vsub.s32 127, %v3116_v40  ;;  %v2959_v35 = vadd.s32 %v2958_v23, %v2956_v44  ;;  %v3207_v36 = vshra.s32 %v8830_v43, 16  ;;  %v2972_v44 = vshll.u32 %v2971_v63, 16 }
 0x96a   : > { %v2945_v22 = vadd.s32 %v2944_v55, %v2942_v18  ;;  %v3013_v63 = vcvt.f32.s32 %v8755_v33 }
 0x96b   : > { %v8836_v0 = vsel %vm5820_vm14, %v8548_v27, %v3132_v51  ;;  %v3118_v28 = vand.u32 127, %v2959_v35  ;;  %vm3150_vm15 = vcmp.eq.s32.totalorder %v8554_v38, %v2959_v35  ;;  %v8839_v41 = vcvt.s32.f32 %v3207_v36 }
 0x96c   : > { %v8842_v13 = vsel %vm3150_vm15, 2147483648, %v8554_v38  ;;  %v3117_v53 = vand.u32 127, %v2945_v22  ;;  %vm3149_vm13 = vcmp.eq.s32.totalorder %v8558_v7, %v2945_v22  ;;  %v2983_v52 = vpop.xlane.xlu1 %2982 }
 0x96d   : > { %v3134_v19 = vsub.s32 127, %v3118_v28  ;;  %v8846_v26 = vsel %vm3149_vm13, 2147483648, %v8558_v7  ;;  %v2984_v23 = vcvt.f32.s32 %v2983_v52  ;;  %v2969_v27 = vpop.xlane.xlu0 %2968  ;;  %3210 = vmax.xlane.f32.xlu1 %v8839_v41  ;;  %v3235_v40 = vshra.s32 %v8842_v13, 16 }
 0x96e   : > { %v3133_v12 = vsub.s32 127, %v3117_v53  ;;  %v2970_v55 = vcvt.f32.s32 %v2969_v27  ;;  %v3221_v38 = vshra.s32 %v8846_v26, 16 }
 0x96f   : > { %v8853_v20 = vsel %vm5820_vm14, %v8565_v56, %v3134_v19  ;;  %v2987_v18 = vadd.s32 %v2986_v48, %v2984_v23  ;;  %v8855_v51 = vcvt.s32.f32 %v3235_v40  ;;  %v3014_v40 = vshll.u32 %v3013_v63, 16 }
 0x970   : > { %v8859_v7 = vsel %vm5820_vm14, %v8571_v21, %v3133_v12  ;;  %v2973_v35 = vadd.s32 %v2972_v44, %v2970_v55  ;;  %v8861_v36 = vcvt.s32.f32 %v3221_v38  ;;  %v2999_v21 = vcvt.f32.s32 %v8757_v1 }
 0x971   : > { %v3120_v22 = vand.u32 127, %v2987_v18  ;;  %vm3152_vm1 = vcmp.eq.s32.totalorder %v8579_v54, %v2987_v18  ;;  %3238 = vmax.xlane.f32.xlu1 %v8855_v51 }
 0x972   : > { %v8867_v56 = vsel %vm3152_vm1, 2147483648, %v8579_v54  ;;  %v3119_v28 = vand.u32 127, %v2973_v35  ;;  %vm3151_vm15 = vcmp.eq.s32.totalorder %v8585_v49, %v2973_v35  ;;  %3224 = vmax.xlane.f32.xlu0 %v8861_v36  ;;  %v3000_v55 = vshll.u32 %v2999_v21, 16 }
 0x973   : > { %v3136_v48 = vsub.s32 127, %v3120_v22  ;;  %v8873_v53 = vsel %vm3151_vm15, 2147483648, %v8585_v49  ;;  %v3263_v52 = vshra.s32 %v8867_v56, 16 }
 0x974   : > { %v3135_v19 = vsub.s32 127, %v3119_v28  ;;  %v3249_v23 = vshra.s32 %v8873_v53, 16 }
 0x975   : > { %v8879_v54 = vsel %vm5820_vm14, %v8591_v46, %v3136_v48  ;;  %v3011_v33 = vpop.xlane.xlu1 %3010  ;;  %v8881_v27 = vcvt.s32.f32 %v3263_v52 }
 0x976   : > { %v8885_v1 = vsel %vm5820_vm14, %v8597_v62, %v3135_v19  ;;  %v3012_v44 = vcvt.f32.s32 %v3011_v33  ;;  %v2997_v49 = vpop.xlane.xlu0 %2996  ;;  %v8887_v12 = vcvt.s32.f32 %v3249_v23  ;;  %v3041_v19 = vcvt.f32.s32 %v8765_v15 }
 0x977   : > { %v2998_v38 = vcvt.f32.s32 %v2997_v49  ;;  %3266 = vmax.xlane.f32.xlu1 %v8881_v27  ;;  %v3069_v49 = vcvt.f32.s32 %v8775_v60 }
 0x978   : > { %v3015_v18 = vadd.s32 %v3014_v40, %v3012_v44  ;;  %3252 = vmax.xlane.f32.xlu0 %v8887_v12  ;;  %v3042_v15 = vshll.u32 %v3041_v19, 16 }
 0x979   : > { %v3001_v46 = vadd.s32 %v3000_v55, %v2998_v38  ;;  %v3055_v55 = vcvt.f32.s32 %v8778_v24  ;;  %v3111_v24 = vcvt.f32.s32 %v8794_v29 }
 0x97a   : > { %v3122_v35 = vand.u32 127, %v3015_v18  ;;  %vm3154_vm13 = vcmp.eq.s32.totalorder %v8605_v58, %v3015_v18 }
 0x97b   : > { %v8893_v22 = vsel %vm3154_vm13, 2147483648, %v8605_v58  ;;  %v3121_v62 = vand.u32 127, %v3001_v46  ;;  %vm3153_vm1 = vcmp.eq.s32.totalorder %v8609_v50, %v3001_v46 }
 0x97c   : > { %v3138_v63 = vsub.s32 127, %v3122_v35  ;;  %v8897_v28 = vsel %vm3153_vm1, 2147483648, %v8609_v50  ;;  %v3291_v21 = vshra.s32 %v8893_v22, 16  ;;  %v3027_v50 = vcvt.f32.s32 %v8770_v42 }
 0x97d   : > { %v3137_v48 = vsub.s32 127, %v3121_v62  ;;  %v3277_v52 = vshra.s32 %v8897_v28, 16  ;;  %v3070_v62 = vshll.u32 %v3069_v49, 16  ;;  %v3056_v42 = vshll.u32 %v3055_v55, 16 }
 0x97e   : > { %v8904_v23 = vsel %vm5820_vm14, %v8617_v61, %v3138_v63  ;;  %v8906_v58 = vcvt.s32.f32 %v3291_v21  ;;  %v3028_v46 = vshll.u32 %v3027_v50, 16  ;;  %v3083_v21 = vcvt.f32.s32 %v8787_v10 }
 0x97f   : > { %v8910_v33 = vsel %vm5820_vm14, %v8623_v39, %v3137_v48  ;;  %v8912_v40 = vcvt.s32.f32 %v3277_v52  ;;  %v3097_v39 = vcvt.f32.s32 %v8785_v16 }
 0x980   : > { %3294 = vmax.xlane.f32.xlu1 %v8906_v58  ;;  %v3084_v29 = vshll.u32 %v3083_v21, 16 }
 0x981   : > { %v3039_v44 = vpop.xlane.xlu1 %3038  ;;  %3280 = vmax.xlane.f32.xlu0 %v8912_v40 }
 0x982   : > { %v3040_v61 = vcvt.f32.s32 %v3039_v44 }
 0x984   : > { %v3043_v38 = vadd.s32 %v3042_v15, %v3040_v61  ;;  %v3025_v18 = vpop.xlane.xlu0 %3024  ;;  %v3098_v15 = vshll.u32 %v3097_v39, 16 }
 0x985   : > { %v3026_v35 = vcvt.f32.s32 %v3025_v18 }
 0x986   : > { %v3124_v63 = vand.u32 127, %v3043_v38  ;;  %vm3156_vm15 = vcmp.eq.s32.totalorder %v8637_v34, %v3043_v38 }
 0x987   : > { %v8923_v48 = vsel %vm3156_vm15, 2147483648, %v8637_v34  ;;  %v3029_v60 = vadd.s32 %v3028_v46, %v3026_v35  ;;  %v3067_v52 = vpop.xlane.xlu1 %3066 }
 0x988   : > { %v3140_v19 = vsub.s32 127, %v3124_v63  ;;  %v3068_v44 = vcvt.f32.s32 %v3067_v52  ;;  %v3053_v50 = vpop.xlane.xlu0 %3052  ;;  %v3319_v16 = vshra.s32 %v8923_v48, 16  ;;  %v3112_v63 = vshll.u32 %v3111_v24, 16 }
 0x989   : > { %v3123_v49 = vand.u32 127, %v3029_v60  ;;  %vm3155_vm13 = vcmp.eq.s32.totalorder %v8640_v37, %v3029_v60  ;;  %v3054_v61 = vcvt.f32.s32 %v3053_v50 }
 0x98a   : > { %v8930_v10 = vsel %vm5820_vm14, %v8646_v30, %v3140_v19  ;;  %v8933_v34 = vsel %vm3155_vm13, 2147483648, %v8640_v37  ;;  %v3071_v55 = vadd.s32 %v3070_v62, %v3068_v44  ;;  %v8935_v38 = vcvt.s32.f32 %v3319_v16 }
 0x98b   : > { %v3139_v18 = vsub.s32 127, %v3123_v49  ;;  %v3057_v46 = vadd.s32 %v3056_v42, %v3054_v61  ;;  %v3095_v35 = vpop.xlane.xlu1 %3094  ;;  %v3305_v39 = vshra.s32 %v8933_v34, 16 }
 0x98c   : > { %v3126_v52 = vand.u32 127, %v3071_v55  ;;  %vm3158_vm1 = vcmp.eq.s32.totalorder %v8657_v2, %v3071_v55  ;;  %v3096_v60 = vcvt.f32.s32 %v3095_v35  ;;  %v3081_v50 = vpop.xlane.xlu0 %3080  ;;  %3322 = vmax.xlane.f32.xlu1 %v8935_v38 }
 0x98d   : > { %v8942_v37 = vsel %vm5820_vm14, %v8650_v8, %v3139_v18  ;;  %v8945_v30 = vsel %vm3158_vm1, 2147483648, %v8657_v2  ;;  %v3125_v62 = vand.u32 127, %v3057_v46  ;;  %vm3157_vm15 = vcmp.eq.s32.totalorder %v8660_v11, %v3057_v46 }
 0x98e   : > { %v3142_v42 = vsub.s32 127, %v3126_v52  ;;  %v8949_v21 = vsel %vm3157_vm15, 2147483648, %v8660_v11  ;;  %v3099_v24 = vadd.s32 %v3098_v15, %v3096_v60  ;;  %v3082_v19 = vcvt.f32.s32 %v3081_v50 }
 0x98f   : > { %v3141_v44 = vsub.s32 127, %v3125_v62  ;;  %v8951_v16 = vcvt.s32.f32 %v3305_v39  ;;  %v3347_v49 = vshra.s32 %v8945_v30, 16  ;;  %v3333_v8 = vshra.s32 %v8949_v21, 16 }
 0x990   : > { %v8957_v2 = vsel %vm5820_vm14, %v8670_v9, %v3142_v42  ;;  %v3128_v61 = vand.u32 127, %v3099_v24  ;;  %vm3160_vm13 = vcmp.eq.s32.totalorder %v8677_v5, %v3099_v24  ;;  %v3085_v55 = vadd.s32 %v3084_v29, %v3082_v19  ;;  %v3109_v18 = vpop.xlane.xlu0 %3108 }
 0x991   : > { %v8962_v11 = vsel %vm5820_vm14, %v8674_v59, %v3141_v44  ;;  %v8965_v15 = vsel %vm3160_vm13, 2147483648, %v8677_v5  ;;  %3308 = vmax.xlane.f32.xlu0 %v8951_v16  ;;  %v3110_v46 = vcvt.f32.s32 %v3109_v18  ;;  %v8968_v35 = vcvt.s32.f32 %v3347_v49 }
 0x992   : > { %v3144_v39 = vsub.s32 127, %v3128_v61  ;;  %v3127_v9 = vand.u32 127, %v3085_v55  ;;  %vm3159_vm1 = vcmp.eq.s32.totalorder %v8684_v6, %v3085_v55  ;;  %v8971_v52 = vcvt.s32.f32 %v3333_v8 }
 0x993   : > { %v8974_v29 = vsel %vm3159_vm1, 2147483648, %v8684_v6  ;;  %v3113_v60 = vadd.s32 %v3112_v63, %v3110_v46  ;;  %3350 = vmax.xlane.f32.xlu1 %v8968_v35  ;;  %v3375_v59 = vshra.s32 %v8965_v15, 16  ;;  %v3178_v18 = vand.u32 65535, %v8815_v4 }
 0x994   : > { %v8980_v5 = vsel %vm5820_vm14, %v8691_v3, %v3144_v39  ;;  %v3143_v50 = vsub.s32 127, %v3127_v9  ;;  %v3361_v62 = vshra.s32 %v8974_v29, 16  ;;  %v3206_v9 = vand.u32 65535, %v8830_v43 }
 0x995   : > { %v3129_v42 = vand.u32 127, %v3113_v60  ;;  %vm3161_vm15 = vcmp.eq.s32.totalorder %v8704_v57, %v3113_v60  ;;  %3336 = vmax.xlane.f32.xlu0 %v8971_v52  ;;  %v8985_v24 = vcvt.s32.f32 %v3375_v59  ;;  %v3180_v46 = vcvt.s32.f32 %v3178_v18 }
 0x996   : > { %v8989_v6 = vsel %vm5820_vm14, %v8701_v14, %v3143_v50  ;;  %v8992_v63 = vsel %vm3161_vm15, 2147483648, %v8704_v57  ;;  %v8994_v19 = vcvt.s32.f32 %v3361_v62  ;;  %v3192_v14 = vand.u32 65535, %v8801_v45 }
 0x997   : > { %v3145_v3 = vsub.s32 127, %v3129_v42  ;;  %3378 = vmax.xlane.f32.xlu1 %v8985_v24  ;;  %v3389_v44 = vshra.s32 %v8992_v63, 16  ;;  %v3208_v59 = vcvt.s32.f32 %v3206_v9  ;;  %v3234_v50 = vand.u32 65535, %v8842_v13 }
 0x998   : > { %v3194_v61 = vcvt.s32.f32 %v3192_v14 }
 0x999   : > { %v9000_v49 = vsel %vm5820_vm14, %v8712_v17, %v3145_v3  ;;  %3364 = vmax.xlane.f32.xlu0 %v8994_v19  ;;  %v9003_v8 = vcvt.s32.f32 %v3389_v44  ;;  %v3236_v3 = vcvt.s32.f32 %v3234_v50  ;;  %v3276_v50 = vand.u32 65535, %v8897_v28 }
 0x99d   : > { %3392 = vmax.xlane.f32.xlu0 %v9003_v8 }
 0x9e9   : > { %v9007_v57 = vpop.xlane.xlu0 %3196 }
 0x9ea   : > { %vm3198_vm13 = vcmp.eq.f32.partialorder %v8809_v31, %v9007_v57  ;;  %v3220_v31 = vand.u32 65535, %v8846_v26 }
 0x9eb   : > { %v3199_v55 = vsel %vm3198_vm13, %v3194_v61, -inf  ;;  %v3262_v61 = vand.u32 65535, %v8867_v56 }
 0x9ec   : > { %3200 = vmax.xlane.f32.xlu0 %v3199_v55  ;;  %v3222_v44 = vcvt.s32.f32 %v3220_v31  ;;  %v3248_v55 = vand.u32 65535, %v8873_v53 }
 0x9f4   : > { %v9012_v17 = vpop.xlane.xlu1 %3182 }
 0x9f5   : > { %vm3184_vm14 = vcmp.eq.f32.partialorder %v8822_v25, %v9012_v17 }
 0x9f6   : > { %v3185_v39 = vsel %vm3184_vm14, %v3180_v46, -inf  ;;  %v3264_v46 = vcvt.s32.f32 %v3262_v61 }
 0x9f7   : > { %3186 = vmax.xlane.f32.xlu1 %v3185_v39 }
 0x9fa   : > { %v9017_v60 = vpop.xlane.xlu1 %3210 }
 0x9fb   : > { %vm3212_vm1 = vcmp.eq.f32.partialorder %v8839_v41, %v9017_v60 }
 0x9fc   : > { %v3213_v62 = vsel %vm3212_vm1, %v3208_v59, -inf  ;;  %v3290_v59 = vand.u32 65535, %v8893_v22 }
 0x9fd   : > { %3214 = vmax.xlane.f32.xlu1 %v3213_v62 }
 0x9fe   : > { %v9023_v42 = vpop.xlane.xlu1 %3238  ;;  %v3292_v62 = vcvt.s32.f32 %v3290_v59 }
 0x9ff   : > { %v9025_v25 = vpop.xlane.xlu0 %3224  ;;  %vm3240_vm15 = vcmp.eq.f32.partialorder %v8855_v51, %v9023_v42  ;;  %v3250_v51 = vcvt.s32.f32 %v3248_v55  ;;  %v3304_v55 = vand.u32 65535, %v8933_v34 }
 0xa00   : > { %v3241_v14 = vsel %vm3240_vm15, %v3236_v3, -inf  ;;  %vm3226_vm13 = vcmp.eq.f32.partialorder %v8861_v36, %v9025_v25 }
 0xa01   : > { %3242 = vmax.xlane.f32.xlu1 %v3241_v14  ;;  %v3227_v41 = vsel %vm3226_vm13, %v3222_v44, -inf  ;;  %v3318_v14 = vand.u32 65535, %v8923_v48 }
 0xa02   : > { %3228 = vmax.xlane.f32.xlu0 %v3227_v41 }
 0xa03   : > { %v3320_v41 = vcvt.s32.f32 %v3318_v14 }
 0xa04   : > { %v9033_v18 = vpop.xlane.xlu1 %3266 }
 0xa05   : > { %v9035_v39 = vpop.xlane.xlu0 %3252  ;;  %vm3268_vm14 = vcmp.eq.f32.partialorder %v8881_v27, %v9033_v18  ;;  %v3278_v27 = vcvt.s32.f32 %v3276_v50 }
 0xa06   : > { %v3269_v9 = vsel %vm3268_vm14, %v3264_v46, -inf  ;;  %vm3254_vm1 = vcmp.eq.f32.partialorder %v8887_v12, %v9035_v39 }
 0xa07   : > { %3270 = vmax.xlane.f32.xlu1 %v3269_v9  ;;  %v3255_v36 = vsel %vm3254_vm1, %v3250_v51, -inf  ;;  %v3332_v9 = vand.u32 65535, %v8949_v21 }
 0xa08   : > { %3256 = vmax.xlane.f32.xlu0 %v3255_v36 }
 0xa0d   : > { %v9043_v31 = vpop.xlane.xlu1 %3294 }
 0xa0e   : > { %v9045_v3 = vpop.xlane.xlu0 %3280  ;;  %vm3296_vm15 = vcmp.eq.f32.partialorder %v8906_v58, %v9043_v31  ;;  %v3346_v58 = vand.u32 65535, %v8945_v30 }
 0xa0f   : > { %v3297_v44 = vsel %vm3296_vm15, %v3292_v62, -inf  ;;  %vm3282_vm13 = vcmp.eq.f32.partialorder %v8912_v40, %v9045_v3  ;;  %v3306_v40 = vcvt.s32.f32 %v3304_v55 }
 0xa10   : > { %3298 = vmax.xlane.f32.xlu1 %v3297_v44  ;;  %v3283_v12 = vsel %vm3282_vm13, %v3278_v27, -inf  ;;  %v3348_v50 = vcvt.s32.f32 %v3346_v58  ;;  %v3334_v44 = vcvt.s32.f32 %v3332_v9  ;;  %v3388_v58 = vand.u32 65535, %v8992_v63 }
 0xa11   : > { %3284 = vmax.xlane.f32.xlu0 %v3283_v12  ;;  %v3360_v12 = vand.u32 65535, %v8974_v29 }
 0xa12   : > { %v3390_v9 = vcvt.s32.f32 %v3388_v58 }
 0xa19   : > { %v9052_v61 = vpop.xlane.xlu1 %3322 }
 0xa1a   : > { %vm3324_vm14 = vcmp.eq.f32.partialorder %v8935_v38, %v9052_v61  ;;  %v3374_v38 = vand.u32 65535, %v8965_v15 }
 0xa1b   : > { %v3325_v46 = vsel %vm3324_vm14, %v3320_v41, -inf }
 0xa1c   : > { %3326 = vmax.xlane.f32.xlu1 %v3325_v46  ;;  %v3376_v41 = vcvt.s32.f32 %v3374_v38  ;;  %v3362_v46 = vcvt.s32.f32 %v3360_v12 }
 0xa1e   : > { %v9058_v51 = vpop.xlane.xlu0 %3308 }
 0xa1f   : > { %vm3310_vm1 = vcmp.eq.f32.partialorder %v8951_v16, %v9058_v51 }
 0xa20   : > { %v3311_v36 = vsel %vm3310_vm1, %v3306_v40, -inf  ;;  %v9063_v59 = vpop.xlane.xlu1 %3350 }
 0xa21   : > { %3312 = vmax.xlane.f32.xlu0 %v3311_v36  ;;  %vm3352_vm15 = vcmp.eq.f32.partialorder %v8968_v35, %v9063_v59 }
 0xa22   : > { %v9068_v62 = vpop.xlane.xlu0 %3336  ;;  %v3353_v27 = vsel %vm3352_vm15, %v3348_v50, -inf }
 0xa23   : > { %3354 = vmax.xlane.f32.xlu1 %v3353_v27  ;;  %vm3338_vm13 = vcmp.eq.f32.partialorder %v8971_v52, %v9068_v62 }
 0xa24   : > { %v3339_v16 = vsel %vm3338_vm13, %v3334_v44, -inf  ;;  %v9073_v14 = vpop.xlane.xlu1 %3378 }
 0xa25   : > { %3340 = vmax.xlane.f32.xlu0 %v3339_v16  ;;  %vm3380_vm14 = vcmp.eq.f32.partialorder %v8985_v24, %v9073_v14  ;;  %v3203_v24 = vcvt.f32.s32 %v9007_v57 }
 0xa26   : > { %v9077_v55 = vpop.xlane.xlu0 %3364  ;;  %v3381_v35 = vsel %vm3380_vm14, %v3376_v41, -inf  ;;  %vm5837_vm14 = vcmask 56320  }
 0xa27   : > { %3382 = vmax.xlane.f32.xlu1 %v3381_v35  ;;  %vm3366_vm1 = vcmp.eq.f32.partialorder %v8994_v19, %v9077_v55  ;;  %v3204_v38 = vshll.u32 %v3203_v24, 16 }
 0xa28   : > { %v3367_v40 = vsel %vm3366_vm1, %v3362_v46, -inf }
 0xa29   : > { %3368 = vmax.xlane.f32.xlu0 %v3367_v40 }
 0xa2a   : > { %v9082_v52 = vpop.xlane.xlu0 %3392 }
 0xa2b   : > { %vm3394_vm15 = vcmp.eq.f32.partialorder %v9003_v8, %v9082_v52  ;;  %v3189_v8 = vcvt.f32.s32 %v9012_v17 }
 0xa2c   : > { %v3395_v36 = vsel %vm3394_vm15, %v3390_v9, -inf }
 0xa2d   : > { %3396 = vmax.xlane.f32.xlu0 %v3395_v36  ;;  %v3190_v58 = vshll.u32 %v3189_v8, 16 }
 0xa79   : > { %v3201_v50 = vpop.xlane.xlu0 %3200 }
 0xa7a   : > { %v3202_v27 = vcvt.f32.s32 %v3201_v50 }
 0xa7c   : > { %v3205_v44 = vadd.s32 %v3204_v38, %v3202_v27 }
 0xa7e   : > { %v3403_v12 = vand.u32 127, %v3205_v44  ;;  %vm3435_vm13 = vcmp.eq.s32.totalorder %v8801_v45, %v3205_v44 }
 0xa7f   : > { %v9089_v19 = vsel %vm3435_vm13, 2147483648, %v8801_v45  ;;  %v3217_v45 = vcvt.f32.s32 %v9017_v60 }
 0xa80   : > { %v3419_v16 = vsub.s32 127, %v3403_v12  ;;  %v3481_v41 = vshra.s32 %v9089_v19, 16  ;;  %v3245_v12 = vcvt.f32.s32 %v9023_v42 }
 0xa81   : > { %v3218_v44 = vshll.u32 %v3217_v45, 16 }
 0xa82   : > { %v9095_v35 = vsel %vm5837_vm14, %v8807_v47, %v3419_v16  ;;  %v9097_v57 = vcvt.s32.f32 %v3481_v41  ;;  %v3231_v41 = vcvt.f32.s32 %v9025_v25  ;;  %v3246_v8 = vshll.u32 %v3245_v12, 16 }
 0xa84   : > { %3484 = vmax.xlane.f32.xlu0 %v9097_v57  ;;  %v3187_v46 = vpop.xlane.xlu1 %3186 }
 0xa85   : > { %v3188_v40 = vcvt.f32.s32 %v3187_v46 }
 0xa87   : > { %v3191_v9 = vadd.s32 %v3190_v58, %v3188_v40  ;;  %v3232_v40 = vshll.u32 %v3231_v41, 16 }
 0xa89   : > { %v3402_v36 = vand.u32 127, %v3191_v9  ;;  %vm3434_vm1 = vcmp.eq.s32.totalorder %v8815_v4, %v3191_v9  ;;  %v3273_v9 = vcvt.f32.s32 %v9033_v18 }
 0xa8a   : > { %v9103_v24 = vsel %vm3434_vm1, 2147483648, %v8815_v4  ;;  %v3215_v38 = vpop.xlane.xlu1 %3214 }
 0xa8b   : > { %v3418_v17 = vsub.s32 127, %v3402_v36  ;;  %v3467_v47 = vshra.s32 %v9103_v24, 16  ;;  %v3216_v16 = vcvt.f32.s32 %v3215_v38  ;;  %v3274_v18 = vshll.u32 %v3273_v9, 16 }
 0xa8d   : > { %v9108_v50 = vsel %vm5837_vm14, %v8820_v32, %v3418_v17  ;;  %v9110_v27 = vcvt.s32.f32 %v3467_v47  ;;  %v3219_v4 = vadd.s32 %v3218_v44, %v3216_v16  ;;  %v3259_v47 = vcvt.f32.s32 %v9035_v39 }
 0xa8e   : > { %v3243_v60 = vpop.xlane.xlu1 %3242 }
 0xa8f   : > { %3470 = vmax.xlane.f32.xlu1 %v9110_v27  ;;  %v3404_v46 = vand.u32 127, %v3219_v4  ;;  %vm3436_vm15 = vcmp.eq.s32.totalorder %v8830_v43, %v3219_v4  ;;  %v3244_v58 = vcvt.f32.s32 %v3243_v60  ;;  %v3229_v32 = vpop.xlane.xlu0 %3228 }
 0xa90   : > { %v9118_v36 = vsel %vm3436_vm15, 2147483648, %v8830_v43  ;;  %v3230_v42 = vcvt.f32.s32 %v3229_v32 }
 0xa91   : > { %v3420_v45 = vsub.s32 127, %v3404_v46  ;;  %v3247_v17 = vadd.s32 %v3246_v8, %v3244_v58  ;;  %v3495_v25 = vshra.s32 %v9118_v36, 16  ;;  %v3260_v58 = vshll.u32 %v3259_v47, 16 }
 0xa92   : > { %v3233_v38 = vadd.s32 %v3232_v40, %v3230_v42  ;;  %v3301_v47 = vcvt.f32.s32 %v9043_v31 }
 0xa93   : > { %v9124_v44 = vsel %vm5837_vm14, %v8836_v0, %v3420_v45  ;;  %v3406_v12 = vand.u32 127, %v3247_v17  ;;  %vm3438_vm13 = vcmp.eq.s32.totalorder %v8842_v13, %v3247_v17  ;;  %v9127_v16 = vcvt.s32.f32 %v3495_v25 }
 0xa94   : > { %v9130_v43 = vsel %vm3438_vm13, 2147483648, %v8842_v13  ;;  %v3405_v41 = vand.u32 127, %v3233_v38  ;;  %vm3437_vm1 = vcmp.eq.s32.totalorder %v8846_v26, %v3233_v38  ;;  %v3271_v4 = vpop.xlane.xlu1 %3270 }
 0xa95   : > { %v3422_v60 = vsub.s32 127, %v3406_v12  ;;  %v9134_v39 = vsel %vm3437_vm1, 2147483648, %v8846_v26  ;;  %v3272_v8 = vcvt.f32.s32 %v3271_v4  ;;  %v3257_v0 = vpop.xlane.xlu0 %3256  ;;  %3498 = vmax.xlane.f32.xlu1 %v9127_v16  ;;  %v3523_v46 = vshra.s32 %v9130_v43, 16 }
 0xa96   : > { %v3421_v32 = vsub.s32 127, %v3405_v41  ;;  %v3258_v40 = vcvt.f32.s32 %v3257_v0  ;;  %v3509_v13 = vshra.s32 %v9134_v39, 16 }
 0xa97   : > { %v9141_v9 = vsel %vm5837_vm14, %v8853_v20, %v3422_v60  ;;  %v3275_v42 = vadd.s32 %v3274_v18, %v3272_v8  ;;  %v9143_v45 = vcvt.s32.f32 %v3523_v46  ;;  %v3302_v46 = vshll.u32 %v3301_v47, 16 }
 0xa98   : > { %v9147_v26 = vsel %vm5837_vm14, %v8859_v7, %v3421_v32  ;;  %v3261_v17 = vadd.s32 %v3260_v58, %v3258_v40  ;;  %v9149_v25 = vcvt.s32.f32 %v3509_v13  ;;  %v3287_v7 = vcvt.f32.s32 %v9045_v3 }
 0xa99   : > { %v3408_v38 = vand.u32 127, %v3275_v42  ;;  %vm3440_vm15 = vcmp.eq.s32.totalorder %v8867_v56, %v3275_v42  ;;  %3526 = vmax.xlane.f32.xlu1 %v9143_v45 }
 0xa9a   : > { %v9155_v20 = vsel %vm3440_vm15, 2147483648, %v8867_v56  ;;  %v3407_v12 = vand.u32 127, %v3261_v17  ;;  %vm3439_vm13 = vcmp.eq.s32.totalorder %v8873_v53, %v3261_v17  ;;  %3512 = vmax.xlane.f32.xlu0 %v9149_v25  ;;  %v3288_v40 = vshll.u32 %v3287_v7, 16 }
 0xa9b   : > { %v3424_v18 = vsub.s32 127, %v3408_v38  ;;  %v9161_v41 = vsel %vm3439_vm13, 2147483648, %v8873_v53  ;;  %v3551_v4 = vshra.s32 %v9155_v20, 16 }
 0xa9c   : > { %v3423_v60 = vsub.s32 127, %v3407_v12  ;;  %v3537_v8 = vshra.s32 %v9161_v41, 16 }
 0xa9d   : > { %v9167_v56 = vsel %vm5837_vm14, %v8879_v54, %v3424_v18  ;;  %v3299_v31 = vpop.xlane.xlu1 %3298  ;;  %v9169_v0 = vcvt.s32.f32 %v3551_v4 }
 0xa9e   : > { %v9173_v3 = vsel %vm5837_vm14, %v8885_v1, %v3423_v60  ;;  %v3300_v58 = vcvt.f32.s32 %v3299_v31  ;;  %v3285_v53 = vpop.xlane.xlu0 %3284  ;;  %v9175_v32 = vcvt.s32.f32 %v3537_v8  ;;  %v3329_v60 = vcvt.f32.s32 %v9052_v61 }
 0xa9f   : > { %v3286_v13 = vcvt.f32.s32 %v3285_v53  ;;  %3554 = vmax.xlane.f32.xlu1 %v9169_v0  ;;  %v3315_v61 = vcvt.f32.s32 %v9058_v51 }
 0xaa0   : > { %v3303_v42 = vadd.s32 %v3302_v46, %v3300_v58  ;;  %3540 = vmax.xlane.f32.xlu0 %v9175_v32  ;;  %v3330_v58 = vshll.u32 %v3329_v60, 16 }
 0xaa1   : > { %v3289_v54 = vadd.s32 %v3288_v40, %v3286_v13  ;;  %v3343_v13 = vcvt.f32.s32 %v9068_v62 }
 0xaa2   : > { %v3410_v17 = vand.u32 127, %v3303_v42  ;;  %vm3442_vm1 = vcmp.eq.s32.totalorder %v8893_v22, %v3303_v42 }
 0xaa3   : > { %v9181_v38 = vsel %vm3442_vm1, 2147483648, %v8893_v22  ;;  %v3409_v1 = vand.u32 127, %v3289_v54  ;;  %vm3441_vm15 = vcmp.eq.s32.totalorder %v8897_v28, %v3289_v54  ;;  %v3316_v54 = vshll.u32 %v3315_v61, 16 }
 0xaa4   : > { %v3426_v47 = vsub.s32 127, %v3410_v17  ;;  %v9185_v12 = vsel %vm3441_vm15, 2147483648, %v8897_v28  ;;  %v3579_v7 = vshra.s32 %v9181_v38, 16 }
 0xaa5   : > { %v3425_v18 = vsub.s32 127, %v3409_v1  ;;  %v3565_v4 = vshra.s32 %v9185_v12, 16 }
 0xaa6   : > { %v9192_v8 = vsel %vm5837_vm14, %v8904_v23, %v3426_v47  ;;  %v9194_v22 = vcvt.s32.f32 %v3579_v7  ;;  %v3357_v23 = vcvt.f32.s32 %v9063_v59  ;;  %v3385_v47 = vcvt.f32.s32 %v9073_v14 }
 0xaa7   : > { %v9198_v31 = vsel %vm5837_vm14, %v8910_v33, %v3425_v18  ;;  %v9200_v46 = vcvt.s32.f32 %v3565_v4  ;;  %v3371_v7 = vcvt.f32.s32 %v9077_v55 }
 0xaa8   : > { %3582 = vmax.xlane.f32.xlu1 %v9194_v22  ;;  %v3358_v59 = vshll.u32 %v3357_v23, 16 }
 0xaa9   : > { %v3327_v28 = vpop.xlane.xlu1 %3326  ;;  %3568 = vmax.xlane.f32.xlu0 %v9200_v46 }
 0xaaa   : > { %v3328_v53 = vcvt.f32.s32 %v3327_v28  ;;  %v3344_v28 = vshll.u32 %v3343_v13, 16 }
 0xaac   : > { %v3331_v40 = vadd.s32 %v3330_v58, %v3328_v53 }
 0xaae   : > { %v3412_v42 = vand.u32 127, %v3331_v40  ;;  %vm3444_vm13 = vcmp.eq.s32.totalorder %v8923_v48, %v3331_v40  ;;  %v3313_v33 = vpop.xlane.xlu0 %3312  ;;  %v3386_v40 = vshll.u32 %v3385_v47, 16 }
 0xaaf   : > { %v9209_v17 = vsel %vm3444_vm13, 2147483648, %v8923_v48  ;;  %v3314_v1 = vcvt.f32.s32 %v3313_v33 }
 0xab0   : > { %v3428_v18 = vsub.s32 127, %v3412_v42  ;;  %v3355_v51 = vpop.xlane.xlu1 %3354  ;;  %v3607_v4 = vshra.s32 %v9209_v17, 16  ;;  %v3372_v42 = vshll.u32 %v3371_v7, 16 }
 0xab1   : > { %v3317_v60 = vadd.s32 %v3316_v54, %v3314_v1  ;;  %v3356_v62 = vcvt.f32.s32 %v3355_v51  ;;  %v3399_v1 = vcvt.f32.s32 %v9082_v52 }
 0xab2   : > { %v9216_v58 = vsel %vm5837_vm14, %v8930_v10, %v3428_v18  ;;  %v3341_v53 = vpop.xlane.xlu0 %3340  ;;  %v9218_v48 = vcvt.s32.f32 %v3607_v4 }
 0xab3   : > { %v3411_v61 = vand.u32 127, %v3317_v60  ;;  %vm3443_vm1 = vcmp.eq.s32.totalorder %v8933_v34, %v3317_v60  ;;  %v3359_v14 = vadd.s32 %v3358_v59, %v3356_v62  ;;  %v3342_v55 = vcvt.f32.s32 %v3341_v53 }
 0xab4   : > { %v9222_v33 = vsel %vm3443_vm1, 2147483648, %v8933_v34  ;;  %v3383_v23 = vpop.xlane.xlu1 %3382  ;;  %3610 = vmax.xlane.f32.xlu1 %v9218_v48 }
 0xab5   : > { %v3427_v13 = vsub.s32 127, %v3411_v61  ;;  %v3414_v54 = vand.u32 127, %v3359_v14  ;;  %vm3446_vm15 = vcmp.eq.s32.totalorder %v8945_v30, %v3359_v14  ;;  %v3345_v10 = vadd.s32 %v3344_v28, %v3342_v55 }
 0xab6   : > { %v9228_v18 = vsel %vm3446_vm15, 2147483648, %v8945_v30  ;;  %v3384_v51 = vcvt.f32.s32 %v3383_v23  ;;  %v3369_v4 = vpop.xlane.xlu0 %3368  ;;  %v3593_v47 = vshra.s32 %v9222_v33, 16  ;;  %v3400_v14 = vshll.u32 %v3399_v1, 16 }
 0xab7   : > { %v9233_v34 = vsel %vm5837_vm14, %v8942_v37, %v3427_v13  ;;  %v3430_v7 = vsub.s32 127, %v3414_v54  ;;  %v3413_v59 = vand.u32 127, %v3345_v10  ;;  %vm3445_vm13 = vcmp.eq.s32.totalorder %v8949_v21, %v3345_v10 }
 0xab8   : > { %v9237_v60 = vsel %vm3445_vm13, 2147483648, %v8949_v21  ;;  %v3387_v62 = vadd.s32 %v3386_v40, %v3384_v51  ;;  %v3370_v52 = vcvt.f32.s32 %v3369_v4  ;;  %v9239_v28 = vcvt.s32.f32 %v3593_v47 }
 0xab9   : > { %v9243_v30 = vsel %vm5837_vm14, %v8957_v2, %v3430_v7  ;;  %v3429_v53 = vsub.s32 127, %v3413_v59  ;;  %v3635_v61 = vshra.s32 %v9228_v18, 16  ;;  %v3621_v37 = vshra.s32 %v9237_v60, 16 }
 0xaba   : > { %v3416_v55 = vand.u32 127, %v3387_v62  ;;  %vm3448_vm1 = vcmp.eq.s32.totalorder %v8965_v15, %v3387_v62  ;;  %v3373_v23 = vadd.s32 %v3372_v42, %v3370_v52  ;;  %3596 = vmax.xlane.f32.xlu0 %v9239_v28  ;;  %v3397_v21 = vpop.xlane.xlu0 %3396 }
 0xabb   : > { %v9251_v40 = vsel %vm5837_vm14, %v8962_v11, %v3429_v53  ;;  %v9254_v2 = vsel %vm3448_vm1, 2147483648, %v8965_v15  ;;  %v3398_v13 = vcvt.f32.s32 %v3397_v21  ;;  %v9256_v54 = vcvt.s32.f32 %v3635_v61 }
 0xabc   : > { %v3432_v10 = vsub.s32 127, %v3416_v55  ;;  %v3415_v51 = vand.u32 127, %v3373_v23  ;;  %vm3447_vm15 = vcmp.eq.s32.totalorder %v8974_v29, %v3373_v23  ;;  %v9259_v1 = vcvt.s32.f32 %v3621_v37 }
 0xabd   : > { %v9262_v42 = vsel %vm3447_vm15, 2147483648, %v8974_v29  ;;  %v3401_v4 = vadd.s32 %v3400_v14, %v3398_v13  ;;  %3638 = vmax.xlane.f32.xlu1 %v9256_v54  ;;  %v3663_v11 = vshra.s32 %v9254_v2, 16  ;;  %v3466_v21 = vand.u32 65535, %v9103_v24 }
 0xabe   : > { %v9268_v15 = vsel %vm5837_vm14, %v8980_v5, %v3432_v10  ;;  %v3431_v47 = vsub.s32 127, %v3415_v51  ;;  %3624 = vmax.xlane.f32.xlu0 %v9259_v1  ;;  %v3649_v7 = vshra.s32 %v9262_v42, 16  ;;  %v3494_v51 = vand.u32 65535, %v9118_v36 }
 0xabf   : > { %v3417_v59 = vand.u32 127, %v3401_v4  ;;  %vm3449_vm13 = vcmp.eq.s32.totalorder %v8992_v63, %v3401_v4  ;;  %v9273_v62 = vcvt.s32.f32 %v3663_v11 }
 0xac0   : > { %v9277_v29 = vsel %vm5837_vm14, %v8989_v6, %v3431_v47  ;;  %v9280_v52 = vsel %vm3449_vm13, 2147483648, %v8992_v63  ;;  %v9282_v53 = vcvt.s32.f32 %v3649_v7  ;;  %v3480_v6 = vand.u32 65535, %v9089_v19 }
 0xac1   : > { %v3433_v5 = vsub.s32 127, %v3417_v59  ;;  %3666 = vmax.xlane.f32.xlu1 %v9273_v62  ;;  %v3677_v61 = vshra.s32 %v9280_v52, 16  ;;  %v3496_v11 = vcvt.s32.f32 %v3494_v51  ;;  %v3522_v47 = vand.u32 65535, %v9130_v43 }
 0xac2   : > { %3652 = vmax.xlane.f32.xlu0 %v9282_v53  ;;  %v3482_v55 = vcvt.s32.f32 %v3480_v6 }
 0xac3   : > { %v9289_v37 = vsel %vm5837_vm14, %v9000_v49, %v3433_v5  ;;  %v9291_v14 = vcvt.s32.f32 %v3677_v61  ;;  %v3468_v49 = vcvt.s32.f32 %v3466_v21  ;;  %v3524_v5 = vcvt.s32.f32 %v3522_v47 }
 0xac4   : > { %v3564_v47 = vand.u32 65535, %v9185_v12 }
 0xac6   : > { %3680 = vmax.xlane.f32.xlu0 %v9291_v14 }
 0xb11   : > { %v9295_v63 = vpop.xlane.xlu0 %3484 }
 0xb12   : > { %vm3486_vm1 = vcmp.eq.f32.partialorder %v9097_v57, %v9295_v63  ;;  %v3508_v57 = vand.u32 65535, %v9134_v39 }
 0xb13   : > { %v3487_v23 = vsel %vm3486_vm1, %v3482_v55, -inf  ;;  %v3550_v55 = vand.u32 65535, %v9155_v20 }
 0xb14   : > { %3488 = vmax.xlane.f32.xlu0 %v3487_v23  ;;  %v3510_v61 = vcvt.s32.f32 %v3508_v57  ;;  %v3536_v23 = vand.u32 65535, %v9161_v41 }
 0xb1c   : > { %v9300_v13 = vpop.xlane.xlu1 %3470 }
 0xb1d   : > { %vm3472_vm14 = vcmp.eq.f32.partialorder %v9110_v27, %v9300_v13 }
 0xb1e   : > { %v3473_v10 = vsel %vm3472_vm14, %v3468_v49, -inf  ;;  %v3552_v49 = vcvt.s32.f32 %v3550_v55 }
 0xb1f   : > { %3474 = vmax.xlane.f32.xlu1 %v3473_v10 }
 0xb22   : > { %v9305_v4 = vpop.xlane.xlu1 %3498 }
 0xb23   : > { %vm3500_vm15 = vcmp.eq.f32.partialorder %v9127_v16, %v9305_v4 }
 0xb24   : > { %v3501_v7 = vsel %vm3500_vm15, %v3496_v11, -inf  ;;  %v3578_v11 = vand.u32 65535, %v9181_v38 }
 0xb25   : > { %3502 = vmax.xlane.f32.xlu1 %v3501_v7 }
 0xb26   : > { %v9311_v59 = vpop.xlane.xlu1 %3526  ;;  %v3580_v7 = vcvt.s32.f32 %v3578_v11 }
 0xb27   : > { %v9313_v27 = vpop.xlane.xlu0 %3512  ;;  %vm3528_vm13 = vcmp.eq.f32.partialorder %v9143_v45, %v9311_v59  ;;  %v3538_v45 = vcvt.s32.f32 %v3536_v23 }
 0xb28   : > { %v3529_v6 = vsel %vm3528_vm13, %v3524_v5, -inf  ;;  %vm3514_vm1 = vcmp.eq.f32.partialorder %v9149_v25, %v9313_v27 }
 0xb29   : > { %3530 = vmax.xlane.f32.xlu1 %v3529_v6  ;;  %v3515_v16 = vsel %vm3514_vm1, %v3510_v61, -inf  ;;  %v3606_v6 = vand.u32 65535, %v9209_v17 }
 0xb2a   : > { %3516 = vmax.xlane.f32.xlu0 %v3515_v16 }
 0xb2b   : > { %v3608_v16 = vcvt.s32.f32 %v3606_v6 }
 0xb2c   : > { %v9321_v21 = vpop.xlane.xlu1 %3554 }
 0xb2d   : > { %v9323_v10 = vpop.xlane.xlu0 %3540  ;;  %vm3556_vm14 = vcmp.eq.f32.partialorder %v9169_v0, %v9321_v21  ;;  %v3566_v0 = vcvt.s32.f32 %v3564_v47 }
 0xb2e   : > { %v3557_v51 = vsel %vm3556_vm14, %v3552_v49, -inf  ;;  %vm3542_vm15 = vcmp.eq.f32.partialorder %v9175_v32, %v9323_v10  ;;  %v3592_v49 = vand.u32 65535, %v9222_v33 }
 0xb2f   : > { %3558 = vmax.xlane.f32.xlu1 %v3557_v51  ;;  %v3543_v25 = vsel %vm3542_vm15, %v3538_v45, -inf  ;;  %v3620_v51 = vand.u32 65535, %v9237_v60 }
 0xb30   : > { %3544 = vmax.xlane.f32.xlu0 %v3543_v25 }
 0xb35   : > { %v9331_v57 = vpop.xlane.xlu1 %3582 }
 0xb36   : > { %v9333_v5 = vpop.xlane.xlu0 %3568  ;;  %vm3584_vm13 = vcmp.eq.f32.partialorder %v9194_v22, %v9331_v57  ;;  %v3634_v22 = vand.u32 65535, %v9228_v18 }
 0xb37   : > { %v3585_v61 = vsel %vm3584_vm13, %v3580_v7, -inf  ;;  %vm3570_vm1 = vcmp.eq.f32.partialorder %v9200_v46, %v9333_v5  ;;  %v3594_v46 = vcvt.s32.f32 %v3592_v49 }
 0xb38   : > { %3586 = vmax.xlane.f32.xlu1 %v3585_v61  ;;  %v3571_v32 = vsel %vm3570_vm1, %v3566_v0, -inf  ;;  %v3636_v47 = vcvt.s32.f32 %v3634_v22  ;;  %v3622_v0 = vcvt.s32.f32 %v3620_v51  ;;  %v3648_v61 = vand.u32 65535, %v9262_v42 }
 0xb39   : > { %3572 = vmax.xlane.f32.xlu0 %v3571_v32 }
 0xb3a   : > { %v3650_v49 = vcvt.s32.f32 %v3648_v61 }
 0xb41   : > { %v9340_v55 = vpop.xlane.xlu1 %3610 }
 0xb42   : > { %vm3612_vm14 = vcmp.eq.f32.partialorder %v9218_v48, %v9340_v55  ;;  %v3662_v48 = vand.u32 65535, %v9254_v2 }
 0xb43   : > { %v3613_v23 = vsel %vm3612_vm14, %v3608_v16, -inf }
 0xb44   : > { %3614 = vmax.xlane.f32.xlu1 %v3613_v23  ;;  %v3664_v16 = vcvt.s32.f32 %v3662_v48 }
 0xb47   : > { %v9346_v45 = vpop.xlane.xlu0 %3596 }
 0xb48   : > { %vm3598_vm15 = vcmp.eq.f32.partialorder %v9239_v28, %v9346_v45 }
 0xb49   : > { %v3599_v25 = vsel %vm3598_vm15, %v3594_v46, -inf }
 0xb4a   : > { %3600 = vmax.xlane.f32.xlu0 %v3599_v25  ;;  %v9351_v11 = vpop.xlane.xlu1 %3638 }
 0xb4b   : > { %v9354_v7 = vpop.xlane.xlu0 %3624  ;;  %vm3640_vm13 = vcmp.eq.f32.partialorder %v9256_v54, %v9351_v11  ;;  %v3676_v54 = vand.u32 65535, %v9280_v52 }
 0xb4c   : > { %v3641_v32 = vsel %vm3640_vm13, %v3636_v47, -inf  ;;  %vm3626_vm1 = vcmp.eq.f32.partialorder %v9259_v1, %v9354_v7 }
 0xb4d   : > { %3642 = vmax.xlane.f32.xlu1 %v3641_v32  ;;  %v3627_v28 = vsel %vm3626_vm1, %v3622_v0, -inf  ;;  %v3678_v51 = vcvt.s32.f32 %v3676_v54 }
 0xb4e   : > { %3628 = vmax.xlane.f32.xlu0 %v3627_v28  ;;  %v9361_v6 = vpop.xlane.xlu1 %3666 }
 0xb4f   : > { %v9363_v23 = vpop.xlane.xlu0 %3652  ;;  %vm3668_vm14 = vcmp.eq.f32.partialorder %v9273_v62, %v9361_v6  ;;  %v3491_v62 = vcvt.f32.s32 %v9295_v63 }
 0xb50   : > { %v3669_v22 = vsel %vm3668_vm14, %v3664_v16, -inf  ;;  %vm3654_vm15 = vcmp.eq.f32.partialorder %v9282_v53, %v9363_v23  ;;  %vm5854_vm14 = vcmask 64512  }
 0xb51   : > { %3670 = vmax.xlane.f32.xlu1 %v3669_v22  ;;  %v3655_v1 = vsel %vm3654_vm15, %v3650_v49, -inf  ;;  %v3492_v48 = vshll.u32 %v3491_v62, 16 }
 0xb52   : > { %3656 = vmax.xlane.f32.xlu0 %v3655_v1 }
 0xb53   : > { %v9370_v46 = vpop.xlane.xlu0 %3680 }
 0xb54   : > { %vm3682_vm13 = vcmp.eq.f32.partialorder %v9291_v14, %v9370_v46  ;;  %v3477_v14 = vcvt.f32.s32 %v9300_v13 }
 0xb55   : > { %v3683_v25 = vsel %vm3682_vm13, %v3678_v51, -inf }
 0xb56   : > { %3684 = vmax.xlane.f32.xlu0 %v3683_v25  ;;  %v3478_v22 = vshll.u32 %v3477_v14, 16 }
 0xba1   : > { %v3489_v47 = vpop.xlane.xlu0 %3488 }
 0xba2   : > { %v3490_v0 = vcvt.f32.s32 %v3489_v47 }
 0xba4   : > { %v3493_v61 = vadd.s32 %v3492_v48, %v3490_v0 }
 0xba6   : > { %v3691_v32 = vand.u32 127, %v3493_v61  ;;  %vm3723_vm1 = vcmp.eq.s32.totalorder %v9089_v19, %v3493_v61 }
 0xba7   : > { %v9377_v53 = vsel %vm3723_vm1, 2147483648, %v9089_v19  ;;  %v3505_v19 = vcvt.f32.s32 %v9305_v4 }
 0xba8   : > { %v3707_v28 = vsub.s32 127, %v3691_v32  ;;  %v3769_v16 = vshra.s32 %v9377_v53, 16  ;;  %v3533_v32 = vcvt.f32.s32 %v9311_v59 }
 0xba9   : > { %v3506_v61 = vshll.u32 %v3505_v19, 16 }
 0xbaa   : > { %v9383_v49 = vsel %vm5854_vm14, %v9095_v35, %v3707_v28  ;;  %v9385_v63 = vcvt.s32.f32 %v3769_v16  ;;  %v3519_v16 = vcvt.f32.s32 %v9313_v27  ;;  %v3534_v14 = vshll.u32 %v3533_v32, 16 }
 0xbac   : > { %3772 = vmax.xlane.f32.xlu0 %v9385_v63  ;;  %v3475_v54 = vpop.xlane.xlu1 %3474 }
 0xbad   : > { %v3476_v1 = vcvt.f32.s32 %v3475_v54 }
 0xbaf   : > { %v3479_v51 = vadd.s32 %v3478_v22, %v3476_v1  ;;  %v3520_v1 = vshll.u32 %v3519_v16, 16 }
 0xbb1   : > { %v3690_v25 = vand.u32 127, %v3479_v51  ;;  %vm3722_vm15 = vcmp.eq.s32.totalorder %v9103_v24, %v3479_v51  ;;  %v3561_v51 = vcvt.f32.s32 %v9321_v21 }
 0xbb2   : > { %v9391_v62 = vsel %vm3722_vm15, 2147483648, %v9103_v24  ;;  %v3503_v48 = vpop.xlane.xlu1 %3502 }
 0xbb3   : > { %v3706_v13 = vsub.s32 127, %v3690_v25  ;;  %v3755_v35 = vshra.s32 %v9391_v62, 16  ;;  %v3504_v28 = vcvt.f32.s32 %v3503_v48  ;;  %v3562_v21 = vshll.u32 %v3561_v51, 16 }
 0xbb5   : > { %v9396_v47 = vsel %vm5854_vm14, %v9108_v50, %v3706_v13  ;;  %v9398_v0 = vcvt.s32.f32 %v3755_v35  ;;  %v3507_v24 = vadd.s32 %v3506_v61, %v3504_v28  ;;  %v3547_v35 = vcvt.f32.s32 %v9323_v10 }
 0xbb6   : > { %v3531_v4 = vpop.xlane.xlu1 %3530 }
 0xbb7   : > { %3758 = vmax.xlane.f32.xlu1 %v9398_v0  ;;  %v3692_v54 = vand.u32 127, %v3507_v24  ;;  %vm3724_vm13 = vcmp.eq.s32.totalorder %v9118_v36, %v3507_v24  ;;  %v3532_v22 = vcvt.f32.s32 %v3531_v4  ;;  %v3517_v50 = vpop.xlane.xlu0 %3516 }
 0xbb8   : > { %v9406_v25 = vsel %vm3724_vm13, 2147483648, %v9118_v36  ;;  %v3518_v59 = vcvt.f32.s32 %v3517_v50 }
 0xbb9   : > { %v3708_v19 = vsub.s32 127, %v3692_v54  ;;  %v3535_v13 = vadd.s32 %v3534_v14, %v3532_v22  ;;  %v3783_v27 = vshra.s32 %v9406_v25, 16  ;;  %v3548_v22 = vshll.u32 %v3547_v35, 16 }
 0xbba   : > { %v3521_v48 = vadd.s32 %v3520_v1, %v3518_v59  ;;  %v3589_v35 = vcvt.f32.s32 %v9331_v57 }
 0xbbb   : > { %v9412_v61 = vsel %vm5854_vm14, %v9124_v44, %v3708_v19  ;;  %v3694_v32 = vand.u32 127, %v3535_v13  ;;  %vm3726_vm1 = vcmp.eq.s32.totalorder %v9130_v43, %v3535_v13  ;;  %v9415_v28 = vcvt.s32.f32 %v3783_v27 }
 0xbbc   : > { %v9418_v36 = vsel %vm3726_vm1, 2147483648, %v9130_v43  ;;  %v3693_v16 = vand.u32 127, %v3521_v48  ;;  %vm3725_vm15 = vcmp.eq.s32.totalorder %v9134_v39, %v3521_v48  ;;  %v3559_v24 = vpop.xlane.xlu1 %3558 }
 0xbbd   : > { %v3710_v4 = vsub.s32 127, %v3694_v32  ;;  %v9422_v10 = vsel %vm3725_vm15, 2147483648, %v9134_v39  ;;  %v3560_v14 = vcvt.f32.s32 %v3559_v24  ;;  %v3545_v44 = vpop.xlane.xlu0 %3544  ;;  %3786 = vmax.xlane.f32.xlu1 %v9415_v28  ;;  %v3811_v54 = vshra.s32 %v9418_v36, 16 }
 0xbbe   : > { %v3709_v50 = vsub.s32 127, %v3693_v16  ;;  %v3546_v1 = vcvt.f32.s32 %v3545_v44  ;;  %v3797_v43 = vshra.s32 %v9422_v10, 16 }
 0xbbf   : > { %v9429_v51 = vsel %vm5854_vm14, %v9141_v9, %v3710_v4  ;;  %v3563_v59 = vadd.s32 %v3562_v21, %v3560_v14  ;;  %v9431_v19 = vcvt.s32.f32 %v3811_v54  ;;  %v3590_v54 = vshll.u32 %v3589_v35, 16 }
 0xbc0   : > { %v9435_v39 = vsel %vm5854_vm14, %v9147_v26, %v3709_v50  ;;  %v3549_v13 = vadd.s32 %v3548_v22, %v3546_v1  ;;  %v9437_v27 = vcvt.s32.f32 %v3797_v43  ;;  %v3575_v26 = vcvt.f32.s32 %v9333_v5 }
 0xbc1   : > { %v3696_v48 = vand.u32 127, %v3563_v59  ;;  %vm3728_vm13 = vcmp.eq.s32.totalorder %v9155_v20, %v3563_v59  ;;  %3814 = vmax.xlane.f32.xlu1 %v9431_v19 }
 0xbc2   : > { %v9443_v9 = vsel %vm3728_vm13, 2147483648, %v9155_v20  ;;  %v3695_v32 = vand.u32 127, %v3549_v13  ;;  %vm3727_vm1 = vcmp.eq.s32.totalorder %v9161_v41, %v3549_v13  ;;  %3800 = vmax.xlane.f32.xlu0 %v9437_v27  ;;  %v3576_v1 = vshll.u32 %v3575_v26, 16 }
 0xbc3   : > { %v3712_v21 = vsub.s32 127, %v3696_v48  ;;  %v9449_v16 = vsel %vm3727_vm1, 2147483648, %v9161_v41  ;;  %v3839_v24 = vshra.s32 %v9443_v9, 16 }
 0xbc4   : > { %v3711_v4 = vsub.s32 127, %v3695_v32  ;;  %v3825_v14 = vshra.s32 %v9449_v16, 16 }
 0xbc5   : > { %v9455_v20 = vsel %vm5854_vm14, %v9167_v56, %v3712_v21  ;;  %v3587_v57 = vpop.xlane.xlu1 %3586  ;;  %v9457_v44 = vcvt.s32.f32 %v3839_v24 }
 0xbc6   : > { %v9461_v5 = vsel %vm5854_vm14, %v9173_v3, %v3711_v4  ;;  %v3588_v22 = vcvt.f32.s32 %v3587_v57  ;;  %v3573_v41 = vpop.xlane.xlu0 %3572  ;;  %v9463_v50 = vcvt.s32.f32 %v3825_v14  ;;  %v3617_v4 = vcvt.f32.s32 %v9340_v55 }
 0xbc7   : > { %v3574_v43 = vcvt.f32.s32 %v3573_v41  ;;  %3842 = vmax.xlane.f32.xlu1 %v9457_v44  ;;  %v3603_v55 = vcvt.f32.s32 %v9346_v45  ;;  %v3659_v45 = vcvt.f32.s32 %v9363_v23 }
 0xbc8   : > { %v3591_v59 = vadd.s32 %v3590_v54, %v3588_v22  ;;  %3828 = vmax.xlane.f32.xlu0 %v9463_v50  ;;  %v3618_v22 = vshll.u32 %v3617_v4, 16 }
 0xbc9   : > { %v3577_v56 = vadd.s32 %v3576_v1, %v3574_v43  ;;  %v3604_v43 = vshll.u32 %v3603_v55, 16 }
 0xbca   : > { %v3698_v13 = vand.u32 127, %v3591_v59  ;;  %vm3730_vm15 = vcmp.eq.s32.totalorder %v9181_v38, %v3591_v59  ;;  %v3645_v59 = vcvt.f32.s32 %v9351_v11 }
 0xbcb   : > { %v9469_v48 = vsel %vm3730_vm15, 2147483648, %v9181_v38  ;;  %v3697_v3 = vand.u32 127, %v3577_v56  ;;  %vm3729_vm13 = vcmp.eq.s32.totalorder %v9185_v12, %v3577_v56 }
 0xbcc   : > { %v3714_v35 = vsub.s32 127, %v3698_v13  ;;  %v9473_v32 = vsel %vm3729_vm13, 2147483648, %v9185_v12  ;;  %v3867_v26 = vshra.s32 %v9469_v48, 16  ;;  %v3631_v13 = vcvt.f32.s32 %v9354_v7 }
 0xbcd   : > { %v3713_v21 = vsub.s32 127, %v3697_v3  ;;  %v3853_v24 = vshra.s32 %v9473_v32, 16 }
 0xbce   : > { %v9480_v14 = vsel %vm5854_vm14, %v9192_v8, %v3714_v35  ;;  %v9482_v38 = vcvt.s32.f32 %v3867_v26  ;;  %v3632_v55 = vshll.u32 %v3631_v13, 16 }
 0xbcf   : > { %v9486_v57 = vsel %vm5854_vm14, %v9198_v31, %v3713_v21  ;;  %v9488_v54 = vcvt.s32.f32 %v3853_v24  ;;  %v3673_v21 = vcvt.f32.s32 %v9361_v6 }
 0xbd0   : > { %3870 = vmax.xlane.f32.xlu1 %v9482_v38 }
 0xbd1   : > { %v3615_v12 = vpop.xlane.xlu1 %3614  ;;  %3856 = vmax.xlane.f32.xlu0 %v9488_v54  ;;  %v3674_v23 = vshll.u32 %v3673_v21, 16 }
 0xbd2   : > { %v3616_v41 = vcvt.f32.s32 %v3615_v12 }
 0xbd4   : > { %v3619_v1 = vadd.s32 %v3618_v22, %v3616_v41  ;;  %v3687_v22 = vcvt.f32.s32 %v9370_v46 }
 0xbd6   : > { %v3700_v8 = vand.u32 127, %v3619_v1  ;;  %vm3732_vm1 = vcmp.eq.s32.totalorder %v9209_v17, %v3619_v1 }
 0xbd7   : > { %v9496_v31 = vsel %vm3732_vm1, 2147483648, %v9209_v17  ;;  %v3601_v56 = vpop.xlane.xlu0 %3600  ;;  %v3646_v17 = vshll.u32 %v3645_v59, 16 }
 0xbd8   : > { %v3716_v3 = vsub.s32 127, %v3700_v8  ;;  %v3602_v35 = vcvt.f32.s32 %v3601_v56  ;;  %v3895_v26 = vshra.s32 %v9496_v31, 16 }
 0xbda   : > { %v9504_v24 = vsel %vm5854_vm14, %v9216_v58, %v3716_v3  ;;  %v3605_v4 = vadd.s32 %v3604_v43, %v3602_v35  ;;  %v3643_v11 = vpop.xlane.xlu1 %3642  ;;  %v9506_v12 = vcvt.s32.f32 %v3895_v26  ;;  %v3660_v43 = vshll.u32 %v3659_v45, 16 }
 0xbdb   : > { %v3644_v7 = vcvt.f32.s32 %v3643_v11  ;;  %v3629_v41 = vpop.xlane.xlu0 %3628  ;;  %v3688_v35 = vshll.u32 %v3687_v22, 16 }
 0xbdc   : > { %v3699_v1 = vand.u32 127, %v3605_v4  ;;  %vm3731_vm15 = vcmp.eq.s32.totalorder %v9222_v33, %v3605_v4  ;;  %v3630_v6 = vcvt.f32.s32 %v3629_v41  ;;  %3898 = vmax.xlane.f32.xlu1 %v9506_v12 }
 0xbdd   : > { %v9512_v58 = vsel %vm3731_vm15, 2147483648, %v9222_v33  ;;  %v3647_v8 = vadd.s32 %v3646_v17, %v3644_v7 }
 0xbde   : > { %v3715_v56 = vsub.s32 127, %v3699_v1  ;;  %v3633_v3 = vadd.s32 %v3632_v55, %v3630_v6  ;;  %v3671_v59 = vpop.xlane.xlu1 %3670  ;;  %v3881_v46 = vshra.s32 %v9512_v58, 16 }
 0xbdf   : > { %v3702_v26 = vand.u32 127, %v3647_v8  ;;  %vm3734_vm13 = vcmp.eq.s32.totalorder %v9228_v18, %v3647_v8  ;;  %v3672_v13 = vcvt.f32.s32 %v3671_v59  ;;  %v3657_v4 = vpop.xlane.xlu0 %3656 }
 0xbe0   : > { %v9518_v11 = vsel %vm5854_vm14, %v9233_v34, %v3715_v56  ;;  %v9521_v33 = vsel %vm3734_vm13, 2147483648, %v9228_v18  ;;  %v3701_v21 = vand.u32 127, %v3633_v3  ;;  %vm3733_vm1 = vcmp.eq.s32.totalorder %v9237_v60, %v3633_v3 }
 0xbe1   : > { %v3718_v45 = vsub.s32 127, %v3702_v26  ;;  %v9525_v17 = vsel %vm3733_vm1, 2147483648, %v9237_v60  ;;  %v3675_v22 = vadd.s32 %v3674_v23, %v3672_v13  ;;  %v3658_v7 = vcvt.f32.s32 %v3657_v4 }
 0xbe2   : > { %v3717_v41 = vsub.s32 127, %v3701_v21  ;;  %v9527_v55 = vcvt.s32.f32 %v3881_v46  ;;  %v3923_v1 = vshra.s32 %v9521_v33, 16  ;;  %v3909_v34 = vshra.s32 %v9525_v17, 16 }
 0xbe3   : > { %v9533_v18 = vsel %vm5854_vm14, %v9243_v30, %v3718_v45  ;;  %v3704_v6 = vand.u32 127, %v3675_v22  ;;  %vm3736_vm15 = vcmp.eq.s32.totalorder %v9254_v2, %v3675_v22  ;;  %v3661_v8 = vadd.s32 %v3660_v43, %v3658_v7  ;;  %v3685_v56 = vpop.xlane.xlu0 %3684 }
 0xbe4   : > { %v9538_v60 = vsel %vm5854_vm14, %v9251_v40, %v3717_v41  ;;  %v9541_v23 = vsel %vm3736_vm15, 2147483648, %v9254_v2  ;;  %3884 = vmax.xlane.f32.xlu0 %v9527_v55  ;;  %v3686_v3 = vcvt.f32.s32 %v3685_v56  ;;  %v9544_v59 = vcvt.s32.f32 %v3923_v1 }
 0xbe5   : > { %v3720_v46 = vsub.s32 127, %v3704_v6  ;;  %v3703_v30 = vand.u32 127, %v3661_v8  ;;  %vm3735_vm13 = vcmp.eq.s32.totalorder %v9262_v42, %v3661_v8  ;;  %v9547_v26 = vcvt.s32.f32 %v3909_v34 }
 0xbe6   : > { %v9550_v43 = vsel %vm3735_vm13, 2147483648, %v9262_v42  ;;  %v3689_v13 = vadd.s32 %v3688_v35, %v3686_v3  ;;  %3926 = vmax.xlane.f32.xlu1 %v9544_v59  ;;  %v3951_v40 = vshra.s32 %v9541_v23, 16  ;;  %v3754_v56 = vand.u32 65535, %v9391_v62 }
 0xbe7   : > { %v9556_v2 = vsel %vm5854_vm14, %v9268_v15, %v3720_v46  ;;  %v3719_v4 = vsub.s32 127, %v3703_v30  ;;  %v3937_v21 = vshra.s32 %v9550_v43, 16  ;;  %v3782_v30 = vand.u32 65535, %v9406_v25 }
 0xbe8   : > { %v3705_v45 = vand.u32 127, %v3689_v13  ;;  %vm3737_vm1 = vcmp.eq.s32.totalorder %v9280_v52, %v3689_v13  ;;  %3912 = vmax.xlane.f32.xlu0 %v9547_v26  ;;  %v9561_v22 = vcvt.s32.f32 %v3951_v40  ;;  %v3756_v3 = vcvt.s32.f32 %v3754_v56 }
 0xbe9   : > { %v9565_v42 = vsel %vm5854_vm14, %v9277_v29, %v3719_v4  ;;  %v9568_v35 = vsel %vm3737_vm1, 2147483648, %v9280_v52  ;;  %v9570_v7 = vcvt.s32.f32 %v3937_v21  ;;  %v3768_v29 = vand.u32 65535, %v9377_v53 }
 0xbea   : > { %v3721_v15 = vsub.s32 127, %v3705_v45  ;;  %3954 = vmax.xlane.f32.xlu1 %v9561_v22  ;;  %v3965_v41 = vshra.s32 %v9568_v35, 16  ;;  %v3784_v40 = vcvt.s32.f32 %v3782_v30  ;;  %v3810_v4 = vand.u32 65535, %v9418_v36 }
 0xbeb   : > { %v3770_v6 = vcvt.s32.f32 %v3768_v29 }
 0xbec   : > { %v9576_v1 = vsel %vm5854_vm14, %v9289_v37, %v3721_v15  ;;  %3940 = vmax.xlane.f32.xlu0 %v9570_v7  ;;  %v9579_v34 = vcvt.s32.f32 %v3965_v41  ;;  %v3812_v15 = vcvt.s32.f32 %v3810_v4  ;;  %v3852_v4 = vand.u32 65535, %v9473_v32 }
 0xbf0   : > { %3968 = vmax.xlane.f32.xlu0 %v9579_v34 }
 0xc39   : > { %v9583_v52 = vpop.xlane.xlu0 %3772 }
 0xc3a   : > { %vm3774_vm15 = vcmp.eq.f32.partialorder %v9385_v63, %v9583_v52  ;;  %v3796_v63 = vand.u32 65535, %v9422_v10 }
 0xc3b   : > { %v3775_v8 = vsel %vm3774_vm15, %v3770_v6, -inf  ;;  %v3838_v6 = vand.u32 65535, %v9443_v9 }
 0xc3c   : > { %3776 = vmax.xlane.f32.xlu0 %v3775_v8  ;;  %v3798_v41 = vcvt.s32.f32 %v3796_v63  ;;  %v3824_v8 = vand.u32 65535, %v9449_v16 }
 0xc44   : > { %v9588_v37 = vpop.xlane.xlu1 %3758 }
 0xc45   : > { %vm3760_vm14 = vcmp.eq.f32.partialorder %v9398_v0, %v9588_v37 }
 0xc46   : > { %v3761_v46 = vsel %vm3760_vm14, %v3756_v3, -inf  ;;  %v3840_v3 = vcvt.s32.f32 %v3838_v6 }
 0xc47   : > { %3762 = vmax.xlane.f32.xlu1 %v3761_v46 }
 0xc4a   : > { %v9593_v13 = vpop.xlane.xlu1 %3786 }
 0xc4b   : > { %vm3788_vm13 = vcmp.eq.f32.partialorder %v9415_v28, %v9593_v13 }
 0xc4c   : > { %v3789_v21 = vsel %vm3788_vm13, %v3784_v40, -inf  ;;  %v3866_v40 = vand.u32 65535, %v9469_v48 }
 0xc4d   : > { %3790 = vmax.xlane.f32.xlu1 %v3789_v21 }
 0xc4e   : > { %v9599_v45 = vpop.xlane.xlu1 %3814  ;;  %v3868_v21 = vcvt.s32.f32 %v3866_v40 }
 0xc4f   : > { %v9601_v0 = vpop.xlane.xlu0 %3800  ;;  %vm3816_vm1 = vcmp.eq.f32.partialorder %v9431_v19, %v9599_v45  ;;  %v3826_v19 = vcvt.s32.f32 %v3824_v8 }
 0xc50   : > { %v3817_v29 = vsel %vm3816_vm1, %v3812_v15, -inf  ;;  %vm3802_vm15 = vcmp.eq.f32.partialorder %v9437_v27, %v9601_v0 }
 0xc51   : > { %3818 = vmax.xlane.f32.xlu1 %v3817_v29  ;;  %v3803_v28 = vsel %vm3802_vm15, %v3798_v41, -inf  ;;  %v3894_v29 = vand.u32 65535, %v9496_v31 }
 0xc52   : > { %3804 = vmax.xlane.f32.xlu0 %v3803_v28 }
 0xc53   : > { %v3896_v28 = vcvt.s32.f32 %v3894_v29 }
 0xc54   : > { %v9609_v56 = vpop.xlane.xlu1 %3842 }
 0xc55   : > { %v9611_v46 = vpop.xlane.xlu0 %3828  ;;  %vm3844_vm14 = vcmp.eq.f32.partialorder %v9457_v44, %v9609_v56  ;;  %v3854_v44 = vcvt.s32.f32 %v3852_v4 }
 0xc56   : > { %v3845_v30 = vsel %vm3844_vm14, %v3840_v3, -inf  ;;  %vm3830_vm13 = vcmp.eq.f32.partialorder %v9463_v50, %v9611_v46  ;;  %v3922_v3 = vand.u32 65535, %v9521_v33 }
 0xc57   : > { %3846 = vmax.xlane.f32.xlu1 %v3845_v30  ;;  %v3831_v27 = vsel %vm3830_vm13, %v3826_v19, -inf  ;;  %v3908_v30 = vand.u32 65535, %v9525_v17 }
 0xc58   : > { %3832 = vmax.xlane.f32.xlu0 %v3831_v27  ;;  %v3924_v4 = vcvt.s32.f32 %v3922_v3  ;;  %v3964_v3 = vand.u32 65535, %v9568_v35 }
 0xc5d   : > { %v9619_v63 = vpop.xlane.xlu1 %3870 }
 0xc5e   : > { %v9621_v15 = vpop.xlane.xlu0 %3856  ;;  %vm3872_vm1 = vcmp.eq.f32.partialorder %v9482_v38, %v9619_v63  ;;  %v3880_v38 = vand.u32 65535, %v9512_v58 }
 0xc5f   : > { %v3873_v41 = vsel %vm3872_vm1, %v3868_v21, -inf  ;;  %vm3858_vm15 = vcmp.eq.f32.partialorder %v9488_v54, %v9621_v15 }
 0xc60   : > { %3874 = vmax.xlane.f32.xlu1 %v3873_v41  ;;  %v3859_v50 = vsel %vm3858_vm15, %v3854_v44, -inf  ;;  %v3882_v54 = vcvt.s32.f32 %v3880_v38  ;;  %v3910_v41 = vcvt.s32.f32 %v3908_v30  ;;  %v3966_v30 = vcvt.s32.f32 %v3964_v3 }
 0xc61   : > { %3860 = vmax.xlane.f32.xlu0 %v3859_v50  ;;  %v3936_v50 = vand.u32 65535, %v9550_v43 }
 0xc63   : > { %v3938_v38 = vcvt.s32.f32 %v3936_v50 }
 0xc69   : > { %v9628_v6 = vpop.xlane.xlu1 %3898 }
 0xc6a   : > { %vm3900_vm14 = vcmp.eq.f32.partialorder %v9506_v12, %v9628_v6  ;;  %v3950_v12 = vand.u32 65535, %v9541_v23 }
 0xc6b   : > { %v3901_v8 = vsel %vm3900_vm14, %v3896_v28, -inf }
 0xc6c   : > { %3902 = vmax.xlane.f32.xlu1 %v3901_v8  ;;  %v3952_v28 = vcvt.s32.f32 %v3950_v12 }
 0xc71   : > { %v9634_v19 = vpop.xlane.xlu0 %3884 }
 0xc72   : > { %vm3886_vm13 = vcmp.eq.f32.partialorder %v9527_v55, %v9634_v19 }
 0xc73   : > { %v3887_v27 = vsel %vm3886_vm13, %v3882_v54, -inf  ;;  %v9639_v40 = vpop.xlane.xlu1 %3926 }
 0xc74   : > { %3888 = vmax.xlane.f32.xlu0 %v3887_v27  ;;  %vm3928_vm1 = vcmp.eq.f32.partialorder %v9544_v59, %v9639_v40 }
 0xc75   : > { %v9644_v21 = vpop.xlane.xlu0 %3912  ;;  %v3929_v44 = vsel %vm3928_vm1, %v3924_v4, -inf }
 0xc76   : > { %3930 = vmax.xlane.f32.xlu1 %v3929_v44  ;;  %vm3914_vm15 = vcmp.eq.f32.partialorder %v9547_v26, %v9644_v21 }
 0xc77   : > { %v3915_v55 = vsel %vm3914_vm15, %v3910_v41, -inf  ;;  %v9649_v29 = vpop.xlane.xlu1 %3954 }
 0xc78   : > { %3916 = vmax.xlane.f32.xlu0 %v3915_v55  ;;  %vm3956_vm14 = vcmp.eq.f32.partialorder %v9561_v22, %v9649_v29  ;;  %v3779_v22 = vcvt.f32.s32 %v9583_v52 }
 0xc79   : > { %v9653_v8 = vpop.xlane.xlu0 %3940  ;;  %v3957_v59 = vsel %vm3956_vm14, %v3952_v28, -inf  ;;  %vm5871_vm14 = vcmask 72704  }
 0xc7a   : > { %3958 = vmax.xlane.f32.xlu1 %v3957_v59  ;;  %vm3942_vm13 = vcmp.eq.f32.partialorder %v9570_v7, %v9653_v8  ;;  %v3780_v12 = vshll.u32 %v3779_v22, 16 }
 0xc7b   : > { %v3943_v54 = vsel %vm3942_vm13, %v3938_v38, -inf }
 0xc7c   : > { %3944 = vmax.xlane.f32.xlu0 %v3943_v54 }
 0xc7d   : > { %v9658_v26 = vpop.xlane.xlu0 %3968 }
 0xc7e   : > { %vm3970_vm1 = vcmp.eq.f32.partialorder %v9579_v34, %v9658_v26  ;;  %v3765_v34 = vcvt.f32.s32 %v9588_v37 }
 0xc7f   : > { %v3971_v27 = vsel %vm3970_vm1, %v3966_v30, -inf }
 0xc80   : > { %3972 = vmax.xlane.f32.xlu0 %v3971_v27  ;;  %v3766_v3 = vshll.u32 %v3765_v34, 16 }
 0xcc9   : > { %v3777_v4 = vpop.xlane.xlu0 %3776 }
 0xcca   : > { %v3778_v44 = vcvt.f32.s32 %v3777_v4 }
 0xccc   : > { %v3781_v41 = vadd.s32 %v3780_v12, %v3778_v44 }
 0xcce   : > { %v3979_v50 = vand.u32 127, %v3781_v41  ;;  %vm4011_vm15 = vcmp.eq.s32.totalorder %v9377_v53, %v3781_v41 }
 0xccf   : > { %v9665_v7 = vsel %vm4011_vm15, 2147483648, %v9377_v53  ;;  %v3793_v53 = vcvt.f32.s32 %v9593_v13 }
 0xcd0   : > { %v3995_v55 = vsub.s32 127, %v3979_v50  ;;  %v4057_v28 = vshra.s32 %v9665_v7, 16  ;;  %v3821_v50 = vcvt.f32.s32 %v9599_v45 }
 0xcd1   : > { %v3794_v41 = vshll.u32 %v3793_v53, 16 }
 0xcd2   : > { %v9671_v59 = vsel %vm5871_vm14, %v9383_v49, %v3995_v55  ;;  %v9673_v52 = vcvt.s32.f32 %v4057_v28  ;;  %v3807_v28 = vcvt.f32.s32 %v9601_v0  ;;  %v3822_v34 = vshll.u32 %v3821_v50, 16 }
 0xcd4   : > { %4060 = vmax.xlane.f32.xlu0 %v9673_v52  ;;  %v3763_v38 = vpop.xlane.xlu1 %3762 }
 0xcd5   : > { %v3764_v54 = vcvt.f32.s32 %v3763_v38 }
 0xcd7   : > { %v3767_v30 = vadd.s32 %v3766_v3, %v3764_v54  ;;  %v3808_v54 = vshll.u32 %v3807_v28, 16 }
 0xcd9   : > { %v3978_v27 = vand.u32 127, %v3767_v30  ;;  %vm4010_vm13 = vcmp.eq.s32.totalorder %v9391_v62, %v3767_v30  ;;  %v3849_v30 = vcvt.f32.s32 %v9609_v56 }
 0xcda   : > { %v9679_v22 = vsel %vm4010_vm13, 2147483648, %v9391_v62  ;;  %v3791_v12 = vpop.xlane.xlu1 %3790 }
 0xcdb   : > { %v3994_v37 = vsub.s32 127, %v3978_v27  ;;  %v4043_v49 = vshra.s32 %v9679_v22, 16  ;;  %v3792_v55 = vcvt.f32.s32 %v3791_v12  ;;  %v3850_v56 = vshll.u32 %v3849_v30, 16 }
 0xcdd   : > { %v9684_v4 = vsel %vm5871_vm14, %v9396_v47, %v3994_v37  ;;  %v9686_v44 = vcvt.s32.f32 %v4043_v49  ;;  %v3795_v62 = vadd.s32 %v3794_v41, %v3792_v55  ;;  %v3835_v49 = vcvt.f32.s32 %v9611_v46 }
 0xcde   : > { %v3819_v13 = vpop.xlane.xlu1 %3818 }
 0xcdf   : > { %4046 = vmax.xlane.f32.xlu1 %v9686_v44  ;;  %v3980_v38 = vand.u32 127, %v3795_v62  ;;  %vm4012_vm1 = vcmp.eq.s32.totalorder %v9406_v25, %v3795_v62  ;;  %v3820_v3 = vcvt.f32.s32 %v3819_v13  ;;  %v3805_v47 = vpop.xlane.xlu0 %3804 }
 0xce0   : > { %v9694_v27 = vsel %vm4012_vm1, 2147483648, %v9406_v25  ;;  %v3806_v45 = vcvt.f32.s32 %v3805_v47 }
 0xce1   : > { %v3996_v53 = vsub.s32 127, %v3980_v38  ;;  %v3823_v37 = vadd.s32 %v3822_v34, %v3820_v3  ;;  %v4071_v0 = vshra.s32 %v9694_v27, 16  ;;  %v3836_v3 = vshll.u32 %v3835_v49, 16 }
 0xce2   : > { %v3809_v12 = vadd.s32 %v3808_v54, %v3806_v45  ;;  %v3877_v49 = vcvt.f32.s32 %v9619_v63 }
 0xce3   : > { %v9700_v41 = vsel %vm5871_vm14, %v9412_v61, %v3996_v53  ;;  %v3982_v50 = vand.u32 127, %v3823_v37  ;;  %vm4014_vm15 = vcmp.eq.s32.totalorder %v9418_v36, %v3823_v37  ;;  %v9703_v55 = vcvt.s32.f32 %v4071_v0 }
 0xce4   : > { %v9706_v25 = vsel %vm4014_vm15, 2147483648, %v9418_v36  ;;  %v3981_v28 = vand.u32 127, %v3809_v12  ;;  %vm4013_vm13 = vcmp.eq.s32.totalorder %v9422_v10, %v3809_v12  ;;  %v3847_v62 = vpop.xlane.xlu1 %3846 }
 0xce5   : > { %v3998_v13 = vsub.s32 127, %v3982_v50  ;;  %v9710_v46 = vsel %vm4013_vm13, 2147483648, %v9422_v10  ;;  %v3848_v34 = vcvt.f32.s32 %v3847_v62  ;;  %v3833_v61 = vpop.xlane.xlu0 %3832  ;;  %4074 = vmax.xlane.f32.xlu1 %v9703_v55  ;;  %v4099_v38 = vshra.s32 %v9706_v25, 16 }
 0xce6   : > { %v3997_v47 = vsub.s32 127, %v3981_v28  ;;  %v3834_v54 = vcvt.f32.s32 %v3833_v61  ;;  %v4085_v36 = vshra.s32 %v9710_v46, 16 }
 0xce7   : > { %v9717_v30 = vsel %vm5871_vm14, %v9429_v51, %v3998_v13  ;;  %v3851_v45 = vadd.s32 %v3850_v56, %v3848_v34  ;;  %v9719_v53 = vcvt.s32.f32 %v4099_v38  ;;  %v3878_v38 = vshll.u32 %v3877_v49, 16 }
 0xce8   : > { %v9723_v10 = vsel %vm5871_vm14, %v9435_v39, %v3997_v47  ;;  %v3837_v37 = vadd.s32 %v3836_v3, %v3834_v54  ;;  %v9725_v0 = vcvt.s32.f32 %v4085_v36  ;;  %v3863_v39 = vcvt.f32.s32 %v9621_v15 }
 0xce9   : > { %v3984_v12 = vand.u32 127, %v3851_v45  ;;  %vm4016_vm1 = vcmp.eq.s32.totalorder %v9443_v9, %v3851_v45  ;;  %4102 = vmax.xlane.f32.xlu1 %v9719_v53 }
 0xcea   : > { %v9731_v51 = vsel %vm4016_vm1, 2147483648, %v9443_v9  ;;  %v3983_v50 = vand.u32 127, %v3837_v37  ;;  %vm4015_vm15 = vcmp.eq.s32.totalorder %v9449_v16, %v3837_v37  ;;  %4088 = vmax.xlane.f32.xlu0 %v9725_v0  ;;  %v3864_v54 = vshll.u32 %v3863_v39, 16 }
 0xceb   : > { %v4000_v56 = vsub.s32 127, %v3984_v12  ;;  %v9737_v28 = vsel %vm4015_vm15, 2147483648, %v9449_v16  ;;  %v4127_v62 = vshra.s32 %v9731_v51, 16 }
 0xcec   : > { %v3999_v13 = vsub.s32 127, %v3983_v50  ;;  %v4113_v34 = vshra.s32 %v9737_v28, 16 }
 0xced   : > { %v9743_v9 = vsel %vm5871_vm14, %v9455_v20, %v4000_v56  ;;  %v3875_v63 = vpop.xlane.xlu1 %3874  ;;  %v9745_v61 = vcvt.s32.f32 %v4127_v62 }
 0xcee   : > { %v9749_v15 = vsel %vm5871_vm14, %v9461_v5, %v3999_v13  ;;  %v3876_v3 = vcvt.f32.s32 %v3875_v63  ;;  %v3861_v16 = vpop.xlane.xlu0 %3860  ;;  %v9751_v47 = vcvt.s32.f32 %v4113_v34  ;;  %v3905_v13 = vcvt.f32.s32 %v9628_v6 }
 0xcef   : > { %v3862_v36 = vcvt.f32.s32 %v3861_v16  ;;  %4130 = vmax.xlane.f32.xlu1 %v9745_v61 }
 0xcf0   : > { %v3879_v45 = vadd.s32 %v3878_v38, %v3876_v3  ;;  %4116 = vmax.xlane.f32.xlu0 %v9751_v47  ;;  %v3906_v3 = vshll.u32 %v3905_v13, 16 }
 0xcf1   : > { %v3865_v20 = vadd.s32 %v3864_v54, %v3862_v36  ;;  %v3891_v54 = vcvt.f32.s32 %v9634_v19 }
 0xcf2   : > { %v3986_v37 = vand.u32 127, %v3879_v45  ;;  %vm4018_vm13 = vcmp.eq.s32.totalorder %v9469_v48, %v3879_v45 }
 0xcf3   : > { %v9757_v12 = vsel %vm4018_vm13, 2147483648, %v9469_v48  ;;  %v3985_v5 = vand.u32 127, %v3865_v20  ;;  %vm4017_vm1 = vcmp.eq.s32.totalorder %v9473_v32, %v3865_v20 }
 0xcf4   : > { %v4002_v49 = vsub.s32 127, %v3986_v37  ;;  %v9761_v50 = vsel %vm4017_vm1, 2147483648, %v9473_v32  ;;  %v4155_v39 = vshra.s32 %v9757_v12, 16  ;;  %v3919_v37 = vcvt.f32.s32 %v9644_v21 }
 0xcf5   : > { %v4001_v56 = vsub.s32 127, %v3985_v5  ;;  %v4141_v62 = vshra.s32 %v9761_v50, 16 }
 0xcf6   : > { %v9768_v34 = vsel %vm5871_vm14, %v9480_v14, %v4002_v49  ;;  %v9770_v48 = vcvt.s32.f32 %v4155_v39  ;;  %v3892_v49 = vshll.u32 %v3891_v54, 16  ;;  %v3920_v21 = vshll.u32 %v3919_v37, 16 }
 0xcf7   : > { %v9774_v63 = vsel %vm5871_vm14, %v9486_v57, %v4001_v56  ;;  %v9776_v38 = vcvt.s32.f32 %v4141_v62  ;;  %v3933_v57 = vcvt.f32.s32 %v9639_v40  ;;  %v3961_v62 = vcvt.f32.s32 %v9649_v29 }
 0xcf8   : > { %4158 = vmax.xlane.f32.xlu1 %v9770_v48 }
 0xcf9   : > { %v3903_v32 = vpop.xlane.xlu1 %3902  ;;  %4144 = vmax.xlane.f32.xlu0 %v9776_v38  ;;  %v3934_v40 = vshll.u32 %v3933_v57, 16 }
 0xcfa   : > { %v3904_v16 = vcvt.f32.s32 %v3903_v32 }
 0xcfc   : > { %v3907_v6 = vadd.s32 %v3906_v3, %v3904_v16 }
 0xcfe   : > { %v3988_v14 = vand.u32 127, %v3907_v6  ;;  %vm4020_vm15 = vcmp.eq.s32.totalorder %v9496_v31, %v3907_v6 }
 0xcff   : > { %v9783_v36 = vsel %vm4020_vm15, 2147483648, %v9496_v31  ;;  %v3947_v31 = vcvt.f32.s32 %v9653_v8 }
 0xd00   : > { %v4004_v45 = vsub.s32 127, %v3988_v14  ;;  %v4183_v20 = vshra.s32 %v9783_v36, 16  ;;  %v3962_v14 = vshll.u32 %v3961_v62, 16 }
 0xd01   : > { %v3889_v5 = vpop.xlane.xlu0 %3888 }
 0xd02   : > { %v9790_v39 = vsel %vm5871_vm14, %v9504_v24, %v4004_v45  ;;  %v3890_v19 = vcvt.f32.s32 %v3889_v5  ;;  %v9792_v56 = vcvt.s32.f32 %v4183_v20  ;;  %v3948_v45 = vshll.u32 %v3947_v31, 16 }
 0xd03   : > { %v3931_v13 = vpop.xlane.xlu1 %3930 }
 0xd04   : > { %v3893_v32 = vadd.s32 %v3892_v49, %v3890_v19  ;;  %v3932_v3 = vcvt.f32.s32 %v3931_v13  ;;  %4186 = vmax.xlane.f32.xlu1 %v9792_v56  ;;  %v3975_v49 = vcvt.f32.s32 %v9658_v26 }
 0xd05   : > { %v3917_v16 = vpop.xlane.xlu0 %3916 }
 0xd06   : > { %v3987_v6 = vand.u32 127, %v3893_v32  ;;  %vm4019_vm13 = vcmp.eq.s32.totalorder %v9512_v58, %v3893_v32  ;;  %v3935_v24 = vadd.s32 %v3934_v40, %v3932_v3  ;;  %v3918_v54 = vcvt.f32.s32 %v3917_v16 }
 0xd07   : > { %v9799_v20 = vsel %vm4019_vm13, 2147483648, %v9512_v58  ;;  %v3959_v29 = vpop.xlane.xlu1 %3958 }
 0xd08   : > { %v4003_v8 = vsub.s32 127, %v3987_v6  ;;  %v3990_v5 = vand.u32 127, %v3935_v24  ;;  %vm4022_vm1 = vcmp.eq.s32.totalorder %v9521_v33, %v3935_v24  ;;  %v3921_v57 = vadd.s32 %v3920_v21, %v3918_v54 }
 0xd09   : > { %v9804_v37 = vsel %vm4022_vm1, 2147483648, %v9521_v33  ;;  %v3960_v19 = vcvt.f32.s32 %v3959_v29  ;;  %v3945_v13 = vpop.xlane.xlu0 %3944  ;;  %v4169_v40 = vshra.s32 %v9799_v20, 16  ;;  %v3976_v24 = vshll.u32 %v3975_v49, 16 }
 0xd0a   : > { %v9809_v62 = vsel %vm5871_vm14, %v9518_v11, %v4003_v8  ;;  %v4006_v58 = vsub.s32 127, %v3990_v5  ;;  %v3989_v31 = vand.u32 127, %v3921_v57  ;;  %vm4021_vm15 = vcmp.eq.s32.totalorder %v9525_v17, %v3921_v57 }
 0xd0b   : > { %v9813_v32 = vsel %vm4021_vm15, 2147483648, %v9525_v17  ;;  %v3963_v3 = vadd.s32 %v3962_v14, %v3960_v19  ;;  %v3946_v26 = vcvt.f32.s32 %v3945_v13  ;;  %v9815_v21 = vcvt.s32.f32 %v4169_v40 }
 0xd0c   : > { %v9819_v33 = vsel %vm5871_vm14, %v9533_v18, %v4006_v58  ;;  %v4005_v16 = vsub.s32 127, %v3989_v31  ;;  %v4211_v6 = vshra.s32 %v9804_v37, 16  ;;  %v4197_v11 = vshra.s32 %v9813_v32, 16 }
 0xd0d   : > { %v3992_v54 = vand.u32 127, %v3963_v3  ;;  %vm4024_vm13 = vcmp.eq.s32.totalorder %v9541_v23, %v3963_v3  ;;  %v3949_v29 = vadd.s32 %v3948_v45, %v3946_v26  ;;  %4172 = vmax.xlane.f32.xlu0 %v9815_v21  ;;  %v3973_v17 = vpop.xlane.xlu0 %3972 }
 0xd0e   : > { %v9827_v14 = vsel %vm5871_vm14, %v9538_v60, %v4005_v16  ;;  %v9830_v18 = vsel %vm4024_vm13, 2147483648, %v9541_v23  ;;  %v3974_v8 = vcvt.f32.s32 %v3973_v17  ;;  %v9832_v5 = vcvt.s32.f32 %v4211_v6 }
 0xd0f   : > { %v4008_v57 = vsub.s32 127, %v3992_v54  ;;  %v3991_v19 = vand.u32 127, %v3949_v29  ;;  %vm4023_vm1 = vcmp.eq.s32.totalorder %v9550_v43, %v3949_v29  ;;  %v9835_v49 = vcvt.s32.f32 %v4197_v11 }
 0xd10   : > { %v9838_v45 = vsel %vm4023_vm1, 2147483648, %v9550_v43  ;;  %v3977_v13 = vadd.s32 %v3976_v24, %v3974_v8  ;;  %4214 = vmax.xlane.f32.xlu1 %v9832_v5  ;;  %v4239_v60 = vshra.s32 %v9830_v18, 16  ;;  %v4042_v17 = vand.u32 65535, %v9679_v22 }
 0xd11   : > { %v9844_v23 = vsel %vm5871_vm14, %v9556_v2, %v4008_v57  ;;  %v4007_v40 = vsub.s32 127, %v3991_v19  ;;  %4200 = vmax.xlane.f32.xlu0 %v9835_v49  ;;  %v4225_v58 = vshra.s32 %v9838_v45, 16  ;;  %v4070_v19 = vand.u32 65535, %v9694_v27 }
 0xd12   : > { %v3993_v31 = vand.u32 127, %v3977_v13  ;;  %vm4025_vm15 = vcmp.eq.s32.totalorder %v9568_v35, %v3977_v13  ;;  %v9849_v3 = vcvt.s32.f32 %v4239_v60 }
 0xd13   : > { %v9853_v43 = vsel %vm5871_vm14, %v9565_v42, %v4007_v40  ;;  %v9856_v26 = vsel %vm4025_vm15, 2147483648, %v9568_v35  ;;  %v9858_v16 = vcvt.s32.f32 %v4225_v58  ;;  %v4056_v42 = vand.u32 65535, %v9665_v7 }
 0xd14   : > { %v4009_v2 = vsub.s32 127, %v3993_v31  ;;  %4242 = vmax.xlane.f32.xlu1 %v9849_v3  ;;  %v4253_v6 = vshra.s32 %v9856_v26, 16  ;;  %v4072_v60 = vcvt.s32.f32 %v4070_v19  ;;  %v4098_v40 = vand.u32 65535, %v9706_v25 }
 0xd15   : > { %4228 = vmax.xlane.f32.xlu0 %v9858_v16  ;;  %v4058_v54 = vcvt.s32.f32 %v4056_v42 }
 0xd16   : > { %v9865_v11 = vsel %vm5871_vm14, %v9576_v1, %v4009_v2  ;;  %v9867_v24 = vcvt.s32.f32 %v4253_v6  ;;  %v4044_v1 = vcvt.s32.f32 %v4042_v17  ;;  %v4100_v2 = vcvt.s32.f32 %v4098_v40 }
 0xd17   : > { %v4140_v40 = vand.u32 65535, %v9761_v50 }
 0xd19   : > { %4256 = vmax.xlane.f32.xlu0 %v9867_v24 }
 0xd61   : > { %v9871_v35 = vpop.xlane.xlu0 %4060 }
 0xd62   : > { %vm4062_vm13 = vcmp.eq.f32.partialorder %v9673_v52, %v9871_v35  ;;  %v4084_v52 = vand.u32 65535, %v9710_v46 }
 0xd63   : > { %v4063_v29 = vsel %vm4062_vm13, %v4058_v54, -inf  ;;  %v4126_v54 = vand.u32 65535, %v9731_v51 }
 0xd64   : > { %4064 = vmax.xlane.f32.xlu0 %v4063_v29  ;;  %v4086_v6 = vcvt.s32.f32 %v4084_v52  ;;  %v4112_v29 = vand.u32 65535, %v9737_v28 }
 0xd6c   : > { %v9876_v8 = vpop.xlane.xlu1 %4046 }
 0xd6d   : > { %vm4048_vm14 = vcmp.eq.f32.partialorder %v9686_v44, %v9876_v8 }
 0xd6e   : > { %v4049_v57 = vsel %vm4048_vm14, %v4044_v1, -inf  ;;  %v4128_v1 = vcvt.s32.f32 %v4126_v54 }
 0xd6f   : > { %4050 = vmax.xlane.f32.xlu1 %v4049_v57 }
 0xd72   : > { %v9881_v13 = vpop.xlane.xlu1 %4074 }
 0xd73   : > { %vm4076_vm1 = vcmp.eq.f32.partialorder %v9703_v55, %v9881_v13 }
 0xd74   : > { %v4077_v58 = vsel %vm4076_vm1, %v4072_v60, -inf  ;;  %v4154_v60 = vand.u32 65535, %v9757_v12 }
 0xd75   : > { %4078 = vmax.xlane.f32.xlu1 %v4077_v58 }
 0xd76   : > { %v9887_v31 = vpop.xlane.xlu1 %4102  ;;  %v4156_v58 = vcvt.s32.f32 %v4154_v60 }
 0xd77   : > { %v9889_v44 = vpop.xlane.xlu0 %4088  ;;  %vm4104_vm15 = vcmp.eq.f32.partialorder %v9719_v53, %v9887_v31  ;;  %v4114_v53 = vcvt.s32.f32 %v4112_v29 }
 0xd78   : > { %v4105_v42 = vsel %vm4104_vm15, %v4100_v2, -inf  ;;  %vm4090_vm13 = vcmp.eq.f32.partialorder %v9725_v0, %v9889_v44 }
 0xd79   : > { %4106 = vmax.xlane.f32.xlu1 %v4105_v42  ;;  %v4091_v55 = vsel %vm4090_vm13, %v4086_v6, -inf  ;;  %v4182_v42 = vand.u32 65535, %v9783_v36 }
 0xd7a   : > { %4092 = vmax.xlane.f32.xlu0 %v4091_v55 }
 0xd7b   : > { %v4184_v55 = vcvt.s32.f32 %v4182_v42 }
 0xd7c   : > { %v9897_v17 = vpop.xlane.xlu1 %4130 }
 0xd7d   : > { %v9899_v57 = vpop.xlane.xlu0 %4116  ;;  %vm4132_vm14 = vcmp.eq.f32.partialorder %v9745_v61, %v9897_v17  ;;  %v4142_v61 = vcvt.s32.f32 %v4140_v40 }
 0xd7e   : > { %v4133_v19 = vsel %vm4132_vm14, %v4128_v1, -inf  ;;  %vm4118_vm1 = vcmp.eq.f32.partialorder %v9751_v47, %v9899_v57  ;;  %v4210_v1 = vand.u32 65535, %v9804_v37 }
 0xd7f   : > { %4134 = vmax.xlane.f32.xlu1 %v4133_v19  ;;  %v4119_v0 = vsel %vm4118_vm1, %v4114_v53, -inf  ;;  %v4196_v19 = vand.u32 65535, %v9813_v32 }
 0xd80   : > { %4120 = vmax.xlane.f32.xlu0 %v4119_v0  ;;  %v4212_v40 = vcvt.s32.f32 %v4210_v1 }
 0xd85   : > { %v9907_v52 = vpop.xlane.xlu1 %4158 }
 0xd86   : > { %v9909_v2 = vpop.xlane.xlu0 %4144  ;;  %vm4160_vm15 = vcmp.eq.f32.partialorder %v9770_v48, %v9907_v52  ;;  %v4168_v48 = vand.u32 65535, %v9799_v20 }
 0xd87   : > { %v4161_v6 = vsel %vm4160_vm15, %v4156_v58, -inf  ;;  %vm4146_vm13 = vcmp.eq.f32.partialorder %v9776_v38, %v9909_v2 }
 0xd88   : > { %4162 = vmax.xlane.f32.xlu1 %v4161_v6  ;;  %v4147_v47 = vsel %vm4146_vm13, %v4142_v61, -inf  ;;  %v4170_v38 = vcvt.s32.f32 %v4168_v48  ;;  %v4198_v61 = vcvt.s32.f32 %v4196_v19  ;;  %v4224_v6 = vand.u32 65535, %v9838_v45 }
 0xd89   : > { %4148 = vmax.xlane.f32.xlu0 %v4147_v47 }
 0xd8a   : > { %v4226_v48 = vcvt.s32.f32 %v4224_v6 }
 0xd91   : > { %v9916_v54 = vpop.xlane.xlu1 %4186 }
 0xd92   : > { %vm4188_vm14 = vcmp.eq.f32.partialorder %v9792_v56, %v9916_v54  ;;  %v4238_v56 = vand.u32 65535, %v9830_v18 }
 0xd93   : > { %v4189_v29 = vsel %vm4188_vm14, %v4184_v55, -inf }
 0xd94   : > { %4190 = vmax.xlane.f32.xlu1 %v4189_v29  ;;  %v4240_v55 = vcvt.s32.f32 %v4238_v56 }
 0xd9a   : > { %v9922_v53 = vpop.xlane.xlu0 %4172 }
 0xd9b   : > { %vm4174_vm1 = vcmp.eq.f32.partialorder %v9815_v21, %v9922_v53 }
 0xd9c   : > { %v4175_v0 = vsel %vm4174_vm1, %v4170_v38, -inf }
 0xd9d   : > { %4176 = vmax.xlane.f32.xlu0 %v4175_v0  ;;  %v9927_v60 = vpop.xlane.xlu1 %4214 }
 0xd9e   : > { %v9930_v58 = vpop.xlane.xlu0 %4200  ;;  %vm4216_vm15 = vcmp.eq.f32.partialorder %v9832_v5, %v9927_v60  ;;  %v4252_v5 = vand.u32 65535, %v9856_v26 }
 0xd9f   : > { %v4217_v47 = vsel %vm4216_vm15, %v4212_v40, -inf  ;;  %vm4202_vm13 = vcmp.eq.f32.partialorder %v9835_v49, %v9930_v58 }
 0xda0   : > { %4218 = vmax.xlane.f32.xlu1 %v4217_v47  ;;  %v4203_v21 = vsel %vm4202_vm13, %v4198_v61, -inf  ;;  %v4254_v19 = vcvt.s32.f32 %v4252_v5 }
 0xda1   : > { %4204 = vmax.xlane.f32.xlu0 %v4203_v21  ;;  %v9937_v42 = vpop.xlane.xlu1 %4242 }
 0xda2   : > { %v9939_v29 = vpop.xlane.xlu0 %4228  ;;  %vm4244_vm14 = vcmp.eq.f32.partialorder %v9849_v3, %v9937_v42  ;;  %v4067_v3 = vcvt.f32.s32 %v9871_v35 }
 0xda3   : > { %v4245_v1 = vsel %vm4244_vm14, %v4240_v55, -inf  ;;  %vm4230_vm1 = vcmp.eq.f32.partialorder %v9858_v16, %v9939_v29  ;;  %vm5888_vm14 = vcmask 80896  }
 0xda4   : > { %4246 = vmax.xlane.f32.xlu1 %v4245_v1  ;;  %v4231_v49 = vsel %vm4230_vm1, %v4226_v48, -inf  ;;  %v4068_v56 = vshll.u32 %v4067_v3, 16 }
 0xda5   : > { %4232 = vmax.xlane.f32.xlu0 %v4231_v49 }
 0xda6   : > { %v9946_v38 = vpop.xlane.xlu0 %4256 }
 0xda7   : > { %vm4258_vm15 = vcmp.eq.f32.partialorder %v9867_v24, %v9946_v38  ;;  %v4053_v24 = vcvt.f32.s32 %v9876_v8 }
 0xda8   : > { %v4259_v0 = vsel %vm4258_vm15, %v4254_v19, -inf }
 0xda9   : > { %4260 = vmax.xlane.f32.xlu0 %v4259_v0  ;;  %v4054_v1 = vshll.u32 %v4053_v24, 16 }
 0xdf1   : > { %v4065_v40 = vpop.xlane.xlu0 %4064 }
 0xdf2   : > { %v4066_v61 = vcvt.f32.s32 %v4065_v40 }
 0xdf4   : > { %v4069_v6 = vadd.s32 %v4068_v56, %v4066_v61 }
 0xdf6   : > { %v4267_v47 = vand.u32 127, %v4069_v6  ;;  %vm4299_vm13 = vcmp.eq.s32.totalorder %v9665_v7, %v4069_v6 }
 0xdf7   : > { %v9953_v16 = vsel %vm4299_vm13, 2147483648, %v9665_v7  ;;  %v4081_v7 = vcvt.f32.s32 %v9881_v13 }
 0xdf8   : > { %v4283_v21 = vsub.s32 127, %v4267_v47  ;;  %v4345_v55 = vshra.s32 %v9953_v16, 16  ;;  %v4109_v47 = vcvt.f32.s32 %v9887_v31 }
 0xdf9   : > { %v4082_v6 = vshll.u32 %v4081_v7, 16 }
 0xdfa   : > { %v9959_v48 = vsel %vm5888_vm14, %v9671_v59, %v4283_v21  ;;  %v9961_v35 = vcvt.s32.f32 %v4345_v55  ;;  %v4095_v55 = vcvt.f32.s32 %v9889_v44  ;;  %v4110_v24 = vshll.u32 %v4109_v47, 16 }
 0xdfc   : > { %4348 = vmax.xlane.f32.xlu0 %v9961_v35  ;;  %v4051_v5 = vpop.xlane.xlu1 %4050 }
 0xdfd   : > { %v4052_v49 = vcvt.f32.s32 %v4051_v5 }
 0xdff   : > { %v4055_v19 = vadd.s32 %v4054_v1, %v4052_v49  ;;  %v4096_v49 = vshll.u32 %v4095_v55, 16 }
 0xe01   : > { %v4266_v0 = vand.u32 127, %v4055_v19  ;;  %vm4298_vm1 = vcmp.eq.s32.totalorder %v9679_v22, %v4055_v19  ;;  %v4137_v19 = vcvt.f32.s32 %v9897_v17 }
 0xe02   : > { %v9967_v3 = vsel %vm4298_vm1, 2147483648, %v9679_v22  ;;  %v4079_v56 = vpop.xlane.xlu1 %4078 }
 0xe03   : > { %v4282_v8 = vsub.s32 127, %v4266_v0  ;;  %v4331_v59 = vshra.s32 %v9967_v3, 16  ;;  %v4080_v21 = vcvt.f32.s32 %v4079_v56  ;;  %v4138_v17 = vshll.u32 %v4137_v19, 16 }
 0xe05   : > { %v9972_v40 = vsel %vm5888_vm14, %v9684_v4, %v4282_v8  ;;  %v9974_v61 = vcvt.s32.f32 %v4331_v59  ;;  %v4083_v22 = vadd.s32 %v4082_v6, %v4080_v21  ;;  %v4123_v59 = vcvt.f32.s32 %v9899_v57 }
 0xe06   : > { %v4107_v13 = vpop.xlane.xlu1 %4106 }
 0xe07   : > { %4334 = vmax.xlane.f32.xlu1 %v9974_v61  ;;  %v4268_v5 = vand.u32 127, %v4083_v22  ;;  %vm4300_vm15 = vcmp.eq.s32.totalorder %v9694_v27, %v4083_v22  ;;  %v4108_v1 = vcvt.f32.s32 %v4107_v13  ;;  %v4093_v4 = vpop.xlane.xlu0 %4092 }
 0xe08   : > { %v9982_v0 = vsel %vm4300_vm15, 2147483648, %v9694_v27  ;;  %v4094_v31 = vcvt.f32.s32 %v4093_v4 }
 0xe09   : > { %v4284_v7 = vsub.s32 127, %v4268_v5  ;;  %v4111_v8 = vadd.s32 %v4110_v24, %v4108_v1  ;;  %v4359_v44 = vshra.s32 %v9982_v0, 16  ;;  %v4124_v1 = vshll.u32 %v4123_v59, 16 }
 0xe0a   : > { %v4097_v56 = vadd.s32 %v4096_v49, %v4094_v31  ;;  %v4165_v59 = vcvt.f32.s32 %v9907_v52 }
 0xe0b   : > { %v9988_v6 = vsel %vm5888_vm14, %v9700_v41, %v4284_v7  ;;  %v4270_v47 = vand.u32 127, %v4111_v8  ;;  %vm4302_vm13 = vcmp.eq.s32.totalorder %v9706_v25, %v4111_v8  ;;  %v9991_v21 = vcvt.s32.f32 %v4359_v44 }
 0xe0c   : > { %v9994_v27 = vsel %vm4302_vm13, 2147483648, %v9706_v25  ;;  %v4269_v55 = vand.u32 127, %v4097_v56  ;;  %vm4301_vm1 = vcmp.eq.s32.totalorder %v9710_v46, %v4097_v56  ;;  %v4135_v22 = vpop.xlane.xlu1 %4134 }
 0xe0d   : > { %v4286_v13 = vsub.s32 127, %v4270_v47  ;;  %v9998_v57 = vsel %vm4301_vm1, 2147483648, %v9710_v46  ;;  %v4136_v24 = vcvt.f32.s32 %v4135_v22  ;;  %v4121_v41 = vpop.xlane.xlu0 %4120  ;;  %4362 = vmax.xlane.f32.xlu1 %v9991_v21  ;;  %v4387_v5 = vshra.s32 %v9994_v27, 16 }
 0xe0e   : > { %v4285_v4 = vsub.s32 127, %v4269_v55  ;;  %v4122_v49 = vcvt.f32.s32 %v4121_v41  ;;  %v4373_v25 = vshra.s32 %v9998_v57, 16 }
 0xe0f   : > { %v10005_v19 = vsel %vm5888_vm14, %v9717_v30, %v4286_v13  ;;  %v4139_v31 = vadd.s32 %v4138_v17, %v4136_v24  ;;  %v10007_v7 = vcvt.s32.f32 %v4387_v5  ;;  %v4166_v5 = vshll.u32 %v4165_v59, 16 }
 0xe10   : > { %v10011_v46 = vsel %vm5888_vm14, %v9723_v10, %v4285_v4  ;;  %v4125_v8 = vadd.s32 %v4124_v1, %v4122_v49  ;;  %v10013_v44 = vcvt.s32.f32 %v4373_v25  ;;  %v4151_v10 = vcvt.f32.s32 %v9909_v2 }
 0xe11   : > { %v4272_v56 = vand.u32 127, %v4139_v31  ;;  %vm4304_vm15 = vcmp.eq.s32.totalorder %v9731_v51, %v4139_v31  ;;  %4390 = vmax.xlane.f32.xlu1 %v10007_v7 }
 0xe12   : > { %v10019_v30 = vsel %vm4304_vm15, 2147483648, %v9731_v51  ;;  %v4271_v47 = vand.u32 127, %v4125_v8  ;;  %vm4303_vm13 = vcmp.eq.s32.totalorder %v9737_v28, %v4125_v8  ;;  %4376 = vmax.xlane.f32.xlu0 %v10013_v44  ;;  %v4152_v49 = vshll.u32 %v4151_v10, 16 }
 0xe13   : > { %v4288_v17 = vsub.s32 127, %v4272_v56  ;;  %v10025_v55 = vsel %vm4303_vm13, 2147483648, %v9737_v28  ;;  %v4415_v22 = vshra.s32 %v10019_v30, 16 }
 0xe14   : > { %v4287_v13 = vsub.s32 127, %v4271_v47  ;;  %v4401_v24 = vshra.s32 %v10025_v55, 16 }
 0xe15   : > { %v10031_v51 = vsel %vm5888_vm14, %v9743_v9, %v4288_v17  ;;  %v4163_v52 = vpop.xlane.xlu1 %4162  ;;  %v10033_v41 = vcvt.s32.f32 %v4415_v22 }
 0xe16   : > { %v10037_v2 = vsel %vm5888_vm14, %v9749_v15, %v4287_v13  ;;  %v4164_v1 = vcvt.f32.s32 %v4163_v52  ;;  %v4149_v28 = vpop.xlane.xlu0 %4148  ;;  %v10039_v4 = vcvt.s32.f32 %v4401_v24  ;;  %v4193_v13 = vcvt.f32.s32 %v9916_v54 }
 0xe17   : > { %v4150_v25 = vcvt.f32.s32 %v4149_v28  ;;  %4418 = vmax.xlane.f32.xlu1 %v10033_v41 }
 0xe18   : > { %v4167_v31 = vadd.s32 %v4166_v5, %v4164_v1  ;;  %4404 = vmax.xlane.f32.xlu0 %v10039_v4  ;;  %v4194_v1 = vshll.u32 %v4193_v13, 16 }
 0xe19   : > { %v4153_v9 = vadd.s32 %v4152_v49, %v4150_v25 }
 0xe1a   : > { %v4274_v8 = vand.u32 127, %v4167_v31  ;;  %vm4306_vm1 = vcmp.eq.s32.totalorder %v9757_v12, %v4167_v31 }
 0xe1b   : > { %v10045_v56 = vsel %vm4306_vm1, 2147483648, %v9757_v12  ;;  %v4273_v15 = vand.u32 127, %v4153_v9  ;;  %vm4305_vm15 = vcmp.eq.s32.totalorder %v9761_v50, %v4153_v9  ;;  %v4221_v9 = vcvt.f32.s32 %v9927_v60 }
 0xe1c   : > { %v4290_v59 = vsub.s32 127, %v4274_v8  ;;  %v10049_v47 = vsel %vm4305_vm15, 2147483648, %v9761_v50  ;;  %v4443_v10 = vshra.s32 %v10045_v56, 16 }
 0xe1d   : > { %v4289_v17 = vsub.s32 127, %v4273_v15  ;;  %v4429_v22 = vshra.s32 %v10049_v47, 16  ;;  %v4222_v60 = vshll.u32 %v4221_v9, 16 }
 0xe1e   : > { %v10056_v24 = vsel %vm5888_vm14, %v9768_v34, %v4290_v59  ;;  %v10058_v12 = vcvt.s32.f32 %v4443_v10  ;;  %v4179_v34 = vcvt.f32.s32 %v9922_v53  ;;  %v4249_v53 = vcvt.f32.s32 %v9937_v42 }
 0xe1f   : > { %v10062_v52 = vsel %vm5888_vm14, %v9774_v63, %v4289_v17  ;;  %v10064_v5 = vcvt.s32.f32 %v4429_v22  ;;  %v4207_v17 = vcvt.f32.s32 %v9930_v58 }
 0xe20   : > { %4446 = vmax.xlane.f32.xlu1 %v10058_v12  ;;  %v4180_v10 = vshll.u32 %v4179_v34, 16  ;;  %v4250_v58 = vshll.u32 %v4249_v53, 16 }
 0xe21   : > { %v4191_v50 = vpop.xlane.xlu1 %4190  ;;  %4432 = vmax.xlane.f32.xlu0 %v10064_v5 }
 0xe22   : > { %v4192_v28 = vcvt.f32.s32 %v4191_v50 }
 0xe24   : > { %v4195_v54 = vadd.s32 %v4194_v1, %v4192_v28  ;;  %v4263_v1 = vcvt.f32.s32 %v9946_v38 }
 0xe26   : > { %v4276_v49 = vand.u32 127, %v4195_v54  ;;  %vm4308_vm13 = vcmp.eq.s32.totalorder %v9783_v36, %v4195_v54  ;;  %v4208_v54 = vshll.u32 %v4207_v17, 16 }
 0xe27   : > { %v10071_v25 = vsel %vm4308_vm13, 2147483648, %v9783_v36  ;;  %v4235_v36 = vcvt.f32.s32 %v9939_v29 }
 0xe28   : > { %v4292_v63 = vsub.s32 127, %v4276_v49  ;;  %v4471_v31 = vshra.s32 %v10071_v25, 16 }
 0xe2a   : > { %v10077_v8 = vsel %vm5888_vm14, %v9790_v39, %v4292_v63  ;;  %v4177_v15 = vpop.xlane.xlu0 %4176  ;;  %v10079_v59 = vcvt.s32.f32 %v4471_v31  ;;  %v4236_v31 = vshll.u32 %v4235_v36, 16 }
 0xe2b   : > { %v4178_v22 = vcvt.f32.s32 %v4177_v15 }
 0xe2c   : > { %4474 = vmax.xlane.f32.xlu1 %v10079_v59 }
 0xe2d   : > { %v4181_v13 = vadd.s32 %v4180_v10, %v4178_v22  ;;  %v4219_v50 = vpop.xlane.xlu1 %4218  ;;  %v4264_v22 = vshll.u32 %v4263_v1, 16 }
 0xe2e   : > { %v4220_v39 = vcvt.f32.s32 %v4219_v50  ;;  %v4205_v28 = vpop.xlane.xlu0 %4204 }
 0xe2f   : > { %v4275_v49 = vand.u32 127, %v4181_v13  ;;  %vm4307_vm1 = vcmp.eq.s32.totalorder %v9799_v20, %v4181_v13  ;;  %v4206_v34 = vcvt.f32.s32 %v4205_v28 }
 0xe30   : > { %v10088_v63 = vsel %vm4307_vm1, 2147483648, %v9799_v20  ;;  %v4223_v42 = vadd.s32 %v4222_v60, %v4220_v39 }
 0xe31   : > { %v4291_v15 = vsub.s32 127, %v4275_v49  ;;  %v4209_v29 = vadd.s32 %v4208_v54, %v4206_v34  ;;  %v4247_v10 = vpop.xlane.xlu1 %4246  ;;  %v4457_v9 = vshra.s32 %v10088_v63, 16 }
 0xe32   : > { %v4278_v38 = vand.u32 127, %v4223_v42  ;;  %vm4310_vm15 = vcmp.eq.s32.totalorder %v9804_v37, %v4223_v42  ;;  %v4248_v17 = vcvt.f32.s32 %v4247_v10  ;;  %v4233_v50 = vpop.xlane.xlu0 %4232 }
 0xe33   : > { %v10094_v13 = vsel %vm5888_vm14, %v9809_v62, %v4291_v15  ;;  %v10097_v20 = vsel %vm4310_vm15, 2147483648, %v9804_v37  ;;  %v4277_v53 = vand.u32 127, %v4209_v29  ;;  %vm4309_vm13 = vcmp.eq.s32.totalorder %v9813_v32, %v4209_v29 }
 0xe34   : > { %v4294_v36 = vsub.s32 127, %v4278_v38  ;;  %v10101_v60 = vsel %vm4309_vm13, 2147483648, %v9813_v32  ;;  %v4251_v1 = vadd.s32 %v4250_v58, %v4248_v17  ;;  %v4234_v39 = vcvt.f32.s32 %v4233_v50 }
 0xe35   : > { %v4293_v28 = vsub.s32 127, %v4277_v53  ;;  %v10103_v54 = vcvt.s32.f32 %v4457_v9  ;;  %v4499_v49 = vshra.s32 %v10097_v20, 16  ;;  %v4485_v62 = vshra.s32 %v10101_v60, 16 }
 0xe36   : > { %v10109_v37 = vsel %vm5888_vm14, %v9819_v33, %v4294_v36  ;;  %v4280_v34 = vand.u32 127, %v4251_v1  ;;  %vm4312_vm1 = vcmp.eq.s32.totalorder %v9830_v18, %v4251_v1  ;;  %v4237_v42 = vadd.s32 %v4236_v31, %v4234_v39  ;;  %v4261_v15 = vpop.xlane.xlu0 %4260 }
 0xe37   : > { %v10114_v32 = vsel %vm5888_vm14, %v9827_v14, %v4293_v28  ;;  %v10117_v58 = vsel %vm4312_vm1, 2147483648, %v9830_v18  ;;  %4460 = vmax.xlane.f32.xlu0 %v10103_v54  ;;  %v4262_v29 = vcvt.f32.s32 %v4261_v15  ;;  %v10120_v10 = vcvt.s32.f32 %v4499_v49 }
 0xe38   : > { %v4296_v9 = vsub.s32 127, %v4280_v34  ;;  %v4279_v33 = vand.u32 127, %v4237_v42  ;;  %vm4311_vm15 = vcmp.eq.s32.totalorder %v9838_v45, %v4237_v42  ;;  %v10123_v38 = vcvt.s32.f32 %v4485_v62 }
 0xe39   : > { %v10126_v31 = vsel %vm4311_vm15, 2147483648, %v9838_v45  ;;  %v4265_v17 = vadd.s32 %v4264_v22, %v4262_v29  ;;  %4502 = vmax.xlane.f32.xlu1 %v10120_v10  ;;  %v4527_v14 = vshra.s32 %v10117_v58, 16  ;;  %v4330_v15 = vand.u32 65535, %v9967_v3 }
 0xe3a   : > { %v10132_v18 = vsel %vm5888_vm14, %v9844_v23, %v4296_v9  ;;  %v4295_v50 = vsub.s32 127, %v4279_v33  ;;  %v4513_v53 = vshra.s32 %v10126_v31, 16  ;;  %v4358_v33 = vand.u32 65535, %v9982_v0 }
 0xe3b   : > { %v4281_v36 = vand.u32 127, %v4265_v17  ;;  %vm4313_vm13 = vcmp.eq.s32.totalorder %v9856_v26, %v4265_v17  ;;  %4488 = vmax.xlane.f32.xlu0 %v10123_v38  ;;  %v10137_v1 = vcvt.s32.f32 %v4527_v14  ;;  %v4332_v29 = vcvt.s32.f32 %v4330_v15 }
 0xe3c   : > { %v10141_v45 = vsel %vm5888_vm14, %v9853_v43, %v4295_v50  ;;  %v10144_v22 = vsel %vm4313_vm13, 2147483648, %v9856_v26  ;;  %v10146_v39 = vcvt.s32.f32 %v4513_v53  ;;  %v4344_v43 = vand.u32 65535, %v9953_v16 }
 0xe3d   : > { %v4297_v23 = vsub.s32 127, %v4281_v36  ;;  %4530 = vmax.xlane.f32.xlu1 %v10137_v1  ;;  %v4541_v28 = vshra.s32 %v10144_v22, 16  ;;  %v4360_v14 = vcvt.s32.f32 %v4358_v33  ;;  %v4386_v50 = vand.u32 65535, %v9994_v27 }
 0xe3e   : > { %v4346_v34 = vcvt.s32.f32 %v4344_v43 }
 0xe3f   : > { %v10152_v49 = vsel %vm5888_vm14, %v9865_v11, %v4297_v23  ;;  %4516 = vmax.xlane.f32.xlu0 %v10146_v39  ;;  %v10155_v62 = vcvt.s32.f32 %v4541_v28  ;;  %v4388_v23 = vcvt.s32.f32 %v4386_v50  ;;  %v4428_v50 = vand.u32 65535, %v10049_v47 }
 0xe43   : > { %4544 = vmax.xlane.f32.xlu0 %v10155_v62 }
 0xe89   : > { %v10159_v26 = vpop.xlane.xlu0 %4348 }
 0xe8a   : > { %vm4350_vm1 = vcmp.eq.f32.partialorder %v9961_v35, %v10159_v26  ;;  %v4372_v35 = vand.u32 65535, %v9998_v57 }
 0xe8b   : > { %v4351_v42 = vsel %vm4350_vm1, %v4346_v34, -inf  ;;  %v4414_v34 = vand.u32 65535, %v10019_v30 }
 0xe8c   : > { %4352 = vmax.xlane.f32.xlu0 %v4351_v42  ;;  %v4374_v28 = vcvt.s32.f32 %v4372_v35  ;;  %v4400_v42 = vand.u32 65535, %v10025_v55 }
 0xe94   : > { %v10164_v11 = vpop.xlane.xlu1 %4334 }
 0xe95   : > { %vm4336_vm14 = vcmp.eq.f32.partialorder %v9974_v61, %v10164_v11 }
 0xe96   : > { %v4337_v9 = vsel %vm4336_vm14, %v4332_v29, -inf  ;;  %v4416_v29 = vcvt.s32.f32 %v4414_v34 }
 0xe97   : > { %4338 = vmax.xlane.f32.xlu1 %v4337_v9 }
 0xe9a   : > { %v10169_v17 = vpop.xlane.xlu1 %4362 }
 0xe9b   : > { %vm4364_vm15 = vcmp.eq.f32.partialorder %v9991_v21, %v10169_v17 }
 0xe9c   : > { %v4365_v53 = vsel %vm4364_vm15, %v4360_v14, -inf  ;;  %v4442_v14 = vand.u32 65535, %v10045_v56 }
 0xe9d   : > { %4366 = vmax.xlane.f32.xlu1 %v4365_v53 }
 0xe9e   : > { %v10175_v36 = vpop.xlane.xlu1 %4390  ;;  %v4444_v53 = vcvt.s32.f32 %v4442_v14 }
 0xe9f   : > { %v10177_v61 = vpop.xlane.xlu0 %4376  ;;  %vm4392_vm13 = vcmp.eq.f32.partialorder %v10007_v7, %v10175_v36  ;;  %v4402_v7 = vcvt.s32.f32 %v4400_v42 }
 0xea0   : > { %v4393_v43 = vsel %vm4392_vm13, %v4388_v23, -inf  ;;  %vm4378_vm1 = vcmp.eq.f32.partialorder %v10013_v44, %v10177_v61 }
 0xea1   : > { %4394 = vmax.xlane.f32.xlu1 %v4393_v43  ;;  %v4379_v21 = vsel %vm4378_vm1, %v4374_v28, -inf  ;;  %v4470_v43 = vand.u32 65535, %v10071_v25 }
 0xea2   : > { %4380 = vmax.xlane.f32.xlu0 %v4379_v21 }
 0xea3   : > { %v4472_v21 = vcvt.s32.f32 %v4470_v43 }
 0xea4   : > { %v10185_v15 = vpop.xlane.xlu1 %4418 }
 0xea5   : > { %v10187_v9 = vpop.xlane.xlu0 %4404  ;;  %vm4420_vm14 = vcmp.eq.f32.partialorder %v10033_v41, %v10185_v15  ;;  %v4430_v41 = vcvt.s32.f32 %v4428_v50 }
 0xea6   : > { %v4421_v33 = vsel %vm4420_vm14, %v4416_v29, -inf  ;;  %vm4406_vm15 = vcmp.eq.f32.partialorder %v10039_v4, %v10187_v9  ;;  %v4498_v29 = vand.u32 65535, %v10097_v20 }
 0xea7   : > { %4422 = vmax.xlane.f32.xlu1 %v4421_v33  ;;  %v4407_v44 = vsel %vm4406_vm15, %v4402_v7, -inf  ;;  %v4484_v33 = vand.u32 65535, %v10101_v60 }
 0xea8   : > { %4408 = vmax.xlane.f32.xlu0 %v4407_v44  ;;  %v4500_v50 = vcvt.s32.f32 %v4498_v29  ;;  %v4540_v29 = vand.u32 65535, %v10144_v22 }
 0xead   : > { %v10195_v35 = vpop.xlane.xlu1 %4446 }
 0xeae   : > { %v10197_v23 = vpop.xlane.xlu0 %4432  ;;  %vm4448_vm13 = vcmp.eq.f32.partialorder %v10058_v12, %v10195_v35  ;;  %v4456_v12 = vand.u32 65535, %v10088_v63 }
 0xeaf   : > { %v4449_v28 = vsel %vm4448_vm13, %v4444_v53, -inf  ;;  %vm4434_vm1 = vcmp.eq.f32.partialorder %v10064_v5, %v10197_v23 }
 0xeb0   : > { %4450 = vmax.xlane.f32.xlu1 %v4449_v28  ;;  %v4435_v4 = vsel %vm4434_vm1, %v4430_v41, -inf  ;;  %v4458_v5 = vcvt.s32.f32 %v4456_v12  ;;  %v4486_v28 = vcvt.s32.f32 %v4484_v33  ;;  %v4542_v33 = vcvt.s32.f32 %v4540_v29 }
 0xeb1   : > { %4436 = vmax.xlane.f32.xlu0 %v4435_v4  ;;  %v4512_v4 = vand.u32 65535, %v10126_v31 }
 0xeb3   : > { %v4514_v12 = vcvt.s32.f32 %v4512_v4 }
 0xeb9   : > { %v10204_v34 = vpop.xlane.xlu1 %4474 }
 0xeba   : > { %vm4476_vm14 = vcmp.eq.f32.partialorder %v10079_v59, %v10204_v34  ;;  %v4526_v59 = vand.u32 65535, %v10117_v58 }
 0xebb   : > { %v4477_v42 = vsel %vm4476_vm14, %v4472_v21, -inf }
 0xebc   : > { %4478 = vmax.xlane.f32.xlu1 %v4477_v42  ;;  %v4528_v21 = vcvt.s32.f32 %v4526_v59 }
 0xec4   : > { %v10210_v7 = vpop.xlane.xlu0 %4460 }
 0xec5   : > { %vm4462_vm15 = vcmp.eq.f32.partialorder %v10103_v54, %v10210_v7 }
 0xec6   : > { %v4463_v44 = vsel %vm4462_vm15, %v4458_v5, -inf  ;;  %v10215_v14 = vpop.xlane.xlu1 %4502 }
 0xec7   : > { %4464 = vmax.xlane.f32.xlu0 %v4463_v44  ;;  %vm4504_vm13 = vcmp.eq.f32.partialorder %v10120_v10, %v10215_v14 }
 0xec8   : > { %v10220_v53 = vpop.xlane.xlu0 %4488  ;;  %v4505_v41 = vsel %vm4504_vm13, %v4500_v50, -inf }
 0xec9   : > { %4506 = vmax.xlane.f32.xlu1 %v4505_v41  ;;  %vm4490_vm1 = vcmp.eq.f32.partialorder %v10123_v38, %v10220_v53 }
 0xeca   : > { %v4491_v54 = vsel %vm4490_vm1, %v4486_v28, -inf  ;;  %v10225_v43 = vpop.xlane.xlu1 %4530 }
 0xecb   : > { %4492 = vmax.xlane.f32.xlu0 %v4491_v54  ;;  %vm4532_vm14 = vcmp.eq.f32.partialorder %v10137_v1, %v10225_v43  ;;  %v4355_v1 = vcvt.f32.s32 %v10159_v26 }
 0xecc   : > { %v10229_v42 = vpop.xlane.xlu0 %4516  ;;  %v4533_v10 = vsel %vm4532_vm14, %v4528_v21, -inf  ;;  %vm5905_vm14 = vcmask 89088  }
 0xecd   : > { %4534 = vmax.xlane.f32.xlu1 %v4533_v10  ;;  %vm4518_vm15 = vcmp.eq.f32.partialorder %v10146_v39, %v10229_v42  ;;  %v4356_v59 = vshll.u32 %v4355_v1, 16 }
 0xece   : > { %v4519_v5 = vsel %vm4518_vm15, %v4514_v12, -inf }
 0xecf   : > { %4520 = vmax.xlane.f32.xlu0 %v4519_v5 }
 0xed0   : > { %v10234_v38 = vpop.xlane.xlu0 %4544 }
 0xed1   : > { %vm4546_vm13 = vcmp.eq.f32.partialorder %v10155_v62, %v10234_v38  ;;  %v4341_v62 = vcvt.f32.s32 %v10164_v11 }
 0xed2   : > { %v4547_v44 = vsel %vm4546_vm13, %v4542_v33, -inf }
 0xed3   : > { %4548 = vmax.xlane.f32.xlu0 %v4547_v44  ;;  %v4342_v29 = vshll.u32 %v4341_v62, 16 }
 0xf19   : > { %v4353_v50 = vpop.xlane.xlu0 %4352 }
 0xf1a   : > { %v4354_v41 = vcvt.f32.s32 %v4353_v50 }
 0xf1c   : > { %v4357_v28 = vadd.s32 %v4356_v59, %v4354_v41 }
 0xf1e   : > { %v4555_v4 = vand.u32 127, %v4357_v28  ;;  %vm4587_vm1 = vcmp.eq.s32.totalorder %v9953_v16, %v4357_v28 }
 0xf1f   : > { %v10241_v39 = vsel %vm4587_vm1, 2147483648, %v9953_v16  ;;  %v4369_v16 = vcvt.f32.s32 %v10169_v17 }
 0xf20   : > { %v4571_v54 = vsub.s32 127, %v4555_v4  ;;  %v4633_v21 = vshra.s32 %v10241_v39, 16  ;;  %v4397_v4 = vcvt.f32.s32 %v10175_v36 }
 0xf21   : > { %v4370_v28 = vshll.u32 %v4369_v16, 16 }
 0xf22   : > { %v10247_v10 = vsel %vm5905_vm14, %v9959_v48, %v4571_v54  ;;  %v10249_v26 = vcvt.s32.f32 %v4633_v21  ;;  %v4383_v21 = vcvt.f32.s32 %v10177_v61  ;;  %v4398_v62 = vshll.u32 %v4397_v4, 16 }
 0xf24   : > { %4636 = vmax.xlane.f32.xlu0 %v10249_v26  ;;  %v4339_v12 = vpop.xlane.xlu1 %4338 }
 0xf25   : > { %v4340_v5 = vcvt.f32.s32 %v4339_v12 }
 0xf27   : > { %v4343_v33 = vadd.s32 %v4342_v29, %v4340_v5  ;;  %v4384_v5 = vshll.u32 %v4383_v21, 16 }
 0xf29   : > { %v4554_v44 = vand.u32 127, %v4343_v33  ;;  %vm4586_vm15 = vcmp.eq.s32.totalorder %v9967_v3, %v4343_v33  ;;  %v4425_v33 = vcvt.f32.s32 %v10185_v15 }
 0xf2a   : > { %v10255_v1 = vsel %vm4586_vm15, 2147483648, %v9967_v3  ;;  %v4367_v59 = vpop.xlane.xlu1 %4366 }
 0xf2b   : > { %v4570_v11 = vsub.s32 127, %v4554_v44  ;;  %v4619_v48 = vshra.s32 %v10255_v1, 16  ;;  %v4368_v54 = vcvt.f32.s32 %v4367_v59  ;;  %v4426_v15 = vshll.u32 %v4425_v33, 16 }
 0xf2d   : > { %v10260_v50 = vsel %vm5905_vm14, %v9972_v40, %v4570_v11  ;;  %v10262_v41 = vcvt.s32.f32 %v4619_v48  ;;  %v4371_v3 = vadd.s32 %v4370_v28, %v4368_v54  ;;  %v4411_v48 = vcvt.f32.s32 %v10187_v9 }
 0xf2e   : > { %v4395_v17 = vpop.xlane.xlu1 %4394 }
 0xf2f   : > { %4622 = vmax.xlane.f32.xlu1 %v10262_v41  ;;  %v4556_v12 = vand.u32 127, %v4371_v3  ;;  %vm4588_vm13 = vcmp.eq.s32.totalorder %v9982_v0, %v4371_v3  ;;  %v4396_v29 = vcvt.f32.s32 %v4395_v17  ;;  %v4381_v40 = vpop.xlane.xlu0 %4380 }
 0xf30   : > { %v10270_v44 = vsel %vm4588_vm13, 2147483648, %v9982_v0  ;;  %v4382_v36 = vcvt.f32.s32 %v4381_v40 }
 0xf31   : > { %v4572_v16 = vsub.s32 127, %v4556_v12  ;;  %v4399_v11 = vadd.s32 %v4398_v62, %v4396_v29  ;;  %v4647_v61 = vshra.s32 %v10270_v44, 16  ;;  %v4412_v29 = vshll.u32 %v4411_v48, 16 }
 0xf32   : > { %v4385_v59 = vadd.s32 %v4384_v5, %v4382_v36  ;;  %v4453_v48 = vcvt.f32.s32 %v10195_v35 }
 0xf33   : > { %v10276_v28 = vsel %vm5905_vm14, %v9988_v6, %v4572_v16  ;;  %v4558_v4 = vand.u32 127, %v4399_v11  ;;  %vm4590_vm1 = vcmp.eq.s32.totalorder %v9994_v27, %v4399_v11  ;;  %v10279_v54 = vcvt.s32.f32 %v4647_v61 }
 0xf34   : > { %v10282_v0 = vsel %vm4590_vm1, 2147483648, %v9994_v27  ;;  %v4557_v21 = vand.u32 127, %v4385_v59  ;;  %vm4589_vm15 = vcmp.eq.s32.totalorder %v9998_v57, %v4385_v59  ;;  %v4423_v3 = vpop.xlane.xlu1 %4422 }
 0xf35   : > { %v4574_v17 = vsub.s32 127, %v4558_v4  ;;  %v10286_v9 = vsel %vm4589_vm15, 2147483648, %v9998_v57  ;;  %v4424_v62 = vcvt.f32.s32 %v4423_v3  ;;  %v4409_v6 = vpop.xlane.xlu0 %4408  ;;  %4650 = vmax.xlane.f32.xlu1 %v10279_v54  ;;  %v4675_v12 = vshra.s32 %v10282_v0, 16 }
 0xf36   : > { %v4573_v40 = vsub.s32 127, %v4557_v21  ;;  %v4410_v5 = vcvt.f32.s32 %v4409_v6  ;;  %v4661_v27 = vshra.s32 %v10286_v9, 16 }
 0xf37   : > { %v10293_v33 = vsel %vm5905_vm14, %v10005_v19, %v4574_v17  ;;  %v4427_v36 = vadd.s32 %v4426_v15, %v4424_v62  ;;  %v10295_v16 = vcvt.s32.f32 %v4675_v12  ;;  %v4454_v12 = vshll.u32 %v4453_v48, 16 }
 0xf38   : > { %v10299_v57 = vsel %vm5905_vm14, %v10011_v46, %v4573_v40  ;;  %v4413_v11 = vadd.s32 %v4412_v29, %v4410_v5  ;;  %v10301_v61 = vcvt.s32.f32 %v4661_v27  ;;  %v4439_v46 = vcvt.f32.s32 %v10197_v23 }
 0xf39   : > { %v4560_v59 = vand.u32 127, %v4427_v36  ;;  %vm4592_vm13 = vcmp.eq.s32.totalorder %v10019_v30, %v4427_v36  ;;  %4678 = vmax.xlane.f32.xlu1 %v10295_v16 }
 0xf3a   : > { %v10307_v19 = vsel %vm4592_vm13, 2147483648, %v10019_v30  ;;  %v4559_v4 = vand.u32 127, %v4413_v11  ;;  %vm4591_vm1 = vcmp.eq.s32.totalorder %v10025_v55, %v4413_v11  ;;  %4664 = vmax.xlane.f32.xlu0 %v10301_v61  ;;  %v4440_v5 = vshll.u32 %v4439_v46, 16 }
 0xf3b   : > { %v4576_v15 = vsub.s32 127, %v4560_v59  ;;  %v10313_v21 = vsel %vm4591_vm1, 2147483648, %v10025_v55  ;;  %v4703_v3 = vshra.s32 %v10307_v19, 16 }
 0xf3c   : > { %v4575_v17 = vsub.s32 127, %v4559_v4  ;;  %v4689_v62 = vshra.s32 %v10313_v21, 16 }
 0xf3d   : > { %v10319_v30 = vsel %vm5905_vm14, %v10031_v51, %v4576_v15  ;;  %v4451_v35 = vpop.xlane.xlu1 %4450  ;;  %v10321_v6 = vcvt.s32.f32 %v4703_v3 }
 0xf3e   : > { %v10325_v23 = vsel %vm5905_vm14, %v10037_v2, %v4575_v17  ;;  %v4452_v29 = vcvt.f32.s32 %v4451_v35  ;;  %v4437_v55 = vpop.xlane.xlu0 %4436  ;;  %v10327_v40 = vcvt.s32.f32 %v4689_v62  ;;  %v4481_v17 = vcvt.f32.s32 %v10204_v34 }
 0xf3f   : > { %v4438_v27 = vcvt.f32.s32 %v4437_v55  ;;  %4706 = vmax.xlane.f32.xlu1 %v10321_v6 }
 0xf40   : > { %v4455_v36 = vadd.s32 %v4454_v12, %v4452_v29  ;;  %4692 = vmax.xlane.f32.xlu0 %v10327_v40  ;;  %v4482_v29 = vshll.u32 %v4481_v17, 16  ;;  %v4523_v17 = vcvt.f32.s32 %v10229_v42 }
 0xf41   : > { %v4441_v51 = vadd.s32 %v4440_v5, %v4438_v27 }
 0xf42   : > { %v4562_v11 = vand.u32 127, %v4455_v36  ;;  %vm4594_vm15 = vcmp.eq.s32.totalorder %v10045_v56, %v4455_v36  ;;  %v4467_v36 = vcvt.f32.s32 %v10210_v7 }
 0xf43   : > { %v10333_v59 = vsel %vm4594_vm15, 2147483648, %v10045_v56  ;;  %v4561_v2 = vand.u32 127, %v4441_v51  ;;  %vm4593_vm13 = vcmp.eq.s32.totalorder %v10049_v47, %v4441_v51 }
 0xf44   : > { %v4578_v48 = vsub.s32 127, %v4562_v11  ;;  %v10337_v4 = vsel %vm4593_vm13, 2147483648, %v10049_v47  ;;  %v4731_v46 = vshra.s32 %v10333_v59, 16 }
 0xf45   : > { %v4577_v15 = vsub.s32 127, %v4561_v2  ;;  %v4717_v3 = vshra.s32 %v10337_v4, 16  ;;  %v4509_v2 = vcvt.f32.s32 %v10215_v14 }
 0xf46   : > { %v10344_v62 = vsel %vm5905_vm14, %v10056_v24, %v4578_v48  ;;  %v10346_v56 = vcvt.s32.f32 %v4731_v46  ;;  %v4495_v48 = vcvt.f32.s32 %v10220_v53 }
 0xf47   : > { %v10350_v35 = vsel %vm5905_vm14, %v10062_v52, %v4577_v15  ;;  %v10352_v12 = vcvt.s32.f32 %v4717_v3  ;;  %v4537_v3 = vcvt.f32.s32 %v10225_v43 }
 0xf48   : > { %4734 = vmax.xlane.f32.xlu1 %v10346_v56 }
 0xf49   : > { %v4479_v47 = vpop.xlane.xlu1 %4478  ;;  %4720 = vmax.xlane.f32.xlu0 %v10352_v12 }
 0xf4a   : > { %v4480_v55 = vcvt.f32.s32 %v4479_v47  ;;  %v4510_v47 = vshll.u32 %v4509_v2, 16  ;;  %v4551_v2 = vcvt.f32.s32 %v10234_v38 }
 0xf4c   : > { %v4483_v34 = vadd.s32 %v4482_v29, %v4480_v55  ;;  %v4496_v55 = vshll.u32 %v4495_v48, 16 }
 0xf4e   : > { %v4564_v5 = vand.u32 127, %v4483_v34  ;;  %vm4596_vm1 = vcmp.eq.s32.totalorder %v10071_v25, %v4483_v34 }
 0xf4f   : > { %v10358_v24 = vsel %vm4596_vm1, 2147483648, %v10071_v25  ;;  %v4468_v25 = vshll.u32 %v4467_v36, 16 }
 0xf50   : > { %v4580_v27 = vsub.s32 127, %v4564_v5  ;;  %v4759_v52 = vshra.s32 %v10358_v24, 16 }
 0xf52   : > { %v10364_v51 = vsel %vm5905_vm14, %v10077_v8, %v4580_v27  ;;  %v10366_v11 = vcvt.s32.f32 %v4759_v52  ;;  %v4538_v27 = vshll.u32 %v4537_v3, 16  ;;  %v4524_v52 = vshll.u32 %v4523_v17, 16 }
 0xf53   : > { %11951 = vst [vmem:[#allocation37_spill] sm:$0xff] %v10364_v51 }
 0xf54   : > { %v4465_v46 = vpop.xlane.xlu0 %4464  ;;  %4762 = vmax.xlane.f32.xlu1 %v10366_v11 }
 0xf55   : > { %v4466_v15 = vcvt.f32.s32 %v4465_v46 }
 0xf56   : > { %v4507_v7 = vpop.xlane.xlu1 %4506 }
 0xf57   : > { %v4469_v29 = vadd.s32 %v4468_v25, %v4466_v15  ;;  %v4508_v8 = vcvt.f32.s32 %v4507_v7 }
 0xf58   : > { %v4493_v34 = vpop.xlane.xlu0 %4492 }
 0xf59   : > { %v4563_v5 = vand.u32 127, %v4469_v29  ;;  %vm4595_vm15 = vcmp.eq.s32.totalorder %v10088_v63, %v4469_v29  ;;  %v4511_v14 = vadd.s32 %v4510_v47, %v4508_v8  ;;  %v4494_v53 = vcvt.f32.s32 %v4493_v34 }
 0xf5a   : > { %v10375_v36 = vsel %vm4595_vm15, 2147483648, %v10088_v63  ;;  %v4535_v46 = vpop.xlane.xlu1 %4534 }
 0xf5b   : > { %v4579_v43 = vsub.s32 127, %v4563_v5  ;;  %v4566_v51 = vand.u32 127, %v4511_v14  ;;  %vm4598_vm13 = vcmp.eq.s32.totalorder %v10097_v20, %v4511_v14  ;;  %v4497_v42 = vadd.s32 %v4496_v55, %v4494_v53 }
 0xf5c   : > { %v10380_v48 = vsel %vm4598_vm13, 2147483648, %v10097_v20  ;;  %v4536_v25 = vcvt.f32.s32 %v4535_v46  ;;  %v4521_v15 = vpop.xlane.xlu0 %4520  ;;  %v4745_v7 = vshra.s32 %v10375_v36, 16 }
 0xf5d   : > { %v10385_v3 = vsel %vm5905_vm14, %v10094_v13, %v4579_v43  ;;  %v4582_v63 = vsub.s32 127, %v4566_v51  ;;  %v4565_v17 = vand.u32 127, %v4497_v42  ;;  %vm4597_vm1 = vcmp.eq.s32.totalorder %v10101_v60, %v4497_v42 }
 0xf5e   : > { %v10389_v47 = vsel %vm4597_vm1, 2147483648, %v10101_v60  ;;  %v4539_v29 = vadd.s32 %v4538_v27, %v4536_v25  ;;  %v4522_v38 = vcvt.f32.s32 %v4521_v15  ;;  %v10391_v8 = vcvt.s32.f32 %v4745_v7 }
 0xf5f   : > { %v10395_v20 = vsel %vm5905_vm14, %v10109_v37, %v4582_v63  ;;  %v4581_v55 = vsub.s32 127, %v4565_v17  ;;  %v4787_v34 = vshra.s32 %v10380_v48, 16  ;;  %v4773_v13 = vshra.s32 %v10389_v47, 16 }
 0xf60   : > { %v4552_v51 = vshll.u32 %v4551_v2, 16  ;;  %v4568_v5 = vand.u32 127, %v4539_v29  ;;  %vm4600_vm15 = vcmp.eq.s32.totalorder %v10117_v58, %v4539_v29  ;;  %v4525_v14 = vadd.s32 %v4524_v52, %v4522_v38  ;;  %4748 = vmax.xlane.f32.xlu0 %v10391_v8  ;;  %v4549_v60 = vpop.xlane.xlu0 %4548 }
 0xf61   : > { %v10403_v53 = vsel %vm5905_vm14, %v10114_v32, %v4581_v55  ;;  %v10406_v37 = vsel %vm4600_vm15, 2147483648, %v10117_v58  ;;  %v4550_v27 = vcvt.f32.s32 %v4549_v60  ;;  %v10408_v46 = vcvt.s32.f32 %v4787_v34 }
 0xf62   : > { %v4584_v43 = vsub.s32 127, %v4568_v5  ;;  %v4567_v42 = vand.u32 127, %v4525_v14  ;;  %vm4599_vm13 = vcmp.eq.s32.totalorder %v10126_v31, %v4525_v14  ;;  %v10411_v2 = vcvt.s32.f32 %v4773_v13 }
 0xf63   : > { %v10414_v52 = vsel %vm4599_vm13, 2147483648, %v10126_v31  ;;  %v4553_v25 = vadd.s32 %v4552_v51, %v4550_v27  ;;  %4790 = vmax.xlane.f32.xlu1 %v10408_v46  ;;  %v4815_v32 = vshra.s32 %v10406_v37, 16  ;;  %v4618_v14 = vand.u32 65535, %v10255_v1 }
 0xf64   : > { %v10420_v58 = vsel %vm5905_vm14, %v10132_v18, %v4584_v43  ;;  %v4583_v15 = vsub.s32 127, %v4567_v42  ;;  %4776 = vmax.xlane.f32.xlu0 %v10411_v2  ;;  %v4801_v7 = vshra.s32 %v10414_v52, 16  ;;  %v4646_v43 = vand.u32 65535, %v10270_v44 }
 0xf65   : > { %v4569_v63 = vand.u32 127, %v4553_v25  ;;  %vm4601_vm1 = vcmp.eq.s32.totalorder %v10144_v22, %v4553_v25  ;;  %v10425_v17 = vcvt.s32.f32 %v4815_v32  ;;  %v4674_v32 = vand.u32 65535, %v10282_v0 }
 0xf66   : > { %v10429_v31 = vsel %vm5905_vm14, %v10141_v45, %v4583_v15  ;;  %v10432_v29 = vsel %vm4601_vm1, 2147483648, %v10144_v22  ;;  %v10434_v38 = vcvt.s32.f32 %v4801_v7  ;;  %v4632_v45 = vand.u32 65535, %v10241_v39 }
 0xf67   : > { %v4585_v18 = vsub.s32 127, %v4569_v63  ;;  %4818 = vmax.xlane.f32.xlu1 %v10425_v17  ;;  %v4829_v55 = vshra.s32 %v10432_v29, 16  ;;  %v4648_v25 = vcvt.s32.f32 %v4646_v43  ;;  %v4676_v63 = vcvt.s32.f32 %v4674_v32 }
 0xf68   : > { %4804 = vmax.xlane.f32.xlu0 %v10434_v38  ;;  %v4634_v51 = vcvt.s32.f32 %v4632_v45  ;;  %v4702_v45 = vand.u32 65535, %v10307_v19  ;;  %v4730_v43 = vand.u32 65535, %v10333_v59 }
 0xf69   : > { %v10441_v34 = vsel %vm5905_vm14, %v10152_v49, %v4585_v18  ;;  %v10443_v13 = vcvt.s32.f32 %v4829_v55  ;;  %v4620_v49 = vcvt.s32.f32 %v4618_v14 }
 0xf6a   : > { %v4704_v14 = vcvt.s32.f32 %v4702_v45 }
 0xf6c   : > { %4832 = vmax.xlane.f32.xlu0 %v10443_v13 }
 0xfb1   : > { %v10447_v22 = vpop.xlane.xlu0 %4636 }
 0xfb2   : > { %vm4638_vm15 = vcmp.eq.f32.partialorder %v10249_v26, %v10447_v22  ;;  %v4660_v26 = vand.u32 65535, %v10286_v9 }
 0xfb3   : > { %v4639_v5 = vsel %vm4638_vm15, %v4634_v51, -inf  ;;  %v4688_v51 = vand.u32 65535, %v10313_v21 }
 0xfb4   : > { %4640 = vmax.xlane.f32.xlu0 %v4639_v5  ;;  %v4662_v18 = vcvt.s32.f32 %v4660_v26  ;;  %v4732_v26 = vcvt.s32.f32 %v4730_v43 }
 0xfbc   : > { %v10452_v60 = vpop.xlane.xlu1 %4622 }
 0xfbd   : > { %vm4624_vm14 = vcmp.eq.f32.partialorder %v10262_v41, %v10452_v60 }
 0xfbe   : > { %v4625_v27 = vsel %vm4624_vm14, %v4620_v49, -inf }
 0xfbf   : > { %4626 = vmax.xlane.f32.xlu1 %v4625_v27 }
 0xfc2   : > { %v10457_v42 = vpop.xlane.xlu1 %4650 }
 0xfc3   : > { %vm4652_vm13 = vcmp.eq.f32.partialorder %v10279_v54, %v10457_v42 }
 0xfc4   : > { %v4653_v15 = vsel %vm4652_vm13, %v4648_v25, -inf  ;;  %v4716_v25 = vand.u32 65535, %v10337_v4 }
 0xfc5   : > { %4654 = vmax.xlane.f32.xlu1 %v4653_v15 }
 0xfc6   : > { %v10463_v7 = vpop.xlane.xlu1 %4678 }
 0xfc7   : > { %v10465_v41 = vpop.xlane.xlu0 %4664  ;;  %vm4680_vm1 = vcmp.eq.f32.partialorder %v10295_v16, %v10463_v7  ;;  %v4690_v16 = vcvt.s32.f32 %v4688_v51  ;;  %v4786_v51 = vand.u32 65535, %v10380_v48 }
 0xfc8   : > { %v4681_v55 = vsel %vm4680_vm1, %v4676_v63, -inf  ;;  %vm4666_vm15 = vcmp.eq.f32.partialorder %v10301_v61, %v10465_v41 }
 0xfc9   : > { %4682 = vmax.xlane.f32.xlu1 %v4681_v55  ;;  %v4667_v54 = vsel %vm4666_vm15, %v4662_v18, -inf  ;;  %v4758_v18 = vand.u32 65535, %v10358_v24  ;;  %v4788_v43 = vcvt.s32.f32 %v4786_v51 }
 0xfca   : > { %4668 = vmax.xlane.f32.xlu0 %v4667_v54 }
 0xfcb   : > { %v4760_v45 = vcvt.s32.f32 %v4758_v18 }
 0xfcc   : > { %v10473_v5 = vpop.xlane.xlu1 %4706 }
 0xfcd   : > { %v10475_v49 = vpop.xlane.xlu0 %4692  ;;  %vm4708_vm14 = vcmp.eq.f32.partialorder %v10321_v6, %v10473_v5  ;;  %v4718_v6 = vcvt.s32.f32 %v4716_v25 }
 0xfce   : > { %v4709_v27 = vsel %vm4708_vm14, %v4704_v14, -inf  ;;  %vm4694_vm13 = vcmp.eq.f32.partialorder %v10327_v40, %v10475_v49 }
 0xfcf   : > { %4710 = vmax.xlane.f32.xlu1 %v4709_v27  ;;  %v4695_v61 = vsel %vm4694_vm13, %v4690_v16, -inf  ;;  %v4772_v16 = vand.u32 65535, %v10389_v47 }
 0xfd0   : > { %4696 = vmax.xlane.f32.xlu0 %v4695_v61 }
 0xfd5   : > { %v10483_v32 = vpop.xlane.xlu1 %4734 }
 0xfd6   : > { %v10485_v15 = vpop.xlane.xlu0 %4720  ;;  %vm4736_vm1 = vcmp.eq.f32.partialorder %v10346_v56, %v10483_v32  ;;  %v4744_v56 = vand.u32 65535, %v10375_v36 }
 0xfd7   : > { %v4737_v63 = vsel %vm4736_vm1, %v4732_v26, -inf  ;;  %vm4722_vm15 = vcmp.eq.f32.partialorder %v10352_v12, %v10485_v15  ;;  %v4774_v26 = vcvt.s32.f32 %v4772_v16 }
 0xfd8   : > { %4738 = vmax.xlane.f32.xlu1 %v4737_v63  ;;  %v4723_v40 = vsel %vm4722_vm15, %v4718_v6, -inf  ;;  %v4746_v12 = vcvt.s32.f32 %v4744_v56  ;;  %v4800_v6 = vand.u32 65535, %v10414_v52 }
 0xfd9   : > { %4724 = vmax.xlane.f32.xlu0 %v4723_v40 }
 0xfe1   : > { %v10492_v55 = vpop.xlane.xlu1 %4762 }
 0xfe2   : > { %vm4764_vm14 = vcmp.eq.f32.partialorder %v10366_v11, %v10492_v55  ;;  %v4814_v11 = vand.u32 65535, %v10406_v37 }
 0xfe3   : > { %v4765_v54 = vsel %vm4764_vm14, %v4760_v45, -inf }
 0xfe4   : > { %4766 = vmax.xlane.f32.xlu1 %v4765_v54  ;;  %v4816_v18 = vcvt.s32.f32 %v4814_v11  ;;  %v4802_v54 = vcvt.s32.f32 %v4800_v6 }
 0xfed   : > { %v10498_v14 = vpop.xlane.xlu0 %4748 }
 0xfee   : > { %vm4750_vm13 = vcmp.eq.f32.partialorder %v10391_v8, %v10498_v14 }
 0xfef   : > { %v4751_v27 = vsel %vm4750_vm13, %v4746_v12, -inf }
 0xff0   : > { %4752 = vmax.xlane.f32.xlu0 %v4751_v27  ;;  %v10503_v61 = vpop.xlane.xlu1 %4790 }
 0xff1   : > { %v10506_v25 = vpop.xlane.xlu0 %4776  ;;  %vm4792_vm1 = vcmp.eq.f32.partialorder %v10408_v46, %v10503_v61  ;;  %v4828_v46 = vand.u32 65535, %v10432_v29 }
 0xff2   : > { %v4793_v63 = vsel %vm4792_vm1, %v4788_v43, -inf  ;;  %vm4778_vm15 = vcmp.eq.f32.partialorder %v10411_v2, %v10506_v25 }
 0xff3   : > { %4794 = vmax.xlane.f32.xlu1 %v4793_v63  ;;  %v4779_v8 = vsel %vm4778_vm15, %v4774_v26, -inf  ;;  %v4830_v12 = vcvt.s32.f32 %v4828_v46 }
 0xff4   : > { %4780 = vmax.xlane.f32.xlu0 %v4779_v8  ;;  %v10513_v40 = vpop.xlane.xlu1 %4818 }
 0xff5   : > { %v10515_v45 = vpop.xlane.xlu0 %4804  ;;  %vm4820_vm14 = vcmp.eq.f32.partialorder %v10425_v17, %v10513_v40  ;;  %v4643_v17 = vcvt.f32.s32 %v10447_v22 }
 0xff6   : > { %v4821_v56 = vsel %vm4820_vm14, %v4816_v18, -inf  ;;  %vm4806_vm13 = vcmp.eq.f32.partialorder %v10434_v38, %v10515_v45  ;;  %vm5922_vm14 = vcmask 97280  }
 0xff7   : > { %4822 = vmax.xlane.f32.xlu1 %v4821_v56  ;;  %v4807_v2 = vsel %vm4806_vm13, %v4802_v54, -inf  ;;  %v4644_v43 = vshll.u32 %v4643_v17, 16 }
 0xff8   : > { %4808 = vmax.xlane.f32.xlu0 %v4807_v2 }
 0xff9   : > { %v10522_v51 = vpop.xlane.xlu0 %4832 }
 0xffa   : > { %vm4834_vm1 = vcmp.eq.f32.partialorder %v10443_v13, %v10522_v51  ;;  %v4629_v13 = vcvt.f32.s32 %v10452_v60 }
 0xffb   : > { %v4835_v16 = vsel %vm4834_vm1, %v4830_v12, -inf }
 0xffc   : > { %4836 = vmax.xlane.f32.xlu0 %v4835_v16  ;;  %v4630_v46 = vshll.u32 %v4629_v13, 16 }
0x1041   : > { %v4641_v27 = vpop.xlane.xlu0 %4640 }
0x1042   : > { %v4642_v11 = vcvt.f32.s32 %v4641_v27 }
0x1044   : > { %v4645_v26 = vadd.s32 %v4644_v43, %v4642_v11 }
0x1046   : > { %v4843_v6 = vand.u32 127, %v4645_v26  ;;  %vm4875_vm15 = vcmp.eq.s32.totalorder %v10241_v39, %v4645_v26  ;;  %v4685_v26 = vcvt.f32.s32 %v10463_v7 }
0x1047   : > { %v10529_v38 = vsel %vm4875_vm15, 2147483648, %v10241_v39  ;;  %v4657_v39 = vcvt.f32.s32 %v10457_v42 }
0x1048   : > { %v4859_v63 = vsub.s32 127, %v4843_v6  ;;  %v4921_v8 = vshra.s32 %v10529_v38, 16 }
0x1049   : > { %v4658_v11 = vshll.u32 %v4657_v39, 16 }
0x104a   : > { %v10535_v18 = vsel %vm5922_vm14, %v10247_v10, %v4859_v63  ;;  %v10537_v22 = vcvt.s32.f32 %v4921_v8  ;;  %v4671_v63 = vcvt.f32.s32 %v10465_v41  ;;  %v4686_v8 = vshll.u32 %v4685_v26, 16 }
0x104c   : > { %4924 = vmax.xlane.f32.xlu0 %v10537_v22  ;;  %v4627_v54 = vpop.xlane.xlu1 %4626 }
0x104d   : > { %v4628_v56 = vcvt.f32.s32 %v4627_v54 }
0x104f   : > { %v4631_v2 = vadd.s32 %v4630_v46, %v4628_v56  ;;  %v4672_v46 = vshll.u32 %v4671_v63, 16  ;;  %v4713_v56 = vcvt.f32.s32 %v10473_v5 }
0x1051   : > { %v4842_v12 = vand.u32 127, %v4631_v2  ;;  %vm4874_vm13 = vcmp.eq.s32.totalorder %v10255_v1, %v4631_v2  ;;  %v4714_v5 = vshll.u32 %v4713_v56, 16 }
0x1052   : > { %v10543_v16 = vsel %vm4874_vm13, 2147483648, %v10255_v1  ;;  %v4655_v27 = vpop.xlane.xlu1 %4654 }
0x1053   : > { %v4858_v60 = vsub.s32 127, %v4842_v12  ;;  %v4907_v10 = vshra.s32 %v10543_v16, 16  ;;  %v4656_v6 = vcvt.f32.s32 %v4655_v27 }
0x1055   : > { %v10548_v17 = vsel %vm5922_vm14, %v10260_v50, %v4858_v60  ;;  %v10550_v43 = vcvt.s32.f32 %v4907_v10  ;;  %v4659_v1 = vadd.s32 %v4658_v11, %v4656_v6  ;;  %v4699_v60 = vcvt.f32.s32 %v10475_v49 }
0x1056   : > { %v4683_v42 = vpop.xlane.xlu1 %4682 }
0x1057   : > { %4910 = vmax.xlane.f32.xlu1 %v10550_v43  ;;  %v4844_v13 = vand.u32 127, %v4659_v1  ;;  %vm4876_vm1 = vcmp.eq.s32.totalorder %v10270_v44, %v4659_v1  ;;  %v4684_v54 = vcvt.f32.s32 %v4683_v42  ;;  %v4669_v50 = vpop.xlane.xlu0 %4668 }
0x1058   : > { %v10558_v2 = vsel %vm4876_vm1, 2147483648, %v10270_v44  ;;  %v4670_v7 = vcvt.f32.s32 %v4669_v50 }
0x1059   : > { %v4860_v12 = vsub.s32 127, %v4844_v13  ;;  %v4687_v39 = vadd.s32 %v4686_v8, %v4684_v54  ;;  %v4935_v41 = vshra.s32 %v10558_v2, 16  ;;  %v4700_v13 = vshll.u32 %v4699_v60, 16 }
0x105a   : > { %v4673_v10 = vadd.s32 %v4672_v46, %v4670_v7  ;;  %v4741_v60 = vcvt.f32.s32 %v10483_v32 }
0x105b   : > { %v10564_v27 = vsel %vm5922_vm14, %v10276_v28, %v4860_v12  ;;  %v4846_v11 = vand.u32 127, %v4687_v39  ;;  %vm4878_vm15 = vcmp.eq.s32.totalorder %v10282_v0, %v4687_v39  ;;  %v10567_v26 = vcvt.s32.f32 %v4935_v41 }
0x105c   : > { %v10570_v44 = vsel %vm4878_vm15, 2147483648, %v10282_v0  ;;  %v4845_v6 = vand.u32 127, %v4673_v10  ;;  %vm4877_vm13 = vcmp.eq.s32.totalorder %v10286_v9, %v4673_v10  ;;  %v4711_v63 = vpop.xlane.xlu1 %4710 }
0x105d   : > { %v4862_v1 = vsub.s32 127, %v4846_v11  ;;  %v10574_v49 = vsel %vm4877_vm13, 2147483648, %v10286_v9  ;;  %v4712_v42 = vcvt.f32.s32 %v4711_v63  ;;  %v4697_v28 = vpop.xlane.xlu0 %4696  ;;  %4938 = vmax.xlane.f32.xlu1 %v10567_v26  ;;  %v4963_v8 = vshra.s32 %v10570_v44, 16 }
0x105e   : > { %v4861_v54 = vsub.s32 127, %v4845_v6  ;;  %v4698_v50 = vcvt.f32.s32 %v4697_v28  ;;  %v4949_v0 = vshra.s32 %v10574_v49, 16  ;;  %v4742_v28 = vshll.u32 %v4741_v60, 16 }
0x105f   : > { %v10581_v46 = vsel %vm5922_vm14, %v10293_v33, %v4862_v1  ;;  %v4715_v56 = vadd.s32 %v4714_v5, %v4712_v42  ;;  %v10583_v7 = vcvt.s32.f32 %v4963_v8 }
0x1060   : > { %v10587_v9 = vsel %vm5922_vm14, %v10299_v57, %v4861_v54  ;;  %v4701_v12 = vadd.s32 %v4700_v13, %v4698_v50  ;;  %v10589_v39 = vcvt.s32.f32 %v4949_v0  ;;  %v4727_v57 = vcvt.f32.s32 %v10485_v15 }
0x1061   : > { %v4848_v41 = vand.u32 127, %v4715_v56  ;;  %vm4880_vm1 = vcmp.eq.s32.totalorder %v10307_v19, %v4715_v56  ;;  %4966 = vmax.xlane.f32.xlu1 %v10583_v7 }
0x1062   : > { %v10595_v33 = vsel %vm4880_vm1, 2147483648, %v10307_v19  ;;  %v4847_v10 = vand.u32 127, %v4701_v12  ;;  %vm4879_vm15 = vcmp.eq.s32.totalorder %v10313_v21, %v4701_v12  ;;  %4952 = vmax.xlane.f32.xlu0 %v10589_v39  ;;  %v4728_v54 = vshll.u32 %v4727_v57, 16 }
0x1063   : > { %v4864_v11 = vsub.s32 127, %v4848_v41  ;;  %v10601_v5 = vsel %vm4879_vm15, 2147483648, %v10313_v21  ;;  %v4991_v6 = vshra.s32 %v10595_v33, 16 }
0x1064   : > { %v4863_v63 = vsub.s32 127, %v4847_v10  ;;  %v4977_v1 = vshra.s32 %v10601_v5, 16 }
0x1065   : > { %v10607_v19 = vsel %vm5922_vm14, %v10319_v30, %v4864_v11  ;;  %v4739_v32 = vpop.xlane.xlu1 %4738  ;;  %v10609_v42 = vcvt.s32.f32 %v4991_v6  ;;  %v4769_v6 = vcvt.f32.s32 %v10492_v55 }
0x1066   : > { %v10613_v15 = vsel %vm5922_vm14, %v10325_v23, %v4863_v63  ;;  %v4740_v8 = vcvt.f32.s32 %v4739_v32  ;;  %v4725_v21 = vpop.xlane.xlu0 %4724  ;;  %v10615_v13 = vcvt.s32.f32 %v4977_v1 }
0x1067   : > { %v4726_v50 = vcvt.f32.s32 %v4725_v21  ;;  %4994 = vmax.xlane.f32.xlu1 %v10609_v42 }
0x1068   : > { %v4743_v0 = vadd.s32 %v4742_v28, %v4740_v8  ;;  %4980 = vmax.xlane.f32.xlu0 %v10615_v13  ;;  %v4770_v28 = vshll.u32 %v4769_v6, 16  ;;  %v4811_v6 = vcvt.f32.s32 %v10515_v45 }
0x1069   : > { %v4729_v30 = vadd.s32 %v4728_v54, %v4726_v50  ;;  %v4755_v50 = vcvt.f32.s32 %v10498_v14 }
0x106a   : > { %v4850_v56 = vand.u32 127, %v4743_v0  ;;  %vm4882_vm13 = vcmp.eq.s32.totalorder %v10333_v59, %v4743_v0  ;;  %v11952_v0 = vld [vmem:[#allocation37_spill] sm:$0xff] }
0x106b   : > { %v10621_v12 = vsel %vm4882_vm13, 2147483648, %v10333_v59  ;;  %v4849_v23 = vand.u32 127, %v4729_v30  ;;  %vm4881_vm1 = vcmp.eq.s32.totalorder %v10337_v4, %v4729_v30 }
0x106c   : > { %v4866_v41 = vsub.s32 127, %v4850_v56  ;;  %v10625_v60 = vsel %vm4881_vm1, 2147483648, %v10337_v4  ;;  %v5019_v10 = vshra.s32 %v10621_v12, 16 }
0x106d   : > { %v4865_v57 = vsub.s32 127, %v4849_v23  ;;  %v5005_v11 = vshra.s32 %v10625_v60, 16  ;;  %v4797_v23 = vcvt.f32.s32 %v10503_v61 }
0x106e   : > { %v10632_v63 = vsel %vm5922_vm14, %v10344_v62, %v4866_v41  ;;  %v10634_v59 = vcvt.s32.f32 %v5019_v10  ;;  %v4756_v10 = vshll.u32 %v4755_v50, 16 }
0x106f   : > { %v10638_v1 = vsel %vm5922_vm14, %v10350_v35, %v4865_v57  ;;  %v10640_v32 = vcvt.s32.f32 %v5005_v11  ;;  %v4825_v11 = vcvt.f32.s32 %v10513_v40  ;;  %v4812_v40 = vshll.u32 %v4811_v6, 16 }
0x1070   : > { %5022 = vmax.xlane.f32.xlu1 %v10634_v59 }
0x1071   : > { %v4767_v4 = vpop.xlane.xlu1 %4766  ;;  %5008 = vmax.xlane.f32.xlu0 %v10640_v32  ;;  %v4826_v50 = vshll.u32 %v4825_v11, 16 }
0x1072   : > { %v4768_v8 = vcvt.f32.s32 %v4767_v4 }
0x1074   : > { %v4771_v55 = vadd.s32 %v4770_v28, %v4768_v8  ;;  %v4798_v28 = vshll.u32 %v4797_v23, 16  ;;  %v4839_v8 = vcvt.f32.s32 %v10522_v51 }
0x1076   : > { %v4852_v21 = vand.u32 127, %v4771_v55  ;;  %vm4884_vm15 = vcmp.eq.s32.totalorder %v10358_v24, %v4771_v55 }
0x1077   : > { %v10646_v62 = vsel %vm4884_vm15, 2147483648, %v10358_v24  ;;  %v4783_v24 = vcvt.f32.s32 %v10506_v25 }
0x1078   : > { %v4868_v54 = vsub.s32 127, %v4852_v21  ;;  %v5047_v35 = vshra.s32 %v10646_v62, 16 }
0x107a   : > { %v10652_v30 = vsel %vm5922_vm14, %v11952_v0, %v4868_v54  ;;  %v10654_v56 = vcvt.s32.f32 %v5047_v35  ;;  %v4784_v54 = vshll.u32 %v4783_v24, 16 }
0x107c   : > { %5050 = vmax.xlane.f32.xlu1 %v10654_v56 }
0x107d   : > { %v4753_v41 = vpop.xlane.xlu0 %4752 }
0x107e   : > { %v4754_v57 = vcvt.f32.s32 %v4753_v41 }
0x1080   : > { %v4757_v14 = vadd.s32 %v4756_v10, %v4754_v57  ;;  %v4795_v4 = vpop.xlane.xlu1 %4794  ;;  %v4840_v57 = vshll.u32 %v4839_v8, 16 }
0x1081   : > { %v4796_v55 = vcvt.f32.s32 %v4795_v4  ;;  %v4781_v21 = vpop.xlane.xlu0 %4780 }
0x1082   : > { %v4851_v35 = vand.u32 127, %v4757_v14  ;;  %vm4883_vm13 = vcmp.eq.s32.totalorder %v10375_v36, %v4757_v14  ;;  %v4782_v61 = vcvt.f32.s32 %v4781_v21 }
0x1083   : > { %v10664_v25 = vsel %vm4883_vm13, 2147483648, %v10375_v36  ;;  %v4799_v0 = vadd.s32 %v4798_v28, %v4796_v55 }
0x1084   : > { %v4867_v41 = vsub.s32 127, %v4851_v35  ;;  %v4785_v45 = vadd.s32 %v4784_v54, %v4782_v61  ;;  %v4823_v10 = vpop.xlane.xlu1 %4822  ;;  %v5033_v23 = vshra.s32 %v10664_v25, 16 }
0x1085   : > { %v4854_v51 = vand.u32 127, %v4799_v0  ;;  %vm4886_vm1 = vcmp.eq.s32.totalorder %v10380_v48, %v4799_v0  ;;  %v4824_v24 = vcvt.f32.s32 %v4823_v10  ;;  %v4809_v4 = vpop.xlane.xlu0 %4808 }
0x1086   : > { %v10670_v14 = vsel %vm5922_vm14, %v10385_v3, %v4867_v41  ;;  %v10673_v36 = vsel %vm4886_vm1, 2147483648, %v10380_v48  ;;  %v4853_v11 = vand.u32 127, %v4785_v45  ;;  %vm4885_vm15 = vcmp.eq.s32.totalorder %v10389_v47, %v4785_v45 }
0x1087   : > { %v4870_v6 = vsub.s32 127, %v4854_v51  ;;  %v10677_v28 = vsel %vm4885_vm15, 2147483648, %v10389_v47  ;;  %v4827_v8 = vadd.s32 %v4826_v50, %v4824_v24  ;;  %v4810_v55 = vcvt.f32.s32 %v4809_v4 }
0x1088   : > { %v4869_v21 = vsub.s32 127, %v4853_v11  ;;  %v10679_v54 = vcvt.s32.f32 %v5033_v23  ;;  %v5075_v35 = vshra.s32 %v10673_v36, 16  ;;  %v5061_v3 = vshra.s32 %v10677_v28, 16 }
0x1089   : > { %v10685_v48 = vsel %vm5922_vm14, %v10395_v20, %v4870_v6  ;;  %v4856_v61 = vand.u32 127, %v4827_v8  ;;  %vm4888_vm13 = vcmp.eq.s32.totalorder %v10406_v37, %v4827_v8  ;;  %v4813_v0 = vadd.s32 %v4812_v40, %v4810_v55  ;;  %v4837_v41 = vpop.xlane.xlu0 %4836 }
0x108a   : > { %v10690_v47 = vsel %vm5922_vm14, %v10403_v53, %v4869_v21  ;;  %v10693_v50 = vsel %vm4888_vm13, 2147483648, %v10406_v37  ;;  %5036 = vmax.xlane.f32.xlu0 %v10679_v54  ;;  %v4838_v45 = vcvt.f32.s32 %v4837_v41  ;;  %v10696_v10 = vcvt.s32.f32 %v5075_v35 }
0x108b   : > { %v4872_v23 = vsub.s32 127, %v4856_v61  ;;  %v4855_v20 = vand.u32 127, %v4813_v0  ;;  %vm4887_vm1 = vcmp.eq.s32.totalorder %v10414_v52, %v4813_v0  ;;  %v10699_v51 = vcvt.s32.f32 %v5061_v3 }
0x108c   : > { %v10702_v40 = vsel %vm4887_vm1, 2147483648, %v10414_v52  ;;  %v4841_v24 = vadd.s32 %v4840_v57, %v4838_v45  ;;  %5078 = vmax.xlane.f32.xlu1 %v10696_v10  ;;  %v5103_v53 = vshra.s32 %v10693_v50, 16  ;;  %v4906_v41 = vand.u32 65535, %v10543_v16 }
0x108d   : > { %v10708_v37 = vsel %vm5922_vm14, %v10420_v58, %v4872_v23  ;;  %v4871_v4 = vsub.s32 127, %v4855_v20  ;;  %v5089_v11 = vshra.s32 %v10702_v40, 16  ;;  %v4934_v20 = vand.u32 65535, %v10558_v2 }
0x108e   : > { %v4857_v6 = vand.u32 127, %v4841_v24  ;;  %vm4889_vm15 = vcmp.eq.s32.totalorder %v10432_v29, %v4841_v24  ;;  %5064 = vmax.xlane.f32.xlu0 %v10699_v51  ;;  %v10713_v8 = vcvt.s32.f32 %v5103_v53  ;;  %v4908_v45 = vcvt.s32.f32 %v4906_v41 }
0x108f   : > { %v10717_v52 = vsel %vm5922_vm14, %v10429_v31, %v4871_v4  ;;  %v10720_v57 = vsel %vm4889_vm15, 2147483648, %v10432_v29  ;;  %v10722_v55 = vcvt.s32.f32 %v5089_v11  ;;  %v4920_v31 = vand.u32 65535, %v10529_v38 }
0x1090   : > { %v4873_v58 = vsub.s32 127, %v4857_v6  ;;  %5106 = vmax.xlane.f32.xlu1 %v10713_v8  ;;  %v5117_v21 = vshra.s32 %v10720_v57, 16  ;;  %v4936_v53 = vcvt.s32.f32 %v4934_v20  ;;  %v4962_v4 = vand.u32 65535, %v10570_v44 }
0x1091   : > { %v4922_v61 = vcvt.s32.f32 %v4920_v31 }
0x1092   : > { %v10728_v35 = vsel %vm5922_vm14, %v10441_v34, %v4873_v58  ;;  %5092 = vmax.xlane.f32.xlu0 %v10722_v55  ;;  %v10731_v3 = vcvt.s32.f32 %v5117_v21  ;;  %v4964_v58 = vcvt.s32.f32 %v4962_v4  ;;  %v5004_v4 = vand.u32 65535, %v10625_v60 }
0x1096   : > { %5120 = vmax.xlane.f32.xlu0 %v10731_v3 }
0x10d9   : > { %v10735_v29 = vpop.xlane.xlu0 %4924 }
0x10da   : > { %vm4926_vm13 = vcmp.eq.f32.partialorder %v10537_v22, %v10735_v29  ;;  %v4948_v22 = vand.u32 65535, %v10574_v49 }
0x10db   : > { %v4927_v0 = vsel %vm4926_vm13, %v4922_v61, -inf  ;;  %v4990_v61 = vand.u32 65535, %v10595_v33 }
0x10dc   : > { %4928 = vmax.xlane.f32.xlu0 %v4927_v0  ;;  %v4950_v21 = vcvt.s32.f32 %v4948_v22  ;;  %v4976_v0 = vand.u32 65535, %v10601_v5 }
0x10e4   : > { %v10740_v34 = vpop.xlane.xlu1 %4910 }
0x10e5   : > { %vm4912_vm14 = vcmp.eq.f32.partialorder %v10550_v43, %v10740_v34 }
0x10e6   : > { %v4913_v23 = vsel %vm4912_vm14, %v4908_v45, -inf  ;;  %v4992_v45 = vcvt.s32.f32 %v4990_v61 }
0x10e7   : > { %4914 = vmax.xlane.f32.xlu1 %v4913_v23 }
0x10ea   : > { %v10745_v24 = vpop.xlane.xlu1 %4938 }
0x10eb   : > { %vm4940_vm1 = vcmp.eq.f32.partialorder %v10567_v26, %v10745_v24 }
0x10ec   : > { %v4941_v11 = vsel %vm4940_vm1, %v4936_v53, -inf  ;;  %v5018_v53 = vand.u32 65535, %v10621_v12 }
0x10ed   : > { %4942 = vmax.xlane.f32.xlu1 %v4941_v11 }
0x10ee   : > { %v10751_v6 = vpop.xlane.xlu1 %4966  ;;  %v5020_v11 = vcvt.s32.f32 %v5018_v53 }
0x10ef   : > { %v10753_v43 = vpop.xlane.xlu0 %4952  ;;  %vm4968_vm15 = vcmp.eq.f32.partialorder %v10583_v7, %v10751_v6  ;;  %v4978_v7 = vcvt.s32.f32 %v4976_v0 }
0x10f0   : > { %v4969_v31 = vsel %vm4968_vm15, %v4964_v58, -inf  ;;  %vm4954_vm13 = vcmp.eq.f32.partialorder %v10589_v39, %v10753_v43 }
0x10f1   : > { %4970 = vmax.xlane.f32.xlu1 %v4969_v31  ;;  %v4955_v26 = vsel %vm4954_vm13, %v4950_v21, -inf  ;;  %v5046_v31 = vand.u32 65535, %v10646_v62 }
0x10f2   : > { %4956 = vmax.xlane.f32.xlu0 %v4955_v26 }
0x10f3   : > { %v5048_v26 = vcvt.s32.f32 %v5046_v31 }
0x10f4   : > { %v10761_v41 = vpop.xlane.xlu1 %4994 }
0x10f5   : > { %v10763_v23 = vpop.xlane.xlu0 %4980  ;;  %vm4996_vm14 = vcmp.eq.f32.partialorder %v10609_v42, %v10761_v41  ;;  %v5006_v42 = vcvt.s32.f32 %v5004_v4 }
0x10f6   : > { %v4997_v20 = vsel %vm4996_vm14, %v4992_v45, -inf  ;;  %vm4982_vm1 = vcmp.eq.f32.partialorder %v10615_v13, %v10763_v23  ;;  %v5074_v45 = vand.u32 65535, %v10673_v36 }
0x10f7   : > { %4998 = vmax.xlane.f32.xlu1 %v4997_v20  ;;  %v4983_v39 = vsel %vm4982_vm1, %v4978_v7, -inf  ;;  %v5060_v20 = vand.u32 65535, %v10677_v28 }
0x10f8   : > { %4984 = vmax.xlane.f32.xlu0 %v4983_v39  ;;  %v5076_v4 = vcvt.s32.f32 %v5074_v45  ;;  %v5116_v45 = vand.u32 65535, %v10720_v57 }
0x10fd   : > { %v10771_v22 = vpop.xlane.xlu1 %5022 }
0x10fe   : > { %v10773_v58 = vpop.xlane.xlu0 %5008  ;;  %vm5024_vm15 = vcmp.eq.f32.partialorder %v10634_v59, %v10771_v22  ;;  %v5032_v59 = vand.u32 65535, %v10664_v25 }
0x10ff   : > { %v5025_v21 = vsel %vm5024_vm15, %v5020_v11, -inf  ;;  %vm5010_vm13 = vcmp.eq.f32.partialorder %v10640_v32, %v10773_v58 }
0x1100   : > { %5026 = vmax.xlane.f32.xlu1 %v5025_v21  ;;  %v5011_v13 = vsel %vm5010_vm13, %v5006_v42, -inf  ;;  %v5034_v32 = vcvt.s32.f32 %v5032_v59  ;;  %v5062_v21 = vcvt.s32.f32 %v5060_v20  ;;  %v5118_v20 = vcvt.s32.f32 %v5116_v45 }
0x1101   : > { %5012 = vmax.xlane.f32.xlu0 %v5011_v13  ;;  %v5088_v13 = vand.u32 65535, %v10702_v40 }
0x1103   : > { %v5090_v59 = vcvt.s32.f32 %v5088_v13 }
0x1109   : > { %v10780_v61 = vpop.xlane.xlu1 %5050 }
0x110a   : > { %vm5052_vm14 = vcmp.eq.f32.partialorder %v10654_v56, %v10780_v61  ;;  %v5102_v56 = vand.u32 65535, %v10693_v50 }
0x110b   : > { %v5053_v0 = vsel %vm5052_vm14, %v5048_v26, -inf }
0x110c   : > { %5054 = vmax.xlane.f32.xlu1 %v5053_v0  ;;  %v5104_v26 = vcvt.s32.f32 %v5102_v56 }
0x1117   : > { %v10786_v7 = vpop.xlane.xlu0 %5036 }
0x1118   : > { %vm5038_vm1 = vcmp.eq.f32.partialorder %v10679_v54, %v10786_v7 }
0x1119   : > { %v5039_v39 = vsel %vm5038_vm1, %v5034_v32, -inf  ;;  %v10791_v53 = vpop.xlane.xlu1 %5078 }
0x111a   : > { %5040 = vmax.xlane.f32.xlu0 %v5039_v39  ;;  %vm5080_vm15 = vcmp.eq.f32.partialorder %v10696_v10, %v10791_v53 }
0x111b   : > { %v10796_v11 = vpop.xlane.xlu0 %5064  ;;  %v5081_v42 = vsel %vm5080_vm15, %v5076_v4, -inf }
0x111c   : > { %5082 = vmax.xlane.f32.xlu1 %v5081_v42  ;;  %vm5066_vm13 = vcmp.eq.f32.partialorder %v10699_v51, %v10796_v11 }
0x111d   : > { %v5067_v54 = vsel %vm5066_vm13, %v5062_v21, -inf  ;;  %v10801_v31 = vpop.xlane.xlu1 %5106 }
0x111e   : > { %5068 = vmax.xlane.f32.xlu0 %v5067_v54  ;;  %vm5108_vm14 = vcmp.eq.f32.partialorder %v10713_v8, %v10801_v31  ;;  %v4931_v8 = vcvt.f32.s32 %v10735_v29 }
0x111f   : > { %v10805_v0 = vpop.xlane.xlu0 %5092  ;;  %v5109_v10 = vsel %vm5108_vm14, %v5104_v26, -inf  ;;  %vm5939_vm14 = vcmask 105472  }
0x1120   : > { %5110 = vmax.xlane.f32.xlu1 %v5109_v10  ;;  %vm5094_vm1 = vcmp.eq.f32.partialorder %v10722_v55, %v10805_v0  ;;  %v4932_v56 = vshll.u32 %v4931_v8, 16 }
0x1121   : > { %v5095_v32 = vsel %vm5094_vm1, %v5090_v59, -inf }
0x1122   : > { %5096 = vmax.xlane.f32.xlu0 %v5095_v32 }
0x1123   : > { %v10810_v51 = vpop.xlane.xlu0 %5120 }
0x1124   : > { %vm5122_vm15 = vcmp.eq.f32.partialorder %v10731_v3, %v10810_v51  ;;  %v4917_v3 = vcvt.f32.s32 %v10740_v34 }
0x1125   : > { %v5123_v39 = vsel %vm5122_vm15, %v5118_v20, -inf }
0x1126   : > { %5124 = vmax.xlane.f32.xlu0 %v5123_v39  ;;  %v4918_v45 = vshll.u32 %v4917_v3, 16 }
0x1169   : > { %v4929_v4 = vpop.xlane.xlu0 %4928 }
0x116a   : > { %v4930_v42 = vcvt.f32.s32 %v4929_v4 }
0x116c   : > { %v4933_v21 = vadd.s32 %v4932_v56, %v4930_v42 }
0x116e   : > { %v5131_v13 = vand.u32 127, %v4933_v21  ;;  %vm5163_vm13 = vcmp.eq.s32.totalorder %v10529_v38, %v4933_v21 }
0x116f   : > { %v10817_v55 = vsel %vm5163_vm13, 2147483648, %v10529_v38  ;;  %v4945_v38 = vcvt.f32.s32 %v10745_v24 }
0x1170   : > { %v5147_v54 = vsub.s32 127, %v5131_v13  ;;  %v5209_v26 = vshra.s32 %v10817_v55, 16  ;;  %v4973_v13 = vcvt.f32.s32 %v10751_v6 }
0x1171   : > { %v4946_v21 = vshll.u32 %v4945_v38, 16 }
0x1172   : > { %v10823_v10 = vsel %vm5939_vm14, %v10535_v18, %v5147_v54  ;;  %v10825_v29 = vcvt.s32.f32 %v5209_v26  ;;  %v4959_v26 = vcvt.f32.s32 %v10753_v43  ;;  %v4974_v3 = vshll.u32 %v4973_v13, 16 }
0x1174   : > { %5212 = vmax.xlane.f32.xlu0 %v10825_v29  ;;  %v4915_v59 = vpop.xlane.xlu1 %4914 }
0x1175   : > { %v4916_v32 = vcvt.f32.s32 %v4915_v59 }
0x1177   : > { %v4919_v20 = vadd.s32 %v4918_v45, %v4916_v32  ;;  %v4960_v32 = vshll.u32 %v4959_v26, 16 }
0x1179   : > { %v5130_v39 = vand.u32 127, %v4919_v20  ;;  %vm5162_vm1 = vcmp.eq.s32.totalorder %v10543_v16, %v4919_v20  ;;  %v5001_v20 = vcvt.f32.s32 %v10761_v41 }
0x117a   : > { %v10831_v8 = vsel %vm5162_vm1, 2147483648, %v10543_v16  ;;  %v4943_v56 = vpop.xlane.xlu1 %4942 }
0x117b   : > { %v5146_v34 = vsub.s32 127, %v5130_v39  ;;  %v5195_v18 = vshra.s32 %v10831_v8, 16  ;;  %v4944_v54 = vcvt.f32.s32 %v4943_v56  ;;  %v5002_v41 = vshll.u32 %v5001_v20, 16 }
0x117d   : > { %v10836_v4 = vsel %vm5939_vm14, %v10548_v17, %v5146_v34  ;;  %v10838_v42 = vcvt.s32.f32 %v5195_v18  ;;  %v4947_v16 = vadd.s32 %v4946_v21, %v4944_v54  ;;  %v4987_v18 = vcvt.f32.s32 %v10763_v23 }
0x117e   : > { %v4971_v24 = vpop.xlane.xlu1 %4970 }
0x117f   : > { %5198 = vmax.xlane.f32.xlu1 %v10838_v42  ;;  %v5132_v59 = vand.u32 127, %v4947_v16  ;;  %vm5164_vm15 = vcmp.eq.s32.totalorder %v10558_v2, %v4947_v16  ;;  %v4972_v45 = vcvt.f32.s32 %v4971_v24  ;;  %v4957_v17 = vpop.xlane.xlu0 %4956 }
0x1180   : > { %v10846_v39 = vsel %vm5164_vm15, 2147483648, %v10558_v2  ;;  %v4958_v6 = vcvt.f32.s32 %v4957_v17 }
0x1181   : > { %v5148_v38 = vsub.s32 127, %v5132_v59  ;;  %v4975_v34 = vadd.s32 %v4974_v3, %v4972_v45  ;;  %v5223_v43 = vshra.s32 %v10846_v39, 16  ;;  %v4988_v45 = vshll.u32 %v4987_v18, 16 }
0x1182   : > { %v4961_v56 = vadd.s32 %v4960_v32, %v4958_v6  ;;  %v5029_v18 = vcvt.f32.s32 %v10771_v22 }
0x1183   : > { %v10852_v21 = vsel %vm5939_vm14, %v10564_v27, %v5148_v38  ;;  %v5134_v13 = vand.u32 127, %v4975_v34  ;;  %vm5166_vm13 = vcmp.eq.s32.totalorder %v10570_v44, %v4975_v34  ;;  %v10855_v54 = vcvt.s32.f32 %v5223_v43 }
0x1184   : > { %v10858_v2 = vsel %vm5166_vm13, 2147483648, %v10570_v44  ;;  %v5133_v26 = vand.u32 127, %v4961_v56  ;;  %vm5165_vm1 = vcmp.eq.s32.totalorder %v10574_v49, %v4961_v56  ;;  %v4999_v16 = vpop.xlane.xlu1 %4998 }
0x1185   : > { %v5150_v24 = vsub.s32 127, %v5134_v13  ;;  %v10862_v23 = vsel %vm5165_vm1, 2147483648, %v10574_v49  ;;  %v5000_v3 = vcvt.f32.s32 %v4999_v16  ;;  %v4985_v27 = vpop.xlane.xlu0 %4984  ;;  %5226 = vmax.xlane.f32.xlu1 %v10855_v54  ;;  %v5251_v59 = vshra.s32 %v10858_v2, 16 }
0x1186   : > { %v5149_v17 = vsub.s32 127, %v5133_v26  ;;  %v4986_v32 = vcvt.f32.s32 %v4985_v27  ;;  %v5237_v44 = vshra.s32 %v10862_v23, 16 }
0x1187   : > { %v10869_v20 = vsel %vm5939_vm14, %v10581_v46, %v5150_v24  ;;  %v5003_v6 = vadd.s32 %v5002_v41, %v5000_v3  ;;  %v10871_v38 = vcvt.s32.f32 %v5251_v59  ;;  %v5030_v59 = vshll.u32 %v5029_v18, 16 }
0x1188   : > { %v10875_v49 = vsel %vm5939_vm14, %v10587_v9, %v5149_v17  ;;  %v4989_v34 = vadd.s32 %v4988_v45, %v4986_v32  ;;  %v10877_v43 = vcvt.s32.f32 %v5237_v44  ;;  %v5015_v9 = vcvt.f32.s32 %v10773_v58 }
0x1189   : > { %v5136_v56 = vand.u32 127, %v5003_v6  ;;  %vm5168_vm15 = vcmp.eq.s32.totalorder %v10595_v33, %v5003_v6  ;;  %5254 = vmax.xlane.f32.xlu1 %v10871_v38 }
0x118a   : > { %v10883_v46 = vsel %vm5168_vm15, 2147483648, %v10595_v33  ;;  %v5135_v13 = vand.u32 127, %v4989_v34  ;;  %vm5167_vm13 = vcmp.eq.s32.totalorder %v10601_v5, %v4989_v34  ;;  %5240 = vmax.xlane.f32.xlu0 %v10877_v43  ;;  %v5016_v32 = vshll.u32 %v5015_v9, 16 }
0x118b   : > { %v5152_v41 = vsub.s32 127, %v5136_v56  ;;  %v10889_v26 = vsel %vm5167_vm13, 2147483648, %v10601_v5  ;;  %v5279_v16 = vshra.s32 %v10883_v46, 16 }
0x118c   : > { %v5151_v24 = vsub.s32 127, %v5135_v13  ;;  %v5265_v3 = vshra.s32 %v10889_v26, 16 }
0x118d   : > { %v10895_v33 = vsel %vm5939_vm14, %v10607_v19, %v5152_v41  ;;  %v5027_v22 = vpop.xlane.xlu1 %5026  ;;  %v10897_v27 = vcvt.s32.f32 %v5279_v16 }
0x118e   : > { %v10901_v58 = vsel %vm5939_vm14, %v10613_v15, %v5151_v24  ;;  %v5028_v45 = vcvt.f32.s32 %v5027_v22  ;;  %v5013_v5 = vpop.xlane.xlu0 %5012  ;;  %v10903_v17 = vcvt.s32.f32 %v5265_v3  ;;  %v5057_v24 = vcvt.f32.s32 %v10780_v61 }
0x118f   : > { %v5014_v44 = vcvt.f32.s32 %v5013_v5  ;;  %5282 = vmax.xlane.f32.xlu1 %v10897_v27 }
0x1190   : > { %v5031_v6 = vadd.s32 %v5030_v59, %v5028_v45  ;;  %5268 = vmax.xlane.f32.xlu0 %v10903_v17  ;;  %v5058_v45 = vshll.u32 %v5057_v24, 16  ;;  %v5099_v24 = vcvt.f32.s32 %v10805_v0 }
0x1191   : > { %v5017_v19 = vadd.s32 %v5016_v32, %v5014_v44 }
0x1192   : > { %v5138_v34 = vand.u32 127, %v5031_v6  ;;  %vm5170_vm1 = vcmp.eq.s32.totalorder %v10621_v12, %v5031_v6 }
0x1193   : > { %v10909_v56 = vsel %vm5170_vm1, 2147483648, %v10621_v12  ;;  %v5137_v15 = vand.u32 127, %v5017_v19  ;;  %vm5169_vm15 = vcmp.eq.s32.totalorder %v10625_v60, %v5017_v19 }
0x1194   : > { %v5154_v18 = vsub.s32 127, %v5138_v34  ;;  %v10913_v13 = vsel %vm5169_vm15, 2147483648, %v10625_v60  ;;  %v5307_v9 = vshra.s32 %v10909_v56, 16  ;;  %v5043_v34 = vcvt.f32.s32 %v10786_v7 }
0x1195   : > { %v5153_v41 = vsub.s32 127, %v5137_v15  ;;  %v5293_v16 = vshra.s32 %v10913_v13, 16  ;;  %v5085_v15 = vcvt.f32.s32 %v10791_v53 }
0x1196   : > { %v10920_v3 = vsel %vm5939_vm14, %v10632_v63, %v5154_v18  ;;  %v10922_v12 = vcvt.s32.f32 %v5307_v9  ;;  %v5071_v18 = vcvt.f32.s32 %v10796_v11  ;;  %v5100_v11 = vshll.u32 %v5099_v24, 16 }
0x1197   : > { %v10926_v22 = vsel %vm5939_vm14, %v10638_v1, %v5153_v41  ;;  %v10928_v59 = vcvt.s32.f32 %v5293_v16  ;;  %v5113_v16 = vcvt.f32.s32 %v10801_v31 }
0x1198   : > { %5310 = vmax.xlane.f32.xlu1 %v10922_v12 }
0x1199   : > { %v5055_v60 = vpop.xlane.xlu1 %5054  ;;  %5296 = vmax.xlane.f32.xlu0 %v10928_v59 }
0x119a   : > { %v5056_v5 = vcvt.f32.s32 %v5055_v60 }
0x119c   : > { %v5059_v61 = vadd.s32 %v5058_v45, %v5056_v5 }
0x119e   : > { %v5140_v32 = vand.u32 127, %v5059_v61  ;;  %vm5172_vm13 = vcmp.eq.s32.totalorder %v10646_v62, %v5059_v61  ;;  %v5072_v61 = vshll.u32 %v5071_v18, 16 }
0x119f   : > { %v10934_v63 = vsel %vm5172_vm13, 2147483648, %v10646_v62  ;;  %v5044_v62 = vshll.u32 %v5043_v34, 16 }
0x11a0   : > { %v5156_v44 = vsub.s32 127, %v5140_v32  ;;  %v5335_v1 = vshra.s32 %v10934_v63, 16 }
0x11a2   : > { %v10939_v6 = vsel %vm5939_vm14, %v10652_v30, %v5156_v44  ;;  %v10941_v19 = vcvt.s32.f32 %v5335_v1  ;;  %v5086_v30 = vshll.u32 %v5085_v15, 16  ;;  %v5114_v1 = vshll.u32 %v5113_v16, 16 }
0x11a3   : > { %11953 = vst [vmem:[#allocation37_spill] sm:$0xff] %v10939_v6  ;;  %v5127_v15 = vcvt.f32.s32 %v10810_v51 }
0x11a4   : > { %5338 = vmax.xlane.f32.xlu1 %v10941_v19 }
0x11a7   : > { %v5041_v9 = vpop.xlane.xlu0 %5040 }
0x11a8   : > { %v5042_v41 = vcvt.f32.s32 %v5041_v9 }
0x11a9   : > { %v5083_v60 = vpop.xlane.xlu1 %5082 }
0x11aa   : > { %v5045_v45 = vadd.s32 %v5044_v62, %v5042_v41  ;;  %v5084_v5 = vcvt.f32.s32 %v5083_v60 }
0x11ab   : > { %v5069_v32 = vpop.xlane.xlu0 %5068 }
0x11ac   : > { %v5139_v7 = vand.u32 127, %v5045_v45  ;;  %vm5171_vm1 = vcmp.eq.s32.totalorder %v10664_v25, %v5045_v45  ;;  %v5087_v44 = vadd.s32 %v5086_v30, %v5084_v5  ;;  %v5070_v53 = vcvt.f32.s32 %v5069_v32 }
0x11ad   : > { %v10951_v34 = vsel %vm5171_vm1, 2147483648, %v10664_v25  ;;  %v5111_v9 = vpop.xlane.xlu1 %5110 }
0x11ae   : > { %v5155_v31 = vsub.s32 127, %v5139_v7  ;;  %v5142_v6 = vand.u32 127, %v5087_v44  ;;  %vm5174_vm15 = vcmp.eq.s32.totalorder %v10673_v36, %v5087_v44  ;;  %v5073_v0 = vadd.s32 %v5072_v61, %v5070_v53 }
0x11af   : > { %v10956_v18 = vsel %vm5174_vm15, 2147483648, %v10673_v36  ;;  %v5112_v62 = vcvt.f32.s32 %v5111_v9  ;;  %v5097_v41 = vpop.xlane.xlu0 %5096  ;;  %v5321_v60 = vshra.s32 %v10951_v34, 16 }
0x11b0   : > { %v10961_v16 = vsel %vm5939_vm14, %v10670_v14, %v5155_v31  ;;  %v5158_v25 = vsub.s32 127, %v5142_v6  ;;  %v5141_v24 = vand.u32 127, %v5073_v0  ;;  %vm5173_vm13 = vcmp.eq.s32.totalorder %v10677_v28, %v5073_v0 }
0x11b1   : > { %v10965_v30 = vsel %vm5173_vm13, 2147483648, %v10677_v28  ;;  %v5115_v45 = vadd.s32 %v5114_v1, %v5112_v62  ;;  %v5098_v51 = vcvt.f32.s32 %v5097_v41  ;;  %v10967_v5 = vcvt.s32.f32 %v5321_v60 }
0x11b2   : > { %v10971_v36 = vsel %vm5939_vm14, %v10685_v48, %v5158_v25  ;;  %v5157_v61 = vsub.s32 127, %v5141_v24  ;;  %v5363_v32 = vshra.s32 %v10956_v18, 16  ;;  %v5349_v14 = vshra.s32 %v10965_v30, 16 }
0x11b3   : > { %11954 = vst [vmem:[#allocation38_spill] sm:$0xff] %v10971_v36  ;;  %v5128_v6 = vshll.u32 %v5127_v15, 16  ;;  %v5144_v7 = vand.u32 127, %v5115_v45  ;;  %vm5176_vm1 = vcmp.eq.s32.totalorder %v10693_v50, %v5115_v45  ;;  %v5101_v44 = vadd.s32 %v5100_v11, %v5098_v51  ;;  %5324 = vmax.xlane.f32.xlu0 %v10967_v5  ;;  %v5125_v28 = vpop.xlane.xlu0 %5124 }
0x11b4   : > { %v10979_v53 = vsel %vm5939_vm14, %v10690_v47, %v5157_v61  ;;  %v10982_v48 = vsel %vm5176_vm1, 2147483648, %v10693_v50  ;;  %v5126_v1 = vcvt.f32.s32 %v5125_v28  ;;  %v10984_v9 = vcvt.s32.f32 %v5363_v32 }
0x11b5   : > { %11955 = vst [vmem:[#allocation39_spill] sm:$0xff] %v10979_v53  ;;  %11956 = vst [vmem:[#allocation40_spill] sm:$0xff] %v10982_v48  ;;  %v5160_v31 = vsub.s32 127, %v5144_v7  ;;  %v5143_v0 = vand.u32 127, %v5101_v44  ;;  %vm5175_vm15 = vcmp.eq.s32.totalorder %v10702_v40, %v5101_v44  ;;  %v10987_v15 = vcvt.s32.f32 %v5349_v14 }
0x11b6   : > { %v10990_v11 = vsel %vm5175_vm15, 2147483648, %v10702_v40  ;;  %v5129_v62 = vadd.s32 %v5128_v6, %v5126_v1  ;;  %5366 = vmax.xlane.f32.xlu1 %v10984_v9  ;;  %v5391_v47 = vshra.s32 %v10982_v48, 16  ;;  %v5194_v44 = vand.u32 65535, %v10831_v8 }
0x11b7   : > { %11957 = vst [vmem:[#allocation41_spill] sm:$0xff] %v10990_v11  ;;  %v10996_v50 = vsel %vm5939_vm14, %v10708_v37, %v5160_v31  ;;  %v5159_v41 = vsub.s32 127, %v5143_v0  ;;  %5352 = vmax.xlane.f32.xlu0 %v10987_v15  ;;  %v5377_v60 = vshra.s32 %v10990_v11, 16  ;;  %v5222_v31 = vand.u32 65535, %v10846_v39 }
0x11b8   : > { %11958 = vst [vmem:[#allocation42_spill] sm:$0xff] %v10996_v50  ;;  %v5145_v25 = vand.u32 127, %v5129_v62  ;;  %vm5177_vm13 = vcmp.eq.s32.totalorder %v10720_v57, %v5129_v62  ;;  %v11001_v24 = vcvt.s32.f32 %v5391_v47  ;;  %v5250_v47 = vand.u32 65535, %v10858_v2 }
0x11b9   : > { %v11005_v40 = vsel %vm5939_vm14, %v10717_v52, %v5159_v41  ;;  %v11008_v45 = vsel %vm5177_vm13, 2147483648, %v10720_v57  ;;  %v11010_v51 = vcvt.s32.f32 %v5377_v60  ;;  %v5208_v52 = vand.u32 65535, %v10817_v55 }
0x11ba   : > { %11959 = vst [vmem:[#allocation43_spill] sm:$0xff] %v11005_v40  ;;  %11960 = vst [vmem:[#allocation44_spill] sm:$0xff] %v11008_v45  ;;  %v5161_v37 = vsub.s32 127, %v5145_v25  ;;  %5394 = vmax.xlane.f32.xlu1 %v11001_v24  ;;  %v5405_v61 = vshra.s32 %v11008_v45, 16  ;;  %v5224_v62 = vcvt.s32.f32 %v5222_v31  ;;  %v5252_v25 = vcvt.s32.f32 %v5250_v47  ;;  %v11996_v40 = vld [vmem:[#allocation3_spill] sm:$0xff] }
0x11bb   : > { %5380 = vmax.xlane.f32.xlu0 %v11010_v51  ;;  %v5210_v6 = vcvt.s32.f32 %v5208_v52  ;;  %v5278_v52 = vand.u32 65535, %v10883_v46  ;;  %v5306_v31 = vand.u32 65535, %v10909_v56 }
0x11bc   : > { %v11017_v32 = vsel %vm5939_vm14, %v10728_v35, %v5161_v37  ;;  %v11019_v14 = vcvt.s32.f32 %v5405_v61  ;;  %v5196_v35 = vcvt.s32.f32 %v5194_v44 }
0x11bd   : > { %11961 = vst [vmem:[#allocation45_spill] sm:$0xff] %v11017_v32  ;;  %v5280_v44 = vcvt.s32.f32 %v5278_v52 }
0x11bf   : > { %5408 = vmax.xlane.f32.xlu0 %v11019_v14 }
0x1201   : > { %v11023_v57 = vpop.xlane.xlu0 %5212 }
0x1202   : > { %vm5214_vm1 = vcmp.eq.f32.partialorder %v10825_v29, %v11023_v57  ;;  %v5236_v29 = vand.u32 65535, %v10862_v23 }
0x1203   : > { %v5215_v7 = vsel %vm5214_vm1, %v5210_v6, -inf  ;;  %v5264_v6 = vand.u32 65535, %v10889_v26 }
0x1204   : > { %5216 = vmax.xlane.f32.xlu0 %v5215_v7  ;;  %v5238_v37 = vcvt.s32.f32 %v5236_v29  ;;  %v5308_v29 = vcvt.s32.f32 %v5306_v31 }
0x120c   : > { %v11028_v28 = vpop.xlane.xlu1 %5198 }
0x120d   : > { %vm5200_vm14 = vcmp.eq.f32.partialorder %v10838_v42, %v11028_v28  ;;  %v5205_v32 = vcvt.f32.s32 %v11028_v28 }
0x120e   : > { %v5201_v1 = vsel %vm5200_vm14, %v5196_v35, -inf }
0x120f   : > { %5202 = vmax.xlane.f32.xlu1 %v5201_v1 }
0x1212   : > { %v11033_v0 = vpop.xlane.xlu1 %5226 }
0x1213   : > { %vm5228_vm15 = vcmp.eq.f32.partialorder %v10855_v54, %v11033_v0 }
0x1214   : > { %v5229_v41 = vsel %vm5228_vm15, %v5224_v62, -inf  ;;  %v5292_v62 = vand.u32 65535, %v10913_v13 }
0x1215   : > { %5230 = vmax.xlane.f32.xlu1 %v5229_v41 }
0x1216   : > { %v11039_v60 = vpop.xlane.xlu1 %5254 }
0x1217   : > { %v11041_v42 = vpop.xlane.xlu0 %5240  ;;  %vm5256_vm13 = vcmp.eq.f32.partialorder %v10871_v38, %v11039_v60  ;;  %v5266_v38 = vcvt.s32.f32 %v5264_v6  ;;  %v5362_v6 = vand.u32 65535, %v10956_v18 }
0x1218   : > { %v5257_v61 = vsel %vm5256_vm13, %v5252_v25, -inf  ;;  %vm5242_vm1 = vcmp.eq.f32.partialorder %v10877_v43, %v11041_v42 }
0x1219   : > { %5258 = vmax.xlane.f32.xlu1 %v5257_v61  ;;  %v5243_v54 = vsel %vm5242_vm1, %v5238_v37, -inf  ;;  %v5334_v37 = vand.u32 65535, %v10934_v63  ;;  %v5364_v31 = vcvt.s32.f32 %v5362_v6 }
0x121a   : > { %5244 = vmax.xlane.f32.xlu0 %v5243_v54 }
0x121b   : > { %v5336_v52 = vcvt.s32.f32 %v5334_v37 }
0x121c   : > { %v11049_v7 = vpop.xlane.xlu1 %5282 }
0x121d   : > { %v11051_v35 = vpop.xlane.xlu0 %5268  ;;  %vm5284_vm14 = vcmp.eq.f32.partialorder %v10897_v27, %v11049_v7  ;;  %v5294_v27 = vcvt.s32.f32 %v5292_v62 }
0x121e   : > { %v5285_v1 = vsel %vm5284_vm14, %v5280_v44, -inf  ;;  %vm5270_vm15 = vcmp.eq.f32.partialorder %v10903_v17, %v11051_v35 }
0x121f   : > { %5286 = vmax.xlane.f32.xlu1 %v5285_v1  ;;  %v5271_v43 = vsel %vm5270_vm15, %v5266_v38, -inf  ;;  %v5348_v38 = vand.u32 65535, %v10965_v30 }
0x1220   : > { %5272 = vmax.xlane.f32.xlu0 %v5271_v43 }
0x1225   : > { %v11059_v47 = vpop.xlane.xlu1 %5310 }
0x1226   : > { %v11061_v41 = vpop.xlane.xlu0 %5296  ;;  %vm5312_vm13 = vcmp.eq.f32.partialorder %v10922_v12, %v11059_v47  ;;  %v5320_v12 = vand.u32 65535, %v10951_v34 }
0x1227   : > { %v5313_v25 = vsel %vm5312_vm13, %v5308_v29, -inf  ;;  %vm5298_vm1 = vcmp.eq.f32.partialorder %v10928_v59, %v11061_v41  ;;  %v5350_v29 = vcvt.s32.f32 %v5348_v38  ;;  %v11962_v38 = vld [vmem:[#allocation2_spill] sm:$0xff] }
0x1228   : > { %5314 = vmax.xlane.f32.xlu1 %v5313_v25  ;;  %v5299_v17 = vsel %vm5298_vm1, %v5294_v27, -inf  ;;  %v5322_v59 = vcvt.s32.f32 %v5320_v12  ;;  %v5376_v27 = vand.u32 65535, %v10990_v11  ;;  %v1535_v50 = vsel %vm1519_vm8, %v11962_v38, 0.0  ;;  %v11988_v11 = vld [vmem:[#allocation33_spill] sm:$0xff] }
0x1229   : > { %5300 = vmax.xlane.f32.xlu0 %v5299_v17  ;;  %v1534_v53 = vsel %vm1518_vm9, %v11962_v38, 0.0  ;;  %v1536_v36 = vsel %vm1520_vm11, %v11962_v38, 0.0 }
0x1231   : > { %v11068_v61 = vpop.xlane.xlu1 %5338 }
0x1232   : > { %vm5340_vm14 = vcmp.eq.f32.partialorder %v10941_v19, %v11068_v61  ;;  %v5390_v19 = vand.u32 65535, %v10982_v48  ;;  %v11994_v48 = vld [vmem:[#allocation35_spill] sm:$0xff] }
0x1233   : > { %v5341_v54 = vsel %vm5340_vm14, %v5336_v52, -inf }
0x1234   : > { %5342 = vmax.xlane.f32.xlu1 %v5341_v54  ;;  %v5392_v37 = vcvt.s32.f32 %v5390_v19  ;;  %v5378_v54 = vcvt.s32.f32 %v5376_v27  ;;  %v1529_v27 = vsel %vm1513_vm3, %v11962_v38, 0.0 }
0x1240   : > { %v11074_v44 = vpop.xlane.xlu0 %5324 }
0x1241   : > { %vm5326_vm15 = vcmp.eq.f32.partialorder %v10967_v5, %v11074_v44 }
0x1242   : > { %v5327_v1 = vsel %vm5326_vm15, %v5322_v59, -inf }
0x1243   : > { %5328 = vmax.xlane.f32.xlu0 %v5327_v1  ;;  %v11079_v43 = vpop.xlane.xlu1 %5366 }
0x1244   : > { %v11082_v62 = vpop.xlane.xlu0 %5352  ;;  %vm5368_vm13 = vcmp.eq.f32.partialorder %v10984_v9, %v11079_v43  ;;  %v5404_v9 = vand.u32 65535, %v11008_v45  ;;  %v1532_v45 = vsel %vm1516_vm7, %v11962_v38, 0.0 }
0x1245   : > { %v5369_v25 = vsel %vm5368_vm13, %v5364_v31, -inf  ;;  %vm5354_vm1 = vcmp.eq.f32.partialorder %v10987_v15, %v11082_v62  ;;  %v1527_v31 = vsel %vm1511_vm2, %v11962_v38, 0.0 }
0x1246   : > { %5370 = vmax.xlane.f32.xlu1 %v5369_v25  ;;  %v5355_v5 = vsel %vm5354_vm1, %v5350_v29, -inf  ;;  %v5406_v59 = vcvt.s32.f32 %v5404_v9  ;;  %v1531_v9 = vsel %vm1515_vm4, %v11962_v38, 0.0 }
0x1247   : > { %5356 = vmax.xlane.f32.xlu0 %v5355_v5  ;;  %v11089_v17 = vpop.xlane.xlu1 %5394 }
0x1248   : > { %vm5396_vm14 = vcmp.eq.f32.partialorder %v11001_v24, %v11089_v17  ;;  %v11093_v52 = vpop.xlane.xlu0 %5380 }
0x1249   : > { %v5397_v12 = vsel %vm5396_vm14, %v5392_v37, -inf  ;;  %vm5382_vm15 = vcmp.eq.f32.partialorder %v11010_v51, %v11093_v52  ;;  %v1528_v37 = vsel %vm1512_vm0, %v11962_v38, 0.0 }
0x124a   : > { %5398 = vmax.xlane.f32.xlu1 %v5397_v12  ;;  %v5383_v15 = vsel %vm5382_vm15, %v5378_v54, -inf }
0x124b   : > { %5384 = vmax.xlane.f32.xlu0 %v5383_v15 }
0x124c   : > { %v11098_v6 = vpop.xlane.xlu0 %5408 }
0x124d   : > { %vm5410_vm13 = vcmp.eq.f32.partialorder %v11019_v14, %v11098_v6 }
0x124e   : > { %1543 = vadd.xlane.f32.xlu1 %v1527_v31  ;;  %v5411_v19 = vsel %vm5410_vm13, %v5406_v59, -inf  ;;  %v1530_v59 = vsel %vm1514_vm5, %v11962_v38, 0.0  ;;  %v1537_v31 = vsel %vm1521_vm10, %v11962_v38, 0.0 }
0x124f   : > { %5412 = vmax.xlane.f32.xlu0 %v5411_v19  ;;  %v11991_v19 = vld [vmem:[#allocation34_spill] sm:$0xff] }
0x1252   : > { %1547 = vadd.xlane.f32.xlu1 %v1529_v27  ;;  %v1533_v27 = vsel %vm1517_vm6, %v11962_v38, 0.0 }
0x1253   : > { %1545 = vadd.xlane.f32.xlu0 %v1528_v37 }
0x1256   : > { %1551 = vadd.xlane.f32.xlu1 %v1531_v9  ;;  %v1539_v9 = vsel %vm1523_vm12, %v11962_v38, 0.0 }
0x1257   : > { %1549 = vadd.xlane.f32.xlu0 %v1530_v59 }
0x125a   : > { %1555 = vadd.xlane.f32.xlu1 %v1533_v27 }
0x125b   : > { %1553 = vadd.xlane.f32.xlu0 %v1532_v45 }
0x125e   : > { %1559 = vadd.xlane.f32.xlu1 %v1535_v50 }
0x125f   : > { %1557 = vadd.xlane.f32.xlu0 %v1534_v53  ;;  %v11987_v53 = vld [vmem:[#allocation17_spill] sm:$0xff] }
0x1260   : > { %vm11989_vm1 = vcmp.eq.s32.totalorder %v11987_v53, %v11988_v11  ;;  %v11998_v11 = vld [vmem:[#allocation36_spill] sm:$0xff] }
0x1261   : > { %v1538_v59 = vsel %vm11989_vm1, %v11962_v38, 0.0 }
0x1262   : > { %1563 = vadd.xlane.f32.xlu1 %v1537_v31  ;;  %v11990_v31 = vld [vmem:[#allocation18_spill] sm:$0xff] }
0x1263   : > { %1561 = vadd.xlane.f32.xlu0 %v1536_v36  ;;  %vm11992_vm14 = vcmp.eq.s32.totalorder %v11990_v31, %v11991_v19  ;;  %v11993_v36 = vld [vmem:[#allocation19_spill] sm:$0xff] }
0x1264   : > { %v1541_v27 = vsel %vm11992_vm14, %v11962_v38, 0.0  ;;  %vm11995_vm15 = vcmp.eq.s32.totalorder %v11993_v36, %v11994_v48  ;;  %vm5956_vm14 = vcmask 113664  }
0x1265   : > { %v1540_v45 = vsel %vm11995_vm15, %v11962_v38, 0.0 }
0x1266   : > { %1567 = vadd.xlane.f32.xlu1 %v1539_v9  ;;  %v1575_v9 = vsel %vm1511_vm2, %v11996_v40, 0.0 }
0x1267   : > { %1565 = vadd.xlane.f32.xlu0 %v1538_v59  ;;  %v11997_v59 = vld [vmem:[#allocation20_spill] sm:$0xff] }
0x1268   : > { %vm11999_vm13 = vcmp.eq.s32.totalorder %v11997_v59, %v11998_v11 }
0x1269   : > { %v1542_v53 = vsel %vm11999_vm13, %v11962_v38, 0.0  ;;  %v1578_v38 = vsel %vm1514_vm5, %v11996_v40, 0.0 }
0x126a   : > { %1571 = vadd.xlane.f32.xlu1 %v1541_v27  ;;  %v1577_v27 = vsel %vm1513_vm3, %v11996_v40, 0.0 }
0x126b   : > { %1569 = vadd.xlane.f32.xlu0 %v1540_v45  ;;  %v1576_v45 = vsel %vm1512_vm0, %v11996_v40, 0.0 }
0x126e   : > { %1591 = vadd.xlane.f32.xlu1 %v1575_v9  ;;  %v1579_v9 = vsel %vm1515_vm4, %v11996_v40, 0.0 }
0x126f   : > { %1573 = vadd.xlane.f32.xlu0 %v1542_v53  ;;  %v1580_v53 = vsel %vm1516_vm7, %v11996_v40, 0.0 }
0x1272   : > { %1595 = vadd.xlane.f32.xlu1 %v1577_v27  ;;  %v5219_v27 = vcvt.f32.s32 %v11023_v57 }
0x1273   : > { %1593 = vadd.xlane.f32.xlu0 %v1576_v45 }
0x1274   : > { %v5220_v5 = vshll.u32 %v5219_v27, 16 }
0x1276   : > { %1599 = vadd.xlane.f32.xlu1 %v1579_v9 }
0x1277   : > { %1597 = vadd.xlane.f32.xlu0 %v1578_v38 }
0x127b   : > { %1601 = vadd.xlane.f32.xlu0 %v1580_v53 }
0x1291   : > { %v5217_v45 = vpop.xlane.xlu0 %5216 }
0x1292   : > { %v5218_v25 = vcvt.f32.s32 %v5217_v45 }
0x1294   : > { %v5221_v54 = vadd.s32 %v5220_v5, %v5218_v25  ;;  %v5206_v5 = vshll.u32 %v5205_v32, 16 }
0x1296   : > { %v5419_v14 = vand.u32 127, %v5221_v54  ;;  %vm5451_vm1 = vcmp.eq.s32.totalorder %v10817_v55, %v5221_v54 }
0x1297   : > { %v11193_v9 = vsel %vm5451_vm1, 2147483648, %v10817_v55  ;;  %v5233_v55 = vcvt.f32.s32 %v11033_v0 }
0x1298   : > { %v5435_v38 = vsub.s32 127, %v5419_v14  ;;  %v5497_v15 = vshra.s32 %v11193_v9, 16 }
0x1299   : > { %v5234_v32 = vshll.u32 %v5233_v55, 16 }
0x129a   : > { %v11199_v53 = vsel %vm5956_vm14, %v10823_v10, %v5435_v38  ;;  %v11201_v57 = vcvt.s32.f32 %v5497_v15 }
0x129b   : > { %12000 = vst [vmem:[#allocation2_spill] sm:$0xff] %v11199_v53 }
0x129c   : > { %5500 = vmax.xlane.f32.xlu0 %v11201_v57  ;;  %v5203_v25 = vpop.xlane.xlu1 %5202 }
0x129d   : > { %v5204_v54 = vcvt.f32.s32 %v5203_v25  ;;  %v5261_v25 = vcvt.f32.s32 %v11039_v60 }
0x129f   : > { %v5207_v27 = vadd.s32 %v5206_v5, %v5204_v54  ;;  %v5247_v54 = vcvt.f32.s32 %v11041_v42 }
0x12a1   : > { %v5418_v45 = vand.u32 127, %v5207_v27  ;;  %vm5450_vm15 = vcmp.eq.s32.totalorder %v10831_v8, %v5207_v27  ;;  %v5262_v27 = vshll.u32 %v5261_v25, 16 }
0x12a2   : > { %v11207_v14 = vsel %vm5450_vm15, 2147483648, %v10831_v8  ;;  %v5231_v38 = vpop.xlane.xlu1 %5230 }
0x12a3   : > { %12001 = vst [vmem:[#allocation6_spill] sm:$0xff] %v11207_v14  ;;  %v5434_v28 = vsub.s32 127, %v5418_v45  ;;  %v5483_v10 = vshra.s32 %v11207_v14, 16  ;;  %v5232_v5 = vcvt.f32.s32 %v5231_v38 }
0x12a5   : > { %v11212_v15 = vsel %vm5956_vm14, %v10836_v4, %v5434_v28  ;;  %v11214_v53 = vcvt.s32.f32 %v5483_v10  ;;  %v5235_v8 = vadd.s32 %v5234_v32, %v5232_v5  ;;  %v5248_v28 = vshll.u32 %v5247_v54, 16 }
0x12a6   : > { %12002 = vst [vmem:[#allocation22_spill] sm:$0xff] %v11212_v15  ;;  %v5259_v0 = vpop.xlane.xlu1 %5258  ;;  %v5289_v10 = vcvt.f32.s32 %v11049_v7  ;;  %v5275_v32 = vcvt.f32.s32 %v11051_v35 }
0x12a7   : > { %5486 = vmax.xlane.f32.xlu1 %v11214_v53  ;;  %v5420_v45 = vand.u32 127, %v5235_v8  ;;  %vm5452_vm13 = vcmp.eq.s32.totalorder %v10846_v39, %v5235_v8  ;;  %v5260_v14 = vcvt.f32.s32 %v5259_v0  ;;  %v5245_v4 = vpop.xlane.xlu0 %5244 }
0x12a8   : > { %v5246_v15 = vcvt.f32.s32 %v5245_v4  ;;  %v11222_v55 = vsel %vm5452_vm13, 2147483648, %v10846_v39  ;;  %v5290_v7 = vshll.u32 %v5289_v10, 16  ;;  %v5276_v4 = vshll.u32 %v5275_v32, 16 }
0x12a9   : > { %v5436_v60 = vsub.s32 127, %v5420_v45  ;;  %v5263_v38 = vadd.s32 %v5262_v27, %v5260_v14  ;;  %v5511_v42 = vshra.s32 %v11222_v55, 16  ;;  %v5317_v32 = vcvt.f32.s32 %v11059_v47 }
0x12aa   : > { %v5249_v5 = vadd.s32 %v5248_v28, %v5246_v15 }
0x12ab   : > { %v11228_v25 = vsel %vm5956_vm14, %v10852_v21, %v5436_v60  ;;  %v5422_v8 = vand.u32 127, %v5263_v38  ;;  %vm5454_vm1 = vcmp.eq.s32.totalorder %v10858_v2, %v5263_v38  ;;  %v11231_v54 = vcvt.s32.f32 %v5511_v42 }
0x12ac   : > { %12003 = vst [vmem:[#allocation7_spill] sm:$0xff] %v11228_v25  ;;  %v5421_v0 = vand.u32 127, %v5249_v5  ;;  %vm5453_vm15 = vcmp.eq.s32.totalorder %v10862_v23, %v5249_v5  ;;  %v5287_v39 = vpop.xlane.xlu1 %5286  ;;  %v11235_v14 = vsel %vm5454_vm1, 2147483648, %v10858_v2 }
0x12ad   : > { %v5438_v27 = vsub.s32 127, %v5422_v8  ;;  %v5288_v35 = vcvt.f32.s32 %v5287_v39  ;;  %v5273_v15 = vpop.xlane.xlu0 %5272  ;;  %5514 = vmax.xlane.f32.xlu1 %v11231_v54  ;;  %v5539_v21 = vshra.s32 %v11235_v14, 16  ;;  %v11240_v45 = vsel %vm5453_vm15, 2147483648, %v10862_v23 }
0x12ae   : > { %v5437_v28 = vsub.s32 127, %v5421_v0  ;;  %v5274_v10 = vcvt.f32.s32 %v5273_v15  ;;  %v5525_v60 = vshra.s32 %v11240_v45, 16 }
0x12af   : > { %v11245_v38 = vsel %vm5956_vm14, %v10869_v20, %v5438_v27  ;;  %v5291_v2 = vadd.s32 %v5290_v7, %v5288_v35  ;;  %v11247_v42 = vcvt.s32.f32 %v5539_v21 }
0x12b0   : > { %12004 = vst [vmem:[#allocation23_spill] sm:$0xff] %v11245_v38  ;;  %v11251_v5 = vsel %vm5956_vm14, %v10875_v49, %v5437_v28  ;;  %v5277_v8 = vadd.s32 %v5276_v4, %v5274_v10  ;;  %v11253_v39 = vcvt.s32.f32 %v5525_v60  ;;  %v5303_v49 = vcvt.f32.s32 %v11061_v41 }
0x12b1   : > { %12005 = vst [vmem:[#allocation9_spill] sm:$0xff] %v11251_v5  ;;  %v5424_v23 = vand.u32 127, %v5291_v2  ;;  %vm5456_vm13 = vcmp.eq.s32.totalorder %v10883_v46, %v5291_v2  ;;  %5542 = vmax.xlane.f32.xlu1 %v11247_v42  ;;  %v1583_v5 = vsel %vm1519_vm8, %v11996_v40, 0.0 }
0x12b2   : > { %v5423_v0 = vand.u32 127, %v5277_v8  ;;  %vm5455_vm1 = vcmp.eq.s32.totalorder %v10889_v26, %v5277_v8  ;;  %5528 = vmax.xlane.f32.xlu0 %v11253_v39  ;;  %v11261_v20 = vsel %vm5456_vm13, 2147483648, %v10883_v46  ;;  %v5318_v46 = vshll.u32 %v5317_v32, 16 }
0x12b3   : > { %v5440_v7 = vsub.s32 127, %v5424_v23  ;;  %v5567_v27 = vshra.s32 %v11261_v20, 16  ;;  %v11266_v35 = vsel %vm5455_vm1, 2147483648, %v10889_v26  ;;  %v5304_v26 = vshll.u32 %v5303_v49, 16 }
0x12b4   : > { %v5439_v15 = vsub.s32 127, %v5423_v0  ;;  %v5553_v21 = vshra.s32 %v11266_v35, 16 }
0x12b5   : > { %v11271_v47 = vsel %vm5956_vm14, %v10895_v33, %v5440_v7  ;;  %v5315_v4 = vpop.xlane.xlu1 %5314  ;;  %v11273_v28 = vcvt.s32.f32 %v5567_v27 }
0x12b6   : > { %12006 = vst [vmem:[#allocation11_spill] sm:$0xff] %v11271_v47  ;;  %v11277_v41 = vsel %vm5956_vm14, %v10901_v58, %v5439_v15  ;;  %v5316_v10 = vcvt.f32.s32 %v5315_v4  ;;  %v5301_v60 = vpop.xlane.xlu0 %5300  ;;  %v11279_v2 = vcvt.s32.f32 %v5553_v21  ;;  %v5345_v4 = vcvt.f32.s32 %v11068_v61 }
0x12b7   : > { %12007 = vst [vmem:[#allocation16_spill] sm:$0xff] %v11277_v41  ;;  %v5302_v8 = vcvt.f32.s32 %v5301_v60  ;;  %5570 = vmax.xlane.f32.xlu1 %v11273_v28  ;;  %v5496_v41 = vand.u32 65535, %v11193_v9  ;;  %v5510_v9 = vand.u32 65535, %v11222_v55 }
0x12b8   : > { %v5319_v23 = vadd.s32 %v5318_v46, %v5316_v10  ;;  %5556 = vmax.xlane.f32.xlu0 %v11279_v2 }
0x12b9   : > { %v5305_v33 = vadd.s32 %v5304_v26, %v5302_v8  ;;  %v5346_v26 = vshll.u32 %v5345_v4, 16  ;;  %v5512_v29 = vcvt.s32.f32 %v5510_v9 }
0x12ba   : > { %v5426_v0 = vand.u32 127, %v5319_v23  ;;  %vm5458_vm15 = vcmp.eq.s32.totalorder %v10909_v56, %v5319_v23 }
0x12bb   : > { %v5425_v32 = vand.u32 127, %v5305_v33  ;;  %vm5457_vm13 = vcmp.eq.s32.totalorder %v10913_v13, %v5305_v33  ;;  %v11286_v58 = vsel %vm5458_vm15, 2147483648, %v10909_v56 }
0x12bc   : > { %v5442_v7 = vsub.s32 127, %v5426_v0  ;;  %v5595_v27 = vshra.s32 %v11286_v58, 16  ;;  %v11290_v49 = vsel %vm5457_vm13, 2147483648, %v10913_v13  ;;  %v12010_v0 = vld [vmem:[#allocation37_spill] sm:$0xff] }
0x12bd   : > { %v5441_v15 = vsub.s32 127, %v5425_v32  ;;  %v5581_v21 = vshra.s32 %v11290_v49, 16 }
0x12be   : > { %v11296_v46 = vsel %vm5956_vm14, %v10920_v3, %v5442_v7  ;;  %v11298_v10 = vcvt.s32.f32 %v5595_v27  ;;  %v5331_v27 = vcvt.f32.s32 %v11074_v44 }
0x12bf   : > { %12008 = vst [vmem:[#allocation18_spill] sm:$0xff] %v11296_v46  ;;  %v11302_v56 = vsel %vm5956_vm14, %v10926_v22, %v5441_v15  ;;  %v11304_v60 = vcvt.s32.f32 %v5581_v21  ;;  %v5373_v15 = vcvt.f32.s32 %v11079_v43 }
0x12c0   : > { %12009 = vst [vmem:[#allocation34_spill] sm:$0xff] %v11302_v56  ;;  %5598 = vmax.xlane.f32.xlu1 %v11298_v10  ;;  %v5332_v4 = vshll.u32 %v5331_v27, 16 }
0x12c1   : > { %v5343_v13 = vpop.xlane.xlu1 %5342  ;;  %5584 = vmax.xlane.f32.xlu0 %v11304_v60 }
0x12c2   : > { %v5344_v8 = vcvt.f32.s32 %v5343_v13 }
0x12c4   : > { %v5347_v61 = vadd.s32 %v5346_v26, %v5344_v8  ;;  %v5401_v26 = vcvt.f32.s32 %v11089_v17  ;;  %v5387_v8 = vcvt.f32.s32 %v11093_v52 }
0x12c6   : > { %v5428_v23 = vand.u32 127, %v5347_v61  ;;  %vm5460_vm1 = vcmp.eq.s32.totalorder %v10934_v63, %v5347_v61  ;;  %v5402_v27 = vshll.u32 %v5401_v26, 16  ;;  %v5388_v17 = vshll.u32 %v5387_v8, 16 }
0x12c7   : > { %v11310_v3 = vsel %vm5460_vm1, 2147483648, %v10934_v63  ;;  %v5359_v63 = vcvt.f32.s32 %v11082_v62 }
0x12c8   : > { %v5444_v33 = vsub.s32 127, %v5428_v23  ;;  %v5623_v22 = vshra.s32 %v11310_v3, 16 }
0x12c9   : > { %v5360_v56 = vshll.u32 %v5359_v63, 16 }
0x12ca   : > { %v11315_v32 = vsel %vm5956_vm14, %v12010_v0, %v5444_v33  ;;  %v11317_v7 = vcvt.s32.f32 %v5623_v22  ;;  %v5374_v33 = vshll.u32 %v5373_v15, 16  ;;  %v5415_v22 = vcvt.f32.s32 %v11098_v6 }
0x12cb   : > { %12011 = vst [vmem:[#allocation19_spill] sm:$0xff] %v11315_v32 }
0x12cc   : > { %5626 = vmax.xlane.f32.xlu1 %v11317_v7 }
0x12d0   : > { %v5329_v21 = vpop.xlane.xlu0 %5328 }
0x12d1   : > { %v5330_v13 = vcvt.f32.s32 %v5329_v21 }
0x12d3   : > { %v5333_v61 = vadd.s32 %v5332_v4, %v5330_v13  ;;  %v5371_v23 = vpop.xlane.xlu1 %5370  ;;  %v5416_v13 = vshll.u32 %v5415_v22, 16 }
0x12d4   : > { %v5372_v0 = vcvt.f32.s32 %v5371_v23  ;;  %v5357_v32 = vpop.xlane.xlu0 %5356 }
0x12d5   : > { %v5427_v44 = vand.u32 127, %v5333_v61  ;;  %vm5459_vm15 = vcmp.eq.s32.totalorder %v10951_v34, %v5333_v61  ;;  %v5358_v43 = vcvt.f32.s32 %v5357_v32 }
0x12d6   : > { %v5375_v46 = vadd.s32 %v5374_v33, %v5372_v0  ;;  %v11328_v62 = vsel %vm5459_vm15, 2147483648, %v10951_v34 }
0x12d7   : > { %v5443_v21 = vsub.s32 127, %v5427_v44  ;;  %v5361_v52 = vadd.s32 %v5360_v56, %v5358_v43  ;;  %v5399_v4 = vpop.xlane.xlu1 %5398  ;;  %v5609_v15 = vshra.s32 %v11328_v62, 16  ;;  %v12013_v43 = vld [vmem:[#allocation38_spill] sm:$0xff] }
0x12d8   : > { %v5430_v6 = vand.u32 127, %v5375_v46  ;;  %vm5462_vm13 = vcmp.eq.s32.totalorder %v10956_v18, %v5375_v46  ;;  %v5400_v63 = vcvt.f32.s32 %v5399_v4  ;;  %v5385_v23 = vpop.xlane.xlu0 %5384 }
0x12d9   : > { %v11334_v32 = vsel %vm5956_vm14, %v10961_v16, %v5443_v21  ;;  %v5429_v26 = vand.u32 127, %v5361_v52  ;;  %vm5461_vm1 = vcmp.eq.s32.totalorder %v10965_v30, %v5361_v52  ;;  %v5386_v34 = vcvt.f32.s32 %v5385_v23 }
0x12da   : > { %12012 = vst [vmem:[#allocation35_spill] sm:$0xff] %v11334_v32  ;;  %v5446_v8 = vsub.s32 127, %v5430_v6  ;;  %v5403_v61 = vadd.s32 %v5402_v27, %v5400_v63  ;;  %v11337_v56 = vcvt.s32.f32 %v5609_v15  ;;  %v11340_v33 = vsel %vm5462_vm13, 2147483648, %v10956_v18  ;;  %v12015_v27 = vld [vmem:[#allocation40_spill] sm:$0xff]  ;;  %v12018_v63 = vld [vmem:[#allocation41_spill] sm:$0xff] }
0x12db   : > { %v5445_v22 = vsub.s32 127, %v5429_v26  ;;  %v5389_v0 = vadd.s32 %v5388_v17, %v5386_v34  ;;  %v11342_v46 = vpop.xlane.xlu1 %1543  ;;  %v5651_v44 = vshra.s32 %v11340_v33, 16  ;;  %v11346_v16 = vsel %vm5461_vm1, 2147483648, %v10965_v30  ;;  %v12016_v17 = vld [vmem:[#allocation39_spill] sm:$0xff] }
0x12dc   : > { %v11350_v21 = vsel %vm5956_vm14, %v12013_v43, %v5446_v8  ;;  %v5432_v52 = vand.u32 127, %v5403_v61  ;;  %vm5464_vm15 = vcmp.eq.s32.totalorder %v12015_v27, %v5403_v61  ;;  %5612 = vmax.xlane.f32.xlu0 %v11337_v56  ;;  %v5413_v18 = vpop.xlane.xlu0 %5412  ;;  %v5637_v4 = vshra.s32 %v11346_v16, 16 }
0x12dd   : > { %12014 = vst [vmem:[#allocation3_spill] sm:$0xff] %v11350_v21  ;;  %v11357_v15 = vsel %vm5956_vm14, %v12016_v17, %v5445_v22  ;;  %v5431_v6 = vand.u32 127, %v5389_v0  ;;  %vm5463_vm13 = vcmp.eq.s32.totalorder %v12018_v63, %v5389_v0  ;;  %v5414_v30 = vcvt.f32.s32 %v5413_v18  ;;  %v12023_v17 = vld [vmem:[#allocation42_spill] sm:$0xff] }
0x12de   : > { %12017 = vst [vmem:[#allocation20_spill] sm:$0xff] %v11357_v15  ;;  %v5448_v23 = vsub.s32 127, %v5432_v52  ;;  %v11360_v26 = vcvt.s32.f32 %v5651_v44  ;;  %v11362_v34 = vcvt.s32.f32 %v5637_v4  ;;  %v11365_v8 = vsel %vm5464_vm15, 2147483648, %v12015_v27  ;;  %v12025_v27 = vld [vmem:[#allocation43_spill] sm:$0xff]  ;;  %v12027_v4 = vld [vmem:[#allocation44_spill] sm:$0xff] }
0x12df   : > { %12021 = vst [vmem:[#allocation38_spill] sm:$0xff] %v11365_v8  ;;  %v5447_v61 = vsub.s32 127, %v5431_v6  ;;  %v5417_v43 = vadd.s32 %v5416_v13, %v5414_v30  ;;  %v11367_v21 = vpop.xlane.xlu1 %1547  ;;  %v5679_v32 = vshra.s32 %v11365_v8, 16  ;;  %v11371_v22 = vsel %vm5463_vm13, 2147483648, %v12018_v63 }
0x12e0   : > { %12019 = vst [vmem:[#allocation36_spill] sm:$0xff] %v11360_v26  ;;  %12020 = vst [vmem:[#allocation37_spill] sm:$0xff] %v11362_v34  ;;  %v11375_v0 = vsel %vm5956_vm14, %v12023_v17, %v5448_v23  ;;  %5654 = vmax.xlane.f32.xlu1 %v11360_v26  ;;  %5640 = vmax.xlane.f32.xlu0 %v11362_v34  ;;  %v1546_v44 = vpop.xlane.xlu0 %1545  ;;  %v5665_v52 = vshra.s32 %v11371_v22, 16  ;;  %vm12055_vm15 = vcmp.eq.s32.totalorder %v11990_v31, %v11991_v19 }
0x12e1   : > { %12022 = vst [vmem:[#allocation40_spill] sm:$0xff] %v11371_v22  ;;  %12024 = vst [vmem:[#allocation39_spill] sm:$0xff] %v11375_v0  ;;  %v11382_v13 = vsel %vm5956_vm14, %v12025_v27, %v5447_v61  ;;  %v5433_v18 = vand.u32 127, %v5417_v43  ;;  %vm5465_vm1 = vcmp.eq.s32.totalorder %v12027_v4, %v5417_v43  ;;  %v11385_v6 = vcvt.s32.f32 %v5679_v32  ;;  %v12031_v27 = vld [vmem:[#allocation45_spill] sm:$0xff] }
0x12e2   : > { %12026 = vst [vmem:[#allocation41_spill] sm:$0xff] %v11382_v13  ;;  %v11387_v63 = vcvt.s32.f32 %v5665_v52  ;;  %v11390_v30 = vsel %vm5465_vm1, 2147483648, %v12027_v4  ;;  %v1581_v4 = vsel %vm1517_vm6, %v11996_v40, 0.0  ;;  %vm12056_vm13 = vcmp.eq.s32.totalorder %v11993_v36, %v11994_v48 }
0x12e3   : > { %12028 = vst [vmem:[#allocation42_spill] sm:$0xff] %v11385_v6  ;;  %12030 = vst [vmem:[#allocation44_spill] sm:$0xff] %v11390_v30  ;;  %v5449_v23 = vsub.s32 127, %v5433_v18  ;;  %v1552_v17 = vpop.xlane.xlu1 %1551  ;;  %v5693_v0 = vshra.s32 %v11390_v30, 16  ;;  %vm12060_vm1 = vcmp.eq.s32.totalorder %v11997_v59, %v11998_v11 }
0x12e4   : > { %12029 = vst [vmem:[#allocation43_spill] sm:$0xff] %v11387_v63  ;;  %5682 = vmax.xlane.f32.xlu1 %v11385_v6  ;;  %5668 = vmax.xlane.f32.xlu0 %v11387_v63  ;;  %v1550_v61 = vpop.xlane.xlu0 %1549  ;;  %v1584_v6 = vsel %vm1520_vm11, %v11996_v40, 0.0  ;;  %v12074_v63 = vld [vmem:[#allocation6_spill] sm:$0xff] }
0x12e5   : > { %v11397_v13 = vsel %vm5956_vm14, %v12031_v27, %v5449_v23  ;;  %v11399_v32 = vcvt.s32.f32 %v5693_v0  ;;  %v1582_v27 = vsel %vm1518_vm9, %v11996_v40, 0.0  ;;  %v5498_v23 = vcvt.s32.f32 %v5496_v41 }
0x12e6   : > { %12032 = vst [vmem:[#allocation45_spill] sm:$0xff] %v11397_v13  ;;  %v12075_v9 = vld [vmem:[#allocation38_spill] sm:$0xff] }
0x12e7   : > { %12033 = vst [vmem:[#allocation46_spill] sm:$0xff] %v11399_v32  ;;  %v11405_v18 = vpop.xlane.xlu1 %1555 }
0x12e8   : > { %12036 = vst [vmem:[#allocation10_spill] sm:$0xff] %v11405_v18  ;;  %1603 = vadd.xlane.f32.xlu1 %v1581_v4  ;;  %5696 = vmax.xlane.f32.xlu0 %v11399_v32  ;;  %v1554_v15 = vpop.xlane.xlu0 %1553  ;;  %v1585_v18 = vsel %vm1521_vm10, %v11996_v40, 0.0  ;;  %v5482_v32 = vand.u32 65535, %v12074_v63  ;;  %v5636_v63 = vand.u32 65535, %v11346_v16 }
0x12ea   : > { %v5484_v4 = vcvt.s32.f32 %v5482_v32 }
0x12eb   : > { %v11416_v13 = vpop.xlane.xlu1 %1559 }
0x12ec   : > { %12041 = vst [vmem:[#allocation26_spill] sm:$0xff] %v11416_v13  ;;  %1607 = vadd.xlane.f32.xlu1 %v1583_v5  ;;  %1605 = vadd.xlane.f32.xlu0 %v1582_v27  ;;  %v11418_v38 = vpop.xlane.xlu0 %1557  ;;  %v1587_v27 = vsel %vm1523_vm12, %v11996_v40, 0.0  ;;  %v12051_v13 = vld [vmem:[#allocation33_spill] sm:$0xff] }
0x12ed   : > { %12042 = vst [vmem:[#allocation12_spill] sm:$0xff] %v11418_v38  ;;  %v12050_v38 = vld [vmem:[#allocation17_spill] sm:$0xff] }
0x12ee   : > { %vm12052_vm14 = vcmp.eq.s32.totalorder %v12050_v38, %v12051_v13 }
0x12ef   : > { %v11428_v30 = vpop.xlane.xlu1 %1563  ;;  %v1586_v26 = vsel %vm12052_vm14, %v11996_v40, 0.0  ;;  %vm12061_vm14 = vcmask 7168  }
0x12f0   : > { %12047 = vst [vmem:[#allocation28_spill] sm:$0xff] %v11428_v30  ;;  %1611 = vadd.xlane.f32.xlu1 %v1585_v18  ;;  %1609 = vadd.xlane.f32.xlu0 %v1584_v6  ;;  %v11430_v34 = vpop.xlane.xlu0 %1561  ;;  %v1589_v6 = vsel %vm12055_vm15, %v11996_v40, 0.0  ;;  %v1588_v18 = vsel %vm12056_vm13, %v11996_v40, 0.0 }
0x12f1   : > { %12048 = vst [vmem:[#allocation13_spill] sm:$0xff] %v11430_v34 }
0x12f3   : > { %v11440_v22 = vpop.xlane.xlu1 %1567 }
0x12f4   : > { %12053 = vst [vmem:[#allocation29_spill] sm:$0xff] %v11440_v22  ;;  %1615 = vadd.xlane.f32.xlu1 %v1587_v27  ;;  %1613 = vadd.xlane.f32.xlu0 %v1586_v26  ;;  %v11442_v8 = vpop.xlane.xlu0 %1565  ;;  %v12059_v27 = vld [vmem:[#allocation4_spill] sm:$0xff]  ;;  %v1590_v22 = vsel %vm12060_vm1, %v11996_v40, 0.0 }
0x12f5   : > { %12054 = vst [vmem:[#allocation14_spill] sm:$0xff] %v11442_v8  ;;  %v1623_v26 = vsel %vm1511_vm2, %v12059_v27, 0.0  ;;  %v1625_v24 = vsel %vm1513_vm3, %v12059_v27, 0.0  ;;  %vm12064_vm2 = vmmov %vm12061_vm14  ;;  %v1627_v51 = vsel %vm1515_vm4, %v12059_v27, 0.0  ;;  %v1628_v12 = vsel %vm1516_vm7, %v12059_v27, 0.0 }
0x12f6   : > { %vm12065_vm15 = vmmov %vm12064_vm2  ;;  %v1630_v43 = vsel %vm1518_vm9, %v12059_v27, 0.0  ;;  %v1633_v37 = vsel %vm1521_vm10, %v12059_v27, 0.0 }
0x12f7   : > { %v11452_v34 = vpop.xlane.xlu1 %1571 }
0x12f8   : > { %12057 = vst [vmem:[#allocation30_spill] sm:$0xff] %v11452_v34  ;;  %1619 = vadd.xlane.f32.xlu1 %v1589_v6  ;;  %1617 = vadd.xlane.f32.xlu0 %v1588_v18  ;;  %v11454_v30 = vpop.xlane.xlu0 %1569  ;;  %v1626_v18 = vsel %vm1514_vm5, %v12059_v27, 0.0  ;;  %vm12073_vm5 = vcmp.eq.s32.totalorder %v12050_v38, %v12051_v13 }
0x12f9   : > { %12058 = vst [vmem:[#allocation15_spill] sm:$0xff] %v11454_v30  ;;  %v1624_v30 = vsel %vm1512_vm0, %v12059_v27, 0.0  ;;  %vm12069_vm0 = vmmov %vm12064_vm2  ;;  %v1634_v47 = vsel %vm12073_vm5, %v12059_v27, 0.0 }
0x12fa   : > { %vm12070_vm3 = vmmov %vm12069_vm0 }
0x12fb   : > { %v1592_v8 = vpop.xlane.xlu1 %1591  ;;  %vm12072_vm4 = vmmov %vm12069_vm0 }
0x12fc   : > { %1639 = vadd.xlane.f32.xlu1 %v1623_v26  ;;  %1621 = vadd.xlane.f32.xlu0 %v1590_v22  ;;  %v11466_v34 = vsel %vm12061_vm14, %v11342_v46, %v1592_v8  ;;  %v11468_v6 = vpop.xlane.xlu0 %1573 }
0x12ff   : > { %v1596_v40 = vpop.xlane.xlu1 %1595 }
0x1300   : > { %1643 = vadd.xlane.f32.xlu1 %v1625_v24  ;;  %1641 = vadd.xlane.f32.xlu0 %v1624_v30  ;;  %v11480_v22 = vsel %vm12064_vm2, %v11367_v21, %v1596_v40  ;;  %v1594_v46 = vpop.xlane.xlu0 %1593  ;;  %v1629_v40 = vsel %vm1517_vm6, %v12059_v27, 0.0 }
0x1301   : > { %v11483_v8 = vsel %vm12065_vm15, %v1546_v44, %v1594_v46 }
0x1303   : > { %v1600_v24 = vpop.xlane.xlu1 %1599 }
0x1304   : > { %1647 = vadd.xlane.f32.xlu1 %v1627_v51  ;;  %1645 = vadd.xlane.f32.xlu0 %v1626_v18  ;;  %v11494_v21 = vsel %vm12069_vm0, %v1552_v17, %v1600_v24  ;;  %v1598_v30 = vpop.xlane.xlu0 %1597  ;;  %v5538_v51 = vand.u32 65535, %v11235_v14 }
0x1305   : > { %v11497_v44 = vsel %vm12070_vm3, %v1550_v61, %v1598_v30  ;;  %v1631_v61 = vsel %vm1519_vm8, %v12059_v27, 0.0  ;;  %v5566_v30 = vand.u32 65535, %v11261_v20 }
0x1306   : > { %v5540_v24 = vcvt.s32.f32 %v5538_v51 }
0x1307   : > { %v5568_v46 = vcvt.s32.f32 %v5566_v30  ;;  %v12079_v30 = vld [vmem:[#allocation44_spill] sm:$0xff] }
0x1308   : > { %1651 = vadd.xlane.f32.xlu1 %v1629_v40  ;;  %1649 = vadd.xlane.f32.xlu0 %v1628_v12  ;;  %v1602_v26 = vpop.xlane.xlu0 %1601 }
0x1309   : > { %v11508_v17 = vsel %vm12072_vm4, %v1554_v15, %v1602_v26  ;;  %v1632_v15 = vsel %vm1520_vm11, %v12059_v27, 0.0  ;;  %v5594_v26 = vand.u32 65535, %v11286_v58  ;;  %v5622_v58 = vand.u32 65535, %v11310_v3 }
0x130c   : > { %1655 = vadd.xlane.f32.xlu1 %v1631_v61  ;;  %1653 = vadd.xlane.f32.xlu0 %v1630_v43  ;;  %v5596_v43 = vcvt.s32.f32 %v5594_v26 }
0x1310   : > { %1659 = vadd.xlane.f32.xlu1 %v1633_v37  ;;  %1657 = vadd.xlane.f32.xlu0 %v1632_v15 }
0x1314   : > { %1661 = vadd.xlane.f32.xlu0 %v1634_v47 }
0x1329   : > { %v11531_v52 = vpop.xlane.xlu0 %5500 }
0x132a   : > { %vm5502_vm6 = vcmp.eq.f32.partialorder %v11201_v57, %v11531_v52  ;;  %v5524_v57 = vand.u32 65535, %v11240_v45  ;;  %v5552_v45 = vand.u32 65535, %v11266_v35  ;;  %v5580_v35 = vand.u32 65535, %v11290_v49 }
0x132b   : > { %v5503_v25 = vsel %vm5502_vm6, %v5498_v23, -inf  ;;  %v5624_v49 = vcvt.s32.f32 %v5622_v58 }
0x132c   : > { %5504 = vmax.xlane.f32.xlu1 %v5503_v25  ;;  %v5526_v55 = vcvt.s32.f32 %v5524_v57  ;;  %v5554_v12 = vcvt.s32.f32 %v5552_v45  ;;  %v5582_v37 = vcvt.s32.f32 %v5580_v35  ;;  %v12077_v57 = vld [vmem:[#allocation36_spill] sm:$0xff]  ;;  %v12080_v45 = vld [vmem:[#allocation42_spill] sm:$0xff] }
0x1334   : > { %v11536_v0 = vpop.xlane.xlu1 %5486 }
0x1335   : > { %vm5488_vm7 = vcmp.eq.f32.partialorder %v11214_v53, %v11536_v0 }
0x1336   : > { %v5489_v38 = vsel %vm5488_vm7, %v5484_v4, -inf  ;;  %vm12083_vm7 = vcmp.eq.s32.totalorder %v11993_v36, %v11994_v48 }
0x1337   : > { %5490 = vmax.xlane.f32.xlu0 %v5489_v38  ;;  %v5638_v38 = vcvt.s32.f32 %v5636_v63 }
0x133a   : > { %v11541_v13 = vpop.xlane.xlu1 %5514 }
0x133b   : > { %vm5516_vm8 = vcmp.eq.f32.partialorder %v11231_v54, %v11541_v13 }
0x133c   : > { %v5517_v1 = vsel %vm5516_vm8, %v5512_v29, -inf  ;;  %v12076_v29 = vld [vmem:[#allocation40_spill] sm:$0xff]  ;;  %vm12084_vm8 = vcmp.eq.s32.totalorder %v11997_v59, %v11998_v11 }
0x133d   : > { %5518 = vmax.xlane.f32.xlu0 %v5517_v1  ;;  %v5664_v51 = vand.u32 65535, %v12076_v29 }
0x133e   : > { %v11547_v18 = vpop.xlane.xlu1 %5542 }
0x133f   : > { %vm5544_vm9 = vcmp.eq.f32.partialorder %v11247_v42, %v11547_v18  ;;  %v11551_v53 = vpop.xlane.xlu0 %5528 }
0x1340   : > { %vm5530_vm10 = vcmp.eq.f32.partialorder %v11253_v39, %v11551_v53  ;;  %v5545_v14 = vsel %vm5544_vm9, %v5540_v24, -inf  ;;  %vm12085_vm9 = vcmp.eq.s32.totalorder %v11990_v31, %v11991_v19 }
0x1341   : > { %5546 = vmax.xlane.f32.xlu0 %v5545_v14  ;;  %v5531_v54 = vsel %vm5530_vm10, %v5526_v55, -inf  ;;  %v5666_v14 = vcvt.s32.f32 %v5664_v51  ;;  %vm12087_vm10 = vcmask 23552  }
0x1342   : > { %5532 = vmax.xlane.f32.xlu1 %v5531_v54  ;;  %v5692_v54 = vand.u32 65535, %v12079_v30 }
0x1344   : > { %v11557_v40 = vpop.xlane.xlu1 %5570  ;;  %v5694_v35 = vcvt.s32.f32 %v5692_v54 }
0x1345   : > { %vm5572_vm11 = vcmp.eq.f32.partialorder %v11273_v28, %v11557_v40  ;;  %v11561_v42 = vpop.xlane.xlu0 %5556 }
0x1346   : > { %vm5558_vm13 = vcmp.eq.f32.partialorder %v11279_v2, %v11561_v42  ;;  %v5573_v39 = vsel %vm5572_vm11, %v5568_v46, -inf  ;;  %v12081_v46 = vld [vmem:[#allocation43_spill] sm:$0xff] }
0x1347   : > { %5574 = vmax.xlane.f32.xlu0 %v5573_v39  ;;  %v5559_v20 = vsel %vm5558_vm13, %v5554_v12, -inf }
0x1348   : > { %5560 = vmax.xlane.f32.xlu1 %v5559_v20 }
0x134d   : > { %v11567_v61 = vpop.xlane.xlu1 %5598 }
0x134e   : > { %vm5600_vm1 = vcmp.eq.f32.partialorder %v11298_v10, %v11567_v61  ;;  %v11571_v28 = vpop.xlane.xlu0 %5584  ;;  %v5608_v10 = vand.u32 65535, %v11328_v62  ;;  %v5678_v62 = vand.u32 65535, %v12075_v9 }
0x134f   : > { %vm5586_vm14 = vcmp.eq.f32.partialorder %v11304_v60, %v11571_v28  ;;  %v5601_v2 = vsel %vm5600_vm1, %v5596_v43, -inf  ;;  %v5650_v60 = vand.u32 65535, %v11340_v33  ;;  %v12078_v33 = vld [vmem:[#allocation37_spill] sm:$0xff]  ;;  %v12082_v43 = vld [vmem:[#allocation46_spill] sm:$0xff]  ;;  %vm12090_vm1 = vmmov %vm12087_vm10 }
0x1350   : > { %5602 = vmax.xlane.f32.xlu0 %v5601_v2  ;;  %v5587_v15 = vsel %vm5586_vm14, %v5582_v37, -inf  ;;  %v5610_v25 = vcvt.s32.f32 %v5608_v10  ;;  %v5680_v55 = vcvt.s32.f32 %v5678_v62  ;;  %v1636_v37 = vsel %vm12083_vm7, %v12059_v27, 0.0  ;;  %vm12091_vm14 = vmmov %vm12090_vm1 }
0x1351   : > { %5588 = vmax.xlane.f32.xlu1 %v5587_v15  ;;  %v1637_v10 = vsel %vm12085_vm9, %v12059_v27, 0.0 }
0x1359   : > { %v11576_v47 = vpop.xlane.xlu1 %5626 }
0x135a   : > { %vm5628_vm2 = vcmp.eq.f32.partialorder %v11317_v7, %v11576_v47  ;;  %v5652_v7 = vcvt.s32.f32 %v5650_v60 }
0x135b   : > { %v5629_v41 = vsel %vm5628_vm2, %v5624_v49, -inf  ;;  %v1638_v49 = vsel %vm12084_vm8, %v12059_v27, 0.0 }
0x135c   : > { %5630 = vmax.xlane.f32.xlu0 %v5629_v41  ;;  %v1635_v41 = vsel %vm1523_vm12, %v12059_v27, 0.0  ;;  %vm12086_vm12 = vcmask 15360  }
0x135d   : > { %vm12088_vm11 = vmmov %vm12086_vm12 }
0x135e   : > { %vm12089_vm13 = vmmov %vm12088_vm11 }
0x135f   : > { %vm12092_vm2 = vmmov %vm12088_vm11 }
0x1369   : > { %v11581_v23 = vpop.xlane.xlu0 %5612 }
0x136a   : > { %vm5614_vm15 = vcmp.eq.f32.partialorder %v11337_v56, %v11581_v23 }
0x136b   : > { %v5615_v3 = vsel %vm5614_vm15, %v5610_v25, -inf  ;;  %vm12093_vm15 = vmmov %vm12092_vm2 }
0x136c   : > { %5616 = vmax.xlane.f32.xlu1 %v5615_v3 }
0x136d   : > { %v11587_v32 = vpop.xlane.xlu1 %5654  ;;  %v11589_v4 = vpop.xlane.xlu0 %5640 }
0x136e   : > { %vm5656_vm0 = vcmp.eq.f32.partialorder %v12077_v57, %v11587_v32  ;;  %vm5642_vm3 = vcmp.eq.f32.partialorder %v12078_v33, %v11589_v4  ;;  %v12104_v33 = vld [vmem:[#allocation12_spill] sm:$0xff] }
0x136f   : > { %v5657_v16 = vsel %vm5656_vm0, %v5652_v7, -inf  ;;  %v5643_v56 = vsel %vm5642_vm3, %v5638_v38, -inf  ;;  %vm12094_vm0 = vmmov %vm12090_vm1 }
0x1370   : > { %5658 = vmax.xlane.f32.xlu0 %v5657_v16  ;;  %5644 = vmax.xlane.f32.xlu1 %v5643_v56  ;;  %vm12095_vm3 = vmmov %vm12094_vm0 }
0x1371   : > { %v11597_v1 = vpop.xlane.xlu1 %5682  ;;  %v11599_v24 = vpop.xlane.xlu0 %5668  ;;  %vm12100_vm7 = vmmov %vm12094_vm0 }
0x1372   : > { %vm5684_vm4 = vcmp.eq.f32.partialorder %v12080_v45, %v11597_v1  ;;  %vm5670_vm5 = vcmp.eq.f32.partialorder %v12081_v46, %v11599_v24  ;;  %vm12101_vm8 = vmmov %vm12094_vm0  ;;  %v12112_v45 = vld [vmem:[#allocation13_spill] sm:$0xff] }
0x1373   : > { %v5685_v12 = vsel %vm5684_vm4, %v5680_v55, -inf  ;;  %v5671_v39 = vsel %vm5670_vm5, %v5666_v14, -inf  ;;  %vm12097_vm4 = vcmask 7168   ;;  %vm12098_vm5 = vmmov %vm12092_vm2 }
0x1374   : > { %5686 = vmax.xlane.f32.xlu0 %v5685_v12  ;;  %5672 = vmax.xlane.f32.xlu1 %v5671_v39  ;;  %vm12103_vm9 = vmmov %vm12097_vm4 }
0x1375   : > { %v1604_v20 = vpop.xlane.xlu1 %1603  ;;  %v11606_v26 = vpop.xlane.xlu0 %5696 }
0x1376   : > { %vm5698_vm6 = vcmp.eq.f32.partialorder %v12082_v43, %v11606_v26  ;;  %v12118_v43 = vld [vmem:[#allocation14_spill] sm:$0xff] }
0x1377   : > { %v5699_v2 = vsel %vm5698_vm6, %v5694_v35, -inf  ;;  %vm12099_vm6 = vmmov %vm12092_vm2 }
0x1378   : > { %1665 = vadd.xlane.f32.xlu0 %v1636_v37  ;;  %5700 = vmax.xlane.f32.xlu1 %v5699_v2 }
0x1379   : > { %v1608_v15 = vpop.xlane.xlu1 %1607  ;;  %v1606_v58 = vpop.xlane.xlu0 %1605 }
0x137c   : > { %1669 = vadd.xlane.f32.xlu0 %v1638_v49  ;;  %1663 = vadd.xlane.f32.xlu1 %v1635_v41 }
0x137d   : > { %v1612_v48 = vpop.xlane.xlu1 %1611  ;;  %v1610_v36 = vpop.xlane.xlu0 %1609 }
0x1380   : > { %1667 = vadd.xlane.f32.xlu1 %v1637_v10 }
0x1381   : > { %v11626_v25 = vpop.xlane.xlu1 %1615  ;;  %v1614_v60 = vpop.xlane.xlu0 %1613 }
0x1385   : > { %v11628_v11 = vpop.xlane.xlu1 %1619  ;;  %v11630_v59 = vpop.xlane.xlu0 %1617 }
0x1389   : > { %v1640_v19 = vpop.xlane.xlu1 %1639  ;;  %v11638_v50 = vpop.xlane.xlu0 %1621 }
0x138a   : > { %v1689_v31 = vsel %vm12086_vm12, %v11466_v34, %v1640_v19  ;;  %vm12105_vm12 = vmmov %vm12097_vm4  ;;  %v5493_v19 = vcvt.f32.s32 %v11536_v0  ;;  %v5549_v0 = vcvt.f32.s32 %v11547_v18  ;;  %v5563_v18 = vcvt.f32.s32 %v11561_v42 }
0x138b   : > { %1706 = vst.msk [vmem:[%s11636_s28] sm:$0xff] %vm12087_vm10, %v1689_v31  ;;  %v1679_v16 = vsel %vm12105_vm12, %v12104_v33, %v1606_v58  ;;  %vm12106_vm10 = vmmov %vm12092_vm2  ;;  %v5507_v58 = vcvt.f32.s32 %v11531_v52  ;;  %v12122_v31 = vld [vmem:[#allocation2_spill] sm:$0xff] }
0x138d   : > { %v1644_v5 = vpop.xlane.xlu1 %1643  ;;  %v1642_v27 = vpop.xlane.xlu0 %1641  ;;  %v5508_v41 = vshll.u32 %v5507_v58, 16  ;;  %v12125_v58 = vld [vmem:[#allocation23_spill] sm:$0xff] }
0x138e   : > { %v1691_v63 = vsel %vm12088_vm11, %v11480_v22, %v1644_v5  ;;  %v1690_v3 = vsel %vm12089_vm13, %v11483_v8, %v1642_v27  ;;  %v12096_v22 = vld [vmem:[#allocation10_spill] sm:$0xff]  ;;  %vm12107_vm11 = vmmov %vm12092_vm2  ;;  %v5494_v27 = vshll.u32 %v5493_v19, 16 }
0x138f   : > { %1708 = vst.msk [vmem:[%s11636_s28 + $0x10] sm:$0xff] %vm12090_vm1, %v1691_v63  ;;  %v1678_v8 = vsel %vm12097_vm4, %v12096_v22, %v1604_v20  ;;  %vm12108_vm13 = vmmov %vm12094_vm0 }
0x1390   : > { %1707 = vst.msk [vmem:[%s11636_s28 + $0x8] sm:$0xff] %vm12091_vm14, %v1690_v3  ;;  %vm12109_vm1 = vmmov %vm12094_vm0 }
0x1391   : > { %v1648_v7 = vpop.xlane.xlu1 %1647  ;;  %v1646_v38 = vpop.xlane.xlu0 %1645  ;;  %vm12111_vm14 = vmmov %vm12097_vm4 }
0x1392   : > { %v1693_v34 = vsel %vm12092_vm2, %v11494_v21, %v1648_v7  ;;  %v1692_v9 = vsel %vm12093_vm15, %v11497_v44, %v1646_v38  ;;  %v12102_v21 = vld [vmem:[#allocation26_spill] sm:$0xff]  ;;  %vm12113_vm2 = vmmov %vm12097_vm4  ;;  %v5521_v38 = vcvt.f32.s32 %v11541_v13 }
0x1393   : > { %1710 = vst.msk [vmem:[%s11636_s28 + $0x20] sm:$0xff] %vm12094_vm0, %v1693_v34  ;;  %v1680_v44 = vsel %vm12103_vm9, %v12102_v21, %v1608_v15  ;;  %v1681_v46 = vsel %vm12113_vm2, %v12112_v45, %v1610_v36  ;;  %vm12114_vm15 = vmmov %vm12098_vm5  ;;  %vm5990_vm9 = vcmask 130048   ;;  %v12124_v45 = vld [vmem:[#allocation7_spill] sm:$0xff] }
0x1394   : > { %1709 = vst.msk [vmem:[%s11636_s28 + $0x18] sm:$0xff] %vm12095_vm3, %v1692_v9  ;;  %vm12115_vm0 = vmmov %vm12098_vm5  ;;  %v12123_v9 = vld [vmem:[#allocation22_spill] sm:$0xff] }
0x1395   : > { %v1652_v62 = vpop.xlane.xlu1 %1651  ;;  %v1650_v29 = vpop.xlane.xlu0 %1649  ;;  %vm12116_vm3 = vmmov %vm12109_vm1 }
0x1396   : > { %v1695_v51 = vsel %vm12098_vm5, %v1678_v8, %v1652_v62  ;;  %v1694_v57 = vsel %vm12099_vm6, %v11508_v17, %v1650_v29  ;;  %v12110_v17 = vld [vmem:[#allocation28_spill] sm:$0xff]  ;;  %vm12117_vm4 = vmmov %vm12109_vm1  ;;  %v5522_v62 = vshll.u32 %v5521_v38, 16 }
0x1397   : > { %1712 = vst.msk [vmem:[%s11636_s28 + $0x30] sm:$0xff] %vm12100_vm7, %v1695_v51  ;;  %v1682_v54 = vsel %vm12111_vm14, %v12110_v17, %v1612_v48  ;;  %vm12119_vm5 = vmmov %vm12113_vm2  ;;  %v5535_v51 = vcvt.f32.s32 %v11551_v53  ;;  %v12128_v38 = vld [vmem:[#allocation16_spill] sm:$0xff] }
0x1398   : > { %1711 = vst.msk [vmem:[%s11636_s28 + $0x28] sm:$0xff] %vm12101_vm8, %v1694_v57  ;;  %v1683_v37 = vsel %vm12119_vm5, %v12118_v43, %v1614_v60  ;;  %vm12120_vm6 = vmmov %vm12115_vm0  ;;  %vm5973_vm8 = vcmask 121856  }
0x1399   : > { %v1656_v56 = vpop.xlane.xlu1 %1655  ;;  %v1654_v55 = vpop.xlane.xlu0 %1653  ;;  %vm12121_vm7 = vmmov %vm12109_vm1 }
0x139a   : > { %v1697_v14 = vsel %vm12106_vm10, %v1680_v44, %v1656_v56  ;;  %v1696_v30 = vsel %vm12107_vm11, %v1679_v16, %v1654_v55  ;;  %v5550_v44 = vshll.u32 %v5549_v0, 16  ;;  %v5536_v56 = vshll.u32 %v5535_v51, 16  ;;  %vm12134_vm12 = vmmov %vm12113_vm2 }
0x139b   : > { %1714 = vst.msk [vmem:[%s11636_s28 + $0x40] sm:$0xff] %vm12108_vm13, %v1697_v14  ;;  %v5577_v14 = vcvt.f32.s32 %v11557_v40  ;;  %v5564_v40 = vshll.u32 %v5563_v18, 16  ;;  %vm12137_vm10 = vmmov %vm12115_vm0 }
0x139c   : > { %1713 = vst.msk [vmem:[%s11636_s28 + $0x38] sm:$0xff] %vm12109_vm1, %v1696_v30  ;;  %vm12138_vm11 = vmmov %vm12109_vm1 }
0x139d   : > { %v1660_v12 = vpop.xlane.xlu1 %1659  ;;  %v1658_v39 = vpop.xlane.xlu0 %1657  ;;  %vm12140_vm13 = vmmov %vm12113_vm2 }
0x139e   : > { %v1699_v20 = vsel %vm12114_vm15, %v1682_v54, %v1660_v12  ;;  %v1698_v35 = vsel %vm12115_vm0, %v1681_v46, %v1658_v39  ;;  %vm12141_vm1 = vmmov %vm12113_vm2 }
0x139f   : > { %1716 = vst.msk [vmem:[%s11636_s28 + $0x50] sm:$0xff] %vm12116_vm3, %v1699_v20  ;;  %v5578_v20 = vshll.u32 %v5577_v14, 16  ;;  %vm12143_vm14 = vmmov %vm12115_vm0 }
0x13a0   : > { %1715 = vst.msk [vmem:[%s11636_s28 + $0x48] sm:$0xff] %vm12117_vm4, %v1698_v35  ;;  %vm12144_vm2 = vmmov %vm12115_vm0 }
0x13a1   : > { %v1662_v2 = vpop.xlane.xlu0 %1661  ;;  %vm12146_vm15 = vmmov %vm12116_vm3 }
0x13a2   : > { %v1700_v15 = vsel %vm12120_vm6, %v1683_v37, %v1662_v2  ;;  %vm12147_vm0 = vmmov %vm12116_vm3 }
0x13a3   : > { %1717 = vst.msk [vmem:[%s11636_s28 + $0x58] sm:$0xff] %vm12121_vm7, %v1700_v15  ;;  %vm12149_vm3 = vmmov %vm12141_vm1 }
0x13a4   : > { %vm12151_vm4 = vmmov %vm12144_vm2 }
0x13a5   : > { %vm12152_vm5 = vmmov %vm12147_vm0 }
0x13b9   : > { %v5505_v49 = vpop.xlane.xlu1 %5504 }
0x13ba   : > { %v5506_v48 = vcvt.f32.s32 %v5505_v49 }
0x13bc   : > { %v5509_v36 = vadd.s32 %v5508_v41, %v5506_v48  ;;  %v12126_v41 = vld [vmem:[#allocation9_spill] sm:$0xff] }
0x13be   : > { %v5707_v10 = vand.u32 127, %v5509_v36 }
0x13c0   : > { %v5723_v60 = vsub.s32 127, %v5707_v10 }
0x13c2   : > { %v5975_v52 = vsel %vm5973_vm8, %v12122_v31, %v5723_v60  ;;  %v5605_v60 = vcvt.f32.s32 %v11567_v61  ;;  %v5591_v31 = vcvt.f32.s32 %v11571_v28 }
0x13c3   : > { %5992 = vst.msk [vmem:[%s11699_s4 + $0x8] sm:$0xff] %vm5990_vm9, %v5975_v52 }
0x13c4   : > { %v5491_v5 = vpop.xlane.xlu0 %5490  ;;  %v5592_v61 = vshll.u32 %v5591_v31, 16 }
0x13c5   : > { %v5492_v63 = vcvt.f32.s32 %v5491_v5 }
0x13c7   : > { %v5495_v3 = vadd.s32 %v5494_v27, %v5492_v63  ;;  %v12127_v27 = vld [vmem:[#allocation11_spill] sm:$0xff] }
0x13c9   : > { %v5706_v7 = vand.u32 127, %v5495_v3 }
0x13ca   : > { %v5519_v8 = vpop.xlane.xlu0 %5518 }
0x13cb   : > { %v5722_v34 = vsub.s32 127, %v5706_v7  ;;  %v5520_v29 = vcvt.f32.s32 %v5519_v8  ;;  %v5606_v7 = vshll.u32 %v5605_v60, 16 }
0x13cd   : > { %v5974_v22 = vsel %vm5973_vm8, %v12123_v9, %v5722_v34  ;;  %v5523_v57 = vadd.s32 %v5522_v62, %v5520_v29 }
0x13ce   : > { %5991 = vst.msk [vmem:[%s11699_s4] sm:$0xff] %vm5990_vm9, %v5974_v22  ;;  %v5547_v21 = vpop.xlane.xlu0 %5546 }
0x13cf   : > { %v5708_v33 = vand.u32 127, %v5523_v57  ;;  %v5533_v16 = vpop.xlane.xlu1 %5532  ;;  %v5548_v13 = vcvt.f32.s32 %v5547_v21  ;;  %v5633_v21 = vcvt.f32.s32 %v11576_v47  ;;  %v5619_v47 = vcvt.f32.s32 %v11581_v23 }
0x13d0   : > { %v5534_v55 = vcvt.f32.s32 %v5533_v16  ;;  %v12130_v16 = vld [vmem:[#allocation34_spill] sm:$0xff]  ;;  %v5689_v23 = vcvt.f32.s32 %v11597_v1 }
0x13d1   : > { %v5724_v30 = vsub.s32 127, %v5708_v33  ;;  %v5551_v17 = vadd.s32 %v5550_v44, %v5548_v13  ;;  %v12129_v44 = vld [vmem:[#allocation18_spill] sm:$0xff] }
0x13d2   : > { %v5537_v54 = vadd.s32 %v5536_v56, %v5534_v55  ;;  %v5634_v55 = vshll.u32 %v5633_v21, 16 }
0x13d3   : > { %v5976_v53 = vsel %vm5973_vm8, %v12124_v45, %v5724_v30  ;;  %v5710_v46 = vand.u32 127, %v5551_v17 }
0x13d4   : > { %5993 = vst.msk [vmem:[%s11699_s4 + $0x10] sm:$0xff] %vm5990_vm9, %v5976_v53  ;;  %v5709_v12 = vand.u32 127, %v5537_v54  ;;  %v5575_v39 = vpop.xlane.xlu0 %5574  ;;  %v12131_v54 = vld [vmem:[#allocation19_spill] sm:$0xff]  ;;  %v5661_v53 = vcvt.f32.s32 %v11587_v32 }
0x13d5   : > { %v5726_v35 = vsub.s32 127, %v5710_v46  ;;  %v5561_v43 = vpop.xlane.xlu1 %5560  ;;  %v5576_v37 = vcvt.f32.s32 %v5575_v39  ;;  %v5647_v39 = vcvt.f32.s32 %v11589_v4  ;;  %v5703_v4 = vcvt.f32.s32 %v11606_v26  ;;  %v12133_v26 = vld [vmem:[#allocation15_spill] sm:$0xff] }
0x13d6   : > { %v5725_v2 = vsub.s32 127, %v5709_v12  ;;  %v5562_v15 = vcvt.f32.s32 %v5561_v43  ;;  %v5620_v12 = vshll.u32 %v5619_v47, 16  ;;  %v5662_v43 = vshll.u32 %v5661_v53, 16 }
0x13d7   : > { %v5978_v42 = vsel %vm5973_vm8, %v12125_v58, %v5726_v35  ;;  %v5579_v49 = vadd.s32 %v5578_v20, %v5576_v37  ;;  %v5675_v37 = vcvt.f32.s32 %v11599_v24 }
0x13d8   : > { %v5977_v48 = vsel %vm5973_vm8, %v12126_v41, %v5725_v2  ;;  %5995 = vst.msk [vmem:[%s11699_s4 + $0x20] sm:$0xff] %vm5990_vm9, %v5978_v42  ;;  %v5565_v36 = vadd.s32 %v5564_v40, %v5562_v15  ;;  %v5648_v15 = vshll.u32 %v5647_v39, 16 }
0x13d9   : > { %5994 = vst.msk [vmem:[%s11699_s4 + $0x18] sm:$0xff] %vm5990_vm9, %v5977_v48  ;;  %v5712_v10 = vand.u32 127, %v5579_v49 }
0x13da   : > { %v5711_v19 = vand.u32 127, %v5565_v36  ;;  %v5676_v36 = vshll.u32 %v5675_v37, 16 }
0x13db   : > { %v5728_v52 = vsub.s32 127, %v5712_v10 }
0x13dc   : > { %v5727_v5 = vsub.s32 127, %v5711_v19  ;;  %v12132_v19 = vld [vmem:[#allocation35_spill] sm:$0xff] }
0x13dd   : > { %v5980_v63 = vsel %vm5973_vm8, %v12127_v27, %v5728_v52  ;;  %v5603_v3 = vpop.xlane.xlu0 %5602  ;;  %v5690_v27 = vshll.u32 %v5689_v23, 16 }
0x13de   : > { %v5979_v34 = vsel %vm5973_vm8, %v12128_v38, %v5727_v5  ;;  %5997 = vst.msk [vmem:[%s11699_s4 + $0x30] sm:$0xff] %vm5990_vm9, %v5980_v63  ;;  %v5589_v9 = vpop.xlane.xlu1 %5588  ;;  %v5604_v22 = vcvt.f32.s32 %v5603_v3  ;;  %v5704_v38 = vshll.u32 %v5703_v4, 16 }
0x13df   : > { %5996 = vst.msk [vmem:[%s11699_s4 + $0x28] sm:$0xff] %vm5990_vm9, %v5979_v34  ;;  %v5590_v28 = vcvt.f32.s32 %v5589_v9  ;;  %v1685_v34 = vsel %vm12134_vm12, %v12133_v26, %v11630_v59 }
0x13e0   : > { %v5607_v8 = vadd.s32 %v5606_v7, %v5604_v22 }
0x13e1   : > { %v5593_v62 = vadd.s32 %v5592_v61, %v5590_v28  ;;  %v12135_v28 = vld [vmem:[#allocation20_spill] sm:$0xff] }
0x13e2   : > { %v5714_v0 = vand.u32 127, %v5607_v8 }
0x13e3   : > { %v5713_v29 = vand.u32 127, %v5593_v62  ;;  %v12136_v62 = vld [vmem:[#allocation3_spill] sm:$0xff] }
0x13e4   : > { %v5730_v51 = vsub.s32 127, %v5714_v0 }
0x13e5   : > { %v5729_v57 = vsub.s32 127, %v5713_v29 }
0x13e6   : > { %v5982_v33 = vsel %vm5973_vm8, %v12129_v44, %v5730_v51 }
0x13e7   : > { %v5981_v13 = vsel %vm5973_vm8, %v12130_v16, %v5729_v57  ;;  %5999 = vst.msk [vmem:[%s11699_s4 + $0x40] sm:$0xff] %vm5990_vm9, %v5982_v33  ;;  %v12139_v33 = vld [vmem:[#allocation29_spill] sm:$0xff] }
0x13e8   : > { %5998 = vst.msk [vmem:[%s11699_s4 + $0x38] sm:$0xff] %vm5990_vm9, %v5981_v13  ;;  %v1684_v16 = vsel %vm12140_vm13, %v12139_v33, %v11626_v25  ;;  %v1687_v13 = vsel %vm12141_vm1, %v11468_v6, %v11638_v50  ;;  %v12145_v25 = vld [vmem:[#allocation39_spill] sm:$0xff]  ;;  %v12148_v50 = vld [vmem:[#allocation30_spill] sm:$0xff] }
0x13e9   : > { %v5631_v56 = vpop.xlane.xlu0 %5630  ;;  %v1686_v53 = vsel %vm12149_vm3, %v12148_v50, %v11628_v11 }
0x13ea   : > { %v5632_v14 = vcvt.f32.s32 %v5631_v56 }
0x13ec   : > { %v5635_v30 = vadd.s32 %v5634_v55, %v5632_v14 }
0x13ee   : > { %v5716_v17 = vand.u32 127, %v5635_v30  ;;  %v12142_v30 = vld [vmem:[#allocation41_spill] sm:$0xff] }
0x13f0   : > { %v5732_v18 = vsub.s32 127, %v5716_v17 }
0x13f2   : > { %v5984_v45 = vsel %vm5973_vm8, %v12131_v54, %v5732_v18 }
0x13f3   : > { %6001 = vst.msk [vmem:[%s11699_s4 + $0x50] sm:$0xff] %vm5990_vm9, %v5984_v45 }
0x13f9   : > { %v5617_v46 = vpop.xlane.xlu1 %5616 }
0x13fa   : > { %v5618_v20 = vcvt.f32.s32 %v5617_v46 }
0x13fc   : > { %v5621_v35 = vadd.s32 %v5620_v12, %v5618_v20  ;;  %v12150_v12 = vld [vmem:[#allocation45_spill] sm:$0xff] }
0x13fd   : > { %v5645_v40 = vpop.xlane.xlu1 %5644  ;;  %v5659_v2 = vpop.xlane.xlu0 %5658 }
0x13fe   : > { %v5715_v58 = vand.u32 127, %v5621_v35  ;;  %v5646_v42 = vcvt.f32.s32 %v5645_v40  ;;  %v5660_v49 = vcvt.f32.s32 %v5659_v2 }
0x1400   : > { %v5731_v41 = vsub.s32 127, %v5715_v58  ;;  %v5649_v32 = vadd.s32 %v5648_v15, %v5646_v42  ;;  %v5663_v48 = vadd.s32 %v5662_v43, %v5660_v49 }
0x1401   : > { %v5673_v10 = vpop.xlane.xlu1 %5672  ;;  %v5687_v60 = vpop.xlane.xlu0 %5686 }
0x1402   : > { %v5983_v24 = vsel %vm5973_vm8, %v12132_v19, %v5731_v41  ;;  %v5717_v31 = vand.u32 127, %v5649_v32  ;;  %v5718_v52 = vand.u32 127, %v5663_v48  ;;  %v5674_v5 = vcvt.f32.s32 %v5673_v10 }
0x1403   : > { %6000 = vst.msk [vmem:[%s11699_s4 + $0x48] sm:$0xff] %vm5990_vm9, %v5983_v24  ;;  %v5688_v1 = vcvt.f32.s32 %v5687_v60 }
0x1404   : > { %v5733_v63 = vsub.s32 127, %v5717_v31  ;;  %v5734_v3 = vsub.s32 127, %v5718_v52  ;;  %v5677_v7 = vadd.s32 %v5676_v36, %v5674_v5 }
0x1405   : > { %v5691_v9 = vadd.s32 %v5690_v27, %v5688_v1  ;;  %v5701_v22 = vpop.xlane.xlu1 %5700  ;;  %v1666_v61 = vpop.xlane.xlu0 %1665 }
0x1406   : > { %v5985_v8 = vsel %vm5973_vm8, %v12135_v28, %v5733_v63  ;;  %v5986_v0 = vsel %vm5973_vm8, %v12136_v62, %v5734_v3  ;;  %v5719_v29 = vand.u32 127, %v5677_v7  ;;  %v5702_v51 = vcvt.f32.s32 %v5701_v22 }
0x1407   : > { %6002 = vst.msk [vmem:[%s11699_s4 + $0x58] sm:$0xff] %vm5990_vm9, %v5985_v8  ;;  %6003 = vst.msk [vmem:[%s11699_s4 + $0x60] sm:$0xff] %vm5990_vm9, %v5986_v0  ;;  %v5720_v57 = vand.u32 127, %v5691_v9  ;;  %v1702_v59 = vsel %vm12137_vm10, %v1685_v34, %v1666_v61 }
0x1408   : > { %v5735_v21 = vsub.s32 127, %v5719_v29  ;;  %v5705_v44 = vadd.s32 %v5704_v38, %v5702_v51  ;;  %1719 = vst.msk [vmem:[%s11636_s28 + $0x68] sm:$0xff] %vm12138_vm11, %v1702_v59 }
0x1409   : > { %v5736_v56 = vsub.s32 127, %v5720_v57  ;;  %v1664_v55 = vpop.xlane.xlu1 %1663  ;;  %v1670_v14 = vpop.xlane.xlu0 %1669 }
0x140a   : > { %v5987_v17 = vsel %vm5973_vm8, %v12142_v30, %v5735_v21  ;;  %v5721_v18 = vand.u32 127, %v5705_v44  ;;  %v1701_v54 = vsel %vm12143_vm14, %v1684_v16, %v1664_v55  ;;  %v1704_v45 = vsel %vm12144_vm2, %v1687_v13, %v1670_v14 }
0x140b   : > { %6004 = vst.msk [vmem:[%s11699_s4 + $0x68] sm:$0xff] %vm5990_vm9, %v5987_v17  ;;  %v5988_v47 = vsel %vm5973_vm8, %v12145_v25, %v5736_v56 }
0x140c   : > { %1718 = vst.msk [vmem:[%s11636_s28 + $0x60] sm:$0xff] %vm12146_vm15, %v1701_v54  ;;  %v5737_v6 = vsub.s32 127, %v5721_v18 }
0x140d   : > { %1721 = vst.msk [vmem:[%s11636_s28 + $0x78] sm:$0xff] %vm12147_vm0, %v1704_v45  ;;  %v1668_v46 = vpop.xlane.xlu1 %1667 }
0x140e   : > { %6005 = vst.msk [vmem:[%s11699_s4 + $0x70] sm:$0xff] %vm5990_vm9, %v5988_v47  ;;  %v5989_v39 = vsel %vm5973_vm8, %v12150_v12, %v5737_v6  ;;  %v1703_v20 = vsel %vm12151_vm4, %v1686_v53, %v1668_v46 }
0x140f   : > { %6006 = vst.msk [vmem:[%s11699_s4 + $0x78] sm:$0xff] %vm5990_vm9, %v5989_v39 }
0x1410   : > { %1720 = vst.msk [vmem:[%s11636_s28 + $0x70] sm:$0xff] %vm12152_vm5, %v1703_v20 }
0x1411 PF: > { %s14_s14 = sadd.s32 1, %s6231_s14   ;;  %s12153_s12 = smov %s6227_s13 }
0x1412   : > { %p11_p5 = scmp.ge.s32.totalorder %s14_s14, 4   ;;  %s12154_s13 = smov %s12156_s15 }
0x1414   :  { %13 = sbr.rel (!%p11_p5) target bundleno = 2 (0x2), region = 73 }

</bundles_post_ra>
